<compile_context>
chip_gen: v7x
topology: tpu7x:2x2x1
jax: 0.10.0
libtpu: 0.0.40
codegen_flags: <defaults>
</compile_context>

<pallas_src>
import functools

import jax
import jax.numpy as jnp
from jax import lax
from jax.experimental import pallas as pl
from jax.experimental.pallas import tpu as pltpu


CP = 128                                   # lane width (output channels padded)
CINS = (3, 16, 32, 48, 64)                 # conv in-channels  (module spec)
COUTS = (16, 32, 48, 64, 80)               # conv out-channels (module spec)
POOL = (True, True, True, False, False)    # MaxPool2d(2,2) after blocks 1..3
NEG_SLOPE = 0.001                          # LeakyReLU slope used by the module
_TM = 128                                  # row-chunk size (fits the vreg file)


def _round_up(x, m):
    return (x + m - 1) // m * m


def _layer_dims(H, W):
    dims, h, w = [], H, W
    for pool in POOL:
        dims.append((h, w, pool))
        if pool:
            h, w = h // 2, w // 2
    return tuple(dims)


def _group_plan():
    """Per layer: (taps per MXU group, #groups, group offset into packed weights)."""
    plan, off = [], 0
    for ci in CINS:
        tpg = max(1, min(9, CP // ci))
        ngl = -(-9 // tpg)
        plan.append((tpg, ngl, off))
        off += ngl
    return tuple(plan), off


def _layout(H, W):
    dims = _layer_dims(H, W)
    R = [h * w + 2 * w + 2 for (h, w, _) in dims]      # padded flat rows per input
    off_in = [0]
    for l in range(1, len(dims)):
        # pooled producer reuses region 0; non-pooled producer writes a disjoint
        # ping-pong region so it never overwrites rows it still has to read.
        off_in.append(0 if dims[l - 1][2] else _round_up(off_in[l - 1] + R[l - 1], 8))
    pad_rows = _round_up(max(o + r for o, r in zip(off_in, R)), 8)
    act_rows = _round_up(max([h * w for (h, w, p) in dims if p] + [8]), 8)
    return dims, tuple(off_in), pad_rows, act_rows


# ---------------------------------------------------------------------------
# Fused backbone kernel (one grid step == one image)
# ---------------------------------------------------------------------------
def _conv_encoder_kernel(x_ref, w_ref, s_ref, t_ref, o_ref, pad_ref, act_ref,
                         *, dims, plan, off_in, x_rows):
    n_layers = len(dims)

    # ---- stage the compact (8-lane) input into pad_ref region 0 -------------
    cc = 256
    nfull, rem = x_rows // cc, x_rows % cc

    def copy_chunk(m0, csz):
        pad_ref[pl.ds(m0, csz), 0:8] = x_ref[0, pl.ds(m0, csz), :]

    if nfull > 4:
        def _copy_body(i, carry):
            copy_chunk(i * cc, cc)
            return carry
        lax.fori_loop(0, nfull, _copy_body, 0)
    else:
        for i in range(nfull):
            copy_chunk(i * cc, cc)
    if rem:
        copy_chunk(nfull * cc, rem)

    # ---- the five conv/BN/LeakyReLU (+pool) blocks ---------------------------
    for li, (H, W, pool) in enumerate(dims):
        M = H * W
        cin = CINS[li]
        base = off_in[li] + W + 1             # payload start row of this input
        tpg, ngl, g0 = plan[li]
        is_last = li == n_layers - 1
        scale = s_ref[li:li + 1, :]            # (1, CP) folded-BN scale
        shift = t_ref[li:li + 1, :]            # (1, CP) folded-BN shift

        if not is_last:
            Hn, Wn = (H // 2, W // 2) if pool else (H, W)
            Mn, basen = Hn * Wn, Wn + 1
            nxt = off_in[li + 1]
            if not pool:
                # direct-write path: zero the next layer's halo before producing it
                pad_ref[nxt:nxt + basen, :] = jnp.zeros((basen, CP), jnp.float32)
                pad_ref[nxt + basen + Mn:nxt + 2 * basen + Mn, :] = (
                    jnp.zeros((basen, CP), jnp.float32))

        def conv_chunk(m0, tm):
            colv = (lax.broadcasted_iota(jnp.int32, (tm, 1), 0) + m0) % W
            not_l = colv > 0                   # w == 0   : no left  neighbour
            not_r = colv < (W - 1)             # w == W-1 : no right neighbour
            if li == 0:
                chan = lax.broadcasted_iota(jnp.int32, (1, CP), 1) < cin
            acc = jnp.zeros((tm, CP), jnp.float32)
            for g in range(ngl):
                packed = None
                for j in range(tpg):
                    t = g * tpg + j
                    if t >= 9:
                        break
                    dy, dx = divmod(t, 3)
                    row0 = base + (dy - 1) * W + (dx - 1)
                    tap = pad_ref[pl.ds(row0 + m0, tm), :]          # (tm, CP) f32
                    if li == 0:
                        tap = jnp.where(chan, tap, 0.0)             # stale lanes >= cin
                    if dx == 0:
                        tap = jnp.where(not_l, tap, 0.0)
                    elif dx == 2:
                        tap = jnp.where(not_r, tap, 0.0)
                    if j:
                        tap = pltpu.roll(tap, shift=j * cin, axis=1)  # lane place (XLU)
                        packed = packed + tap
                    else:
                        packed = tap
                acc = acc + jnp.dot(packed.astype(jnp.bfloat16), w_ref[g0 + g],
                                    preferred_element_type=jnp.float32)
            y = acc * scale + shift                                  # BN (eval, folded)
            y = jnp.where(y >= 0.0, y, NEG_SLOPE * y)                # LeakyReLU(0.001)
            if is_last:
                o_ref[0, pl.ds(m0, tm), :] = y                       # lane-dense store
            elif pool:
                act_ref[pl.ds(m0, tm), :] = y
            else:
                pad_ref[pl.ds(nxt + basen + m0, tm), :] = y          # direct next input

        nfc, remc = M // _TM, M % _TM
        if nfc > 2:
            def chunk_body(i, carry):
                conv_chunk(pl.multiple_of(i * _TM, _TM), _TM)
                return carry
            lax.fori_loop(0, nfc, chunk_body, 0)
        else:
            for i in range(nfc):
                conv_chunk(i * _TM, _TM)
        if remc:                                                     # tail-safe chunk
            conv_chunk(nfc * _TM, remc)

        if is_last:
            continue

        if pool:
            # zero next layer's halo rows (its payload is rewritten below)
            pad_ref[nxt:nxt + basen, :] = jnp.zeros((basen, CP), jnp.float32)
            pad_ref[nxt + basen + Mn:nxt + 2 * basen + Mn, :] = (
                jnp.zeros((basen, CP), jnp.float32))

            # fused 2x2/stride-2 max pool, banded: roll-based horizontal and
            # vertical pairwise max (XLU), one strided read per pooled row.
            PB = max(1, min(Hn, 64 // W))
            nb, pbt = Hn // PB, Hn % PB

            def pool_band(bs, ho0, pb):
                n = 2 * pb * W
                rows = act_ref[bs:bs + n, :]
                hmax = jnp.maximum(rows, pltpu.roll(rows, shift=n - 1, axis=0))
                vmax = jnp.maximum(hmax, pltpu.roll(hmax, shift=n - W, axis=0))
                act_ref[bs:bs + n, :] = vmax
                parts = [act_ref[pl.ds(bs + 2 * r * W, Wn, stride=2), :]
                         for r in range(pb)]
                band = parts[0] if pb == 1 else jnp.concatenate(parts, axis=0)
                dst = nxt + basen + ho0 * Wn
                pad_ref[dst:dst + pb * Wn, :] = band

            for bi in range(nb):
                pool_band(bi * 2 * PB * W, bi * PB, PB)
            if pbt:
                pool_band(nb * 2 * PB * W, nb * PB, pbt)


# ---------------------------------------------------------------------------
# Wrapper (all static config derived from x.shape; params hold arrays only)
# ---------------------------------------------------------------------------
def conv_encoder_forward(params, x):
    """x: NCHW float (B, 3, H, W) -> NCHW (B, 80, H//8, W//8)."""
    B, C, H, W = x.shape
    assert C == CINS[0] and H % 8 == 0 and W % 8 == 0
    dims, off_in, pad_rows, act_rows = _layout(H, W)
    plan, _ = _group_plan()
    M1 = H * W
    XR = _round_up(M1 + 2 * W + 2, 8)
    Hf, Wf, _ = dims[-1]
    Mf = Hf * Wf
    NG = params["w"].shape[0]

    # NCHW -> flat zero-padded rows with only 8 lanes (compact input DMA).
    xf = jnp.transpose(x.astype(jnp.float32), (0, 2, 3, 1)).reshape(B, M1, C)
    xp = jnp.zeros((B, XR, 8), jnp.float32)
    xp = xp.at[:, W + 1:W + 1 + M1, :C].set(xf)

    # per-generation VMEM budgeting (whole-image-resident design)
    est = ((pad_rows + act_rows) * CP * 4
           + 2 * (XR * 8 * 4 + NG * CP * CP * 2 + 2 * len(CINS) * CP * 4 + Mf * CP * 4))
    assert est < 56 * 2**20, (
        "TODO(synk): add a spatial row-band grid axis for very large inputs")
    vmem_limit = int(min(60 * 2**20, max(est + (8 << 20), 16 << 20)))

    kernel = functools.partial(_conv_encoder_kernel, dims=dims, plan=plan,
                               off_in=off_in, x_rows=XR)
    out = pl.pallas_call(
        kernel,
        out_shape=jax.ShapeDtypeStruct((B, Mf, CP), jnp.float32),
        grid_spec=pltpu.PrefetchScalarGridSpec(
            num_scalar_prefetch=0,
            grid=(B,),
            in_specs=[
                pl.BlockSpec((1, XR, 8), lambda b: (b, 0, 0)),
                pl.BlockSpec((NG, CP, CP), lambda b: (0, 0, 0)),
                pl.BlockSpec((len(CINS), CP), lambda b: (0, 0)),
                pl.BlockSpec((len(CINS), CP), lambda b: (0, 0)),
            ],
            out_specs=pl.BlockSpec((1, Mf, CP), lambda b: (b, 0, 0)),
            scratch_shapes=[
                pltpu.VMEM((pad_rows, CP), jnp.float32),   # padded layer inputs
                pltpu.VMEM((act_rows, CP), jnp.float32),   # pre-pool activations
            ],
        ),
        compiler_params=pltpu.CompilerParams(
            dimension_semantics=("parallel",),
            vmem_limit_bytes=vmem_limit),
    )(xp, params["w"], params["scale"], params["shift"])

    out = out.reshape(B, Hf, Wf, CP)[..., :COUTS[-1]]
    return jnp.transpose(out, (0, 3, 1, 2))


# ---------------------------------------------------------------------------
# Deterministic synthetic parameters (BN eval stats folded) + pure-JAX reference
# ---------------------------------------------------------------------------
def init_params(key):
    """Returns (kernel params, per-layer HWIO f32 weights for the reference).

    Kernel weights are K-packed per MXU group: group g of layer l is a (128,128)
    matrix whose K-rows [j*cin,(j+1)*cin) hold tap (g*tpg+j)'s (cin,cout) slice,
    stored in bf16.  scale/shift are folded BatchNorm (zero on padded channels).
    """
    plan, ng_total = _group_plan()
    n = len(CINS)
    w_packed = jnp.zeros((ng_total, CP, CP), jnp.float32)
    scales = jnp.zeros((n, CP), jnp.float32)
    shifts = jnp.zeros((n, CP), jnp.float32)
    ref_ws = []
    keys = jax.random.split(key, 5 * n)
    for li, (ci, co) in enumerate(zip(CINS, COUTS)):
        k = keys[5 * li:5 * li + 5]
        w = jax.random.normal(k[0], (co, ci, 3, 3), jnp.float32) * (2.0 / (9 * ci)) ** 0.5
        gamma = 1.0 + 0.05 * jax.random.normal(k[1], (co,), jnp.float32)
        beta = 0.05 * jax.random.normal(k[2], (co,), jnp.float32)
        rmean = 0.05 * jax.random.normal(k[3], (co,), jnp.float32)
        rvar = 1.0 + jnp.abs(0.1 * jax.random.normal(k[4], (co,), jnp.float32))
        sc = gamma / jnp.sqrt(rvar + 1e-5)
        sh = beta - rmean * sc
        hwio = jnp.transpose(w, (2, 3, 1, 0))          # (3, 3, cin, cout)
        ref_ws.append(hwio)
        taps = hwio.reshape(9, ci, co)                 # tap t = dy*3 + dx
        tpg, ngl, g0 = plan[li]
        for t in range(9):
            g, j = divmod(t, tpg)
            w_packed = w_packed.at[g0 + g, j * ci:(j + 1) * ci, :co].set(taps[t])
        scales = scales.at[li, :co].set(sc)
        shifts = shifts.at[li, :co].set(sh)
    params = {"w": w_packed.astype(jnp.bfloat16), "scale": scales, "shift": shifts}
    return params, tuple(ref_ws)


def reference_forward(ref_ws, params, x):
    """Pure-JAX (XLA) reference of ConvEncoder.forward (eval mode) with the same
    bf16-operand / f32-accumulate numerics as the kernel."""
    y = jnp.transpose(x.astype(jnp.float32), (0, 2, 3, 1))          # NHWC
    for li, (ci, co) in enumerate(zip(CINS, COUTS)):
        w = ref_ws[li]
        y = jax.lax.conv_general_dilated(
            y.astype(jnp.bfloat16), w.astype(jnp.bfloat16),
            window_strides=(1, 1), padding="SAME",
            dimension_numbers=("NHWC", "HWIO", "NHWC"),
            preferred_element_type=jnp.float32)
        y = y * params["scale"][li, :co] + params["shift"][li, :co]
        y = jnp.where(y >= 0.0, y, NEG_SLOPE * y)
        if POOL[li]:
            Bc, Hc, Wc, Cc = y.shape
            y = y.reshape(Bc, Hc // 2, 2, Wc // 2, 2, Cc).max(axis=(2, 4))
    return jnp.transpose(y, (0, 3, 1, 2))                           # NCHW


if __name__ == "__main__":
    key = jax.random.PRNGKey(0)
    pkey, xkey = jax.random.split(key)
    params, ref_ws = init_params(pkey)

    # Small NCHW input (PyTorch convention); H and W must be multiples of 8.
    x = jax.random.normal(xkey, (2, 3, 32, 32), dtype=jnp.float32)

    out = jax.block_until_ready(jax.jit(conv_encoder_forward)(params, x))
    assert out.shape == (2, 80, 4, 4), out.shape
    assert bool(jnp.all(jnp.isfinite(out)))

    ref = jax.block_until_ready(jax.jit(reference_forward)(ref_ws, params, x))
    err = float(jnp.max(jnp.abs(out - ref)) / (jnp.max(jnp.abs(ref)) + 1e-6))
    assert err < 2e-2, f"mismatch vs reference: {err}"

    print("KERNEL_OK")
</pallas_src>

<mosaic_0001>
module attributes {stable_mosaic.version = 11 : i64} {
  func.func @_conv_encoder_kernel(%arg0: i32, %arg1: memref<1x1096x8xf32, #tpu.memory_space<vmem>>, %arg2: memref<16x128x128xbf16, #tpu.memory_space<vmem>>, %arg3: memref<5x128xf32, #tpu.memory_space<vmem>>, %arg4: memref<5x128xf32, #tpu.memory_space<vmem>>, %arg5: memref<1x16x128xf32, #tpu.memory_space<vmem>>, %arg6: memref<1096x128xf32, #tpu.memory_space<vmem>>, %arg7: memref<1024x128xf32, #tpu.memory_space<vmem>>) attributes {dimension_semantics = [#tpu.dimension_semantics<parallel>], iteration_bounds = array<i64: 2>, scalar_prefetch = 0 : i64, scratch_operands = 2 : i64, tpu.core_type = #tpu.core_type<tc>, window_params = [{transform_indices = @transform_0, window_bounds = array<i64: 1, 1096, 8>}, {pipeline_mode = #tpu.pipeline_mode<synchronous>, transform_indices = @transform_1, window_bounds = array<i64: 16, 128, 128>}, {pipeline_mode = #tpu.pipeline_mode<synchronous>, transform_indices = @transform_2, window_bounds = array<i64: 5, 128>}, {pipeline_mode = #tpu.pipeline_mode<synchronous>, transform_indices = @transform_3, window_bounds = array<i64: 5, 128>}, {transform_indices = @transform_4, window_bounds = array<i64: 1, 16, 128>}]} {
    %c0 = arith.constant 0 : index
    %c0_0 = arith.constant 0 : index
    %c0_1 = arith.constant 0 : index
    %0 = vector.load %arg1[%c0, %c0_0, %c0_1] : memref<1x1096x8xf32, #tpu.memory_space<vmem>>, vector<1x256x8xf32>
    %1 = vector.shape_cast %0 : vector<1x256x8xf32> to vector<256x8xf32>
    %c0_2 = arith.constant 0 : index
    %c0_3 = arith.constant 0 : index
    %2 = vector.load %arg6[%c0_2, %c0_3] : memref<1096x128xf32, #tpu.memory_space<vmem>>, vector<256x8xf32>
    tpu.vector_store %arg6[%c0_2, %c0_3], %1 {strides = array<i32>} : memref<1096x128xf32, #tpu.memory_space<vmem>>, vector<256x8xf32>,
    %c0_4 = arith.constant 0 : index
    %c256 = arith.constant 256 : index
    %c0_5 = arith.constant 0 : index
    %3 = vector.load %arg1[%c0_4, %c256, %c0_5] : memref<1x1096x8xf32, #tpu.memory_space<vmem>>, vector<1x256x8xf32>
    %4 = vector.shape_cast %3 : vector<1x256x8xf32> to vector<256x8xf32>
    %c256_6 = arith.constant 256 : index
    %c0_7 = arith.constant 0 : index
    %5 = vector.load %arg6[%c256_6, %c0_7] : memref<1096x128xf32, #tpu.memory_space<vmem>>, vector<256x8xf32>
    tpu.vector_store %arg6[%c256_6, %c0_7], %4 {strides = array<i32>} : memref<1096x128xf32, #tpu.memory_space<vmem>>, vector<256x8xf32>,
    %c0_8 = arith.constant 0 : index
    %c512 = arith.constant 512 : index
    %c0_9 = arith.constant 0 : index
    %6 = vector.load %arg1[%c0_8, %c512, %c0_9] : memref<1x1096x8xf32, #tpu.memory_space<vmem>>, vector<1x256x8xf32>
    %7 = vector.shape_cast %6 : vector<1x256x8xf32> to vector<256x8xf32>
    %c512_10 = arith.constant 512 : index
    %c0_11 = arith.constant 0 : index
    %8 = vector.load %arg6[%c512_10, %c0_11] : memref<1096x128xf32, #tpu.memory_space<vmem>>, vector<256x8xf32>
    tpu.vector_store %arg6[%c512_10, %c0_11], %7 {strides = array<i32>} : memref<1096x128xf32, #tpu.memory_space<vmem>>, vector<256x8xf32>,
    %c0_12 = arith.constant 0 : index
    %c768 = arith.constant 768 : index
    %c0_13 = arith.constant 0 : index
    %9 = vector.load %arg1[%c0_12, %c768, %c0_13] : memref<1x1096x8xf32, #tpu.memory_space<vmem>>, vector<1x256x8xf32>
    %10 = vector.shape_cast %9 : vector<1x256x8xf32> to vector<256x8xf32>
    %c768_14 = arith.constant 768 : index
    %c0_15 = arith.constant 0 : index
    %11 = vector.load %arg6[%c768_14, %c0_15] : memref<1096x128xf32, #tpu.memory_space<vmem>>, vector<256x8xf32>
    tpu.vector_store %arg6[%c768_14, %c0_15], %10 {strides = array<i32>} : memref<1096x128xf32, #tpu.memory_space<vmem>>, vector<256x8xf32>,
    %c0_16 = arith.constant 0 : index
    %c1024 = arith.constant 1024 : index
    %c0_17 = arith.constant 0 : index
    %12 = vector.load %arg1[%c0_16, %c1024, %c0_17] : memref<1x1096x8xf32, #tpu.memory_space<vmem>>, vector<1x72x8xf32>
    %13 = vector.shape_cast %12 : vector<1x72x8xf32> to vector<72x8xf32>
    %c1024_18 = arith.constant 1024 : index
    %c0_19 = arith.constant 0 : index
    %14 = vector.load %arg6[%c1024_18, %c0_19] : memref<1096x128xf32, #tpu.memory_space<vmem>>, vector<72x8xf32>
    tpu.vector_store %arg6[%c1024_18, %c0_19], %13 {strides = array<i32>} : memref<1096x128xf32, #tpu.memory_space<vmem>>, vector<72x8xf32>,
    %c0_20 = arith.constant 0 : index
    %c0_21 = arith.constant 0 : index
    %15 = vector.load %arg3[%c0_20, %c0_21] : memref<5x128xf32, #tpu.memory_space<vmem>>, vector<1x128xf32>
    %c0_22 = arith.constant 0 : index
    %c0_23 = arith.constant 0 : index
    %16 = vector.load %arg4[%c0_22, %c0_23] : memref<5x128xf32, #tpu.memory_space<vmem>>, vector<1x128xf32>
    %c0_i32 = arith.constant 0 : i32
    %c8_i32 = arith.constant 8 : i32
    %17 = arith.addi %c0_i32, %c8_i32 : i32
    %c1_i32 = arith.constant 1 : i32
    scf.for %arg8 = %c0_i32 to %17 step %c1_i32  : i32 {
      %c128_i32_420 = arith.constant 128 : i32
      %636 = arith.muli %arg8, %c128_i32_420 : i32
      %637 = tpu.assume_multiple %636, 128 : i32
      %638 = tpu.iota {dimensions = array<i32: 0>} : vector<128x1xi32>
      %639 = vector.broadcast %637 : i32 to vector<128x1xi32>
      %640 = arith.addi %638, %639 : vector<128x1xi32>
      %c32_i32_421 = arith.constant 32 : i32
      %c0_i32_422 = arith.constant 0 : i32
      %641 = arith.cmpi eq, %c32_i32_421, %c0_i32_422 : i32
      %c1_i32_423 = arith.constant 1 : i32
      %642 = arith.select %641, %c1_i32_423, %c32_i32_421 : i32
      %643 = vector.broadcast %642 : i32 to vector<128x1xi32>
      %644 = arith.remsi %640, %643 : vector<128x1xi32>
      %c0_i32_424 = arith.constant 0 : i32
      %645 = vector.broadcast %c0_i32_424 : i32 to vector<128x1xi32>
      %646 = arith.cmpi ne, %644, %645 : vector<128x1xi32>
      %c0_i32_425 = arith.constant 0 : i32
      %647 = vector.broadcast %c0_i32_425 : i32 to vector<128x1xi32>
      %648 = arith.cmpi slt, %644, %647 : vector<128x1xi32>
      %c0_i32_426 = arith.constant 0 : i32
      %649 = arith.cmpi slt, %642, %c0_i32_426 : i32
      %650 = vector.broadcast %649 : i1 to vector<128x1xi1>
      %651 = vector.broadcast %650 : vector<128x1xi1> to vector<128x1xi1>
      %652 = arith.xori %648, %651 : vector<128x1xi1>
      %653 = arith.andi %652, %646 : vector<128x1xi1>
      %654 = vector.broadcast %642 : i32 to vector<128x1xi32>
      %655 = arith.addi %644, %654 : vector<128x1xi32>
      %656 = arith.select %653, %655, %644 : vector<128x1xi1>, vector<128x1xi32>
      %c0_i32_427 = arith.constant 0 : i32
      %657 = vector.broadcast %c0_i32_427 : i32 to vector<128x1xi32>
      %658 = arith.cmpi sgt, %656, %657 : vector<128x1xi32>
      %c31_i32 = arith.constant 31 : i32
      %659 = vector.broadcast %c31_i32 : i32 to vector<128x1xi32>
      %660 = arith.cmpi slt, %656, %659 : vector<128x1xi32>
      %661 = tpu.iota {dimensions = array<i32: 1>} : vector<1x128xi32>
      %c3_i32_428 = arith.constant 3 : i32
      %662 = vector.broadcast %c3_i32_428 : i32 to vector<1x128xi32>
      %663 = arith.cmpi slt, %661, %662 : vector<1x128xi32>
      %cst_429 = arith.constant 0.000000e+00 : f32
      %664 = vector.broadcast %cst_429 : f32 to vector<128x128xf32>
      %c0_i32_430 = arith.constant 0 : i32
      %665 = arith.addi %c0_i32_430, %637 : i32
      %666 = arith.index_cast %665 : i32 to index
      %c0_431 = arith.constant 0 : index
      %667 = vector.load %arg6[%666, %c0_431] : memref<1096x128xf32, #tpu.memory_space<vmem>>, vector<128x128xf32>
      %cst_432 = arith.constant 0.000000e+00 : f32
      %668 = vector.shape_cast %663 : vector<1x128xi1> to vector<1x128xi1>
      %669 = vector.broadcast %668 : vector<1x128xi1> to vector<128x128xi1>
      %670 = vector.broadcast %cst_432 : f32 to vector<128x128xf32>
      %671 = arith.select %669, %667, %670 : vector<128x128xi1>, vector<128x128xf32>
      %cst_433 = arith.constant 0.000000e+00 : f32
      %672 = vector.shape_cast %658 : vector<128x1xi1> to vector<128x1xi1>
      %673 = vector.broadcast %672 : vector<128x1xi1> to vector<128x128xi1>
      %674 = vector.broadcast %cst_433 : f32 to vector<128x128xf32>
      %675 = arith.select %673, %671, %674 : vector<128x128xi1>, vector<128x128xf32>
      %c1_i32_434 = arith.constant 1 : i32
      %676 = arith.addi %c1_i32_434, %637 : i32
      %677 = arith.index_cast %676 : i32 to index
      %c0_435 = arith.constant 0 : index
      %678 = vector.load %arg6[%677, %c0_435] : memref<1096x128xf32, #tpu.memory_space<vmem>>, vector<128x128xf32>
      %cst_436 = arith.constant 0.000000e+00 : f32
      %679 = vector.shape_cast %663 : vector<1x128xi1> to vector<1x128xi1>
      %680 = vector.broadcast %679 : vector<1x128xi1> to vector<128x128xi1>
      %681 = vector.broadcast %cst_436 : f32 to vector<128x128xf32>
      %682 = arith.select %680, %678, %681 : vector<128x128xi1>, vector<128x128xf32>
      %c3_i32_437 = arith.constant 3 : i32
      %683 = tpu.dynamic_rotate %682 by %c3_i32_437 dim 1 : vector<128x128xf32>, i32 -> vector<128x128xf32>
      %684 = arith.addf %675, %683 : vector<128x128xf32>
      %c2_i32 = arith.constant 2 : i32
      %685 = arith.addi %c2_i32, %637 : i32
      %686 = arith.index_cast %685 : i32 to index
      %c0_438 = arith.constant 0 : index
      %687 = vector.load %arg6[%686, %c0_438] : memref<1096x128xf32, #tpu.memory_space<vmem>>, vector<128x128xf32>
      %cst_439 = arith.constant 0.000000e+00 : f32
      %688 = vector.shape_cast %663 : vector<1x128xi1> to vector<1x128xi1>
      %689 = vector.broadcast %688 : vector<1x128xi1> to vector<128x128xi1>
      %690 = vector.broadcast %cst_439 : f32 to vector<128x128xf32>
      %691 = arith.select %689, %687, %690 : vector<128x128xi1>, vector<128x128xf32>
      %cst_440 = arith.constant 0.000000e+00 : f32
      %692 = vector.shape_cast %660 : vector<128x1xi1> to vector<128x1xi1>
      %693 = vector.broadcast %692 : vector<128x1xi1> to vector<128x128xi1>
      %694 = vector.broadcast %cst_440 : f32 to vector<128x128xf32>
      %695 = arith.select %693, %691, %694 : vector<128x128xi1>, vector<128x128xf32>
      %c6_i32 = arith.constant 6 : i32
      %696 = tpu.dynamic_rotate %695 by %c6_i32 dim 1 : vector<128x128xf32>, i32 -> vector<128x128xf32>
      %697 = arith.addf %684, %696 : vector<128x128xf32>
      %c32_i32_441 = arith.constant 32 : i32
      %698 = arith.addi %c32_i32_441, %637 : i32
      %699 = arith.index_cast %698 : i32 to index
      %c0_442 = arith.constant 0 : index
      %700 = vector.load %arg6[%699, %c0_442] : memref<1096x128xf32, #tpu.memory_space<vmem>>, vector<128x128xf32>
      %cst_443 = arith.constant 0.000000e+00 : f32
      %701 = vector.shape_cast %663 : vector<1x128xi1> to vector<1x128xi1>
      %702 = vector.broadcast %701 : vector<1x128xi1> to vector<128x128xi1>
      %703 = vector.broadcast %cst_443 : f32 to vector<128x128xf32>
      %704 = arith.select %702, %700, %703 : vector<128x128xi1>, vector<128x128xf32>
      %cst_444 = arith.constant 0.000000e+00 : f32
      %705 = vector.shape_cast %658 : vector<128x1xi1> to vector<128x1xi1>
      %706 = vector.broadcast %705 : vector<128x1xi1> to vector<128x128xi1>
      %707 = vector.broadcast %cst_444 : f32 to vector<128x128xf32>
      %708 = arith.select %706, %704, %707 : vector<128x128xi1>, vector<128x128xf32>
      %c9_i32 = arith.constant 9 : i32
      %709 = tpu.dynamic_rotate %708 by %c9_i32 dim 1 : vector<128x128xf32>, i32 -> vector<128x128xf32>
      %710 = arith.addf %697, %709 : vector<128x128xf32>
      %c33_i32 = arith.constant 33 : i32
      %711 = arith.addi %c33_i32, %637 : i32
      %712 = arith.index_cast %711 : i32 to index
      %c0_445 = arith.constant 0 : index
      %713 = vector.load %arg6[%712, %c0_445] : memref<1096x128xf32, #tpu.memory_space<vmem>>, vector<128x128xf32>
      %cst_446 = arith.constant 0.000000e+00 : f32
      %714 = vector.shape_cast %663 : vector<1x128xi1> to vector<1x128xi1>
      %715 = vector.broadcast %714 : vector<1x128xi1> to vector<128x128xi1>
      %716 = vector.broadcast %cst_446 : f32 to vector<128x128xf32>
      %717 = arith.select %715, %713, %716 : vector<128x128xi1>, vector<128x128xf32>
      %c12_i32 = arith.constant 12 : i32
      %718 = tpu.dynamic_rotate %717 by %c12_i32 dim 1 : vector<128x128xf32>, i32 -> vector<128x128xf32>
      %719 = arith.addf %710, %718 : vector<128x128xf32>
      %c34_i32 = arith.constant 34 : i32
      %720 = arith.addi %c34_i32, %637 : i32
      %721 = arith.index_cast %720 : i32 to index
      %c0_447 = arith.constant 0 : index
      %722 = vector.load %arg6[%721, %c0_447] : memref<1096x128xf32, #tpu.memory_space<vmem>>, vector<128x128xf32>
      %cst_448 = arith.constant 0.000000e+00 : f32
      %723 = vector.shape_cast %663 : vector<1x128xi1> to vector<1x128xi1>
      %724 = vector.broadcast %723 : vector<1x128xi1> to vector<128x128xi1>
      %725 = vector.broadcast %cst_448 : f32 to vector<128x128xf32>
      %726 = arith.select %724, %722, %725 : vector<128x128xi1>, vector<128x128xf32>
      %cst_449 = arith.constant 0.000000e+00 : f32
      %727 = vector.shape_cast %660 : vector<128x1xi1> to vector<128x1xi1>
      %728 = vector.broadcast %727 : vector<128x1xi1> to vector<128x128xi1>
      %729 = vector.broadcast %cst_449 : f32 to vector<128x128xf32>
      %730 = arith.select %728, %726, %729 : vector<128x128xi1>, vector<128x128xf32>
      %c15_i32_450 = arith.constant 15 : i32
      %731 = tpu.dynamic_rotate %730 by %c15_i32_450 dim 1 : vector<128x128xf32>, i32 -> vector<128x128xf32>
      %732 = arith.addf %719, %731 : vector<128x128xf32>
      %c64_i32_451 = arith.constant 64 : i32
      %733 = arith.addi %c64_i32_451, %637 : i32
      %734 = arith.index_cast %733 : i32 to index
      %c0_452 = arith.constant 0 : index
      %735 = vector.load %arg6[%734, %c0_452] : memref<1096x128xf32, #tpu.memory_space<vmem>>, vector<128x128xf32>
      %cst_453 = arith.constant 0.000000e+00 : f32
      %736 = vector.shape_cast %663 : vector<1x128xi1> to vector<1x128xi1>
      %737 = vector.broadcast %736 : vector<1x128xi1> to vector<128x128xi1>
      %738 = vector.broadcast %cst_453 : f32 to vector<128x128xf32>
      %739 = arith.select %737, %735, %738 : vector<128x128xi1>, vector<128x128xf32>
      %cst_454 = arith.constant 0.000000e+00 : f32
      %740 = vector.shape_cast %658 : vector<128x1xi1> to vector<128x1xi1>
      %741 = vector.broadcast %740 : vector<128x1xi1> to vector<128x128xi1>
      %742 = vector.broadcast %cst_454 : f32 to vector<128x128xf32>
      %743 = arith.select %741, %739, %742 : vector<128x128xi1>, vector<128x128xf32>
      %c18_i32 = arith.constant 18 : i32
      %744 = tpu.dynamic_rotate %743 by %c18_i32 dim 1 : vector<128x128xf32>, i32 -> vector<128x128xf32>
      %745 = arith.addf %732, %744 : vector<128x128xf32>
      %c65_i32 = arith.constant 65 : i32
      %746 = arith.addi %c65_i32, %637 : i32
      %747 = arith.index_cast %746 : i32 to index
      %c0_455 = arith.constant 0 : index
      %748 = vector.load %arg6[%747, %c0_455] : memref<1096x128xf32, #tpu.memory_space<vmem>>, vector<128x128xf32>
      %cst_456 = arith.constant 0.000000e+00 : f32
      %749 = vector.shape_cast %663 : vector<1x128xi1> to vector<1x128xi1>
      %750 = vector.broadcast %749 : vector<1x128xi1> to vector<128x128xi1>
      %751 = vector.broadcast %cst_456 : f32 to vector<128x128xf32>
      %752 = arith.select %750, %748, %751 : vector<128x128xi1>, vector<128x128xf32>
      %c21_i32 = arith.constant 21 : i32
      %753 = tpu.dynamic_rotate %752 by %c21_i32 dim 1 : vector<128x128xf32>, i32 -> vector<128x128xf32>
      %754 = arith.addf %745, %753 : vector<128x128xf32>
      %c66_i32 = arith.constant 66 : i32
      %755 = arith.addi %c66_i32, %637 : i32
      %756 = arith.index_cast %755 : i32 to index
      %c0_457 = arith.constant 0 : index
      %757 = vector.load %arg6[%756, %c0_457] : memref<1096x128xf32, #tpu.memory_space<vmem>>, vector<128x128xf32>
      %cst_458 = arith.constant 0.000000e+00 : f32
      %758 = vector.shape_cast %663 : vector<1x128xi1> to vector<1x128xi1>
      %759 = vector.broadcast %758 : vector<1x128xi1> to vector<128x128xi1>
      %760 = vector.broadcast %cst_458 : f32 to vector<128x128xf32>
      %761 = arith.select %759, %757, %760 : vector<128x128xi1>, vector<128x128xf32>
      %cst_459 = arith.constant 0.000000e+00 : f32
      %762 = vector.shape_cast %660 : vector<128x1xi1> to vector<128x1xi1>
      %763 = vector.broadcast %762 : vector<128x1xi1> to vector<128x128xi1>
      %764 = vector.broadcast %cst_459 : f32 to vector<128x128xf32>
      %765 = arith.select %763, %761, %764 : vector<128x128xi1>, vector<128x128xf32>
      %c24_i32 = arith.constant 24 : i32
      %766 = tpu.dynamic_rotate %765 by %c24_i32 dim 1 : vector<128x128xf32>, i32 -> vector<128x128xf32>
      %767 = arith.addf %754, %766 : vector<128x128xf32>
      %768 = arith.truncf %767 : vector<128x128xf32> to vector<128x128xbf16>
      %c0_460 = arith.constant 0 : index
      %c0_461 = arith.constant 0 : index
      %c0_462 = arith.constant 0 : index
      %769 = vector.load %arg2[%c0_460, %c0_461, %c0_462] : memref<16x128x128xbf16, #tpu.memory_space<vmem>>, vector<1x128x128xbf16>
      %770 = vector.shape_cast %769 : vector<1x128x128xbf16> to vector<128x128xbf16>
      %cst_463 = arith.constant dense<0.000000e+00> : vector<128x128xf32>
      %771 = tpu.matmul %768, %770, %cst_463 {dimension_numbers = #tpu.dot_dimension_numbers<[1], [0], [0], [1], [0, 0, 1, 1], [], []>} : vector<128x128xbf16>, vector<128x128xbf16>, vector<128x128xf32> -> vector<128x128xf32>
      %772 = arith.addf %664, %771 : vector<128x128xf32>
      %773 = vector.broadcast %15 : vector<1x128xf32> to vector<128x128xf32>
      %774 = arith.mulf %772, %773 : vector<128x128xf32>
      %775 = vector.broadcast %16 : vector<1x128xf32> to vector<128x128xf32>
      %776 = arith.addf %774, %775 : vector<128x128xf32>
      %cst_464 = arith.constant 0.000000e+00 : f32
      %777 = vector.broadcast %cst_464 : f32 to vector<128x128xf32>
      %778 = arith.cmpf oge, %776, %777 : vector<128x128xf32>
      %cst_465 = arith.constant 1.000000e-03 : f32
      %779 = vector.broadcast %cst_465 : f32 to vector<128x128xf32>
      %780 = arith.mulf %779, %776 : vector<128x128xf32>
      %781 = arith.select %778, %776, %780 : vector<128x128xi1>, vector<128x128xf32>
      %782 = arith.index_cast %637 : i32 to index
      %c0_466 = arith.constant 0 : index
      %783 = vector.load %arg7[%782, %c0_466] : memref<1024x128xf32, #tpu.memory_space<vmem>>, vector<128x128xf32>
      tpu.vector_store %arg7[%782, %c0_466], %781 {strides = array<i32>} : memref<1024x128xf32, #tpu.memory_space<vmem>>, vector<128x128xf32>,
    }
    %c8_i32_24 = arith.constant 8 : i32
    %cst = arith.constant 0.000000e+00 : f32
    %18 = vector.broadcast %cst : f32 to vector<17x128xf32>
    %c0_25 = arith.constant 0 : index
    %c0_26 = arith.constant 0 : index
    %19 = vector.load %arg6[%c0_25, %c0_26] : memref<1096x128xf32, #tpu.memory_space<vmem>>, vector<17x128xf32>
    tpu.vector_store %arg6[%c0_25, %c0_26], %18 {strides = array<i32>} : memref<1096x128xf32, #tpu.memory_space<vmem>>, vector<17x128xf32>,
    %cst_27 = arith.constant 0.000000e+00 : f32
    %20 = vector.broadcast %cst_27 : f32 to vector<17x128xf32>
    %c273 = arith.constant 273 : index
    %c0_28 = arith.constant 0 : index
    %21 = vector.load %arg6[%c273, %c0_28] : memref<1096x128xf32, #tpu.memory_space<vmem>>, vector<17x128xf32>
    tpu.vector_store %arg6[%c273, %c0_28], %20 {strides = array<i32>} : memref<1096x128xf32, #tpu.memory_space<vmem>>, vector<17x128xf32>,
    %c0_29 = arith.constant 0 : index
    %c0_30 = arith.constant 0 : index
    %22 = vector.load %arg7[%c0_29, %c0_30] : memref<1024x128xf32, #tpu.memory_space<vmem>>, vector<128x128xf32>
    %c127_i32 = arith.constant 127 : i32
    %23 = tpu.dynamic_rotate %22 by %c127_i32 dim 0 : vector<128x128xf32>, i32 -> vector<128x128xf32>
    %24 = arith.maximumf %22, %23 : vector<128x128xf32>
    %c96_i32 = arith.constant 96 : i32
    %25 = tpu.dynamic_rotate %24 by %c96_i32 dim 0 : vector<128x128xf32>, i32 -> vector<128x128xf32>
    %26 = arith.maximumf %24, %25 : vector<128x128xf32>
    %c0_31 = arith.constant 0 : index
    %c0_32 = arith.constant 0 : index
    %27 = vector.load %arg7[%c0_31, %c0_32] : memref<1024x128xf32, #tpu.memory_space<vmem>>, vector<128x128xf32>
    tpu.vector_store %arg7[%c0_31, %c0_32], %26 {strides = array<i32>} : memref<1024x128xf32, #tpu.memory_space<vmem>>, vector<128x128xf32>,
    %c0_33 = arith.constant 0 : index
    %c0_34 = arith.constant 0 : index
    %28 = tpu.strided_load %arg7[%c0_33, %c0_34] {strides = array<i32: 2, 1>} : memref<1024x128xf32, #tpu.memory_space<vmem>>, vector<16x128xf32>
    %c64 = arith.constant 64 : index
    %c0_35 = arith.constant 0 : index
    %29 = tpu.strided_load %arg7[%c64, %c0_35] {strides = array<i32: 2, 1>} : memref<1024x128xf32, #tpu.memory_space<vmem>>, vector<16x128xf32>
    %30 = tpu.concatenate %28, %29 in 0 : vector<16x128xf32>, vector<16x128xf32> -> vector<32x128xf32>
    %c17 = arith.constant 17 : index
    %c0_36 = arith.constant 0 : index
    %31 = vector.load %arg6[%c17, %c0_36] : memref<1096x128xf32, #tpu.memory_space<vmem>>, vector<32x128xf32>
    tpu.vector_store %arg6[%c17, %c0_36], %30 {strides = array<i32>} : memref<1096x128xf32, #tpu.memory_space<vmem>>, vector<32x128xf32>,
    %c128 = arith.constant 128 : index
    %c0_37 = arith.constant 0 : index
    %32 = vector.load %arg7[%c128, %c0_37] : memref<1024x128xf32, #tpu.memory_space<vmem>>, vector<128x128xf32>
    %c127_i32_38 = arith.constant 127 : i32
    %33 = tpu.dynamic_rotate %32 by %c127_i32_38 dim 0 : vector<128x128xf32>, i32 -> vector<128x128xf32>
    %34 = arith.maximumf %32, %33 : vector<128x128xf32>
    %c96_i32_39 = arith.constant 96 : i32
    %35 = tpu.dynamic_rotate %34 by %c96_i32_39 dim 0 : vector<128x128xf32>, i32 -> vector<128x128xf32>
    %36 = arith.maximumf %34, %35 : vector<128x128xf32>
    %c128_40 = arith.constant 128 : index
    %c0_41 = arith.constant 0 : index
    %37 = vector.load %arg7[%c128_40, %c0_41] : memref<1024x128xf32, #tpu.memory_space<vmem>>, vector<128x128xf32>
    tpu.vector_store %arg7[%c128_40, %c0_41], %36 {strides = array<i32>} : memref<1024x128xf32, #tpu.memory_space<vmem>>, vector<128x128xf32>,
    %c128_42 = arith.constant 128 : index
    %c0_43 = arith.constant 0 : index
    %38 = tpu.strided_load %arg7[%c128_42, %c0_43] {strides = array<i32: 2, 1>} : memref<1024x128xf32, #tpu.memory_space<vmem>>, vector<16x128xf32>
    %c192 = arith.constant 192 : index
    %c0_44 = arith.constant 0 : index
    %39 = tpu.strided_load %arg7[%c192, %c0_44] {strides = array<i32: 2, 1>} : memref<1024x128xf32, #tpu.memory_space<vmem>>, vector<16x128xf32>
    %40 = tpu.concatenate %38, %39 in 0 : vector<16x128xf32>, vector<16x128xf32> -> vector<32x128xf32>
    %c49 = arith.constant 49 : index
    %c0_45 = arith.constant 0 : index
    %41 = vector.load %arg6[%c49, %c0_45] : memref<1096x128xf32, #tpu.memory_space<vmem>>, vector<32x128xf32>
    tpu.vector_store %arg6[%c49, %c0_45], %40 {strides = array<i32>} : memref<1096x128xf32, #tpu.memory_space<vmem>>, vector<32x128xf32>,
    %c256_46 = arith.constant 256 : index
    %c0_47 = arith.constant 0 : index
    %42 = vector.load %arg7[%c256_46, %c0_47] : memref<1024x128xf32, #tpu.memory_space<vmem>>, vector<128x128xf32>
    %c127_i32_48 = arith.constant 127 : i32
    %43 = tpu.dynamic_rotate %42 by %c127_i32_48 dim 0 : vector<128x128xf32>, i32 -> vector<128x128xf32>
    %44 = arith.maximumf %42, %43 : vector<128x128xf32>
    %c96_i32_49 = arith.constant 96 : i32
    %45 = tpu.dynamic_rotate %44 by %c96_i32_49 dim 0 : vector<128x128xf32>, i32 -> vector<128x128xf32>
    %46 = arith.maximumf %44, %45 : vector<128x128xf32>
    %c256_50 = arith.constant 256 : index
    %c0_51 = arith.constant 0 : index
    %47 = vector.load %arg7[%c256_50, %c0_51] : memref<1024x128xf32, #tpu.memory_space<vmem>>, vector<128x128xf32>
    tpu.vector_store %arg7[%c256_50, %c0_51], %46 {strides = array<i32>} : memref<1024x128xf32, #tpu.memory_space<vmem>>, vector<128x128xf32>,
    %c256_52 = arith.constant 256 : index
    %c0_53 = arith.constant 0 : index
    %48 = tpu.strided_load %arg7[%c256_52, %c0_53] {strides = array<i32: 2, 1>} : memref<1024x128xf32, #tpu.memory_space<vmem>>, vector<16x128xf32>
    %c320 = arith.constant 320 : index
    %c0_54 = arith.constant 0 : index
    %49 = tpu.strided_load %arg7[%c320, %c0_54] {strides = array<i32: 2, 1>} : memref<1024x128xf32, #tpu.memory_space<vmem>>, vector<16x128xf32>
    %50 = tpu.concatenate %48, %49 in 0 : vector<16x128xf32>, vector<16x128xf32> -> vector<32x128xf32>
    %c81 = arith.constant 81 : index
    %c0_55 = arith.constant 0 : index
    %51 = vector.load %arg6[%c81, %c0_55] : memref<1096x128xf32, #tpu.memory_space<vmem>>, vector<32x128xf32>
    tpu.vector_store %arg6[%c81, %c0_55], %50 {strides = array<i32>} : memref<1096x128xf32, #tpu.memory_space<vmem>>, vector<32x128xf32>,
    %c384 = arith.constant 384 : index
    %c0_56 = arith.constant 0 : index
    %52 = vector.load %arg7[%c384, %c0_56] : memref<1024x128xf32, #tpu.memory_space<vmem>>, vector<128x128xf32>
    %c127_i32_57 = arith.constant 127 : i32
    %53 = tpu.dynamic_rotate %52 by %c127_i32_57 dim 0 : vector<128x128xf32>, i32 -> vector<128x128xf32>
    %54 = arith.maximumf %52, %53 : vector<128x128xf32>
    %c96_i32_58 = arith.constant 96 : i32
    %55 = tpu.dynamic_rotate %54 by %c96_i32_58 dim 0 : vector<128x128xf32>, i32 -> vector<128x128xf32>
    %56 = arith.maximumf %54, %55 : vector<128x128xf32>
    %c384_59 = arith.constant 384 : index
    %c0_60 = arith.constant 0 : index
    %57 = vector.load %arg7[%c384_59, %c0_60] : memref<1024x128xf32, #tpu.memory_space<vmem>>, vector<128x128xf32>
    tpu.vector_store %arg7[%c384_59, %c0_60], %56 {strides = array<i32>} : memref<1024x128xf32, #tpu.memory_space<vmem>>, vector<128x128xf32>,
    %c384_61 = arith.constant 384 : index
    %c0_62 = arith.constant 0 : index
    %58 = tpu.strided_load %arg7[%c384_61, %c0_62] {strides = array<i32: 2, 1>} : memref<1024x128xf32, #tpu.memory_space<vmem>>, vector<16x128xf32>
    %c448 = arith.constant 448 : index
    %c0_63 = arith.constant 0 : index
    %59 = tpu.strided_load %arg7[%c448, %c0_63] {strides = array<i32: 2, 1>} : memref<1024x128xf32, #tpu.memory_space<vmem>>, vector<16x128xf32>
    %60 = tpu.concatenate %58, %59 in 0 : vector<16x128xf32>, vector<16x128xf32> -> vector<32x128xf32>
    %c113 = arith.constant 113 : index
    %c0_64 = arith.constant 0 : index
    %61 = vector.load %arg6[%c113, %c0_64] : memref<1096x128xf32, #tpu.memory_space<vmem>>, vector<32x128xf32>
    tpu.vector_store %arg6[%c113, %c0_64], %60 {strides = array<i32>} : memref<1096x128xf32, #tpu.memory_space<vmem>>, vector<32x128xf32>,
    %c512_65 = arith.constant 512 : index
    %c0_66 = arith.constant 0 : index
    %62 = vector.load %arg7[%c512_65, %c0_66] : memref<1024x128xf32, #tpu.memory_space<vmem>>, vector<128x128xf32>
    %c127_i32_67 = arith.constant 127 : i32
    %63 = tpu.dynamic_rotate %62 by %c127_i32_67 dim 0 : vector<128x128xf32>, i32 -> vector<128x128xf32>
    %64 = arith.maximumf %62, %63 : vector<128x128xf32>
    %c96_i32_68 = arith.constant 96 : i32
    %65 = tpu.dynamic_rotate %64 by %c96_i32_68 dim 0 : vector<128x128xf32>, i32 -> vector<128x128xf32>
    %66 = arith.maximumf %64, %65 : vector<128x128xf32>
    %c512_69 = arith.constant 512 : index
    %c0_70 = arith.constant 0 : index
    %67 = vector.load %arg7[%c512_69, %c0_70] : memref<1024x128xf32, #tpu.memory_space<vmem>>, vector<128x128xf32>
    tpu.vector_store %arg7[%c512_69, %c0_70], %66 {strides = array<i32>} : memref<1024x128xf32, #tpu.memory_space<vmem>>, vector<128x128xf32>,
    %c512_71 = arith.constant 512 : index
    %c0_72 = arith.constant 0 : index
    %68 = tpu.strided_load %arg7[%c512_71, %c0_72] {strides = array<i32: 2, 1>} : memref<1024x128xf32, #tpu.memory_space<vmem>>, vector<16x128xf32>
    %c576 = arith.constant 576 : index
    %c0_73 = arith.constant 0 : index
    %69 = tpu.strided_load %arg7[%c576, %c0_73] {strides = array<i32: 2, 1>} : memref<1024x128xf32, #tpu.memory_space<vmem>>, vector<16x128xf32>
    %70 = tpu.concatenate %68, %69 in 0 : vector<16x128xf32>, vector<16x128xf32> -> vector<32x128xf32>
    %c145 = arith.constant 145 : index
    %c0_74 = arith.constant 0 : index
    %71 = vector.load %arg6[%c145, %c0_74] : memref<1096x128xf32, #tpu.memory_space<vmem>>, vector<32x128xf32>
    tpu.vector_store %arg6[%c145, %c0_74], %70 {strides = array<i32>} : memref<1096x128xf32, #tpu.memory_space<vmem>>, vector<32x128xf32>,
    %c640 = arith.constant 640 : index
    %c0_75 = arith.constant 0 : index
    %72 = vector.load %arg7[%c640, %c0_75] : memref<1024x128xf32, #tpu.memory_space<vmem>>, vector<128x128xf32>
    %c127_i32_76 = arith.constant 127 : i32
    %73 = tpu.dynamic_rotate %72 by %c127_i32_76 dim 0 : vector<128x128xf32>, i32 -> vector<128x128xf32>
    %74 = arith.maximumf %72, %73 : vector<128x128xf32>
    %c96_i32_77 = arith.constant 96 : i32
    %75 = tpu.dynamic_rotate %74 by %c96_i32_77 dim 0 : vector<128x128xf32>, i32 -> vector<128x128xf32>
    %76 = arith.maximumf %74, %75 : vector<128x128xf32>
    %c640_78 = arith.constant 640 : index
    %c0_79 = arith.constant 0 : index
    %77 = vector.load %arg7[%c640_78, %c0_79] : memref<1024x128xf32, #tpu.memory_space<vmem>>, vector<128x128xf32>
    tpu.vector_store %arg7[%c640_78, %c0_79], %76 {strides = array<i32>} : memref<1024x128xf32, #tpu.memory_space<vmem>>, vector<128x128xf32>,
    %c640_80 = arith.constant 640 : index
    %c0_81 = arith.constant 0 : index
    %78 = tpu.strided_load %arg7[%c640_80, %c0_81] {strides = array<i32: 2, 1>} : memref<1024x128xf32, #tpu.memory_space<vmem>>, vector<16x128xf32>
    %c704 = arith.constant 704 : index
    %c0_82 = arith.constant 0 : index
    %79 = tpu.strided_load %arg7[%c704, %c0_82] {strides = array<i32: 2, 1>} : memref<1024x128xf32, #tpu.memory_space<vmem>>, vector<16x128xf32>
    %80 = tpu.concatenate %78, %79 in 0 : vector<16x128xf32>, vector<16x128xf32> -> vector<32x128xf32>
    %c177 = arith.constant 177 : index
    %c0_83 = arith.constant 0 : index
    %81 = vector.load %arg6[%c177, %c0_83] : memref<1096x128xf32, #tpu.memory_space<vmem>>, vector<32x128xf32>
    tpu.vector_store %arg6[%c177, %c0_83], %80 {strides = array<i32>} : memref<1096x128xf32, #tpu.memory_space<vmem>>, vector<32x128xf32>,
    %c768_84 = arith.constant 768 : index
    %c0_85 = arith.constant 0 : index
    %82 = vector.load %arg7[%c768_84, %c0_85] : memref<1024x128xf32, #tpu.memory_space<vmem>>, vector<128x128xf32>
    %c127_i32_86 = arith.constant 127 : i32
    %83 = tpu.dynamic_rotate %82 by %c127_i32_86 dim 0 : vector<128x128xf32>, i32 -> vector<128x128xf32>
    %84 = arith.maximumf %82, %83 : vector<128x128xf32>
    %c96_i32_87 = arith.constant 96 : i32
    %85 = tpu.dynamic_rotate %84 by %c96_i32_87 dim 0 : vector<128x128xf32>, i32 -> vector<128x128xf32>
    %86 = arith.maximumf %84, %85 : vector<128x128xf32>
    %c768_88 = arith.constant 768 : index
    %c0_89 = arith.constant 0 : index
    %87 = vector.load %arg7[%c768_88, %c0_89] : memref<1024x128xf32, #tpu.memory_space<vmem>>, vector<128x128xf32>
    tpu.vector_store %arg7[%c768_88, %c0_89], %86 {strides = array<i32>} : memref<1024x128xf32, #tpu.memory_space<vmem>>, vector<128x128xf32>,
    %c768_90 = arith.constant 768 : index
    %c0_91 = arith.constant 0 : index
    %88 = tpu.strided_load %arg7[%c768_90, %c0_91] {strides = array<i32: 2, 1>} : memref<1024x128xf32, #tpu.memory_space<vmem>>, vector<16x128xf32>
    %c832 = arith.constant 832 : index
    %c0_92 = arith.constant 0 : index
    %89 = tpu.strided_load %arg7[%c832, %c0_92] {strides = array<i32: 2, 1>} : memref<1024x128xf32, #tpu.memory_space<vmem>>, vector<16x128xf32>
    %90 = tpu.concatenate %88, %89 in 0 : vector<16x128xf32>, vector<16x128xf32> -> vector<32x128xf32>
    %c209 = arith.constant 209 : index
    %c0_93 = arith.constant 0 : index
    %91 = vector.load %arg6[%c209, %c0_93] : memref<1096x128xf32, #tpu.memory_space<vmem>>, vector<32x128xf32>
    tpu.vector_store %arg6[%c209, %c0_93], %90 {strides = array<i32>} : memref<1096x128xf32, #tpu.memory_space<vmem>>, vector<32x128xf32>,
    %c896 = arith.constant 896 : index
    %c0_94 = arith.constant 0 : index
    %92 = vector.load %arg7[%c896, %c0_94] : memref<1024x128xf32, #tpu.memory_space<vmem>>, vector<128x128xf32>
    %c127_i32_95 = arith.constant 127 : i32
    %93 = tpu.dynamic_rotate %92 by %c127_i32_95 dim 0 : vector<128x128xf32>, i32 -> vector<128x128xf32>
    %94 = arith.maximumf %92, %93 : vector<128x128xf32>
    %c96_i32_96 = arith.constant 96 : i32
    %95 = tpu.dynamic_rotate %94 by %c96_i32_96 dim 0 : vector<128x128xf32>, i32 -> vector<128x128xf32>
    %96 = arith.maximumf %94, %95 : vector<128x128xf32>
    %c896_97 = arith.constant 896 : index
    %c0_98 = arith.constant 0 : index
    %97 = vector.load %arg7[%c896_97, %c0_98] : memref<1024x128xf32, #tpu.memory_space<vmem>>, vector<128x128xf32>
    tpu.vector_store %arg7[%c896_97, %c0_98], %96 {strides = array<i32>} : memref<1024x128xf32, #tpu.memory_space<vmem>>, vector<128x128xf32>,
    %c896_99 = arith.constant 896 : index
    %c0_100 = arith.constant 0 : index
    %98 = tpu.strided_load %arg7[%c896_99, %c0_100] {strides = array<i32: 2, 1>} : memref<1024x128xf32, #tpu.memory_space<vmem>>, vector<16x128xf32>
    %c960 = arith.constant 960 : index
    %c0_101 = arith.constant 0 : index
    %99 = tpu.strided_load %arg7[%c960, %c0_101] {strides = array<i32: 2, 1>} : memref<1024x128xf32, #tpu.memory_space<vmem>>, vector<16x128xf32>
    %100 = tpu.concatenate %98, %99 in 0 : vector<16x128xf32>, vector<16x128xf32> -> vector<32x128xf32>
    %c241 = arith.constant 241 : index
    %c0_102 = arith.constant 0 : index
    %101 = vector.load %arg6[%c241, %c0_102] : memref<1096x128xf32, #tpu.memory_space<vmem>>, vector<32x128xf32>
    tpu.vector_store %arg6[%c241, %c0_102], %100 {strides = array<i32>} : memref<1096x128xf32, #tpu.memory_space<vmem>>, vector<32x128xf32>,
    %c1 = arith.constant 1 : index
    %c0_103 = arith.constant 0 : index
    %102 = vector.load %arg3[%c1, %c0_103] : memref<5x128xf32, #tpu.memory_space<vmem>>, vector<1x128xf32>
    %c1_104 = arith.constant 1 : index
    %c0_105 = arith.constant 0 : index
    %103 = vector.load %arg4[%c1_104, %c0_105] : memref<5x128xf32, #tpu.memory_space<vmem>>, vector<1x128xf32>
    %104 = tpu.iota {dimensions = array<i32: 0>} : vector<128x1xi32>
    %c0_i32_106 = arith.constant 0 : i32
    %105 = vector.broadcast %c0_i32_106 : i32 to vector<128x1xi32>
    %106 = arith.addi %104, %105 : vector<128x1xi32>
    %c16_i32 = arith.constant 16 : i32
    %c0_i32_107 = arith.constant 0 : i32
    %107 = arith.cmpi eq, %c16_i32, %c0_i32_107 : i32
    %c1_i32_108 = arith.constant 1 : i32
    %108 = arith.select %107, %c1_i32_108, %c16_i32 : i32
    %109 = vector.broadcast %108 : i32 to vector<128x1xi32>
    %110 = arith.remsi %106, %109 : vector<128x1xi32>
    %c0_i32_109 = arith.constant 0 : i32
    %111 = vector.broadcast %c0_i32_109 : i32 to vector<128x1xi32>
    %112 = arith.cmpi ne, %110, %111 : vector<128x1xi32>
    %c0_i32_110 = arith.constant 0 : i32
    %113 = vector.broadcast %c0_i32_110 : i32 to vector<128x1xi32>
    %114 = arith.cmpi slt, %110, %113 : vector<128x1xi32>
    %c0_i32_111 = arith.constant 0 : i32
    %115 = arith.cmpi slt, %108, %c0_i32_111 : i32
    %116 = vector.broadcast %115 : i1 to vector<128x1xi1>
    %117 = vector.broadcast %116 : vector<128x1xi1> to vector<128x1xi1>
    %118 = arith.xori %114, %117 : vector<128x1xi1>
    %119 = arith.andi %118, %112 : vector<128x1xi1>
    %120 = vector.broadcast %108 : i32 to vector<128x1xi32>
    %121 = arith.addi %110, %120 : vector<128x1xi32>
    %122 = arith.select %119, %121, %110 : vector<128x1xi1>, vector<128x1xi32>
    %c0_i32_112 = arith.constant 0 : i32
    %123 = vector.broadcast %c0_i32_112 : i32 to vector<128x1xi32>
    %124 = arith.cmpi sgt, %122, %123 : vector<128x1xi32>
    %c15_i32 = arith.constant 15 : i32
    %125 = vector.broadcast %c15_i32 : i32 to vector<128x1xi32>
    %126 = arith.cmpi slt, %122, %125 : vector<128x1xi32>
    %cst_113 = arith.constant 0.000000e+00 : f32
    %127 = vector.broadcast %cst_113 : f32 to vector<128x128xf32>
    %c0_114 = arith.constant 0 : index
    %c0_115 = arith.constant 0 : index
    %128 = vector.load %arg6[%c0_114, %c0_115] : memref<1096x128xf32, #tpu.memory_space<vmem>>, vector<128x128xf32>
    %cst_116 = arith.constant 0.000000e+00 : f32
    %129 = vector.shape_cast %124 : vector<128x1xi1> to vector<128x1xi1>
    %130 = vector.broadcast %129 : vector<128x1xi1> to vector<128x128xi1>
    %131 = vector.broadcast %cst_116 : f32 to vector<128x128xf32>
    %132 = arith.select %130, %128, %131 : vector<128x128xi1>, vector<128x128xf32>
    %c1_117 = arith.constant 1 : index
    %c0_118 = arith.constant 0 : index
    %133 = vector.load %arg6[%c1_117, %c0_118] : memref<1096x128xf32, #tpu.memory_space<vmem>>, vector<128x128xf32>
    %c16_i32_119 = arith.constant 16 : i32
    %134 = tpu.dynamic_rotate %133 by %c16_i32_119 dim 1 : vector<128x128xf32>, i32 -> vector<128x128xf32>
    %135 = arith.addf %132, %134 : vector<128x128xf32>
    %c2 = arith.constant 2 : index
    %c0_120 = arith.constant 0 : index
    %136 = vector.load %arg6[%c2, %c0_120] : memref<1096x128xf32, #tpu.memory_space<vmem>>, vector<128x128xf32>
    %cst_121 = arith.constant 0.000000e+00 : f32
    %137 = vector.shape_cast %126 : vector<128x1xi1> to vector<128x1xi1>
    %138 = vector.broadcast %137 : vector<128x1xi1> to vector<128x128xi1>
    %139 = vector.broadcast %cst_121 : f32 to vector<128x128xf32>
    %140 = arith.select %138, %136, %139 : vector<128x128xi1>, vector<128x128xf32>
    %c32_i32 = arith.constant 32 : i32
    %141 = tpu.dynamic_rotate %140 by %c32_i32 dim 1 : vector<128x128xf32>, i32 -> vector<128x128xf32>
    %142 = arith.addf %135, %141 : vector<128x128xf32>
    %c16 = arith.constant 16 : index
    %c0_122 = arith.constant 0 : index
    %143 = vector.load %arg6[%c16, %c0_122] : memref<1096x128xf32, #tpu.memory_space<vmem>>, vector<128x128xf32>
    %cst_123 = arith.constant 0.000000e+00 : f32
    %144 = vector.shape_cast %124 : vector<128x1xi1> to vector<128x1xi1>
    %145 = vector.broadcast %144 : vector<128x1xi1> to vector<128x128xi1>
    %146 = vector.broadcast %cst_123 : f32 to vector<128x128xf32>
    %147 = arith.select %145, %143, %146 : vector<128x128xi1>, vector<128x128xf32>
    %c48_i32 = arith.constant 48 : i32
    %148 = tpu.dynamic_rotate %147 by %c48_i32 dim 1 : vector<128x128xf32>, i32 -> vector<128x128xf32>
    %149 = arith.addf %142, %148 : vector<128x128xf32>
    %c17_124 = arith.constant 17 : index
    %c0_125 = arith.constant 0 : index
    %150 = vector.load %arg6[%c17_124, %c0_125] : memref<1096x128xf32, #tpu.memory_space<vmem>>, vector<128x128xf32>
    %c64_i32 = arith.constant 64 : i32
    %151 = tpu.dynamic_rotate %150 by %c64_i32 dim 1 : vector<128x128xf32>, i32 -> vector<128x128xf32>
    %152 = arith.addf %149, %151 : vector<128x128xf32>
    %c18 = arith.constant 18 : index
    %c0_126 = arith.constant 0 : index
    %153 = vector.load %arg6[%c18, %c0_126] : memref<1096x128xf32, #tpu.memory_space<vmem>>, vector<128x128xf32>
    %cst_127 = arith.constant 0.000000e+00 : f32
    %154 = vector.shape_cast %126 : vector<128x1xi1> to vector<128x1xi1>
    %155 = vector.broadcast %154 : vector<128x1xi1> to vector<128x128xi1>
    %156 = vector.broadcast %cst_127 : f32 to vector<128x128xf32>
    %157 = arith.select %155, %153, %156 : vector<128x128xi1>, vector<128x128xf32>
    %c80_i32 = arith.constant 80 : i32
    %158 = tpu.dynamic_rotate %157 by %c80_i32 dim 1 : vector<128x128xf32>, i32 -> vector<128x128xf32>
    %159 = arith.addf %152, %158 : vector<128x128xf32>
    %c32 = arith.constant 32 : index
    %c0_128 = arith.constant 0 : index
    %160 = vector.load %arg6[%c32, %c0_128] : memref<1096x128xf32, #tpu.memory_space<vmem>>, vector<128x128xf32>
    %cst_129 = arith.constant 0.000000e+00 : f32
    %161 = vector.shape_cast %124 : vector<128x1xi1> to vector<128x1xi1>
    %162 = vector.broadcast %161 : vector<128x1xi1> to vector<128x128xi1>
    %163 = vector.broadcast %cst_129 : f32 to vector<128x128xf32>
    %164 = arith.select %162, %160, %163 : vector<128x128xi1>, vector<128x128xf32>
    %c96_i32_130 = arith.constant 96 : i32
    %165 = tpu.dynamic_rotate %164 by %c96_i32_130 dim 1 : vector<128x128xf32>, i32 -> vector<128x128xf32>
    %166 = arith.addf %159, %165 : vector<128x128xf32>
    %c33 = arith.constant 33 : index
    %c0_131 = arith.constant 0 : index
    %167 = vector.load %arg6[%c33, %c0_131] : memref<1096x128xf32, #tpu.memory_space<vmem>>, vector<128x128xf32>
    %c112_i32 = arith.constant 112 : i32
    %168 = tpu.dynamic_rotate %167 by %c112_i32 dim 1 : vector<128x128xf32>, i32 -> vector<128x128xf32>
    %169 = arith.addf %166, %168 : vector<128x128xf32>
    %170 = arith.truncf %169 : vector<128x128xf32> to vector<128x128xbf16>
    %c1_132 = arith.constant 1 : index
    %c0_133 = arith.constant 0 : index
    %c0_134 = arith.constant 0 : index
    %171 = vector.load %arg2[%c1_132, %c0_133, %c0_134] : memref<16x128x128xbf16, #tpu.memory_space<vmem>>, vector<1x128x128xbf16>
    %172 = vector.shape_cast %171 : vector<1x128x128xbf16> to vector<128x128xbf16>
    %cst_135 = arith.constant dense<0.000000e+00> : vector<128x128xf32>
    %173 = tpu.matmul %170, %172, %cst_135 {dimension_numbers = #tpu.dot_dimension_numbers<[1], [0], [0], [1], [0, 0, 1, 1], [], []>} : vector<128x128xbf16>, vector<128x128xbf16>, vector<128x128xf32> -> vector<128x128xf32>
    %174 = arith.addf %127, %173 : vector<128x128xf32>
    %c34 = arith.constant 34 : index
    %c0_136 = arith.constant 0 : index
    %175 = vector.load %arg6[%c34, %c0_136] : memref<1096x128xf32, #tpu.memory_space<vmem>>, vector<128x128xf32>
    %cst_137 = arith.constant 0.000000e+00 : f32
    %176 = vector.shape_cast %126 : vector<128x1xi1> to vector<128x1xi1>
    %177 = vector.broadcast %176 : vector<128x1xi1> to vector<128x128xi1>
    %178 = vector.broadcast %cst_137 : f32 to vector<128x128xf32>
    %179 = arith.select %177, %175, %178 : vector<128x128xi1>, vector<128x128xf32>
    %180 = arith.truncf %179 : vector<128x128xf32> to vector<128x128xbf16>
    %c2_138 = arith.constant 2 : index
    %c0_139 = arith.constant 0 : index
    %c0_140 = arith.constant 0 : index
    %181 = vector.load %arg2[%c2_138, %c0_139, %c0_140] : memref<16x128x128xbf16, #tpu.memory_space<vmem>>, vector<1x128x128xbf16>
    %182 = vector.shape_cast %181 : vector<1x128x128xbf16> to vector<128x128xbf16>
    %cst_141 = arith.constant dense<0.000000e+00> : vector<128x128xf32>
    %183 = tpu.matmul %180, %182, %cst_141 {dimension_numbers = #tpu.dot_dimension_numbers<[1], [0], [0], [1], [0, 0, 1, 1], [], []>} : vector<128x128xbf16>, vector<128x128xbf16>, vector<128x128xf32> -> vector<128x128xf32>
    %184 = arith.addf %174, %183 : vector<128x128xf32>
    %185 = vector.broadcast %102 : vector<1x128xf32> to vector<128x128xf32>
    %186 = arith.mulf %184, %185 : vector<128x128xf32>
    %187 = vector.broadcast %103 : vector<1x128xf32> to vector<128x128xf32>
    %188 = arith.addf %186, %187 : vector<128x128xf32>
    %cst_142 = arith.constant 0.000000e+00 : f32
    %189 = vector.broadcast %cst_142 : f32 to vector<128x128xf32>
    %190 = arith.cmpf oge, %188, %189 : vector<128x128xf32>
    %cst_143 = arith.constant 1.000000e-03 : f32
    %191 = vector.broadcast %cst_143 : f32 to vector<128x128xf32>
    %192 = arith.mulf %191, %188 : vector<128x128xf32>
    %193 = arith.select %190, %188, %192 : vector<128x128xi1>, vector<128x128xf32>
    %c0_144 = arith.constant 0 : index
    %c0_145 = arith.constant 0 : index
    %194 = vector.load %arg7[%c0_144, %c0_145] : memref<1024x128xf32, #tpu.memory_space<vmem>>, vector<128x128xf32>
    tpu.vector_store %arg7[%c0_144, %c0_145], %193 {strides = array<i32>} : memref<1024x128xf32, #tpu.memory_space<vmem>>, vector<128x128xf32>,
    %195 = tpu.iota {dimensions = array<i32: 0>} : vector<128x1xi32>
    %c128_i32 = arith.constant 128 : i32
    %196 = vector.broadcast %c128_i32 : i32 to vector<128x1xi32>
    %197 = arith.addi %195, %196 : vector<128x1xi32>
    %c16_i32_146 = arith.constant 16 : i32
    %c0_i32_147 = arith.constant 0 : i32
    %198 = arith.cmpi eq, %c16_i32_146, %c0_i32_147 : i32
    %c1_i32_148 = arith.constant 1 : i32
    %199 = arith.select %198, %c1_i32_148, %c16_i32_146 : i32
    %200 = vector.broadcast %199 : i32 to vector<128x1xi32>
    %201 = arith.remsi %197, %200 : vector<128x1xi32>
    %c0_i32_149 = arith.constant 0 : i32
    %202 = vector.broadcast %c0_i32_149 : i32 to vector<128x1xi32>
    %203 = arith.cmpi ne, %201, %202 : vector<128x1xi32>
    %c0_i32_150 = arith.constant 0 : i32
    %204 = vector.broadcast %c0_i32_150 : i32 to vector<128x1xi32>
    %205 = arith.cmpi slt, %201, %204 : vector<128x1xi32>
    %c0_i32_151 = arith.constant 0 : i32
    %206 = arith.cmpi slt, %199, %c0_i32_151 : i32
    %207 = vector.broadcast %206 : i1 to vector<128x1xi1>
    %208 = vector.broadcast %207 : vector<128x1xi1> to vector<128x1xi1>
    %209 = arith.xori %205, %208 : vector<128x1xi1>
    %210 = arith.andi %209, %203 : vector<128x1xi1>
    %211 = vector.broadcast %199 : i32 to vector<128x1xi32>
    %212 = arith.addi %201, %211 : vector<128x1xi32>
    %213 = arith.select %210, %212, %201 : vector<128x1xi1>, vector<128x1xi32>
    %c0_i32_152 = arith.constant 0 : i32
    %214 = vector.broadcast %c0_i32_152 : i32 to vector<128x1xi32>
    %215 = arith.cmpi sgt, %213, %214 : vector<128x1xi32>
    %c15_i32_153 = arith.constant 15 : i32
    %216 = vector.broadcast %c15_i32_153 : i32 to vector<128x1xi32>
    %217 = arith.cmpi slt, %213, %216 : vector<128x1xi32>
    %cst_154 = arith.constant 0.000000e+00 : f32
    %218 = vector.broadcast %cst_154 : f32 to vector<128x128xf32>
    %c128_155 = arith.constant 128 : index
    %c0_156 = arith.constant 0 : index
    %219 = vector.load %arg6[%c128_155, %c0_156] : memref<1096x128xf32, #tpu.memory_space<vmem>>, vector<128x128xf32>
    %cst_157 = arith.constant 0.000000e+00 : f32
    %220 = vector.shape_cast %215 : vector<128x1xi1> to vector<128x1xi1>
    %221 = vector.broadcast %220 : vector<128x1xi1> to vector<128x128xi1>
    %222 = vector.broadcast %cst_157 : f32 to vector<128x128xf32>
    %223 = arith.select %221, %219, %222 : vector<128x128xi1>, vector<128x128xf32>
    %c129 = arith.constant 129 : index
    %c0_158 = arith.constant 0 : index
    %224 = vector.load %arg6[%c129, %c0_158] : memref<1096x128xf32, #tpu.memory_space<vmem>>, vector<128x128xf32>
    %c16_i32_159 = arith.constant 16 : i32
    %225 = tpu.dynamic_rotate %224 by %c16_i32_159 dim 1 : vector<128x128xf32>, i32 -> vector<128x128xf32>
    %226 = arith.addf %223, %225 : vector<128x128xf32>
    %c130 = arith.constant 130 : index
    %c0_160 = arith.constant 0 : index
    %227 = vector.load %arg6[%c130, %c0_160] : memref<1096x128xf32, #tpu.memory_space<vmem>>, vector<128x128xf32>
    %cst_161 = arith.constant 0.000000e+00 : f32
    %228 = vector.shape_cast %217 : vector<128x1xi1> to vector<128x1xi1>
    %229 = vector.broadcast %228 : vector<128x1xi1> to vector<128x128xi1>
    %230 = vector.broadcast %cst_161 : f32 to vector<128x128xf32>
    %231 = arith.select %229, %227, %230 : vector<128x128xi1>, vector<128x128xf32>
    %c32_i32_162 = arith.constant 32 : i32
    %232 = tpu.dynamic_rotate %231 by %c32_i32_162 dim 1 : vector<128x128xf32>, i32 -> vector<128x128xf32>
    %233 = arith.addf %226, %232 : vector<128x128xf32>
    %c144 = arith.constant 144 : index
    %c0_163 = arith.constant 0 : index
    %234 = vector.load %arg6[%c144, %c0_163] : memref<1096x128xf32, #tpu.memory_space<vmem>>, vector<128x128xf32>
    %cst_164 = arith.constant 0.000000e+00 : f32
    %235 = vector.shape_cast %215 : vector<128x1xi1> to vector<128x1xi1>
    %236 = vector.broadcast %235 : vector<128x1xi1> to vector<128x128xi1>
    %237 = vector.broadcast %cst_164 : f32 to vector<128x128xf32>
    %238 = arith.select %236, %234, %237 : vector<128x128xi1>, vector<128x128xf32>
    %c48_i32_165 = arith.constant 48 : i32
    %239 = tpu.dynamic_rotate %238 by %c48_i32_165 dim 1 : vector<128x128xf32>, i32 -> vector<128x128xf32>
    %240 = arith.addf %233, %239 : vector<128x128xf32>
    %c145_166 = arith.constant 145 : index
    %c0_167 = arith.constant 0 : index
    %241 = vector.load %arg6[%c145_166, %c0_167] : memref<1096x128xf32, #tpu.memory_space<vmem>>, vector<128x128xf32>
    %c64_i32_168 = arith.constant 64 : i32
    %242 = tpu.dynamic_rotate %241 by %c64_i32_168 dim 1 : vector<128x128xf32>, i32 -> vector<128x128xf32>
    %243 = arith.addf %240, %242 : vector<128x128xf32>
    %c146 = arith.constant 146 : index
    %c0_169 = arith.constant 0 : index
    %244 = vector.load %arg6[%c146, %c0_169] : memref<1096x128xf32, #tpu.memory_space<vmem>>, vector<128x128xf32>
    %cst_170 = arith.constant 0.000000e+00 : f32
    %245 = vector.shape_cast %217 : vector<128x1xi1> to vector<128x1xi1>
    %246 = vector.broadcast %245 : vector<128x1xi1> to vector<128x128xi1>
    %247 = vector.broadcast %cst_170 : f32 to vector<128x128xf32>
    %248 = arith.select %246, %244, %247 : vector<128x128xi1>, vector<128x128xf32>
    %c80_i32_171 = arith.constant 80 : i32
    %249 = tpu.dynamic_rotate %248 by %c80_i32_171 dim 1 : vector<128x128xf32>, i32 -> vector<128x128xf32>
    %250 = arith.addf %243, %249 : vector<128x128xf32>
    %c160 = arith.constant 160 : index
    %c0_172 = arith.constant 0 : index
    %251 = vector.load %arg6[%c160, %c0_172] : memref<1096x128xf32, #tpu.memory_space<vmem>>, vector<128x128xf32>
    %cst_173 = arith.constant 0.000000e+00 : f32
    %252 = vector.shape_cast %215 : vector<128x1xi1> to vector<128x1xi1>
    %253 = vector.broadcast %252 : vector<128x1xi1> to vector<128x128xi1>
    %254 = vector.broadcast %cst_173 : f32 to vector<128x128xf32>
    %255 = arith.select %253, %251, %254 : vector<128x128xi1>, vector<128x128xf32>
    %c96_i32_174 = arith.constant 96 : i32
    %256 = tpu.dynamic_rotate %255 by %c96_i32_174 dim 1 : vector<128x128xf32>, i32 -> vector<128x128xf32>
    %257 = arith.addf %250, %256 : vector<128x128xf32>
    %c161 = arith.constant 161 : index
    %c0_175 = arith.constant 0 : index
    %258 = vector.load %arg6[%c161, %c0_175] : memref<1096x128xf32, #tpu.memory_space<vmem>>, vector<128x128xf32>
    %c112_i32_176 = arith.constant 112 : i32
    %259 = tpu.dynamic_rotate %258 by %c112_i32_176 dim 1 : vector<128x128xf32>, i32 -> vector<128x128xf32>
    %260 = arith.addf %257, %259 : vector<128x128xf32>
    %261 = arith.truncf %260 : vector<128x128xf32> to vector<128x128xbf16>
    %c1_177 = arith.constant 1 : index
    %c0_178 = arith.constant 0 : index
    %c0_179 = arith.constant 0 : index
    %262 = vector.load %arg2[%c1_177, %c0_178, %c0_179] : memref<16x128x128xbf16, #tpu.memory_space<vmem>>, vector<1x128x128xbf16>
    %263 = vector.shape_cast %262 : vector<1x128x128xbf16> to vector<128x128xbf16>
    %cst_180 = arith.constant dense<0.000000e+00> : vector<128x128xf32>
    %264 = tpu.matmul %261, %263, %cst_180 {dimension_numbers = #tpu.dot_dimension_numbers<[1], [0], [0], [1], [0, 0, 1, 1], [], []>} : vector<128x128xbf16>, vector<128x128xbf16>, vector<128x128xf32> -> vector<128x128xf32>
    %265 = arith.addf %218, %264 : vector<128x128xf32>
    %c162 = arith.constant 162 : index
    %c0_181 = arith.constant 0 : index
    %266 = vector.load %arg6[%c162, %c0_181] : memref<1096x128xf32, #tpu.memory_space<vmem>>, vector<128x128xf32>
    %cst_182 = arith.constant 0.000000e+00 : f32
    %267 = vector.shape_cast %217 : vector<128x1xi1> to vector<128x1xi1>
    %268 = vector.broadcast %267 : vector<128x1xi1> to vector<128x128xi1>
    %269 = vector.broadcast %cst_182 : f32 to vector<128x128xf32>
    %270 = arith.select %268, %266, %269 : vector<128x128xi1>, vector<128x128xf32>
    %271 = arith.truncf %270 : vector<128x128xf32> to vector<128x128xbf16>
    %c2_183 = arith.constant 2 : index
    %c0_184 = arith.constant 0 : index
    %c0_185 = arith.constant 0 : index
    %272 = vector.load %arg2[%c2_183, %c0_184, %c0_185] : memref<16x128x128xbf16, #tpu.memory_space<vmem>>, vector<1x128x128xbf16>
    %273 = vector.shape_cast %272 : vector<1x128x128xbf16> to vector<128x128xbf16>
    %cst_186 = arith.constant dense<0.000000e+00> : vector<128x128xf32>
    %274 = tpu.matmul %271, %273, %cst_186 {dimension_numbers = #tpu.dot_dimension_numbers<[1], [0], [0], [1], [0, 0, 1, 1], [], []>} : vector<128x128xbf16>, vector<128x128xbf16>, vector<128x128xf32> -> vector<128x128xf32>
    %275 = arith.addf %265, %274 : vector<128x128xf32>
    %276 = vector.broadcast %102 : vector<1x128xf32> to vector<128x128xf32>
    %277 = arith.mulf %275, %276 : vector<128x128xf32>
    %278 = vector.broadcast %103 : vector<1x128xf32> to vector<128x128xf32>
    %279 = arith.addf %277, %278 : vector<128x128xf32>
    %cst_187 = arith.constant 0.000000e+00 : f32
    %280 = vector.broadcast %cst_187 : f32 to vector<128x128xf32>
    %281 = arith.cmpf oge, %279, %280 : vector<128x128xf32>
    %cst_188 = arith.constant 1.000000e-03 : f32
    %282 = vector.broadcast %cst_188 : f32 to vector<128x128xf32>
    %283 = arith.mulf %282, %279 : vector<128x128xf32>
    %284 = arith.select %281, %279, %283 : vector<128x128xi1>, vector<128x128xf32>
    %c128_189 = arith.constant 128 : index
    %c0_190 = arith.constant 0 : index
    %285 = vector.load %arg7[%c128_189, %c0_190] : memref<1024x128xf32, #tpu.memory_space<vmem>>, vector<128x128xf32>
    tpu.vector_store %arg7[%c128_189, %c0_190], %284 {strides = array<i32>} : memref<1024x128xf32, #tpu.memory_space<vmem>>, vector<128x128xf32>,
    %cst_191 = arith.constant 0.000000e+00 : f32
    %286 = vector.broadcast %cst_191 : f32 to vector<9x128xf32>
    %c0_192 = arith.constant 0 : index
    %c0_193 = arith.constant 0 : index
    %287 = vector.load %arg6[%c0_192, %c0_193] : memref<1096x128xf32, #tpu.memory_space<vmem>>, vector<9x128xf32>
    tpu.vector_store %arg6[%c0_192, %c0_193], %286 {strides = array<i32>} : memref<1096x128xf32, #tpu.memory_space<vmem>>, vector<9x128xf32>,
    %cst_194 = arith.constant 0.000000e+00 : f32
    %288 = vector.broadcast %cst_194 : f32 to vector<9x128xf32>
    %c73 = arith.constant 73 : index
    %c0_195 = arith.constant 0 : index
    %289 = vector.load %arg6[%c73, %c0_195] : memref<1096x128xf32, #tpu.memory_space<vmem>>, vector<9x128xf32>
    tpu.vector_store %arg6[%c73, %c0_195], %288 {strides = array<i32>} : memref<1096x128xf32, #tpu.memory_space<vmem>>, vector<9x128xf32>,
    %c0_196 = arith.constant 0 : index
    %c0_197 = arith.constant 0 : index
    %290 = vector.load %arg7[%c0_196, %c0_197] : memref<1024x128xf32, #tpu.memory_space<vmem>>, vector<128x128xf32>
    %c127_i32_198 = arith.constant 127 : i32
    %291 = tpu.dynamic_rotate %290 by %c127_i32_198 dim 0 : vector<128x128xf32>, i32 -> vector<128x128xf32>
    %292 = arith.maximumf %290, %291 : vector<128x128xf32>
    %c112_i32_199 = arith.constant 112 : i32
    %293 = tpu.dynamic_rotate %292 by %c112_i32_199 dim 0 : vector<128x128xf32>, i32 -> vector<128x128xf32>
    %294 = arith.maximumf %292, %293 : vector<128x128xf32>
    %c0_200 = arith.constant 0 : index
    %c0_201 = arith.constant 0 : index
    %295 = vector.load %arg7[%c0_200, %c0_201] : memref<1024x128xf32, #tpu.memory_space<vmem>>, vector<128x128xf32>
    tpu.vector_store %arg7[%c0_200, %c0_201], %294 {strides = array<i32>} : memref<1024x128xf32, #tpu.memory_space<vmem>>, vector<128x128xf32>,
    %c0_202 = arith.constant 0 : index
    %c0_203 = arith.constant 0 : index
    %296 = tpu.strided_load %arg7[%c0_202, %c0_203] {strides = array<i32: 2, 1>} : memref<1024x128xf32, #tpu.memory_space<vmem>>, vector<8x128xf32>
    %c32_204 = arith.constant 32 : index
    %c0_205 = arith.constant 0 : index
    %297 = tpu.strided_load %arg7[%c32_204, %c0_205] {strides = array<i32: 2, 1>} : memref<1024x128xf32, #tpu.memory_space<vmem>>, vector<8x128xf32>
    %c64_206 = arith.constant 64 : index
    %c0_207 = arith.constant 0 : index
    %298 = tpu.strided_load %arg7[%c64_206, %c0_207] {strides = array<i32: 2, 1>} : memref<1024x128xf32, #tpu.memory_space<vmem>>, vector<8x128xf32>
    %c96 = arith.constant 96 : index
    %c0_208 = arith.constant 0 : index
    %299 = tpu.strided_load %arg7[%c96, %c0_208] {strides = array<i32: 2, 1>} : memref<1024x128xf32, #tpu.memory_space<vmem>>, vector<8x128xf32>
    %300 = tpu.concatenate %296, %297, %298, %299 in 0 : vector<8x128xf32>, vector<8x128xf32>, vector<8x128xf32>, vector<8x128xf32> -> vector<32x128xf32>
    %c9 = arith.constant 9 : index
    %c0_209 = arith.constant 0 : index
    %301 = vector.load %arg6[%c9, %c0_209] : memref<1096x128xf32, #tpu.memory_space<vmem>>, vector<32x128xf32>
    tpu.vector_store %arg6[%c9, %c0_209], %300 {strides = array<i32>} : memref<1096x128xf32, #tpu.memory_space<vmem>>, vector<32x128xf32>,
    %c128_210 = arith.constant 128 : index
    %c0_211 = arith.constant 0 : index
    %302 = vector.load %arg7[%c128_210, %c0_211] : memref<1024x128xf32, #tpu.memory_space<vmem>>, vector<128x128xf32>
    %c127_i32_212 = arith.constant 127 : i32
    %303 = tpu.dynamic_rotate %302 by %c127_i32_212 dim 0 : vector<128x128xf32>, i32 -> vector<128x128xf32>
    %304 = arith.maximumf %302, %303 : vector<128x128xf32>
    %c112_i32_213 = arith.constant 112 : i32
    %305 = tpu.dynamic_rotate %304 by %c112_i32_213 dim 0 : vector<128x128xf32>, i32 -> vector<128x128xf32>
    %306 = arith.maximumf %304, %305 : vector<128x128xf32>
    %c128_214 = arith.constant 128 : index
    %c0_215 = arith.constant 0 : index
    %307 = vector.load %arg7[%c128_214, %c0_215] : memref<1024x128xf32, #tpu.memory_space<vmem>>, vector<128x128xf32>
    tpu.vector_store %arg7[%c128_214, %c0_215], %306 {strides = array<i32>} : memref<1024x128xf32, #tpu.memory_space<vmem>>, vector<128x128xf32>,
    %c128_216 = arith.constant 128 : index
    %c0_217 = arith.constant 0 : index
    %308 = tpu.strided_load %arg7[%c128_216, %c0_217] {strides = array<i32: 2, 1>} : memref<1024x128xf32, #tpu.memory_space<vmem>>, vector<8x128xf32>
    %c160_218 = arith.constant 160 : index
    %c0_219 = arith.constant 0 : index
    %309 = tpu.strided_load %arg7[%c160_218, %c0_219] {strides = array<i32: 2, 1>} : memref<1024x128xf32, #tpu.memory_space<vmem>>, vector<8x128xf32>
    %c192_220 = arith.constant 192 : index
    %c0_221 = arith.constant 0 : index
    %310 = tpu.strided_load %arg7[%c192_220, %c0_221] {strides = array<i32: 2, 1>} : memref<1024x128xf32, #tpu.memory_space<vmem>>, vector<8x128xf32>
    %c224 = arith.constant 224 : index
    %c0_222 = arith.constant 0 : index
    %311 = tpu.strided_load %arg7[%c224, %c0_222] {strides = array<i32: 2, 1>} : memref<1024x128xf32, #tpu.memory_space<vmem>>, vector<8x128xf32>
    %312 = tpu.concatenate %308, %309, %310, %311 in 0 : vector<8x128xf32>, vector<8x128xf32>, vector<8x128xf32>, vector<8x128xf32> -> vector<32x128xf32>
    %c41 = arith.constant 41 : index
    %c0_223 = arith.constant 0 : index
    %313 = vector.load %arg6[%c41, %c0_223] : memref<1096x128xf32, #tpu.memory_space<vmem>>, vector<32x128xf32>
    tpu.vector_store %arg6[%c41, %c0_223], %312 {strides = array<i32>} : memref<1096x128xf32, #tpu.memory_space<vmem>>, vector<32x128xf32>,
    %c2_224 = arith.constant 2 : index
    %c0_225 = arith.constant 0 : index
    %314 = vector.load %arg3[%c2_224, %c0_225] : memref<5x128xf32, #tpu.memory_space<vmem>>, vector<1x128xf32>
    %c2_226 = arith.constant 2 : index
    %c0_227 = arith.constant 0 : index
    %315 = vector.load %arg4[%c2_226, %c0_227] : memref<5x128xf32, #tpu.memory_space<vmem>>, vector<1x128xf32>
    %316 = tpu.iota {dimensions = array<i32: 0>} : vector<64x1xi32>
    %c0_i32_228 = arith.constant 0 : i32
    %317 = vector.broadcast %c0_i32_228 : i32 to vector<64x1xi32>
    %318 = arith.addi %316, %317 : vector<64x1xi32>
    %c8_i32_229 = arith.constant 8 : i32
    %c0_i32_230 = arith.constant 0 : i32
    %319 = arith.cmpi eq, %c8_i32_229, %c0_i32_230 : i32
    %c1_i32_231 = arith.constant 1 : i32
    %320 = arith.select %319, %c1_i32_231, %c8_i32_229 : i32
    %321 = vector.broadcast %320 : i32 to vector<64x1xi32>
    %322 = arith.remsi %318, %321 : vector<64x1xi32>
    %c0_i32_232 = arith.constant 0 : i32
    %323 = vector.broadcast %c0_i32_232 : i32 to vector<64x1xi32>
    %324 = arith.cmpi ne, %322, %323 : vector<64x1xi32>
    %c0_i32_233 = arith.constant 0 : i32
    %325 = vector.broadcast %c0_i32_233 : i32 to vector<64x1xi32>
    %326 = arith.cmpi slt, %322, %325 : vector<64x1xi32>
    %c0_i32_234 = arith.constant 0 : i32
    %327 = arith.cmpi slt, %320, %c0_i32_234 : i32
    %328 = vector.broadcast %327 : i1 to vector<64x1xi1>
    %329 = vector.broadcast %328 : vector<64x1xi1> to vector<64x1xi1>
    %330 = arith.xori %326, %329 : vector<64x1xi1>
    %331 = arith.andi %330, %324 : vector<64x1xi1>
    %332 = vector.broadcast %320 : i32 to vector<64x1xi32>
    %333 = arith.addi %322, %332 : vector<64x1xi32>
    %334 = arith.select %331, %333, %322 : vector<64x1xi1>, vector<64x1xi32>
    %c0_i32_235 = arith.constant 0 : i32
    %335 = vector.broadcast %c0_i32_235 : i32 to vector<64x1xi32>
    %336 = arith.cmpi sgt, %334, %335 : vector<64x1xi32>
    %c7_i32 = arith.constant 7 : i32
    %337 = vector.broadcast %c7_i32 : i32 to vector<64x1xi32>
    %338 = arith.cmpi slt, %334, %337 : vector<64x1xi32>
    %cst_236 = arith.constant 0.000000e+00 : f32
    %339 = vector.broadcast %cst_236 : f32 to vector<64x128xf32>
    %c0_237 = arith.constant 0 : index
    %c0_238 = arith.constant 0 : index
    %340 = vector.load %arg6[%c0_237, %c0_238] : memref<1096x128xf32, #tpu.memory_space<vmem>>, vector<64x128xf32>
    %cst_239 = arith.constant 0.000000e+00 : f32
    %341 = vector.shape_cast %336 : vector<64x1xi1> to vector<64x1xi1>
    %342 = vector.broadcast %341 : vector<64x1xi1> to vector<64x128xi1>
    %343 = vector.broadcast %cst_239 : f32 to vector<64x128xf32>
    %344 = arith.select %342, %340, %343 : vector<64x128xi1>, vector<64x128xf32>
    %c1_240 = arith.constant 1 : index
    %c0_241 = arith.constant 0 : index
    %345 = vector.load %arg6[%c1_240, %c0_241] : memref<1096x128xf32, #tpu.memory_space<vmem>>, vector<64x128xf32>
    %c32_i32_242 = arith.constant 32 : i32
    %346 = tpu.dynamic_rotate %345 by %c32_i32_242 dim 1 : vector<64x128xf32>, i32 -> vector<64x128xf32>
    %347 = arith.addf %344, %346 : vector<64x128xf32>
    %c2_243 = arith.constant 2 : index
    %c0_244 = arith.constant 0 : index
    %348 = vector.load %arg6[%c2_243, %c0_244] : memref<1096x128xf32, #tpu.memory_space<vmem>>, vector<64x128xf32>
    %cst_245 = arith.constant 0.000000e+00 : f32
    %349 = vector.shape_cast %338 : vector<64x1xi1> to vector<64x1xi1>
    %350 = vector.broadcast %349 : vector<64x1xi1> to vector<64x128xi1>
    %351 = vector.broadcast %cst_245 : f32 to vector<64x128xf32>
    %352 = arith.select %350, %348, %351 : vector<64x128xi1>, vector<64x128xf32>
    %c64_i32_246 = arith.constant 64 : i32
    %353 = tpu.dynamic_rotate %352 by %c64_i32_246 dim 1 : vector<64x128xf32>, i32 -> vector<64x128xf32>
    %354 = arith.addf %347, %353 : vector<64x128xf32>
    %c8 = arith.constant 8 : index
    %c0_247 = arith.constant 0 : index
    %355 = vector.load %arg6[%c8, %c0_247] : memref<1096x128xf32, #tpu.memory_space<vmem>>, vector<64x128xf32>
    %cst_248 = arith.constant 0.000000e+00 : f32
    %356 = vector.shape_cast %336 : vector<64x1xi1> to vector<64x1xi1>
    %357 = vector.broadcast %356 : vector<64x1xi1> to vector<64x128xi1>
    %358 = vector.broadcast %cst_248 : f32 to vector<64x128xf32>
    %359 = arith.select %357, %355, %358 : vector<64x128xi1>, vector<64x128xf32>
    %c96_i32_249 = arith.constant 96 : i32
    %360 = tpu.dynamic_rotate %359 by %c96_i32_249 dim 1 : vector<64x128xf32>, i32 -> vector<64x128xf32>
    %361 = arith.addf %354, %360 : vector<64x128xf32>
    %362 = arith.truncf %361 : vector<64x128xf32> to vector<64x128xbf16>
    %c3 = arith.constant 3 : index
    %c0_250 = arith.constant 0 : index
    %c0_251 = arith.constant 0 : index
    %363 = vector.load %arg2[%c3, %c0_250, %c0_251] : memref<16x128x128xbf16, #tpu.memory_space<vmem>>, vector<1x128x128xbf16>
    %364 = vector.shape_cast %363 : vector<1x128x128xbf16> to vector<128x128xbf16>
    %cst_252 = arith.constant dense<0.000000e+00> : vector<64x128xf32>
    %365 = tpu.matmul %362, %364, %cst_252 {dimension_numbers = #tpu.dot_dimension_numbers<[1], [0], [0], [1], [0, 0, 1, 1], [], []>} : vector<64x128xbf16>, vector<128x128xbf16>, vector<64x128xf32> -> vector<64x128xf32>
    %366 = arith.addf %339, %365 : vector<64x128xf32>
    %c9_253 = arith.constant 9 : index
    %c0_254 = arith.constant 0 : index
    %367 = vector.load %arg6[%c9_253, %c0_254] : memref<1096x128xf32, #tpu.memory_space<vmem>>, vector<64x128xf32>
    %c10 = arith.constant 10 : index
    %c0_255 = arith.constant 0 : index
    %368 = vector.load %arg6[%c10, %c0_255] : memref<1096x128xf32, #tpu.memory_space<vmem>>, vector<64x128xf32>
    %cst_256 = arith.constant 0.000000e+00 : f32
    %369 = vector.shape_cast %338 : vector<64x1xi1> to vector<64x1xi1>
    %370 = vector.broadcast %369 : vector<64x1xi1> to vector<64x128xi1>
    %371 = vector.broadcast %cst_256 : f32 to vector<64x128xf32>
    %372 = arith.select %370, %368, %371 : vector<64x128xi1>, vector<64x128xf32>
    %c32_i32_257 = arith.constant 32 : i32
    %373 = tpu.dynamic_rotate %372 by %c32_i32_257 dim 1 : vector<64x128xf32>, i32 -> vector<64x128xf32>
    %374 = arith.addf %367, %373 : vector<64x128xf32>
    %c16_258 = arith.constant 16 : index
    %c0_259 = arith.constant 0 : index
    %375 = vector.load %arg6[%c16_258, %c0_259] : memref<1096x128xf32, #tpu.memory_space<vmem>>, vector<64x128xf32>
    %cst_260 = arith.constant 0.000000e+00 : f32
    %376 = vector.shape_cast %336 : vector<64x1xi1> to vector<64x1xi1>
    %377 = vector.broadcast %376 : vector<64x1xi1> to vector<64x128xi1>
    %378 = vector.broadcast %cst_260 : f32 to vector<64x128xf32>
    %379 = arith.select %377, %375, %378 : vector<64x128xi1>, vector<64x128xf32>
    %c64_i32_261 = arith.constant 64 : i32
    %380 = tpu.dynamic_rotate %379 by %c64_i32_261 dim 1 : vector<64x128xf32>, i32 -> vector<64x128xf32>
    %381 = arith.addf %374, %380 : vector<64x128xf32>
    %c17_262 = arith.constant 17 : index
    %c0_263 = arith.constant 0 : index
    %382 = vector.load %arg6[%c17_262, %c0_263] : memref<1096x128xf32, #tpu.memory_space<vmem>>, vector<64x128xf32>
    %c96_i32_264 = arith.constant 96 : i32
    %383 = tpu.dynamic_rotate %382 by %c96_i32_264 dim 1 : vector<64x128xf32>, i32 -> vector<64x128xf32>
    %384 = arith.addf %381, %383 : vector<64x128xf32>
    %385 = arith.truncf %384 : vector<64x128xf32> to vector<64x128xbf16>
    %c4 = arith.constant 4 : index
    %c0_265 = arith.constant 0 : index
    %c0_266 = arith.constant 0 : index
    %386 = vector.load %arg2[%c4, %c0_265, %c0_266] : memref<16x128x128xbf16, #tpu.memory_space<vmem>>, vector<1x128x128xbf16>
    %387 = vector.shape_cast %386 : vector<1x128x128xbf16> to vector<128x128xbf16>
    %cst_267 = arith.constant dense<0.000000e+00> : vector<64x128xf32>
    %388 = tpu.matmul %385, %387, %cst_267 {dimension_numbers = #tpu.dot_dimension_numbers<[1], [0], [0], [1], [0, 0, 1, 1], [], []>} : vector<64x128xbf16>, vector<128x128xbf16>, vector<64x128xf32> -> vector<64x128xf32>
    %389 = arith.addf %366, %388 : vector<64x128xf32>
    %c18_268 = arith.constant 18 : index
    %c0_269 = arith.constant 0 : index
    %390 = vector.load %arg6[%c18_268, %c0_269] : memref<1096x128xf32, #tpu.memory_space<vmem>>, vector<64x128xf32>
    %cst_270 = arith.constant 0.000000e+00 : f32
    %391 = vector.shape_cast %338 : vector<64x1xi1> to vector<64x1xi1>
    %392 = vector.broadcast %391 : vector<64x1xi1> to vector<64x128xi1>
    %393 = vector.broadcast %cst_270 : f32 to vector<64x128xf32>
    %394 = arith.select %392, %390, %393 : vector<64x128xi1>, vector<64x128xf32>
    %395 = arith.truncf %394 : vector<64x128xf32> to vector<64x128xbf16>
    %c5 = arith.constant 5 : index
    %c0_271 = arith.constant 0 : index
    %c0_272 = arith.constant 0 : index
    %396 = vector.load %arg2[%c5, %c0_271, %c0_272] : memref<16x128x128xbf16, #tpu.memory_space<vmem>>, vector<1x128x128xbf16>
    %397 = vector.shape_cast %396 : vector<1x128x128xbf16> to vector<128x128xbf16>
    %cst_273 = arith.constant dense<0.000000e+00> : vector<64x128xf32>
    %398 = tpu.matmul %395, %397, %cst_273 {dimension_numbers = #tpu.dot_dimension_numbers<[1], [0], [0], [1], [0, 0, 1, 1], [], []>} : vector<64x128xbf16>, vector<128x128xbf16>, vector<64x128xf32> -> vector<64x128xf32>
    %399 = arith.addf %389, %398 : vector<64x128xf32>
    %400 = vector.broadcast %314 : vector<1x128xf32> to vector<64x128xf32>
    %401 = arith.mulf %399, %400 : vector<64x128xf32>
    %402 = vector.broadcast %315 : vector<1x128xf32> to vector<64x128xf32>
    %403 = arith.addf %401, %402 : vector<64x128xf32>
    %cst_274 = arith.constant 0.000000e+00 : f32
    %404 = vector.broadcast %cst_274 : f32 to vector<64x128xf32>
    %405 = arith.cmpf oge, %403, %404 : vector<64x128xf32>
    %cst_275 = arith.constant 1.000000e-03 : f32
    %406 = vector.broadcast %cst_275 : f32 to vector<64x128xf32>
    %407 = arith.mulf %406, %403 : vector<64x128xf32>
    %408 = arith.select %405, %403, %407 : vector<64x128xi1>, vector<64x128xf32>
    %c0_276 = arith.constant 0 : index
    %c0_277 = arith.constant 0 : index
    %409 = vector.load %arg7[%c0_276, %c0_277] : memref<1024x128xf32, #tpu.memory_space<vmem>>, vector<64x128xf32>
    tpu.vector_store %arg7[%c0_276, %c0_277], %408 {strides = array<i32>} : memref<1024x128xf32, #tpu.memory_space<vmem>>, vector<64x128xf32>,
    %cst_278 = arith.constant 0.000000e+00 : f32
    %410 = vector.broadcast %cst_278 : f32 to vector<5x128xf32>
    %c0_279 = arith.constant 0 : index
    %c0_280 = arith.constant 0 : index
    %411 = vector.load %arg6[%c0_279, %c0_280] : memref<1096x128xf32, #tpu.memory_space<vmem>>, vector<5x128xf32>
    tpu.vector_store %arg6[%c0_279, %c0_280], %410 {strides = array<i32>} : memref<1096x128xf32, #tpu.memory_space<vmem>>, vector<5x128xf32>,
    %cst_281 = arith.constant 0.000000e+00 : f32
    %412 = vector.broadcast %cst_281 : f32 to vector<5x128xf32>
    %c21 = arith.constant 21 : index
    %c0_282 = arith.constant 0 : index
    %413 = vector.load %arg6[%c21, %c0_282] : memref<1096x128xf32, #tpu.memory_space<vmem>>, vector<5x128xf32>
    tpu.vector_store %arg6[%c21, %c0_282], %412 {strides = array<i32>} : memref<1096x128xf32, #tpu.memory_space<vmem>>, vector<5x128xf32>,
    %c0_283 = arith.constant 0 : index
    %c0_284 = arith.constant 0 : index
    %414 = vector.load %arg7[%c0_283, %c0_284] : memref<1024x128xf32, #tpu.memory_space<vmem>>, vector<64x128xf32>
    %c63_i32 = arith.constant 63 : i32
    %415 = tpu.dynamic_rotate %414 by %c63_i32 dim 0 : vector<64x128xf32>, i32 -> vector<64x128xf32>
    %416 = arith.maximumf %414, %415 : vector<64x128xf32>
    %c56_i32 = arith.constant 56 : i32
    %417 = tpu.dynamic_rotate %416 by %c56_i32 dim 0 : vector<64x128xf32>, i32 -> vector<64x128xf32>
    %418 = arith.maximumf %416, %417 : vector<64x128xf32>
    %c0_285 = arith.constant 0 : index
    %c0_286 = arith.constant 0 : index
    %419 = vector.load %arg7[%c0_285, %c0_286] : memref<1024x128xf32, #tpu.memory_space<vmem>>, vector<64x128xf32>
    tpu.vector_store %arg7[%c0_285, %c0_286], %418 {strides = array<i32>} : memref<1024x128xf32, #tpu.memory_space<vmem>>, vector<64x128xf32>,
    %c0_287 = arith.constant 0 : index
    %c0_288 = arith.constant 0 : index
    %420 = tpu.strided_load %arg7[%c0_287, %c0_288] {strides = array<i32: 2, 1>} : memref<1024x128xf32, #tpu.memory_space<vmem>>, vector<4x128xf32>
    %c16_289 = arith.constant 16 : index
    %c0_290 = arith.constant 0 : index
    %421 = tpu.strided_load %arg7[%c16_289, %c0_290] {strides = array<i32: 2, 1>} : memref<1024x128xf32, #tpu.memory_space<vmem>>, vector<4x128xf32>
    %c32_291 = arith.constant 32 : index
    %c0_292 = arith.constant 0 : index
    %422 = tpu.strided_load %arg7[%c32_291, %c0_292] {strides = array<i32: 2, 1>} : memref<1024x128xf32, #tpu.memory_space<vmem>>, vector<4x128xf32>
    %c48 = arith.constant 48 : index
    %c0_293 = arith.constant 0 : index
    %423 = tpu.strided_load %arg7[%c48, %c0_293] {strides = array<i32: 2, 1>} : memref<1024x128xf32, #tpu.memory_space<vmem>>, vector<4x128xf32>
    %424 = tpu.concatenate %420, %421, %422, %423 in 0 : vector<4x128xf32>, vector<4x128xf32>, vector<4x128xf32>, vector<4x128xf32> -> vector<16x128xf32>
    %c5_294 = arith.constant 5 : index
    %c0_295 = arith.constant 0 : index
    %425 = vector.load %arg6[%c5_294, %c0_295] : memref<1096x128xf32, #tpu.memory_space<vmem>>, vector<16x128xf32>
    tpu.vector_store %arg6[%c5_294, %c0_295], %424 {strides = array<i32>} : memref<1096x128xf32, #tpu.memory_space<vmem>>, vector<16x128xf32>,
    %c3_296 = arith.constant 3 : index
    %c0_297 = arith.constant 0 : index
    %426 = vector.load %arg3[%c3_296, %c0_297] : memref<5x128xf32, #tpu.memory_space<vmem>>, vector<1x128xf32>
    %c3_298 = arith.constant 3 : index
    %c0_299 = arith.constant 0 : index
    %427 = vector.load %arg4[%c3_298, %c0_299] : memref<5x128xf32, #tpu.memory_space<vmem>>, vector<1x128xf32>
    %cst_300 = arith.constant 0.000000e+00 : f32
    %428 = vector.broadcast %cst_300 : f32 to vector<5x128xf32>
    %c32_301 = arith.constant 32 : index
    %c0_302 = arith.constant 0 : index
    %429 = vector.load %arg6[%c32_301, %c0_302] : memref<1096x128xf32, #tpu.memory_space<vmem>>, vector<5x128xf32>
    tpu.vector_store %arg6[%c32_301, %c0_302], %428 {strides = array<i32>} : memref<1096x128xf32, #tpu.memory_space<vmem>>, vector<5x128xf32>,
    %cst_303 = arith.constant 0.000000e+00 : f32
    %430 = vector.broadcast %cst_303 : f32 to vector<5x128xf32>
    %c53 = arith.constant 53 : index
    %c0_304 = arith.constant 0 : index
    %431 = vector.load %arg6[%c53, %c0_304] : memref<1096x128xf32, #tpu.memory_space<vmem>>, vector<5x128xf32>
    tpu.vector_store %arg6[%c53, %c0_304], %430 {strides = array<i32>} : memref<1096x128xf32, #tpu.memory_space<vmem>>, vector<5x128xf32>,
    %432 = tpu.iota {dimensions = array<i32: 0>} : vector<16x1xi32>
    %c0_i32_305 = arith.constant 0 : i32
    %433 = vector.broadcast %c0_i32_305 : i32 to vector<16x1xi32>
    %434 = arith.addi %432, %433 : vector<16x1xi32>
    %c4_i32 = arith.constant 4 : i32
    %c0_i32_306 = arith.constant 0 : i32
    %435 = arith.cmpi eq, %c4_i32, %c0_i32_306 : i32
    %c1_i32_307 = arith.constant 1 : i32
    %436 = arith.select %435, %c1_i32_307, %c4_i32 : i32
    %437 = vector.broadcast %436 : i32 to vector<16x1xi32>
    %438 = arith.remsi %434, %437 : vector<16x1xi32>
    %c0_i32_308 = arith.constant 0 : i32
    %439 = vector.broadcast %c0_i32_308 : i32 to vector<16x1xi32>
    %440 = arith.cmpi ne, %438, %439 : vector<16x1xi32>
    %c0_i32_309 = arith.constant 0 : i32
    %441 = vector.broadcast %c0_i32_309 : i32 to vector<16x1xi32>
    %442 = arith.cmpi slt, %438, %441 : vector<16x1xi32>
    %c0_i32_310 = arith.constant 0 : i32
    %443 = arith.cmpi slt, %436, %c0_i32_310 : i32
    %444 = vector.broadcast %443 : i1 to vector<16x1xi1>
    %445 = vector.broadcast %444 : vector<16x1xi1> to vector<16x1xi1>
    %446 = arith.xori %442, %445 : vector<16x1xi1>
    %447 = arith.andi %446, %440 : vector<16x1xi1>
    %448 = vector.broadcast %436 : i32 to vector<16x1xi32>
    %449 = arith.addi %438, %448 : vector<16x1xi32>
    %450 = arith.select %447, %449, %438 : vector<16x1xi1>, vector<16x1xi32>
    %c0_i32_311 = arith.constant 0 : i32
    %451 = vector.broadcast %c0_i32_311 : i32 to vector<16x1xi32>
    %452 = arith.cmpi sgt, %450, %451 : vector<16x1xi32>
    %c3_i32 = arith.constant 3 : i32
    %453 = vector.broadcast %c3_i32 : i32 to vector<16x1xi32>
    %454 = arith.cmpi slt, %450, %453 : vector<16x1xi32>
    %cst_312 = arith.constant 0.000000e+00 : f32
    %455 = vector.broadcast %cst_312 : f32 to vector<16x128xf32>
    %c0_313 = arith.constant 0 : index
    %c0_314 = arith.constant 0 : index
    %456 = vector.load %arg6[%c0_313, %c0_314] : memref<1096x128xf32, #tpu.memory_space<vmem>>, vector<16x128xf32>
    %cst_315 = arith.constant 0.000000e+00 : f32
    %457 = vector.shape_cast %452 : vector<16x1xi1> to vector<16x1xi1>
    %458 = vector.broadcast %457 : vector<16x1xi1> to vector<16x128xi1>
    %459 = vector.broadcast %cst_315 : f32 to vector<16x128xf32>
    %460 = arith.select %458, %456, %459 : vector<16x128xi1>, vector<16x128xf32>
    %c1_316 = arith.constant 1 : index
    %c0_317 = arith.constant 0 : index
    %461 = vector.load %arg6[%c1_316, %c0_317] : memref<1096x128xf32, #tpu.memory_space<vmem>>, vector<16x128xf32>
    %c48_i32_318 = arith.constant 48 : i32
    %462 = tpu.dynamic_rotate %461 by %c48_i32_318 dim 1 : vector<16x128xf32>, i32 -> vector<16x128xf32>
    %463 = arith.addf %460, %462 : vector<16x128xf32>
    %464 = arith.truncf %463 : vector<16x128xf32> to vector<16x128xbf16>
    %c6 = arith.constant 6 : index
    %c0_319 = arith.constant 0 : index
    %c0_320 = arith.constant 0 : index
    %465 = vector.load %arg2[%c6, %c0_319, %c0_320] : memref<16x128x128xbf16, #tpu.memory_space<vmem>>, vector<1x128x128xbf16>
    %466 = vector.shape_cast %465 : vector<1x128x128xbf16> to vector<128x128xbf16>
    %cst_321 = arith.constant dense<0.000000e+00> : vector<16x128xf32>
    %467 = tpu.matmul %464, %466, %cst_321 {dimension_numbers = #tpu.dot_dimension_numbers<[1], [0], [0], [1], [0, 0, 1, 1], [], []>} : vector<16x128xbf16>, vector<128x128xbf16>, vector<16x128xf32> -> vector<16x128xf32>
    %468 = arith.addf %455, %467 : vector<16x128xf32>
    %c2_322 = arith.constant 2 : index
    %c0_323 = arith.constant 0 : index
    %469 = vector.load %arg6[%c2_322, %c0_323] : memref<1096x128xf32, #tpu.memory_space<vmem>>, vector<16x128xf32>
    %cst_324 = arith.constant 0.000000e+00 : f32
    %470 = vector.shape_cast %454 : vector<16x1xi1> to vector<16x1xi1>
    %471 = vector.broadcast %470 : vector<16x1xi1> to vector<16x128xi1>
    %472 = vector.broadcast %cst_324 : f32 to vector<16x128xf32>
    %473 = arith.select %471, %469, %472 : vector<16x128xi1>, vector<16x128xf32>
    %c4_325 = arith.constant 4 : index
    %c0_326 = arith.constant 0 : index
    %474 = vector.load %arg6[%c4_325, %c0_326] : memref<1096x128xf32, #tpu.memory_space<vmem>>, vector<16x128xf32>
    %cst_327 = arith.constant 0.000000e+00 : f32
    %475 = vector.shape_cast %452 : vector<16x1xi1> to vector<16x1xi1>
    %476 = vector.broadcast %475 : vector<16x1xi1> to vector<16x128xi1>
    %477 = vector.broadcast %cst_327 : f32 to vector<16x128xf32>
    %478 = arith.select %476, %474, %477 : vector<16x128xi1>, vector<16x128xf32>
    %c48_i32_328 = arith.constant 48 : i32
    %479 = tpu.dynamic_rotate %478 by %c48_i32_328 dim 1 : vector<16x128xf32>, i32 -> vector<16x128xf32>
    %480 = arith.addf %473, %479 : vector<16x128xf32>
    %481 = arith.truncf %480 : vector<16x128xf32> to vector<16x128xbf16>
    %c7 = arith.constant 7 : index
    %c0_329 = arith.constant 0 : index
    %c0_330 = arith.constant 0 : index
    %482 = vector.load %arg2[%c7, %c0_329, %c0_330] : memref<16x128x128xbf16, #tpu.memory_space<vmem>>, vector<1x128x128xbf16>
    %483 = vector.shape_cast %482 : vector<1x128x128xbf16> to vector<128x128xbf16>
    %cst_331 = arith.constant dense<0.000000e+00> : vector<16x128xf32>
    %484 = tpu.matmul %481, %483, %cst_331 {dimension_numbers = #tpu.dot_dimension_numbers<[1], [0], [0], [1], [0, 0, 1, 1], [], []>} : vector<16x128xbf16>, vector<128x128xbf16>, vector<16x128xf32> -> vector<16x128xf32>
    %485 = arith.addf %468, %484 : vector<16x128xf32>
    %c5_332 = arith.constant 5 : index
    %c0_333 = arith.constant 0 : index
    %486 = vector.load %arg6[%c5_332, %c0_333] : memref<1096x128xf32, #tpu.memory_space<vmem>>, vector<16x128xf32>
    %c6_334 = arith.constant 6 : index
    %c0_335 = arith.constant 0 : index
    %487 = vector.load %arg6[%c6_334, %c0_335] : memref<1096x128xf32, #tpu.memory_space<vmem>>, vector<16x128xf32>
    %cst_336 = arith.constant 0.000000e+00 : f32
    %488 = vector.shape_cast %454 : vector<16x1xi1> to vector<16x1xi1>
    %489 = vector.broadcast %488 : vector<16x1xi1> to vector<16x128xi1>
    %490 = vector.broadcast %cst_336 : f32 to vector<16x128xf32>
    %491 = arith.select %489, %487, %490 : vector<16x128xi1>, vector<16x128xf32>
    %c48_i32_337 = arith.constant 48 : i32
    %492 = tpu.dynamic_rotate %491 by %c48_i32_337 dim 1 : vector<16x128xf32>, i32 -> vector<16x128xf32>
    %493 = arith.addf %486, %492 : vector<16x128xf32>
    %494 = arith.truncf %493 : vector<16x128xf32> to vector<16x128xbf16>
    %c8_338 = arith.constant 8 : index
    %c0_339 = arith.constant 0 : index
    %c0_340 = arith.constant 0 : index
    %495 = vector.load %arg2[%c8_338, %c0_339, %c0_340] : memref<16x128x128xbf16, #tpu.memory_space<vmem>>, vector<1x128x128xbf16>
    %496 = vector.shape_cast %495 : vector<1x128x128xbf16> to vector<128x128xbf16>
    %cst_341 = arith.constant dense<0.000000e+00> : vector<16x128xf32>
    %497 = tpu.matmul %494, %496, %cst_341 {dimension_numbers = #tpu.dot_dimension_numbers<[1], [0], [0], [1], [0, 0, 1, 1], [], []>} : vector<16x128xbf16>, vector<128x128xbf16>, vector<16x128xf32> -> vector<16x128xf32>
    %498 = arith.addf %485, %497 : vector<16x128xf32>
    %c8_342 = arith.constant 8 : index
    %c0_343 = arith.constant 0 : index
    %499 = vector.load %arg6[%c8_342, %c0_343] : memref<1096x128xf32, #tpu.memory_space<vmem>>, vector<16x128xf32>
    %cst_344 = arith.constant 0.000000e+00 : f32
    %500 = vector.shape_cast %452 : vector<16x1xi1> to vector<16x1xi1>
    %501 = vector.broadcast %500 : vector<16x1xi1> to vector<16x128xi1>
    %502 = vector.broadcast %cst_344 : f32 to vector<16x128xf32>
    %503 = arith.select %501, %499, %502 : vector<16x128xi1>, vector<16x128xf32>
    %c9_345 = arith.constant 9 : index
    %c0_346 = arith.constant 0 : index
    %504 = vector.load %arg6[%c9_345, %c0_346] : memref<1096x128xf32, #tpu.memory_space<vmem>>, vector<16x128xf32>
    %c48_i32_347 = arith.constant 48 : i32
    %505 = tpu.dynamic_rotate %504 by %c48_i32_347 dim 1 : vector<16x128xf32>, i32 -> vector<16x128xf32>
    %506 = arith.addf %503, %505 : vector<16x128xf32>
    %507 = arith.truncf %506 : vector<16x128xf32> to vector<16x128xbf16>
    %c9_348 = arith.constant 9 : index
    %c0_349 = arith.constant 0 : index
    %c0_350 = arith.constant 0 : index
    %508 = vector.load %arg2[%c9_348, %c0_349, %c0_350] : memref<16x128x128xbf16, #tpu.memory_space<vmem>>, vector<1x128x128xbf16>
    %509 = vector.shape_cast %508 : vector<1x128x128xbf16> to vector<128x128xbf16>
    %cst_351 = arith.constant dense<0.000000e+00> : vector<16x128xf32>
    %510 = tpu.matmul %507, %509, %cst_351 {dimension_numbers = #tpu.dot_dimension_numbers<[1], [0], [0], [1], [0, 0, 1, 1], [], []>} : vector<16x128xbf16>, vector<128x128xbf16>, vector<16x128xf32> -> vector<16x128xf32>
    %511 = arith.addf %498, %510 : vector<16x128xf32>
    %c10_352 = arith.constant 10 : index
    %c0_353 = arith.constant 0 : index
    %512 = vector.load %arg6[%c10_352, %c0_353] : memref<1096x128xf32, #tpu.memory_space<vmem>>, vector<16x128xf32>
    %cst_354 = arith.constant 0.000000e+00 : f32
    %513 = vector.shape_cast %454 : vector<16x1xi1> to vector<16x1xi1>
    %514 = vector.broadcast %513 : vector<16x1xi1> to vector<16x128xi1>
    %515 = vector.broadcast %cst_354 : f32 to vector<16x128xf32>
    %516 = arith.select %514, %512, %515 : vector<16x128xi1>, vector<16x128xf32>
    %517 = arith.truncf %516 : vector<16x128xf32> to vector<16x128xbf16>
    %c10_355 = arith.constant 10 : index
    %c0_356 = arith.constant 0 : index
    %c0_357 = arith.constant 0 : index
    %518 = vector.load %arg2[%c10_355, %c0_356, %c0_357] : memref<16x128x128xbf16, #tpu.memory_space<vmem>>, vector<1x128x128xbf16>
    %519 = vector.shape_cast %518 : vector<1x128x128xbf16> to vector<128x128xbf16>
    %cst_358 = arith.constant dense<0.000000e+00> : vector<16x128xf32>
    %520 = tpu.matmul %517, %519, %cst_358 {dimension_numbers = #tpu.dot_dimension_numbers<[1], [0], [0], [1], [0, 0, 1, 1], [], []>} : vector<16x128xbf16>, vector<128x128xbf16>, vector<16x128xf32> -> vector<16x128xf32>
    %521 = arith.addf %511, %520 : vector<16x128xf32>
    %522 = vector.broadcast %426 : vector<1x128xf32> to vector<16x128xf32>
    %523 = arith.mulf %521, %522 : vector<16x128xf32>
    %524 = vector.broadcast %427 : vector<1x128xf32> to vector<16x128xf32>
    %525 = arith.addf %523, %524 : vector<16x128xf32>
    %cst_359 = arith.constant 0.000000e+00 : f32
    %526 = vector.broadcast %cst_359 : f32 to vector<16x128xf32>
    %527 = arith.cmpf oge, %525, %526 : vector<16x128xf32>
    %cst_360 = arith.constant 1.000000e-03 : f32
    %528 = vector.broadcast %cst_360 : f32 to vector<16x128xf32>
    %529 = arith.mulf %528, %525 : vector<16x128xf32>
    %530 = arith.select %527, %525, %529 : vector<16x128xi1>, vector<16x128xf32>
    %c37 = arith.constant 37 : index
    %c0_361 = arith.constant 0 : index
    %531 = vector.load %arg6[%c37, %c0_361] : memref<1096x128xf32, #tpu.memory_space<vmem>>, vector<16x128xf32>
    tpu.vector_store %arg6[%c37, %c0_361], %530 {strides = array<i32>} : memref<1096x128xf32, #tpu.memory_space<vmem>>, vector<16x128xf32>,
    %c4_362 = arith.constant 4 : index
    %c0_363 = arith.constant 0 : index
    %532 = vector.load %arg3[%c4_362, %c0_363] : memref<5x128xf32, #tpu.memory_space<vmem>>, vector<1x128xf32>
    %c4_364 = arith.constant 4 : index
    %c0_365 = arith.constant 0 : index
    %533 = vector.load %arg4[%c4_364, %c0_365] : memref<5x128xf32, #tpu.memory_space<vmem>>, vector<1x128xf32>
    %534 = tpu.iota {dimensions = array<i32: 0>} : vector<16x1xi32>
    %c0_i32_366 = arith.constant 0 : i32
    %535 = vector.broadcast %c0_i32_366 : i32 to vector<16x1xi32>
    %536 = arith.addi %534, %535 : vector<16x1xi32>
    %c4_i32_367 = arith.constant 4 : i32
    %c0_i32_368 = arith.constant 0 : i32
    %537 = arith.cmpi eq, %c4_i32_367, %c0_i32_368 : i32
    %c1_i32_369 = arith.constant 1 : i32
    %538 = arith.select %537, %c1_i32_369, %c4_i32_367 : i32
    %539 = vector.broadcast %538 : i32 to vector<16x1xi32>
    %540 = arith.remsi %536, %539 : vector<16x1xi32>
    %c0_i32_370 = arith.constant 0 : i32
    %541 = vector.broadcast %c0_i32_370 : i32 to vector<16x1xi32>
    %542 = arith.cmpi ne, %540, %541 : vector<16x1xi32>
    %c0_i32_371 = arith.constant 0 : i32
    %543 = vector.broadcast %c0_i32_371 : i32 to vector<16x1xi32>
    %544 = arith.cmpi slt, %540, %543 : vector<16x1xi32>
    %c0_i32_372 = arith.constant 0 : i32
    %545 = arith.cmpi slt, %538, %c0_i32_372 : i32
    %546 = vector.broadcast %545 : i1 to vector<16x1xi1>
    %547 = vector.broadcast %546 : vector<16x1xi1> to vector<16x1xi1>
    %548 = arith.xori %544, %547 : vector<16x1xi1>
    %549 = arith.andi %548, %542 : vector<16x1xi1>
    %550 = vector.broadcast %538 : i32 to vector<16x1xi32>
    %551 = arith.addi %540, %550 : vector<16x1xi32>
    %552 = arith.select %549, %551, %540 : vector<16x1xi1>, vector<16x1xi32>
    %c0_i32_373 = arith.constant 0 : i32
    %553 = vector.broadcast %c0_i32_373 : i32 to vector<16x1xi32>
    %554 = arith.cmpi sgt, %552, %553 : vector<16x1xi32>
    %c3_i32_374 = arith.constant 3 : i32
    %555 = vector.broadcast %c3_i32_374 : i32 to vector<16x1xi32>
    %556 = arith.cmpi slt, %552, %555 : vector<16x1xi32>
    %cst_375 = arith.constant 0.000000e+00 : f32
    %557 = vector.broadcast %cst_375 : f32 to vector<16x128xf32>
    %c32_376 = arith.constant 32 : index
    %c0_377 = arith.constant 0 : index
    %558 = vector.load %arg6[%c32_376, %c0_377] : memref<1096x128xf32, #tpu.memory_space<vmem>>, vector<16x128xf32>
    %cst_378 = arith.constant 0.000000e+00 : f32
    %559 = vector.shape_cast %554 : vector<16x1xi1> to vector<16x1xi1>
    %560 = vector.broadcast %559 : vector<16x1xi1> to vector<16x128xi1>
    %561 = vector.broadcast %cst_378 : f32 to vector<16x128xf32>
    %562 = arith.select %560, %558, %561 : vector<16x128xi1>, vector<16x128xf32>
    %c33_379 = arith.constant 33 : index
    %c0_380 = arith.constant 0 : index
    %563 = vector.load %arg6[%c33_379, %c0_380] : memref<1096x128xf32, #tpu.memory_space<vmem>>, vector<16x128xf32>
    %c64_i32_381 = arith.constant 64 : i32
    %564 = tpu.dynamic_rotate %563 by %c64_i32_381 dim 1 : vector<16x128xf32>, i32 -> vector<16x128xf32>
    %565 = arith.addf %562, %564 : vector<16x128xf32>
    %566 = arith.truncf %565 : vector<16x128xf32> to vector<16x128xbf16>
    %c11 = arith.constant 11 : index
    %c0_382 = arith.constant 0 : index
    %c0_383 = arith.constant 0 : index
    %567 = vector.load %arg2[%c11, %c0_382, %c0_383] : memref<16x128x128xbf16, #tpu.memory_space<vmem>>, vector<1x128x128xbf16>
    %568 = vector.shape_cast %567 : vector<1x128x128xbf16> to vector<128x128xbf16>
    %cst_384 = arith.constant dense<0.000000e+00> : vector<16x128xf32>
    %569 = tpu.matmul %566, %568, %cst_384 {dimension_numbers = #tpu.dot_dimension_numbers<[1], [0], [0], [1], [0, 0, 1, 1], [], []>} : vector<16x128xbf16>, vector<128x128xbf16>, vector<16x128xf32> -> vector<16x128xf32>
    %570 = arith.addf %557, %569 : vector<16x128xf32>
    %c34_385 = arith.constant 34 : index
    %c0_386 = arith.constant 0 : index
    %571 = vector.load %arg6[%c34_385, %c0_386] : memref<1096x128xf32, #tpu.memory_space<vmem>>, vector<16x128xf32>
    %cst_387 = arith.constant 0.000000e+00 : f32
    %572 = vector.shape_cast %556 : vector<16x1xi1> to vector<16x1xi1>
    %573 = vector.broadcast %572 : vector<16x1xi1> to vector<16x128xi1>
    %574 = vector.broadcast %cst_387 : f32 to vector<16x128xf32>
    %575 = arith.select %573, %571, %574 : vector<16x128xi1>, vector<16x128xf32>
    %c36 = arith.constant 36 : index
    %c0_388 = arith.constant 0 : index
    %576 = vector.load %arg6[%c36, %c0_388] : memref<1096x128xf32, #tpu.memory_space<vmem>>, vector<16x128xf32>
    %cst_389 = arith.constant 0.000000e+00 : f32
    %577 = vector.shape_cast %554 : vector<16x1xi1> to vector<16x1xi1>
    %578 = vector.broadcast %577 : vector<16x1xi1> to vector<16x128xi1>
    %579 = vector.broadcast %cst_389 : f32 to vector<16x128xf32>
    %580 = arith.select %578, %576, %579 : vector<16x128xi1>, vector<16x128xf32>
    %c64_i32_390 = arith.constant 64 : i32
    %581 = tpu.dynamic_rotate %580 by %c64_i32_390 dim 1 : vector<16x128xf32>, i32 -> vector<16x128xf32>
    %582 = arith.addf %575, %581 : vector<16x128xf32>
    %583 = arith.truncf %582 : vector<16x128xf32> to vector<16x128xbf16>
    %c12 = arith.constant 12 : index
    %c0_391 = arith.constant 0 : index
    %c0_392 = arith.constant 0 : index
    %584 = vector.load %arg2[%c12, %c0_391, %c0_392] : memref<16x128x128xbf16, #tpu.memory_space<vmem>>, vector<1x128x128xbf16>
    %585 = vector.shape_cast %584 : vector<1x128x128xbf16> to vector<128x128xbf16>
    %cst_393 = arith.constant dense<0.000000e+00> : vector<16x128xf32>
    %586 = tpu.matmul %583, %585, %cst_393 {dimension_numbers = #tpu.dot_dimension_numbers<[1], [0], [0], [1], [0, 0, 1, 1], [], []>} : vector<16x128xbf16>, vector<128x128xbf16>, vector<16x128xf32> -> vector<16x128xf32>
    %587 = arith.addf %570, %586 : vector<16x128xf32>
    %c37_394 = arith.constant 37 : index
    %c0_395 = arith.constant 0 : index
    %588 = vector.load %arg6[%c37_394, %c0_395] : memref<1096x128xf32, #tpu.memory_space<vmem>>, vector<16x128xf32>
    %c38 = arith.constant 38 : index
    %c0_396 = arith.constant 0 : index
    %589 = vector.load %arg6[%c38, %c0_396] : memref<1096x128xf32, #tpu.memory_space<vmem>>, vector<16x128xf32>
    %cst_397 = arith.constant 0.000000e+00 : f32
    %590 = vector.shape_cast %556 : vector<16x1xi1> to vector<16x1xi1>
    %591 = vector.broadcast %590 : vector<16x1xi1> to vector<16x128xi1>
    %592 = vector.broadcast %cst_397 : f32 to vector<16x128xf32>
    %593 = arith.select %591, %589, %592 : vector<16x128xi1>, vector<16x128xf32>
    %c64_i32_398 = arith.constant 64 : i32
    %594 = tpu.dynamic_rotate %593 by %c64_i32_398 dim 1 : vector<16x128xf32>, i32 -> vector<16x128xf32>
    %595 = arith.addf %588, %594 : vector<16x128xf32>
    %596 = arith.truncf %595 : vector<16x128xf32> to vector<16x128xbf16>
    %c13 = arith.constant 13 : index
    %c0_399 = arith.constant 0 : index
    %c0_400 = arith.constant 0 : index
    %597 = vector.load %arg2[%c13, %c0_399, %c0_400] : memref<16x128x128xbf16, #tpu.memory_space<vmem>>, vector<1x128x128xbf16>
    %598 = vector.shape_cast %597 : vector<1x128x128xbf16> to vector<128x128xbf16>
    %cst_401 = arith.constant dense<0.000000e+00> : vector<16x128xf32>
    %599 = tpu.matmul %596, %598, %cst_401 {dimension_numbers = #tpu.dot_dimension_numbers<[1], [0], [0], [1], [0, 0, 1, 1], [], []>} : vector<16x128xbf16>, vector<128x128xbf16>, vector<16x128xf32> -> vector<16x128xf32>
    %600 = arith.addf %587, %599 : vector<16x128xf32>
    %c40 = arith.constant 40 : index
    %c0_402 = arith.constant 0 : index
    %601 = vector.load %arg6[%c40, %c0_402] : memref<1096x128xf32, #tpu.memory_space<vmem>>, vector<16x128xf32>
    %cst_403 = arith.constant 0.000000e+00 : f32
    %602 = vector.shape_cast %554 : vector<16x1xi1> to vector<16x1xi1>
    %603 = vector.broadcast %602 : vector<16x1xi1> to vector<16x128xi1>
    %604 = vector.broadcast %cst_403 : f32 to vector<16x128xf32>
    %605 = arith.select %603, %601, %604 : vector<16x128xi1>, vector<16x128xf32>
    %c41_404 = arith.constant 41 : index
    %c0_405 = arith.constant 0 : index
    %606 = vector.load %arg6[%c41_404, %c0_405] : memref<1096x128xf32, #tpu.memory_space<vmem>>, vector<16x128xf32>
    %c64_i32_406 = arith.constant 64 : i32
    %607 = tpu.dynamic_rotate %606 by %c64_i32_406 dim 1 : vector<16x128xf32>, i32 -> vector<16x128xf32>
    %608 = arith.addf %605, %607 : vector<16x128xf32>
    %609 = arith.truncf %608 : vector<16x128xf32> to vector<16x128xbf16>
    %c14 = arith.constant 14 : index
    %c0_407 = arith.constant 0 : index
    %c0_408 = arith.constant 0 : index
    %610 = vector.load %arg2[%c14, %c0_407, %c0_408] : memref<16x128x128xbf16, #tpu.memory_space<vmem>>, vector<1x128x128xbf16>
    %611 = vector.shape_cast %610 : vector<1x128x128xbf16> to vector<128x128xbf16>
    %cst_409 = arith.constant dense<0.000000e+00> : vector<16x128xf32>
    %612 = tpu.matmul %609, %611, %cst_409 {dimension_numbers = #tpu.dot_dimension_numbers<[1], [0], [0], [1], [0, 0, 1, 1], [], []>} : vector<16x128xbf16>, vector<128x128xbf16>, vector<16x128xf32> -> vector<16x128xf32>
    %613 = arith.addf %600, %612 : vector<16x128xf32>
    %c42 = arith.constant 42 : index
    %c0_410 = arith.constant 0 : index
    %614 = vector.load %arg6[%c42, %c0_410] : memref<1096x128xf32, #tpu.memory_space<vmem>>, vector<16x128xf32>
    %cst_411 = arith.constant 0.000000e+00 : f32
    %615 = vector.shape_cast %556 : vector<16x1xi1> to vector<16x1xi1>
    %616 = vector.broadcast %615 : vector<16x1xi1> to vector<16x128xi1>
    %617 = vector.broadcast %cst_411 : f32 to vector<16x128xf32>
    %618 = arith.select %616, %614, %617 : vector<16x128xi1>, vector<16x128xf32>
    %619 = arith.truncf %618 : vector<16x128xf32> to vector<16x128xbf16>
    %c15 = arith.constant 15 : index
    %c0_412 = arith.constant 0 : index
    %c0_413 = arith.constant 0 : index
    %620 = vector.load %arg2[%c15, %c0_412, %c0_413] : memref<16x128x128xbf16, #tpu.memory_space<vmem>>, vector<1x128x128xbf16>
    %621 = vector.shape_cast %620 : vector<1x128x128xbf16> to vector<128x128xbf16>
    %cst_414 = arith.constant dense<0.000000e+00> : vector<16x128xf32>
    %622 = tpu.matmul %619, %621, %cst_414 {dimension_numbers = #tpu.dot_dimension_numbers<[1], [0], [0], [1], [0, 0, 1, 1], [], []>} : vector<16x128xbf16>, vector<128x128xbf16>, vector<16x128xf32> -> vector<16x128xf32>
    %623 = arith.addf %613, %622 : vector<16x128xf32>
    %624 = vector.broadcast %532 : vector<1x128xf32> to vector<16x128xf32>
    %625 = arith.mulf %623, %624 : vector<16x128xf32>
    %626 = vector.broadcast %533 : vector<1x128xf32> to vector<16x128xf32>
    %627 = arith.addf %625, %626 : vector<16x128xf32>
    %cst_415 = arith.constant 0.000000e+00 : f32
    %628 = vector.broadcast %cst_415 : f32 to vector<16x128xf32>
    %629 = arith.cmpf oge, %627, %628 : vector<16x128xf32>
    %cst_416 = arith.constant 1.000000e-03 : f32
    %630 = vector.broadcast %cst_416 : f32 to vector<16x128xf32>
    %631 = arith.mulf %630, %627 : vector<16x128xf32>
    %632 = arith.select %629, %627, %631 : vector<16x128xi1>, vector<16x128xf32>
    %c0_417 = arith.constant 0 : index
    %c0_418 = arith.constant 0 : index
    %c0_419 = arith.constant 0 : index
    %633 = vector.load %arg5[%c0_417, %c0_418, %c0_419] : memref<1x16x128xf32, #tpu.memory_space<vmem>>, vector<1x16x128xf32>
    %634 = vector.shape_cast %633 : vector<1x16x128xf32> to vector<16x128xf32>
    %635 = vector.shape_cast %632 : vector<16x128xf32> to vector<1x16x128xf32>
    tpu.vector_store %arg5[%c0_417, %c0_418, %c0_419], %635 {strides = array<i32>} : memref<1x16x128xf32, #tpu.memory_space<vmem>>, vector<1x16x128xf32>,
    return
  }
  func.func @transform_0(%arg0: i32) -> (i32, i32, i32) {
    %c0_i32 = arith.constant 0 : i32
    %c0_i32_0 = arith.constant 0 : i32
    %c0_i32_1 = arith.constant 0 : i32
    return %arg0, %c0_i32, %c0_i32_0 : i32, i32, i32
  }
  func.func @transform_1(%arg0: i32) -> (i32, i32, i32) {
    %c0_i32 = arith.constant 0 : i32
    %c0_i32_0 = arith.constant 0 : i32
    %c0_i32_1 = arith.constant 0 : i32
    %c0_i32_2 = arith.constant 0 : i32
    return %c0_i32, %c0_i32_0, %c0_i32_1 : i32, i32, i32
  }
  func.func @transform_2(%arg0: i32) -> (i32, i32) {
    %c0_i32 = arith.constant 0 : i32
    %c0_i32_0 = arith.constant 0 : i32
    %c0_i32_1 = arith.constant 0 : i32
    return %c0_i32, %c0_i32_0 : i32, i32
  }
  func.func @transform_3(%arg0: i32) -> (i32, i32) {
    %c0_i32 = arith.constant 0 : i32
    %c0_i32_0 = arith.constant 0 : i32
    %c0_i32_1 = arith.constant 0 : i32
    return %c0_i32, %c0_i32_0 : i32, i32
  }
  func.func @transform_4(%arg0: i32) -> (i32, i32, i32) {
    %c0_i32 = arith.constant 0 : i32
    %c0_i32_0 = arith.constant 0 : i32
    %c0_i32_1 = arith.constant 0 : i32
    return %arg0, %c0_i32, %c0_i32_0 : i32, i32, i32
  }
}

</mosaic_0001>

<bundles_post_ra>
// kernel: conv_encoder_forward.1
= control target key start
LH: loop header
LB: loop body
LE: loop exit
PB: predicated region body
PF: predicated region fallthrough
CT: control target
= control target key end

     0   :  { %s9380_s15 = smov 0   ;;  %s14777_s0 = inlined_call_operand.vmem [shape: f32[2,1096,8], index: 0, kind: input, shape index: {}]   ;;  %s14778_s1 = inlined_call_operand.vmem [shape: bf16[16,128,128], index: 1, kind: input, shape index: {}]   ;;  %s14779_s2 = inlined_call_operand.vmem [shape: f32[5,128], index: 2, kind: input, shape index: {}]   ;;  %s14780_s3 = inlined_call_operand.vmem [shape: f32[5,128], index: 3, kind: input, shape index: {}]   ;;  %s14781_s4 = inlined_call_operand.vmem [shape: f32[2,16,128], index: 4, kind: output, shape index: {}]  }
   0x1 LB: > { %s7695_s16 = sadd.s32 4294967295, %s9331_s15   ;;  %p7699_p0 = scmp.ge.s32.totalorder %s9331_s15, 1  ;;  %s9331_s15 = sphi %s9380_s15, %s14_s15  }
   0x2   : > { %p162_p1 = scmp.lt.s32.totalorder %s9331_s15, 3 }
   0x4   : > { %p163_p2 = pnand %p7699_p0, %p162_p1 }
   0x6   : > { %166 = sbr.rel (%p163_p2) target bundleno = 2931 (0xb73), region = 36 }
   0xd   : > { %p188_p3 = scmp.lt.s32.totalorder %s7695_s16, 1  ;;  %v9391_v0 = vld [vmem:[%s14779_s2] ss:$0 sm:$0xff]  ;;  %vm231_vm0 = vcmask 64512   ;;  %s9682_s29 = smov 0  }
   0xe   : > { %14938 = vst [vmem:[#allocation4_spill] sm:$0xff] %v9391_v0  ;;  %v9396_v1 = vld [vmem:[%s14780_s3] ss:$0 sm:$0xff] }
   0xf   : > { %14939 = vst [vmem:[#allocation5_spill] sm:$0xff] %v9396_v1  ;;  %s15460_s16 = smov (!%p188_p3, %s7695_s16), 1 }
  0x10   : > { %s9085_s21 = smul.u32 1096, %s15460_s16  ;;  %s8350_s22 = sshll.u32 %s15460_s16, 4 }
  0x11   : > { %s9401_s25 = scalar_lea.vmem %s14781_s4, %s8350_s22 }
  0x12   : > { %s9406_s28 = scalar_lea.vmem %s14777_s0, %s9085_s21 }
  0x13   : > { %v199_v2 = vld [vmem:[%s9406_s28] sm:$0xff]  ;;  %v200_v3 = vld [vmem:[%s9406_s28 + $0x8] sm:$0xff]  ;;  %v201_v4 = vld [vmem:[%s9406_s28 + $0x10] sm:$0xff] }
  0x14   : > { %232 = vst.msk [vmem:[#allocation2] sm:$0xff] %vm231_vm0, %v199_v2  ;;  %233 = vst.msk [vmem:[#allocation2 + $0x8] sm:$0xff] %vm231_vm0, %v200_v3  ;;  %v202_v5 = vld [vmem:[%s9406_s28 + $0x18] sm:$0xff]  ;;  %v203_v6 = vld [vmem:[%s9406_s28 + $0x20] sm:$0xff] }
  0x15   : > { %234 = vst.msk [vmem:[#allocation2 + $0x10] sm:$0xff] %vm231_vm0, %v201_v4  ;;  %v204_v7 = vld [vmem:[%s9406_s28 + $0x28] sm:$0xff]  ;;  %235 = vst.msk [vmem:[#allocation2 + $0x18] sm:$0xff] %vm231_vm0, %v202_v5  ;;  %v205_v8 = vld [vmem:[%s9406_s28 + $0x30] sm:$0xff] }
  0x16   : > { %236 = vst.msk [vmem:[#allocation2 + $0x20] sm:$0xff] %vm231_vm0, %v203_v6  ;;  %237 = vst.msk [vmem:[#allocation2 + $0x28] sm:$0xff] %vm231_vm0, %v204_v7  ;;  %v206_v9 = vld [vmem:[%s9406_s28 + $0x38] sm:$0xff]  ;;  %v207_v10 = vld [vmem:[%s9406_s28 + $0x40] sm:$0xff] }
  0x17   : > { %238 = vst.msk [vmem:[#allocation2 + $0x30] sm:$0xff] %vm231_vm0, %v205_v8  ;;  %239 = vst.msk [vmem:[#allocation2 + $0x38] sm:$0xff] %vm231_vm0, %v206_v9  ;;  %v208_v11 = vld [vmem:[%s9406_s28 + $0x48] sm:$0xff]  ;;  %v209_v12 = vld [vmem:[%s9406_s28 + $0x50] sm:$0xff] }
  0x18   : > { %240 = vst.msk [vmem:[#allocation2 + $0x40] sm:$0xff] %vm231_vm0, %v207_v10  ;;  %v210_v13 = vld [vmem:[%s9406_s28 + $0x58] sm:$0xff]  ;;  %241 = vst.msk [vmem:[#allocation2 + $0x48] sm:$0xff] %vm231_vm0, %v208_v11  ;;  %v211_v14 = vld [vmem:[%s9406_s28 + $0x60] sm:$0xff] }
  0x19   : > { %242 = vst.msk [vmem:[#allocation2 + $0x50] sm:$0xff] %vm231_vm0, %v209_v12  ;;  %243 = vst.msk [vmem:[#allocation2 + $0x58] sm:$0xff] %vm231_vm0, %v210_v13  ;;  %v212_v15 = vld [vmem:[%s9406_s28 + $0x68] sm:$0xff]  ;;  %v213_v16 = vld [vmem:[%s9406_s28 + $0x70] sm:$0xff] }
  0x1a   : > { %244 = vst.msk [vmem:[#allocation2 + $0x60] sm:$0xff] %vm231_vm0, %v211_v14  ;;  %245 = vst.msk [vmem:[#allocation2 + $0x68] sm:$0xff] %vm231_vm0, %v212_v15  ;;  %v214_v17 = vld [vmem:[%s9406_s28 + $0x78] sm:$0xff]  ;;  %v215_v18 = vld [vmem:[%s9406_s28 + $0x80] sm:$0xff] }
  0x1b   : > { %246 = vst.msk [vmem:[#allocation2 + $0x70] sm:$0xff] %vm231_vm0, %v213_v16  ;;  %v216_v19 = vld [vmem:[%s9406_s28 + $0x88] sm:$0xff]  ;;  %247 = vst.msk [vmem:[#allocation2 + $0x78] sm:$0xff] %vm231_vm0, %v214_v17  ;;  %v217_v20 = vld [vmem:[%s9406_s28 + $0x90] sm:$0xff] }
  0x1c   : > { %248 = vst.msk [vmem:[#allocation2 + $0x80] sm:$0xff] %vm231_vm0, %v215_v18  ;;  %249 = vst.msk [vmem:[#allocation2 + $0x88] sm:$0xff] %vm231_vm0, %v216_v19  ;;  %v218_v21 = vld [vmem:[%s9406_s28 + $0x98] sm:$0xff]  ;;  %v219_v22 = vld [vmem:[%s9406_s28 + $0xa0] sm:$0xff] }
  0x1d   : > { %250 = vst.msk [vmem:[#allocation2 + $0x90] sm:$0xff] %vm231_vm0, %v217_v20  ;;  %251 = vst.msk [vmem:[#allocation2 + $0x98] sm:$0xff] %vm231_vm0, %v218_v21  ;;  %v220_v23 = vld [vmem:[%s9406_s28 + $0xa8] sm:$0xff]  ;;  %v221_v24 = vld [vmem:[%s9406_s28 + $0xb0] sm:$0xff] }
  0x1e   : > { %252 = vst.msk [vmem:[#allocation2 + $0xa0] sm:$0xff] %vm231_vm0, %v219_v22  ;;  %v222_v25 = vld [vmem:[%s9406_s28 + $0xb8] sm:$0xff]  ;;  %253 = vst.msk [vmem:[#allocation2 + $0xa8] sm:$0xff] %vm231_vm0, %v220_v23  ;;  %v223_v26 = vld [vmem:[%s9406_s28 + $0xc0] sm:$0xff] }
  0x1f   : > { %254 = vst.msk [vmem:[#allocation2 + $0xb0] sm:$0xff] %vm231_vm0, %v221_v24  ;;  %255 = vst.msk [vmem:[#allocation2 + $0xb8] sm:$0xff] %vm231_vm0, %v222_v25  ;;  %v224_v27 = vld [vmem:[%s9406_s28 + $0xc8] sm:$0xff]  ;;  %v225_v28 = vld [vmem:[%s9406_s28 + $0xd0] sm:$0xff] }
  0x20   : > { %256 = vst.msk [vmem:[#allocation2 + $0xc0] sm:$0xff] %vm231_vm0, %v223_v26  ;;  %257 = vst.msk [vmem:[#allocation2 + $0xc8] sm:$0xff] %vm231_vm0, %v224_v27  ;;  %v226_v29 = vld [vmem:[%s9406_s28 + $0xd8] sm:$0xff]  ;;  %v227_v30 = vld [vmem:[%s9406_s28 + $0xe0] sm:$0xff] }
  0x21   : > { %258 = vst.msk [vmem:[#allocation2 + $0xd0] sm:$0xff] %vm231_vm0, %v225_v28  ;;  %v228_v31 = vld [vmem:[%s9406_s28 + $0xe8] sm:$0xff]  ;;  %259 = vst.msk [vmem:[#allocation2 + $0xd8] sm:$0xff] %vm231_vm0, %v226_v29  ;;  %v229_v32 = vld [vmem:[%s9406_s28 + $0xf0] sm:$0xff] }
  0x22   : > { %260 = vst.msk [vmem:[#allocation2 + $0xe0] sm:$0xff] %vm231_vm0, %v227_v30  ;;  %261 = vst.msk [vmem:[#allocation2 + $0xe8] sm:$0xff] %vm231_vm0, %v228_v31  ;;  %v230_v33 = vld [vmem:[%s9406_s28 + $0xf8] sm:$0xff]  ;;  %v264_v34 = vld [vmem:[%s9406_s28 + $0x100] sm:$0xff] }
  0x23   : > { %262 = vst.msk [vmem:[#allocation2 + $0xf0] sm:$0xff] %vm231_vm0, %v229_v32  ;;  %263 = vst.msk [vmem:[#allocation2 + $0xf8] sm:$0xff] %vm231_vm0, %v230_v33  ;;  %v265_v35 = vld [vmem:[%s9406_s28 + $0x108] sm:$0xff]  ;;  %v266_v36 = vld [vmem:[%s9406_s28 + $0x110] sm:$0xff] }
  0x24   : > { %296 = vst.msk [vmem:[#allocation2 + $0x100] sm:$0xff] %vm231_vm0, %v264_v34  ;;  %v267_v37 = vld [vmem:[%s9406_s28 + $0x118] sm:$0xff]  ;;  %297 = vst.msk [vmem:[#allocation2 + $0x108] sm:$0xff] %vm231_vm0, %v265_v35  ;;  %v268_v38 = vld [vmem:[%s9406_s28 + $0x120] sm:$0xff] }
  0x25   : > { %298 = vst.msk [vmem:[#allocation2 + $0x110] sm:$0xff] %vm231_vm0, %v266_v36  ;;  %299 = vst.msk [vmem:[#allocation2 + $0x118] sm:$0xff] %vm231_vm0, %v267_v37  ;;  %v269_v39 = vld [vmem:[%s9406_s28 + $0x128] sm:$0xff]  ;;  %v270_v40 = vld [vmem:[%s9406_s28 + $0x130] sm:$0xff] }
  0x26   : > { %300 = vst.msk [vmem:[#allocation2 + $0x120] sm:$0xff] %vm231_vm0, %v268_v38  ;;  %301 = vst.msk [vmem:[#allocation2 + $0x128] sm:$0xff] %vm231_vm0, %v269_v39  ;;  %v271_v41 = vld [vmem:[%s9406_s28 + $0x138] sm:$0xff]  ;;  %v272_v42 = vld [vmem:[%s9406_s28 + $0x140] sm:$0xff] }
  0x27   : > { %302 = vst.msk [vmem:[#allocation2 + $0x130] sm:$0xff] %vm231_vm0, %v270_v40  ;;  %v273_v43 = vld [vmem:[%s9406_s28 + $0x148] sm:$0xff]  ;;  %303 = vst.msk [vmem:[#allocation2 + $0x138] sm:$0xff] %vm231_vm0, %v271_v41  ;;  %v274_v44 = vld [vmem:[%s9406_s28 + $0x150] sm:$0xff] }
  0x28   : > { %304 = vst.msk [vmem:[#allocation2 + $0x140] sm:$0xff] %vm231_vm0, %v272_v42  ;;  %305 = vst.msk [vmem:[#allocation2 + $0x148] sm:$0xff] %vm231_vm0, %v273_v43  ;;  %v275_v45 = vld [vmem:[%s9406_s28 + $0x158] sm:$0xff]  ;;  %v276_v46 = vld [vmem:[%s9406_s28 + $0x160] sm:$0xff] }
  0x29   : > { %306 = vst.msk [vmem:[#allocation2 + $0x150] sm:$0xff] %vm231_vm0, %v274_v44  ;;  %307 = vst.msk [vmem:[#allocation2 + $0x158] sm:$0xff] %vm231_vm0, %v275_v45  ;;  %v277_v47 = vld [vmem:[%s9406_s28 + $0x168] sm:$0xff]  ;;  %v278_v48 = vld [vmem:[%s9406_s28 + $0x170] sm:$0xff] }
  0x2a   : > { %308 = vst.msk [vmem:[#allocation2 + $0x160] sm:$0xff] %vm231_vm0, %v276_v46  ;;  %v279_v49 = vld [vmem:[%s9406_s28 + $0x178] sm:$0xff]  ;;  %309 = vst.msk [vmem:[#allocation2 + $0x168] sm:$0xff] %vm231_vm0, %v277_v47  ;;  %v280_v50 = vld [vmem:[%s9406_s28 + $0x180] sm:$0xff] }
  0x2b   : > { %310 = vst.msk [vmem:[#allocation2 + $0x170] sm:$0xff] %vm231_vm0, %v278_v48  ;;  %311 = vst.msk [vmem:[#allocation2 + $0x178] sm:$0xff] %vm231_vm0, %v279_v49  ;;  %v281_v51 = vld [vmem:[%s9406_s28 + $0x188] sm:$0xff]  ;;  %v282_v52 = vld [vmem:[%s9406_s28 + $0x190] sm:$0xff] }
  0x2c   : > { %312 = vst.msk [vmem:[#allocation2 + $0x180] sm:$0xff] %vm231_vm0, %v280_v50  ;;  %313 = vst.msk [vmem:[#allocation2 + $0x188] sm:$0xff] %vm231_vm0, %v281_v51  ;;  %v283_v53 = vld [vmem:[%s9406_s28 + $0x198] sm:$0xff]  ;;  %v284_v54 = vld [vmem:[%s9406_s28 + $0x1a0] sm:$0xff] }
  0x2d   : > { %314 = vst.msk [vmem:[#allocation2 + $0x190] sm:$0xff] %vm231_vm0, %v282_v52  ;;  %v285_v55 = vld [vmem:[%s9406_s28 + $0x1a8] sm:$0xff]  ;;  %315 = vst.msk [vmem:[#allocation2 + $0x198] sm:$0xff] %vm231_vm0, %v283_v53  ;;  %v286_v56 = vld [vmem:[%s9406_s28 + $0x1b0] sm:$0xff] }
  0x2e   : > { %316 = vst.msk [vmem:[#allocation2 + $0x1a0] sm:$0xff] %vm231_vm0, %v284_v54  ;;  %317 = vst.msk [vmem:[#allocation2 + $0x1a8] sm:$0xff] %vm231_vm0, %v285_v55  ;;  %v287_v57 = vld [vmem:[%s9406_s28 + $0x1b8] sm:$0xff]  ;;  %v288_v58 = vld [vmem:[%s9406_s28 + $0x1c0] sm:$0xff] }
  0x2f   : > { %318 = vst.msk [vmem:[#allocation2 + $0x1b0] sm:$0xff] %vm231_vm0, %v286_v56  ;;  %319 = vst.msk [vmem:[#allocation2 + $0x1b8] sm:$0xff] %vm231_vm0, %v287_v57  ;;  %v289_v59 = vld [vmem:[%s9406_s28 + $0x1c8] sm:$0xff]  ;;  %v290_v60 = vld [vmem:[%s9406_s28 + $0x1d0] sm:$0xff] }
  0x30   : > { %320 = vst.msk [vmem:[#allocation2 + $0x1c0] sm:$0xff] %vm231_vm0, %v288_v58  ;;  %v291_v61 = vld [vmem:[%s9406_s28 + $0x1d8] sm:$0xff]  ;;  %321 = vst.msk [vmem:[#allocation2 + $0x1c8] sm:$0xff] %vm231_vm0, %v289_v59  ;;  %v292_v62 = vld [vmem:[%s9406_s28 + $0x1e0] sm:$0xff] }
  0x31   : > { %322 = vst.msk [vmem:[#allocation2 + $0x1d0] sm:$0xff] %vm231_vm0, %v290_v60  ;;  %323 = vst.msk [vmem:[#allocation2 + $0x1d8] sm:$0xff] %vm231_vm0, %v291_v61  ;;  %v293_v63 = vld [vmem:[%s9406_s28 + $0x1e8] sm:$0xff]  ;;  %v294_v2 = vld [vmem:[%s9406_s28 + $0x1f0] sm:$0xff] }
  0x32   : > { %324 = vst.msk [vmem:[#allocation2 + $0x1e0] sm:$0xff] %vm231_vm0, %v292_v62  ;;  %325 = vst.msk [vmem:[#allocation2 + $0x1e8] sm:$0xff] %vm231_vm0, %v293_v63  ;;  %v295_v3 = vld [vmem:[%s9406_s28 + $0x1f8] sm:$0xff]  ;;  %v328_v4 = vld [vmem:[%s9406_s28 + $0x200] sm:$0xff] }
  0x33   : > { %326 = vst.msk [vmem:[#allocation2 + $0x1f0] sm:$0xff] %vm231_vm0, %v294_v2  ;;  %v329_v5 = vld [vmem:[%s9406_s28 + $0x208] sm:$0xff]  ;;  %327 = vst.msk [vmem:[#allocation2 + $0x1f8] sm:$0xff] %vm231_vm0, %v295_v3  ;;  %v330_v6 = vld [vmem:[%s9406_s28 + $0x210] sm:$0xff] }
  0x34   : > { %360 = vst.msk [vmem:[#allocation2 + $0x200] sm:$0xff] %vm231_vm0, %v328_v4  ;;  %361 = vst.msk [vmem:[#allocation2 + $0x208] sm:$0xff] %vm231_vm0, %v329_v5  ;;  %v331_v7 = vld [vmem:[%s9406_s28 + $0x218] sm:$0xff]  ;;  %v332_v8 = vld [vmem:[%s9406_s28 + $0x220] sm:$0xff] }
  0x35   : > { %362 = vst.msk [vmem:[#allocation2 + $0x210] sm:$0xff] %vm231_vm0, %v330_v6  ;;  %363 = vst.msk [vmem:[#allocation2 + $0x218] sm:$0xff] %vm231_vm0, %v331_v7  ;;  %v333_v9 = vld [vmem:[%s9406_s28 + $0x228] sm:$0xff]  ;;  %v334_v10 = vld [vmem:[%s9406_s28 + $0x230] sm:$0xff] }
  0x36   : > { %364 = vst.msk [vmem:[#allocation2 + $0x220] sm:$0xff] %vm231_vm0, %v332_v8  ;;  %v335_v11 = vld [vmem:[%s9406_s28 + $0x238] sm:$0xff]  ;;  %365 = vst.msk [vmem:[#allocation2 + $0x228] sm:$0xff] %vm231_vm0, %v333_v9  ;;  %v336_v12 = vld [vmem:[%s9406_s28 + $0x240] sm:$0xff] }
  0x37   : > { %366 = vst.msk [vmem:[#allocation2 + $0x230] sm:$0xff] %vm231_vm0, %v334_v10  ;;  %367 = vst.msk [vmem:[#allocation2 + $0x238] sm:$0xff] %vm231_vm0, %v335_v11  ;;  %v337_v13 = vld [vmem:[%s9406_s28 + $0x248] sm:$0xff]  ;;  %v338_v14 = vld [vmem:[%s9406_s28 + $0x250] sm:$0xff] }
  0x38   : > { %368 = vst.msk [vmem:[#allocation2 + $0x240] sm:$0xff] %vm231_vm0, %v336_v12  ;;  %369 = vst.msk [vmem:[#allocation2 + $0x248] sm:$0xff] %vm231_vm0, %v337_v13  ;;  %v339_v15 = vld [vmem:[%s9406_s28 + $0x258] sm:$0xff]  ;;  %v340_v16 = vld [vmem:[%s9406_s28 + $0x260] sm:$0xff] }
  0x39   : > { %370 = vst.msk [vmem:[#allocation2 + $0x250] sm:$0xff] %vm231_vm0, %v338_v14  ;;  %v341_v17 = vld [vmem:[%s9406_s28 + $0x268] sm:$0xff]  ;;  %371 = vst.msk [vmem:[#allocation2 + $0x258] sm:$0xff] %vm231_vm0, %v339_v15  ;;  %v342_v18 = vld [vmem:[%s9406_s28 + $0x270] sm:$0xff] }
  0x3a   : > { %372 = vst.msk [vmem:[#allocation2 + $0x260] sm:$0xff] %vm231_vm0, %v340_v16  ;;  %373 = vst.msk [vmem:[#allocation2 + $0x268] sm:$0xff] %vm231_vm0, %v341_v17  ;;  %v343_v19 = vld [vmem:[%s9406_s28 + $0x278] sm:$0xff]  ;;  %v344_v20 = vld [vmem:[%s9406_s28 + $0x280] sm:$0xff] }
  0x3b   : > { %374 = vst.msk [vmem:[#allocation2 + $0x270] sm:$0xff] %vm231_vm0, %v342_v18  ;;  %375 = vst.msk [vmem:[#allocation2 + $0x278] sm:$0xff] %vm231_vm0, %v343_v19  ;;  %v345_v21 = vld [vmem:[%s9406_s28 + $0x288] sm:$0xff]  ;;  %v346_v22 = vld [vmem:[%s9406_s28 + $0x290] sm:$0xff] }
  0x3c   : > { %376 = vst.msk [vmem:[#allocation2 + $0x280] sm:$0xff] %vm231_vm0, %v344_v20  ;;  %v347_v23 = vld [vmem:[%s9406_s28 + $0x298] sm:$0xff]  ;;  %377 = vst.msk [vmem:[#allocation2 + $0x288] sm:$0xff] %vm231_vm0, %v345_v21  ;;  %v348_v24 = vld [vmem:[%s9406_s28 + $0x2a0] sm:$0xff] }
  0x3d   : > { %378 = vst.msk [vmem:[#allocation2 + $0x290] sm:$0xff] %vm231_vm0, %v346_v22  ;;  %379 = vst.msk [vmem:[#allocation2 + $0x298] sm:$0xff] %vm231_vm0, %v347_v23  ;;  %v349_v25 = vld [vmem:[%s9406_s28 + $0x2a8] sm:$0xff]  ;;  %v350_v26 = vld [vmem:[%s9406_s28 + $0x2b0] sm:$0xff] }
  0x3e   : > { %380 = vst.msk [vmem:[#allocation2 + $0x2a0] sm:$0xff] %vm231_vm0, %v348_v24  ;;  %381 = vst.msk [vmem:[#allocation2 + $0x2a8] sm:$0xff] %vm231_vm0, %v349_v25  ;;  %v351_v27 = vld [vmem:[%s9406_s28 + $0x2b8] sm:$0xff]  ;;  %v352_v28 = vld [vmem:[%s9406_s28 + $0x2c0] sm:$0xff] }
  0x3f   : > { %382 = vst.msk [vmem:[#allocation2 + $0x2b0] sm:$0xff] %vm231_vm0, %v350_v26  ;;  %v353_v29 = vld [vmem:[%s9406_s28 + $0x2c8] sm:$0xff]  ;;  %383 = vst.msk [vmem:[#allocation2 + $0x2b8] sm:$0xff] %vm231_vm0, %v351_v27  ;;  %v354_v30 = vld [vmem:[%s9406_s28 + $0x2d0] sm:$0xff] }
  0x40   : > { %384 = vst.msk [vmem:[#allocation2 + $0x2c0] sm:$0xff] %vm231_vm0, %v352_v28  ;;  %385 = vst.msk [vmem:[#allocation2 + $0x2c8] sm:$0xff] %vm231_vm0, %v353_v29  ;;  %v355_v31 = vld [vmem:[%s9406_s28 + $0x2d8] sm:$0xff]  ;;  %v356_v32 = vld [vmem:[%s9406_s28 + $0x2e0] sm:$0xff] }
  0x41   : > { %386 = vst.msk [vmem:[#allocation2 + $0x2d0] sm:$0xff] %vm231_vm0, %v354_v30  ;;  %387 = vst.msk [vmem:[#allocation2 + $0x2d8] sm:$0xff] %vm231_vm0, %v355_v31  ;;  %v357_v33 = vld [vmem:[%s9406_s28 + $0x2e8] sm:$0xff]  ;;  %v358_v34 = vld [vmem:[%s9406_s28 + $0x2f0] sm:$0xff] }
  0x42   : > { %388 = vst.msk [vmem:[#allocation2 + $0x2e0] sm:$0xff] %vm231_vm0, %v356_v32  ;;  %v359_v35 = vld [vmem:[%s9406_s28 + $0x2f8] sm:$0xff]  ;;  %389 = vst.msk [vmem:[#allocation2 + $0x2e8] sm:$0xff] %vm231_vm0, %v357_v33  ;;  %v392_v36 = vld [vmem:[%s9406_s28 + $0x300] sm:$0xff] }
  0x43   : > { %390 = vst.msk [vmem:[#allocation2 + $0x2f0] sm:$0xff] %vm231_vm0, %v358_v34  ;;  %391 = vst.msk [vmem:[#allocation2 + $0x2f8] sm:$0xff] %vm231_vm0, %v359_v35  ;;  %v393_v37 = vld [vmem:[%s9406_s28 + $0x308] sm:$0xff]  ;;  %v394_v38 = vld [vmem:[%s9406_s28 + $0x310] sm:$0xff] }
  0x44   : > { %424 = vst.msk [vmem:[#allocation2 + $0x300] sm:$0xff] %vm231_vm0, %v392_v36  ;;  %425 = vst.msk [vmem:[#allocation2 + $0x308] sm:$0xff] %vm231_vm0, %v393_v37  ;;  %v395_v39 = vld [vmem:[%s9406_s28 + $0x318] sm:$0xff]  ;;  %v396_v40 = vld [vmem:[%s9406_s28 + $0x320] sm:$0xff] }
  0x45   : > { %426 = vst.msk [vmem:[#allocation2 + $0x310] sm:$0xff] %vm231_vm0, %v394_v38  ;;  %v397_v41 = vld [vmem:[%s9406_s28 + $0x328] sm:$0xff]  ;;  %427 = vst.msk [vmem:[#allocation2 + $0x318] sm:$0xff] %vm231_vm0, %v395_v39  ;;  %v398_v42 = vld [vmem:[%s9406_s28 + $0x330] sm:$0xff] }
  0x46   : > { %428 = vst.msk [vmem:[#allocation2 + $0x320] sm:$0xff] %vm231_vm0, %v396_v40  ;;  %429 = vst.msk [vmem:[#allocation2 + $0x328] sm:$0xff] %vm231_vm0, %v397_v41  ;;  %v399_v43 = vld [vmem:[%s9406_s28 + $0x338] sm:$0xff]  ;;  %v400_v44 = vld [vmem:[%s9406_s28 + $0x340] sm:$0xff] }
  0x47   : > { %430 = vst.msk [vmem:[#allocation2 + $0x330] sm:$0xff] %vm231_vm0, %v398_v42  ;;  %431 = vst.msk [vmem:[#allocation2 + $0x338] sm:$0xff] %vm231_vm0, %v399_v43  ;;  %v401_v45 = vld [vmem:[%s9406_s28 + $0x348] sm:$0xff]  ;;  %v402_v46 = vld [vmem:[%s9406_s28 + $0x350] sm:$0xff] }
  0x48   : > { %432 = vst.msk [vmem:[#allocation2 + $0x340] sm:$0xff] %vm231_vm0, %v400_v44  ;;  %v403_v47 = vld [vmem:[%s9406_s28 + $0x358] sm:$0xff]  ;;  %433 = vst.msk [vmem:[#allocation2 + $0x348] sm:$0xff] %vm231_vm0, %v401_v45  ;;  %v404_v48 = vld [vmem:[%s9406_s28 + $0x360] sm:$0xff] }
  0x49   : > { %434 = vst.msk [vmem:[#allocation2 + $0x350] sm:$0xff] %vm231_vm0, %v402_v46  ;;  %435 = vst.msk [vmem:[#allocation2 + $0x358] sm:$0xff] %vm231_vm0, %v403_v47  ;;  %v405_v49 = vld [vmem:[%s9406_s28 + $0x368] sm:$0xff]  ;;  %v406_v50 = vld [vmem:[%s9406_s28 + $0x370] sm:$0xff] }
  0x4a   : > { %436 = vst.msk [vmem:[#allocation2 + $0x360] sm:$0xff] %vm231_vm0, %v404_v48  ;;  %437 = vst.msk [vmem:[#allocation2 + $0x368] sm:$0xff] %vm231_vm0, %v405_v49  ;;  %v407_v51 = vld [vmem:[%s9406_s28 + $0x378] sm:$0xff]  ;;  %v408_v52 = vld [vmem:[%s9406_s28 + $0x380] sm:$0xff] }
  0x4b   : > { %438 = vst.msk [vmem:[#allocation2 + $0x370] sm:$0xff] %vm231_vm0, %v406_v50  ;;  %v409_v53 = vld [vmem:[%s9406_s28 + $0x388] sm:$0xff]  ;;  %439 = vst.msk [vmem:[#allocation2 + $0x378] sm:$0xff] %vm231_vm0, %v407_v51  ;;  %v410_v54 = vld [vmem:[%s9406_s28 + $0x390] sm:$0xff] }
  0x4c   : > { %440 = vst.msk [vmem:[#allocation2 + $0x380] sm:$0xff] %vm231_vm0, %v408_v52  ;;  %441 = vst.msk [vmem:[#allocation2 + $0x388] sm:$0xff] %vm231_vm0, %v409_v53  ;;  %v411_v55 = vld [vmem:[%s9406_s28 + $0x398] sm:$0xff]  ;;  %v412_v56 = vld [vmem:[%s9406_s28 + $0x3a0] sm:$0xff] }
  0x4d   : > { %442 = vst.msk [vmem:[#allocation2 + $0x390] sm:$0xff] %vm231_vm0, %v410_v54  ;;  %443 = vst.msk [vmem:[#allocation2 + $0x398] sm:$0xff] %vm231_vm0, %v411_v55  ;;  %v413_v57 = vld [vmem:[%s9406_s28 + $0x3a8] sm:$0xff]  ;;  %v414_v58 = vld [vmem:[%s9406_s28 + $0x3b0] sm:$0xff] }
  0x4e   : > { %444 = vst.msk [vmem:[#allocation2 + $0x3a0] sm:$0xff] %vm231_vm0, %v412_v56  ;;  %v415_v59 = vld [vmem:[%s9406_s28 + $0x3b8] sm:$0xff]  ;;  %445 = vst.msk [vmem:[#allocation2 + $0x3a8] sm:$0xff] %vm231_vm0, %v413_v57  ;;  %v416_v60 = vld [vmem:[%s9406_s28 + $0x3c0] sm:$0xff] }
  0x4f   : > { %446 = vst.msk [vmem:[#allocation2 + $0x3b0] sm:$0xff] %vm231_vm0, %v414_v58  ;;  %447 = vst.msk [vmem:[#allocation2 + $0x3b8] sm:$0xff] %vm231_vm0, %v415_v59  ;;  %v417_v61 = vld [vmem:[%s9406_s28 + $0x3c8] sm:$0xff]  ;;  %v418_v62 = vld [vmem:[%s9406_s28 + $0x3d0] sm:$0xff] }
  0x50   : > { %448 = vst.msk [vmem:[#allocation2 + $0x3c0] sm:$0xff] %vm231_vm0, %v416_v60  ;;  %449 = vst.msk [vmem:[#allocation2 + $0x3c8] sm:$0xff] %vm231_vm0, %v417_v61  ;;  %v419_v63 = vld [vmem:[%s9406_s28 + $0x3d8] sm:$0xff]  ;;  %v420_v2 = vld [vmem:[%s9406_s28 + $0x3e0] sm:$0xff] }
  0x51   : > { %450 = vst.msk [vmem:[#allocation2 + $0x3d0] sm:$0xff] %vm231_vm0, %v418_v62  ;;  %v421_v3 = vld [vmem:[%s9406_s28 + $0x3e8] sm:$0xff]  ;;  %451 = vst.msk [vmem:[#allocation2 + $0x3d8] sm:$0xff] %vm231_vm0, %v419_v63  ;;  %v422_v4 = vld [vmem:[%s9406_s28 + $0x3f0] sm:$0xff] }
  0x52   : > { %452 = vst.msk [vmem:[#allocation2 + $0x3e0] sm:$0xff] %vm231_vm0, %v420_v2  ;;  %453 = vst.msk [vmem:[#allocation2 + $0x3e8] sm:$0xff] %vm231_vm0, %v421_v3  ;;  %v423_v5 = vld [vmem:[%s9406_s28 + $0x3f8] sm:$0xff]  ;;  %v456_v6 = vld [vmem:[%s9406_s28 + $0x400] sm:$0xff] }
  0x53   : > { %454 = vst.msk [vmem:[#allocation2 + $0x3f0] sm:$0xff] %vm231_vm0, %v422_v4  ;;  %455 = vst.msk [vmem:[#allocation2 + $0x3f8] sm:$0xff] %vm231_vm0, %v423_v5  ;;  %v457_v7 = vld [vmem:[%s9406_s28 + $0x408] sm:$0xff]  ;;  %v458_v8 = vld [vmem:[%s9406_s28 + $0x410] sm:$0xff] }
  0x54   : > { %465 = vst.msk [vmem:[#allocation2 + $0x400] sm:$0xff] %vm231_vm0, %v456_v6  ;;  %v459_v9 = vld [vmem:[%s9406_s28 + $0x418] sm:$0xff]  ;;  %466 = vst.msk [vmem:[#allocation2 + $0x408] sm:$0xff] %vm231_vm0, %v457_v7  ;;  %v460_v10 = vld [vmem:[%s9406_s28 + $0x420] sm:$0xff] }
  0x55   : > { %467 = vst.msk [vmem:[#allocation2 + $0x410] sm:$0xff] %vm231_vm0, %v458_v8  ;;  %468 = vst.msk [vmem:[#allocation2 + $0x418] sm:$0xff] %vm231_vm0, %v459_v9  ;;  %v461_v11 = vld [vmem:[%s9406_s28 + $0x428] sm:$0xff]  ;;  %v462_v12 = vld [vmem:[%s9406_s28 + $0x430] sm:$0xff] }
  0x56   : > { %469 = vst.msk [vmem:[#allocation2 + $0x420] sm:$0xff] %vm231_vm0, %v460_v10  ;;  %470 = vst.msk [vmem:[#allocation2 + $0x428] sm:$0xff] %vm231_vm0, %v461_v11  ;;  %v463_v13 = vld [vmem:[%s9406_s28 + $0x438] sm:$0xff]  ;;  %v464_v14 = vld [vmem:[%s9406_s28 + $0x440] sm:$0xff] }
  0x57   : > { %471 = vst.msk [vmem:[#allocation2 + $0x430] sm:$0xff] %vm231_vm0, %v462_v12  ;;  %472 = vst.msk [vmem:[#allocation2 + $0x438] sm:$0xff] %vm231_vm0, %v463_v13 }
  0x58   : > { %473 = vst.msk [vmem:[#allocation2 + $0x440] sm:$0xff] %vm231_vm0, %v464_v14 }
  0x59 LB: >> { %v483_v15 = vlaneseq  ;;  %s9688_s30 = sshll.u32 %s9335_s29, 7  ;;  %s9337_s6 = smov 3   ;;  %s9335_s29 = sphi %s9682_s29, %s481_s29  }
  0x5a   : >> { %v9695_v18 = vstv %s9688_s30  ;;  %s9699_s5 = scalar_lea.vmem [#allocation2], %s9688_s30  ;;  %s9338_s7 = smov 6  }
  0x5b   : >> { %v9690_v16 = vand.u32 127, %v483_v15  ;;  %v9692_v17 = vshrl.u32 %v483_v15, 7  ;;  %s9339_s8 = smov 9   ;;  %s9340_s9 = smov 12  }
  0x5c   : >> { %s9341_s10 = smov 15   ;;  %s9342_s11 = smov 18  }
  0x5d   : >> { %14940 = vst [vmem:[#allocation6_spill] sm:$0xff] %v9692_v17  ;;  %vm743_vm1 = vcmp.lt.s32.totalorder %v9690_v16, 3  ;;  %v9705_v22 = vadd.s32 8, %v9692_v17  ;;  %v501_v23 = vadd.s32 %v9695_v18, %v9692_v17  ;;  %v9717_v29 = vadd.s32 72, %v9692_v17  ;;  %s9343_s12 = smov 21   ;;  %s9344_s27 = smov 24  }
  0x5e   : >> { %v9743_v46 = vadd.s32 64, %v9692_v17  ;;  %v9751_v50 = vadd.s32 24, %v9692_v17  ;;  %v9764_v58 = vadd.s32 16, %v9692_v17  ;;  %v9785_v14 = vadd.s32 88, %v9692_v17  ;;  %s481_s29 = sadd.s32 1, %s9335_s29  }
  0x5f   : >> { %v7729_v19 = vld [vmem:[%s9699_s5 + $0x41] sm:$0xff]  ;;  %v7730_v21 = vld [vmem:[%s9699_s5 + $0x49] sm:$0xff]  ;;  %14941 = vst [vmem:[#allocation7_spill] sm:$0xff] %v9705_v22  ;;  %v7724_v27 = vld [vmem:[%s9699_s5 + $0x19] sm:$0xff]  ;;  %v502_v32 = vadd.s32 %v9695_v18, %v9705_v22  ;;  %v518_v37 = vsub.s32 0, %v501_v23  ;;  %vm517_vm2 = vcmp.lt.s32.totalorder %v501_v23, 0  ;;  %v510_v44 = vadd.s32 %v9695_v18, %v9717_v29 }
  0x60   : >> { %v7721_v20 = vld [vmem:[%s9699_s5 + $0x1] sm:$0xff]  ;;  %v853_v24 = vsel %vm743_vm1, %v7729_v19, 0.0  ;;  %v7722_v26 = vld [vmem:[%s9699_s5 + $0x9] sm:$0xff]  ;;  %v7723_v28 = vld [vmem:[%s9699_s5 + $0x11] sm:$0xff]  ;;  %14942 = vst [vmem:[#allocation8_spill] sm:$0xff] %v9717_v29  ;;  %v854_v33 = vsel %vm743_vm1, %v7730_v21, 0.0  ;;  %v509_v54 = vadd.s32 %v9695_v18, %v9743_v46  ;;  %v9761_v57 = vadd.s32 %v9695_v18, %v9751_v50 }
  0x61   : >> { %v845_v25 = vsel %vm743_vm1, %v7721_v20, 0.0  ;;  %877 = vrot.lane.b32.xlu1 %v853_v24, %s9337_s6  ;;  %v7732_v30 = vld [vmem:[%s9699_s5 + $0x59] sm:$0xff]  ;;  %v7731_v31 = vld [vmem:[%s9699_s5 + $0x51] sm:$0xff]  ;;  %v846_v34 = vsel %vm743_vm1, %v7722_v26, 0.0  ;;  %v848_v35 = vsel %vm743_vm1, %v7724_v27, 0.0  ;;  %v847_v38 = vsel %vm743_vm1, %v7723_v28, 0.0 }
  0x62   : >> { %861 = vrot.lane.b32.xlu0 %v845_v25, %s9337_s6  ;;  %v7739_v36 = vld [vmem:[%s9699_s5 + $0xa] sm:$0xff]  ;;  %v856_v39 = vsel %vm743_vm1, %v7732_v30, 0.0  ;;  %v855_v40 = vsel %vm743_vm1, %v7731_v31, 0.0  ;;  %v525_v41 = vsub.s32 0, %v502_v32  ;;  %v7738_v42 = vld [vmem:[%s9699_s5 + $0x2] sm:$0xff]  ;;  %v7704_v43 = vmin.u32 %v518_v37, %v501_v23  ;;  %14943 = vst [vmem:[#allocation9_spill] sm:$0xff] %v9743_v46 }
  0x63   : >> { %v7747_v45 = vld [vmem:[%s9699_s5 + $0x4a] sm:$0xff]  ;;  %vm524_vm3 = vcmp.lt.s32.totalorder %v502_v32, 0  ;;  %v928_v48 = vsel %vm743_vm1, %v7739_v36, 0.0  ;;  %v7746_v49 = vld [vmem:[%s9699_s5 + $0x42] sm:$0xff]  ;;  %14944 = vst [vmem:[#allocation10_spill] sm:$0xff] %v9751_v50  ;;  %v927_v52 = vsel %vm743_vm1, %v7738_v42, 0.0  ;;  %v9776_v6 = vadd.s32 %v9695_v18, %v9764_v58 }
  0x64   : >> { %v7705_v47 = vmin.u32 %v525_v41, %v502_v32  ;;  %v521_v51 = vand.u32 31, %v7704_v43  ;;  %v581_v53 = vsub.s32 0, %v510_v44  ;;  %v936_v56 = vsel %vm743_vm1, %v7747_v45, 0.0  ;;  %14945 = vst [vmem:[#allocation11_spill] sm:$0xff] %v9764_v58  ;;  %14946 = vst [vmem:[#allocation12_spill] sm:$0xff] %v9785_v14  ;;  %v7741_v20 = vld [vmem:[%s9699_s5 + $0x1a] sm:$0xff] }
  0x65   : >> { %879 = vrot.lane.b32.xlu1 %v854_v33, %s9337_s6  ;;  %v574_v61 = vsub.s32 0, %v509_v54  ;;  %v9768_v62 = vsel %vm743_vm1, %v7746_v49, 0.0  ;;  %vm580_vm4 = vcmp.lt.s32.totalorder %v510_v44, 0  ;;  %vm573_vm5 = vcmp.lt.s32.totalorder %v509_v54, 0  ;;  %v7824_v29 = vld [vmem:[%s9699_s5 + $0x49] sm:$0xff]  ;;  %p478_p4 = scmp.ge.s32.totalorder %s481_s29, 8  }
  0x66   : >> { %863 = vrot.lane.b32.xlu0 %v846_v34, %s9337_s6  ;;  %v528_v55 = vand.u32 31, %v7705_v47  ;;  %v522_v59 = vsub.s32 0, %v521_v51  ;;  %v7713_v60 = vmin.u32 %v581_v53, %v510_v44  ;;  %v539_v2 = vsub.s32 0, %v9761_v57  ;;  %v7841_v0 = vld [vmem:[%s9699_s5 + $0x4a] sm:$0xff]  ;;  %s9346_s29 = smov (%p478_p4), 32   ;;  %s9352_s28 = smov (%p478_p4), 112  }
  0x67   : >> { %v7712_v5 = vmin.u32 %v574_v61, %v509_v54  ;;  %v532_v21 = vsub.s32 0, %v9776_v6  ;;  %v930_v28 = vsel %vm743_vm1, %v7741_v20, 0.0  ;;  %v512_v31 = vadd.s32 %v9695_v18, %v9785_v14  ;;  %v7764_v20 = vld [vmem:[%s9699_s5 + $0x68] sm:$0xff] }
  0x68   : >> { %v529_v63 = vsub.s32 0, %v528_v55  ;;  %v523_v3 = vsel %vm517_vm2, %v522_v59, %v521_v51  ;;  %v584_v4 = vand.u32 31, %v7713_v60  ;;  %v7707_v13 = vmin.u32 %v539_v2, %v9761_v57 }
  0x69   : >> { %867 = vrot.lane.b32.xlu1 %v848_v35, %s9337_s6  ;;  %vm629_vm6 = vcmp.ne.s32.totalorder %v523_v3, 0  ;;  %vm645_vm7 = vcmp.lt.s32.totalorder %v523_v3, 0  ;;  %v677_v8 = vadd.s32 32, %v523_v3  ;;  %v577_v12 = vand.u32 31, %v7712_v5 }
  0x6a   : >> { %865 = vrot.lane.b32.xlu0 %v847_v38, %s9337_s6  ;;  %v530_v7 = vsel %vm524_vm3, %v529_v63, %v528_v55  ;;  %vm661_vm10 = vmand %vm645_vm7, %vm629_vm6  ;;  %v585_v10 = vsub.s32 0, %v584_v4  ;;  %v542_v27 = vand.u32 31, %v7707_v13  ;;  %vm538_vm2 = vcmp.lt.s32.totalorder %v9761_v57, 0 }
  0x6b   : >> { %vm630_vm8 = vcmp.ne.s32.totalorder %v530_v7, 0  ;;  %vm646_vm9 = vcmp.lt.s32.totalorder %v530_v7, 0  ;;  %v678_v9 = vadd.s32 32, %v530_v7  ;;  %v9781_v11 = vsel %vm661_vm10, %v677_v8, %v523_v3  ;;  %v7748_v8 = vld [vmem:[%s9699_s5 + $0x52] sm:$0xff] }
  0x6c   : >> { %vm662_vm11 = vmand %vm646_vm9, %vm630_vm8  ;;  %vm725_vm12 = vcmp.lt.s32.totalorder %v9781_v11, 31  ;;  %v586_v19 = vsel %vm580_vm4, %v585_v10, %v584_v4  ;;  %v578_v26 = vsub.s32 0, %v577_v12  ;;  %v7706_v30 = vmin.u32 %v532_v21, %v9776_v6  ;;  %v7756_v4 = vld [vmem:[%s9699_s5 + $0x28] sm:$0xff] }
  0x6d   : >> { %883 = vrot.lane.b32.xlu1 %v856_v39, %s9337_s6  ;;  %v9787_v15 = vsel %vm662_vm11, %v678_v9, %v530_v7  ;;  %v975_v23 = vsel %vm725_vm12, %v927_v52, 0.0  ;;  %vm638_vm14 = vcmp.ne.s32.totalorder %v586_v19, 0  ;;  %vm654_vm15 = vcmp.lt.s32.totalorder %v586_v19, 0 }
  0x6e   : >> { %881 = vrot.lane.b32.xlu0 %v855_v40, %s9337_s6  ;;  %vm14795_vm13 = vcmp.lt.s32.totalorder %v9787_v15, 31  ;;  %vm670_vm0 = vmand %vm654_vm15, %vm638_vm14  ;;  %v686_v25 = vadd.s32 32, %v586_v19  ;;  %v579_v33 = vsel %vm573_vm5, %v578_v26, %v577_v12  ;;  %v543_v34 = vsub.s32 0, %v542_v27 }
  0x6f   : >> { %v976_v24 = vsel %vm14795_vm13, %v928_v48, 0.0  ;;  %v9810_v35 = vadd.s32 80, %v9692_v17  ;;  %vm637_vm4 = vcmp.ne.s32.totalorder %v579_v33, 0  ;;  %vm653_vm6 = vcmp.lt.s32.totalorder %v579_v33, 0  ;;  %v7740_v48 = vld [vmem:[%s9699_s5 + $0x12] sm:$0xff] }
  0x70   : >> { %v9806_v32 = vsel %vm670_vm0, %v686_v25, %v586_v19  ;;  %v685_v36 = vadd.s32 32, %v579_v33  ;;  %vm669_vm7 = vmand %vm653_vm6, %vm637_vm4  ;;  %v544_v38 = vsel %vm538_vm2, %v543_v34, %v542_v27  ;;  %vm531_vm8 = vcmp.lt.s32.totalorder %v9776_v6, 0  ;;  %v7755_v19 = vld [vmem:[%s9699_s5 + $0x20] sm:$0xff] }
  0x71   : >> { %993 = vrot.lane.b32.xlu1 %v976_v24, %s9338_s7  ;;  %14947 = vst [vmem:[#allocation13_spill] sm:$0xff] %v9810_v35  ;;  %vm14811_vm3 = vcmp.lt.s32.totalorder %v9806_v32, 31  ;;  %v535_v39 = vand.u32 31, %v7706_v30  ;;  %vm632_vm5 = vcmp.ne.s32.totalorder %v544_v38, 0  ;;  %vm648_vm9 = vcmp.lt.s32.totalorder %v544_v38, 0  ;;  %v7758_v30 = vld [vmem:[%s9699_s5 + $0x38] sm:$0xff] }
  0x72   : >> { %991 = vrot.lane.b32.xlu0 %v975_v23, %s9338_s7  ;;  %v984_v37 = vsel %vm14811_vm3, %v936_v56, 0.0  ;;  %v9817_v40 = vsel %vm669_vm7, %v685_v36, %v579_v33  ;;  %v680_v41 = vadd.s32 32, %v544_v38  ;;  %vm664_vm11 = vmand %vm648_vm9, %vm632_vm5  ;;  %v595_v43 = vsub.s32 0, %v512_v31 }
  0x73   : >> { %vm14808_vm10 = vcmp.lt.s32.totalorder %v9817_v40, 31  ;;  %v536_v42 = vsub.s32 0, %v535_v39  ;;  %v511_v44 = vadd.s32 %v9695_v18, %v9810_v35  ;;  %v929_v54 = vsel %vm743_vm1, %v7740_v48, 0.0  ;;  %v7832_v35 = vld [vmem:[%s9699_s5 + $0x89] sm:$0xff] }
  0x74   : >> { %v983_v45 = vsel %vm14808_vm10, %v9768_v62, 0.0  ;;  %v9825_v47 = vsel %vm664_vm11, %v680_v41, %v544_v38  ;;  %v7715_v51 = vmin.u32 %v595_v43, %v512_v31  ;;  %vm594_vm4 = vcmp.lt.s32.totalorder %v512_v31, 0  ;;  %v7749_v62 = vld [vmem:[%s9699_s5 + $0x5a] sm:$0xff] }
  0x75   : >> { %1009 = vrot.lane.b32.xlu1 %v984_v37, %s9338_s7  ;;  %vm14802_vm14 = vcmp.lt.s32.totalorder %v9825_v47, 31  ;;  %v537_v49 = vsel %vm531_vm8, %v536_v42, %v535_v39  ;;  %v588_v56 = vsub.s32 0, %v511_v44  ;;  %vm587_vm5 = vcmp.lt.s32.totalorder %v511_v44, 0  ;;  %v7757_v37 = vld [vmem:[%s9699_s5 + $0x30] sm:$0xff]  ;;  %v7766_v38 = vld [vmem:[%s9699_s5 + $0x78] sm:$0xff] }
  0x76   : >> { %1007 = vrot.lane.b32.xlu0 %v983_v45, %s9338_s7  ;;  %v978_v52 = vsel %vm14802_vm14, %v930_v28, 0.0  ;;  %vm631_vm15 = vcmp.ne.s32.totalorder %v537_v49, 0  ;;  %vm647_vm0 = vcmp.lt.s32.totalorder %v537_v49, 0  ;;  %v679_v53 = vadd.s32 32, %v537_v49  ;;  %v7763_v28 = vld [vmem:[%s9699_s5 + $0x60] sm:$0xff] }
  0x77   : >> { %vm663_vm2 = vmand %vm647_vm0, %vm631_vm15  ;;  %v598_v55 = vand.u32 31, %v7715_v51  ;;  %v7714_v60 = vmin.u32 %v588_v56, %v511_v44  ;;  %v938_v5 = vsel %vm743_vm1, %v7749_v62, 0.0  ;;  %vm14798_vm15 = vcmp.gt.s32.totalorder %v9787_v15, 0  ;;  %v7765_v44 = vld [vmem:[%s9699_s5 + $0x70] sm:$0xff]  ;;  %v7806_v45 = vld [vmem:[%s9699_s5 + $0x40] sm:$0xff] }
  0x78   : >> { %v9837_v57 = vsel %vm663_vm2, %v679_v53, %v537_v49  ;;  %v9854_v10 = vsel %vm743_vm1, %v7756_v4, 0.0  ;;  %v937_v21 = vsel %vm743_vm1, %v7748_v8, 0.0  ;;  %v9872_v25 = vsel %vm743_vm1, %v7755_v19, 0.0  ;;  %v7781_v4 = vld [vmem:[%s9699_s5 + $0x69] sm:$0xff]  ;;  %v7780_v19 = vld [vmem:[%s9699_s5 + $0x61] sm:$0xff] }
  0x79   : >> { %997 = vrot.lane.b32.xlu1 %v978_v52, %s9338_s7  ;;  %vm14801_vm6 = vcmp.lt.s32.totalorder %v9837_v57, 31  ;;  %v599_v59 = vsub.s32 0, %v598_v55  ;;  %v591_v2 = vand.u32 31, %v7714_v60  ;;  %v1074_v24 = vsel %vm14798_vm15, %v9854_v10, 0.0 }
  0x7a   : >> { %v977_v61 = vsel %vm14801_vm6, %v929_v54, 0.0  ;;  %v9877_v26 = vsel %vm743_vm1, %v7764_v20, 0.0  ;;  %v9894_v34 = vsel %vm743_vm1, %v7763_v28, 0.0  ;;  %v1060_v36 = vsel %vm743_vm1, %v7758_v30, 0.0  ;;  %v7773_v54 = vld [vmem:[%s9699_s5 + $0x29] sm:$0xff]  ;;  %v7775_v20 = vld [vmem:[%s9699_s5 + $0x39] sm:$0xff] }
  0x7b   : >> { %995 = vrot.lane.b32.xlu0 %v977_v61, %s9338_s7  ;;  %v600_v63 = vsel %vm594_vm4, %v599_v59, %v598_v55  ;;  %v592_v6 = vsub.s32 0, %v591_v2  ;;  %v1059_v42 = vsel %vm743_vm1, %v7757_v37, 0.0  ;;  %v1068_v43 = vsel %vm743_vm1, %v7766_v38, 0.0  ;;  %v7774_v37 = vld [vmem:[%s9699_s5 + $0x31] sm:$0xff]  ;;  %v7783_v38 = vld [vmem:[%s9699_s5 + $0x79] sm:$0xff] }
  0x7c   : >> { %vm640_vm7 = vcmp.ne.s32.totalorder %v600_v63, 0  ;;  %vm656_vm8 = vcmp.lt.s32.totalorder %v600_v63, 0  ;;  %v688_v3 = vadd.s32 32, %v600_v63  ;;  %v9919_v48 = vadd.s32 40, %v9692_v17 }
  0x7d   : >> { %vm672_vm9 = vmand %vm656_vm8, %vm640_vm7  ;;  %v593_v9 = vsel %vm587_vm5, %v592_v6, %v591_v2  ;;  %vm14790_vm7 = vcmp.gt.s32.totalorder %v9781_v11, 0  ;;  %vm14789_vm5 = vcmp.gt.s32.totalorder %v9806_v32, 0  ;;  %v9926_v52 = vadd.s32 32, %v9692_v17 }
  0x7e   : >> { %v9847_v7 = vsel %vm672_vm9, %v688_v3, %v600_v63  ;;  %vm639_vm0 = vcmp.ne.s32.totalorder %v593_v9, 0  ;;  %vm655_vm2 = vcmp.lt.s32.totalorder %v593_v9, 0  ;;  %v687_v13 = vadd.s32 32, %v593_v9  ;;  %14948 = vst [vmem:[#allocation14_spill] sm:$0xff] %v9919_v48  ;;  %v7772_v3 = vld [vmem:[%s9699_s5 + $0x21] sm:$0xff] }
  0x7f   : >> { %vm14800_vm11 = vcmp.lt.s32.totalorder %v9847_v7, 31  ;;  %vm671_vm4 = vmand %vm655_vm2, %vm639_vm0  ;;  %v1073_v31 = vsel %vm14790_vm7, %v9872_v25, 0.0  ;;  %v1082_v33 = vsel %vm14789_vm5, %v9877_v26, 0.0  ;;  %vm14784_vm9 = vcmp.gt.s32.totalorder %v9817_v40, 0  ;;  %14949 = vst [vmem:[#allocation15_spill] sm:$0xff] %v9926_v52 }
  0x80   : >> { %v986_v12 = vsel %vm14800_vm11, %v938_v5, 0.0  ;;  %v9863_v23 = vsel %vm671_vm4, %v687_v13, %v593_v9  ;;  %vm14782_vm0 = vcmp.gt.s32.totalorder %v9825_v47, 0  ;;  %v1081_v39 = vsel %vm14784_vm9, %v9894_v34, 0.0 }
  0x81   : >> { %1013 = vrot.lane.b32.xlu1 %v986_v12, %s9338_s7  ;;  %vm14799_vm8 = vcmp.lt.s32.totalorder %v9863_v23, 31  ;;  %v1076_v41 = vsel %vm14782_vm0, %v1060_v36, 0.0  ;;  %vm14783_vm2 = vcmp.gt.s32.totalorder %v9837_v57, 0  ;;  %vm14797_vm4 = vcmp.gt.s32.totalorder %v9847_v7, 0 }
  0x82   : >> { %v985_v27 = vsel %vm14799_vm8, %v937_v21, 0.0  ;;  %v1075_v49 = vsel %vm14783_vm2, %v1059_v42, 0.0  ;;  %v1084_v51 = vsel %vm14797_vm4, %v1068_v43, 0.0  ;;  %vm14796_vm0 = vcmp.gt.s32.totalorder %v9863_v23, 0 }
  0x83   : >> { %1011 = vrot.lane.b32.xlu0 %v985_v27, %s9338_s7  ;;  %v1067_v53 = vsel %vm743_vm1, %v7765_v44, 0.0  ;;  %v9933_v55 = vadd.s32 104, %v9692_v17  ;;  %v9937_v56 = vsel %vm743_vm1, %v7806_v45, 0.0  ;;  %v9940_v59 = vadd.s32 96, %v9692_v17 }
  0x84   : >> { %v9945_v60 = vsel %vm14784_vm9, %v9937_v56, 0.0  ;;  %v9951_v61 = vadd.s32 %v9695_v18, %v9919_v48  ;;  %v1083_v62 = vsel %vm14796_vm0, %v1067_v53, 0.0  ;;  %v9957_v63 = vsel %vm743_vm1, %v7773_v54, 0.0  ;;  %v7826_v48 = vld [vmem:[%s9699_s5 + $0x59] sm:$0xff] }
  0x85   : >> { %1091 = vrot.lane.b32.xlu1 %v1074_v24, %s9339_s8  ;;  %14950 = vst [vmem:[#allocation16_spill] sm:$0xff] %v9933_v55  ;;  %14951 = vst [vmem:[#allocation17_spill] sm:$0xff] %v9940_v59  ;;  %v9961_v2 = vadd.s32 %v9695_v18, %v9926_v52  ;;  %v9967_v5 = vadd.s32 %v9695_v18, %v9933_v55  ;;  %v9971_v6 = vadd.s32 %v9695_v18, %v9940_v59  ;;  %v7807_v24 = vld [vmem:[%s9699_s5 + $0x48] sm:$0xff] }
  0x86   : >> { %v553_v8 = vsub.s32 0, %v9951_v61  ;;  %v9979_v9 = vsel %vm743_vm1, %v7772_v3, 0.0  ;;  %v9983_v12 = vsel %vm743_vm1, %v7781_v4, 0.0  ;;  %v9998_v30 = vsel %vm743_vm1, %v7780_v19, 0.0  ;;  %v7790_v3 = vld [vmem:[%s9699_s5 + $0x2a] sm:$0xff] }
  0x87   : >> { %1089 = vrot.lane.b32.xlu0 %v1073_v31, %s9339_s8  ;;  %v546_v13 = vsub.s32 0, %v9961_v2  ;;  %v609_v21 = vsub.s32 0, %v9967_v5  ;;  %v602_v27 = vsub.s32 0, %v9971_v6  ;;  %v10002_v31 = vsel %vm743_vm1, %v7775_v20, 0.0  ;;  %v7798_v59 = vld [vmem:[%s9699_s5 + $0x6a] sm:$0xff] }
  0x88   : >> { %v7709_v28 = vmin.u32 %v553_v8, %v9951_v61  ;;  %v10007_v36 = vsel %vm743_vm1, %v7807_v24, 0.0  ;;  %v10016_v42 = vadd.s32 112, %v9692_v17  ;;  %v10038_v53 = vsel %vm743_vm1, %v7774_v37, 0.0 }
  0x89   : >> { %1107 = vrot.lane.b32.xlu1 %v1082_v33, %s9339_s8  ;;  %v7708_v33 = vmin.u32 %v546_v13, %v9961_v2  ;;  %v10021_v43 = vsel %vm14789_vm5, %v10007_v36, 0.0  ;;  %v7716_v44 = vmin.u32 %v602_v27, %v9971_v6  ;;  %v10042_v54 = vsel %vm743_vm1, %v7783_v38, 0.0  ;;  %v7789_v27 = vld [vmem:[%s9699_s5 + $0x22] sm:$0xff] }
  0x8a   : >> { %14953 = vst [vmem:[#allocation19_spill] sm:$0xff] %v10016_v42  ;;  %v556_v45 = vand.u32 31, %v7709_v28  ;;  %v10058_v24 = vsel %vm743_vm1, %v7790_v3, 0.0  ;;  %vm552_vm2 = vcmp.lt.s32.totalorder %v9951_v61, 0  ;;  %vm545_vm9 = vcmp.lt.s32.totalorder %v9961_v2, 0 }
  0x8b   : >> { %1105 = vrot.lane.b32.xlu0 %v1081_v39, %s9339_s8  ;;  %v7717_v39 = vmin.u32 %v609_v21, %v9967_v5  ;;  %v549_v4 = vand.u32 31, %v7708_v33  ;;  %v605_v13 = vand.u32 31, %v7716_v44  ;;  %v7809_v44 = vld [vmem:[%s9699_s5 + $0x58] sm:$0xff]  ;;  %v10072_v3 = vsel %vm743_vm1, %v7789_v27, 0.0 }
  0x8c   : >> { %v557_v28 = vsub.s32 0, %v556_v45  ;;  %vm608_vm5 = vcmp.lt.s32.totalorder %v9967_v5, 0  ;;  %vm601_vm7 = vcmp.lt.s32.totalorder %v9971_v6, 0  ;;  %v10086_v5 = vsel %vm743_vm1, %v7809_v44, 0.0 }
  0x8d   : >> { %1095 = vrot.lane.b32.xlu1 %v1076_v41, %s9339_s8  ;;  %v10013_v41 = vadd.s32 120, %v9692_v17  ;;  %v612_v8 = vand.u32 31, %v7717_v39  ;;  %v550_v33 = vsub.s32 0, %v549_v4  ;;  %v606_v61 = vsub.s32 0, %v605_v13 }
  0x8e   : >> { %v558_v2 = vsel %vm552_vm2, %v557_v28, %v556_v45  ;;  %v10099_v45 = vsel %vm14797_vm4, %v10086_v5, 0.0 }
  0x8f   : >> { %1093 = vrot.lane.b32.xlu0 %v1075_v49, %s9339_s8  ;;  %14952 = vst [vmem:[#allocation18_spill] sm:$0xff] %v10013_v41  ;;  %v10030_v49 = vadd.s32 %v9695_v18, %v10013_v41  ;;  %v613_v39 = vsub.s32 0, %v612_v8  ;;  %v551_v27 = vsel %vm545_vm9, %v550_v33, %v549_v4  ;;  %vm634_vm9 = vcmp.ne.s32.totalorder %v558_v2, 0 }
  0x90   : >> { %vm650_vm2 = vcmp.lt.s32.totalorder %v558_v2, 0  ;;  %v607_v28 = vsel %vm601_vm7, %v606_v61, %v605_v13 }
  0x91   : >> { %1111 = vrot.lane.b32.xlu1 %v1084_v51, %s9339_s8  ;;  %v10034_v51 = vadd.s32 %v9695_v18, %v10016_v42  ;;  %v623_v19 = vsub.s32 0, %v10030_v49  ;;  %v7808_v42 = vld [vmem:[%s9699_s5 + $0x50] sm:$0xff]  ;;  %v614_v6 = vsel %vm608_vm5, %v613_v39, %v612_v8  ;;  %vm633_vm5 = vcmp.ne.s32.totalorder %v551_v27, 0  ;;  %vm10120_vm15 = vmand %vm650_vm2, %vm634_vm9 }
  0x92   : >> { %v10090_v55 = vsel %vm743_vm1, %v7808_v42, 0.0  ;;  %v10107_v42 = vadd.s32 48, %v9692_v17  ;;  %vm658_vm4 = vcmp.lt.s32.totalorder %v614_v6, 0  ;;  %vm622_vm7 = vcmp.lt.s32.totalorder %v10030_v49, 0 }
  0x93   : >> { %1109 = vrot.lane.b32.xlu0 %v1083_v62, %s9339_s8  ;;  %v7782_v62 = vld [vmem:[%s9699_s5 + $0x71] sm:$0xff]  ;;  %v616_v20 = vsub.s32 0, %v10034_v51  ;;  %v7719_v37 = vmin.u32 %v623_v19, %v10030_v49  ;;  %v10082_v19 = vadd.s32 56, %v9692_v17  ;;  %v10104_v4 = vsel %vm14796_vm0, %v10090_v55, 0.0 }
  0x94   : >> { %v10054_v21 = vsel %vm743_vm1, %v7782_v62, 0.0  ;;  %v1254_v62 = vsel %vm14795_vm13, %v10058_v24, 0.0  ;;  %14955 = vst [vmem:[#allocation21_spill] sm:$0xff] %v10107_v42  ;;  %vm649_vm13 = vcmp.lt.s32.totalorder %v551_v27, 0  ;;  %vm642_vm0 = vcmp.ne.s32.totalorder %v614_v6, 0  ;;  %v7833_v17 = vld [vmem:[%s9699_s5 + $0x91] sm:$0xff] }
  0x95   : >> { %1173 = vrot.lane.b32.xlu1 %v9957_v63, %s9340_s9  ;;  %v7718_v38 = vmin.u32 %v616_v20, %v10034_v51  ;;  %14954 = vst [vmem:[#allocation20_spill] sm:$0xff] %v10082_v19  ;;  %v626_v20 = vand.u32 31, %v7719_v37  ;;  %v10116_v8 = vadd.s32 %v9695_v18, %v10082_v19  ;;  %vm641_vm8 = vcmp.ne.s32.totalorder %v607_v28, 0  ;;  %vm10129_vm14 = vmand %vm649_vm13, %vm633_vm5 }
  0x96   : >> { %vm657_vm11 = vcmp.lt.s32.totalorder %v607_v28, 0  ;;  %vm615_vm6 = vcmp.lt.s32.totalorder %v10034_v51, 0  ;;  %v681_v39 = vadd.s32 32, %v551_v27  ;;  %v690_v44 = vadd.s32 32, %v614_v6  ;;  %vm674_vm9 = vmand %vm658_vm4, %vm642_vm0 }
  0x97   : >> { %1171 = vrot.lane.b32.xlu0 %v9979_v9, %s9340_s9  ;;  %v619_v41 = vand.u32 31, %v7718_v38  ;;  %v627_v33 = vsub.s32 0, %v626_v20  ;;  %v689_v51 = vadd.s32 32, %v607_v28  ;;  %vm673_vm13 = vmand %vm657_vm11, %vm641_vm8  ;;  %v567_v49 = vsub.s32 0, %v10116_v8 }
  0x99   : >> { %1189 = vrot.lane.b32.xlu1 %v9983_v12, %s9340_s9  ;;  %v620_v13 = vsub.s32 0, %v619_v41  ;;  %v628_v61 = vsel %vm622_vm7, %v627_v33, %v626_v20  ;;  %v10157_v20 = vadd.s32 %v9695_v18, %v10107_v42  ;;  %v10161_v33 = vsel %vm10129_vm14, %v681_v39, %v551_v27  ;;  %v7792_v27 = vld [vmem:[%s9699_s5 + $0x3a] sm:$0xff] }
  0x9a   : >> { %vm660_vm11 = vcmp.lt.s32.totalorder %v628_v61, 0  ;;  %v692_v18 = vadd.s32 32, %v628_v61  ;;  %vm713_vm14 = vcmp.gt.s32.totalorder %v10161_v33, 0 }
  0x9b   : >> { %1187 = vrot.lane.b32.xlu0 %v9998_v30, %s9340_s9  ;;  %v560_v38 = vsub.s32 0, %v10157_v20 }
  0x9d   : >> { %1177 = vrot.lane.b32.xlu1 %v10002_v31, %s9340_s9 }
  0x9f   : >> { %1175 = vrot.lane.b32.xlu0 %v10038_v53, %s9340_s9 }
  0xa1   : >> { %1193 = vrot.lane.b32.xlu1 %v10042_v54, %s9340_s9 }
  0xa3   : >> { %1191 = vrot.lane.b32.xlu0 %v10054_v21, %s9340_s9 }
  0xa5   : >> { %871 = vrot.lane.b32.xlu1 %v9957_v63, %s9337_s6  ;;  %v10094_v63 = vsel %vm743_vm1, %v7798_v59, 0.0  ;;  %v7797_v59 = vld [vmem:[%s9699_s5 + $0x62] sm:$0xff] }
  0xa6   : >> { %v1262_v46 = vsel %vm14811_vm3, %v10094_v63, 0.0 }
  0xa7   : >> { %869 = vrot.lane.b32.xlu0 %v9979_v9, %s9337_s6  ;;  %v682_v9 = vadd.s32 32, %v558_v2 }
  0xa9   : >> { %887 = vrot.lane.b32.xlu1 %v9983_v12, %s9337_s6  ;;  %v10127_v12 = vsel %vm743_vm1, %v7797_v59, 0.0  ;;  %v1253_v59 = vsel %vm725_vm12, %v10072_v3, 0.0  ;;  %v10152_v14 = vsel %vm10120_vm15, %v682_v9, %v558_v2  ;;  %v10167_v2 = vsel %vm673_vm13, %v689_v51, %v607_v28  ;;  %v759_v9 = vld [vmem:[%s9699_s5 + $0x70] sm:$0xff]  ;;  %v7800_v51 = vld [vmem:[%s9699_s5 + $0x7a] sm:$0xff] }
  0xaa   : >> { %vm714_vm0 = vcmp.gt.s32.totalorder %v10152_v14, 0  ;;  %vm721_vm5 = vcmp.gt.s32.totalorder %v10167_v2, 0 }
  0xab   : >> { %885 = vrot.lane.b32.xlu0 %v9998_v30, %s9337_s6  ;;  %v621_v30 = vsel %vm615_vm6, %v620_v13, %v619_v41  ;;  %v10163_v41 = vsel %vm674_vm9, %v690_v44, %v614_v6  ;;  %vm644_vm6 = vcmp.ne.s32.totalorder %v628_v61, 0  ;;  %v10182_v6 = vsel %vm713_vm14, %v9872_v25, 0.0 }
  0xac   : >> { %vm643_vm15 = vcmp.ne.s32.totalorder %v621_v30, 0  ;;  %vm659_vm8 = vcmp.lt.s32.totalorder %v621_v30, 0  ;;  %v691_v13 = vadd.s32 32, %v621_v30  ;;  %vm722_vm4 = vcmp.gt.s32.totalorder %v10163_v41, 0  ;;  %vm676_vm2 = vmand %vm660_vm11, %vm644_vm6 }
  0xad   : >> { %1271 = vrot.lane.b32.xlu1 %v1254_v62, %s9341_s10  ;;  %v1261_v62 = vsel %vm14808_vm10, %v10127_v12, 0.0  ;;  %v10187_v28 = vsel %vm722_vm4, %v9877_v26, 0.0  ;;  %vm675_vm7 = vmand %vm659_vm8, %vm643_vm15  ;;  %v10192_v37 = vsel %vm721_vm5, %v9894_v34, 0.0  ;;  %v10201_v25 = vsel %vm743_vm1, %v7792_v27, 0.0  ;;  %v7791_v34 = vld [vmem:[%s9699_s5 + $0x32] sm:$0xff] }
  0xae   : >> { %v7711_v26 = vmin.u32 %v567_v49, %v10116_v8  ;;  %v10205_v39 = vsel %vm676_vm2, %v692_v18, %v628_v61  ;;  %v10207_v44 = vsel %vm675_vm7, %v691_v13, %v621_v30  ;;  %vm14966_vm6 = vcmp.lt.s32.totalorder %v9825_v47, 31  ;;  %v7799_v13 = vld [vmem:[%s9699_s5 + $0x72] sm:$0xff] }
  0xaf   : >> { %1269 = vrot.lane.b32.xlu0 %v1253_v59, %s9341_s10  ;;  %14960 = vst [vmem:[#allocation22_spill] sm:$0xff] %v10205_v39  ;;  %14961 = vst [vmem:[#allocation23_spill] sm:$0xff] %v10207_v44  ;;  %vm724_vm9 = vcmp.gt.s32.totalorder %v10205_v39, 0  ;;  %vm14840_vm13 = vcmp.gt.s32.totalorder %v10207_v44, 0  ;;  %v10219_v59 = vsel %vm743_vm1, %v759_v9, 0.0  ;;  %v7710_v18 = vmin.u32 %v560_v38, %v10157_v20 }
  0xb0   : >> { %14963 = vst [vmem:[#allocation25_spill] sm:$0xff] %v10219_v59  ;;  %v10233_v30 = vsel %vm14840_vm13, %v10219_v59, 0.0  ;;  %v570_v49 = vand.u32 31, %v7711_v26  ;;  %vm14967_vm11 = vcmp.lt.s32.totalorder %v9837_v57, 31  ;;  %vm14968_vm15 = vcmp.lt.s32.totalorder %v9847_v7, 31 }
  0xb1   : >> { %1287 = vrot.lane.b32.xlu1 %v1262_v46, %s9341_s10  ;;  %v10177_v46 = vsel %vm714_vm0, %v9854_v10, 0.0  ;;  %v760_v10 = vld [vmem:[%s9699_s5 + $0x78] sm:$0xff]  ;;  %14965 = vst [vmem:[#allocation27_spill] sm:$0xff] %v10233_v30  ;;  %v10259_v9 = vsel %vm743_vm1, %v7799_v13, 0.0  ;;  %vm14807_vm8 = vcmp.lt.s32.totalorder %v10152_v14, 31  ;;  %v563_v38 = vand.u32 31, %v7710_v18 }
  0xb2   : >> { %v571_v26 = vsub.s32 0, %v570_v49  ;;  %vm566_vm2 = vcmp.lt.s32.totalorder %v10116_v8, 0  ;;  %vm14969_vm7 = vcmp.lt.s32.totalorder %v9863_v23, 31  ;;  %v7815_v18 = vld [vmem:[%s9699_s5 + $0x88] sm:$0xff] }
  0xb3   : >> { %1285 = vrot.lane.b32.xlu0 %v1261_v62, %s9341_s10  ;;  %v1256_v62 = vsel %vm14966_vm6, %v10201_v25, 0.0  ;;  %vm14809_vm6 = vcmp.lt.s32.totalorder %v10161_v33, 31  ;;  %v1344_v13 = vsel %vm743_vm1, %v7815_v18, 0.0  ;;  %v7849_v30 = vld [vmem:[%s9699_s5 + $0x8a] sm:$0xff] }
  0xb4   : >> { %v979_v8 = vsel %vm14809_vm6, %v10072_v3, 0.0  ;;  %vm14970_vm6 = vcmp.gt.s32.totalorder %v9787_v15, 0 }
  0xb5   : >> { %875 = vrot.lane.b32.xlu1 %v10002_v31, %s9337_s6  ;;  %v10215_v31 = vsel %vm743_vm1, %v760_v10, 0.0 }
  0xb6   : >> { %14962 = vst [vmem:[#allocation24_spill] sm:$0xff] %v10215_v31  ;;  %v10228_v61 = vsel %vm724_vm9, %v10215_v31, 0.0  ;;  %v10505_v31 = vsel %vm743_vm1, %v7841_v0, 0.0  ;;  %v9125_v0 = vld [vmem:[%s14778_s1 + $0x28] sm:$0xff]  }
  0xb7   : >> { %873 = vrot.lane.b32.xlu0 %v10038_v53, %s9337_s6  ;;  %14964 = vst [vmem:[#allocation26_spill] sm:$0xff] %v10228_v61  ;;  %v10240_v53 = vsel %vm743_vm1, %v7791_v34, 0.0  ;;  %v980_v34 = vsel %vm14807_vm8, %v10058_v24, 0.0 }
  0xb8   : >> { %v1255_v27 = vsel %vm14967_vm11, %v10240_v53, 0.0  ;;  %vm14810_vm11 = vcmp.lt.s32.totalorder %v10163_v41, 31 }
  0xb9   : >> { %891 = vrot.lane.b32.xlu1 %v10042_v54, %s9337_s6  ;;  %v10244_v54 = vsel %vm743_vm1, %v7800_v51, 0.0  ;;  %v572_v51 = vsel %vm566_vm2, %v571_v26, %v570_v49  ;;  %v988_v24 = vsel %vm14810_vm11, %v10094_v63, 0.0  ;;  %vm737_vm2 = vcmp.lt.s32.totalorder %v10167_v2, 31 }
  0xba   : >> { %v1264_v10 = vsel %vm14968_vm15, %v10244_v54, 0.0  ;;  %vm559_vm15 = vcmp.lt.s32.totalorder %v10157_v20, 0  ;;  %vm652_vm8 = vcmp.lt.s32.totalorder %v572_v51, 0  ;;  %v684_v20 = vadd.s32 32, %v572_v51 }
  0xbb   : >> { %889 = vrot.lane.b32.xlu0 %v10054_v21, %s9337_s6  ;;  %v1263_v21 = vsel %vm14969_vm7, %v10259_v9, 0.0  ;;  %vm636_vm7 = vcmp.ne.s32.totalorder %v572_v51, 0  ;;  %v987_v3 = vsel %vm737_vm2, %v10127_v12, 0.0  ;;  %v1352_v63 = vsel %vm14970_vm6, %v10007_v36, 0.0 }
  0xbc   : >> { %vm668_vm10 = vmand %vm652_vm8, %vm636_vm7  ;;  %vm14972_vm6 = vcmp.gt.s32.totalorder %v9806_v32, 0  ;;  %vm740_vm7 = vcmp.lt.s32.totalorder %v10205_v39, 31  ;;  %v7848_v39 = vld [vmem:[%s9699_s5 + $0x82] sm:$0xff] }
  0xbd   : >> { %1275 = vrot.lane.b32.xlu1 %v1256_v62, %s9341_s10  ;;  %v564_v62 = vsub.s32 0, %v563_v38 }
  0xbf   : >> { %1273 = vrot.lane.b32.xlu0 %v1255_v27, %s9341_s10  ;;  %v565_v49 = vsel %vm559_vm15, %v564_v62, %v563_v38  ;;  %v7814_v27 = vld [vmem:[%s9699_s5 + $0x80] sm:$0xff]  ;;  %vm14971_vm15 = vcmp.gt.s32.totalorder %v9781_v11, 0  ;;  %v1360_v38 = vsel %vm14972_vm6, %v1344_v13, 0.0  ;;  %vm14975_vm6 = vcmp.gt.s32.totalorder %v9837_v57, 0 }
  0xc0   : >> { %vm635_vm11 = vcmp.ne.s32.totalorder %v565_v49, 0  ;;  %vm651_vm3 = vcmp.lt.s32.totalorder %v565_v49, 0  ;;  %v683_v26 = vadd.s32 32, %v565_v49  ;;  %v1351_v12 = vsel %vm14971_vm15, %v9937_v56, 0.0 }
  0xc1   : >> { %1291 = vrot.lane.b32.xlu1 %v1264_v10, %s9341_s10  ;;  %v10295_v10 = vsel %vm668_vm10, %v684_v20, %v572_v51  ;;  %vm667_vm8 = vmand %vm651_vm3, %vm635_vm11  ;;  %vm14973_vm3 = vcmp.gt.s32.totalorder %v9817_v40, 0  ;;  %vm14974_vm15 = vcmp.gt.s32.totalorder %v9825_v47, 0 }
  0xc2   : >> { %vm732_vm10 = vcmp.lt.s32.totalorder %v10295_v10, 31 }
  0xc3   : >> { %1289 = vrot.lane.b32.xlu0 %v1263_v21, %s9341_s10  ;;  %v1343_v21 = vsel %vm743_vm1, %v7814_v27, 0.0 }
  0xc5   : >> { %1001 = vrot.lane.b32.xlu1 %v980_v34, %s9338_s7  ;;  %v10307_v34 = vsel %vm667_vm8, %v683_v26, %v565_v49  ;;  %vm739_vm8 = vcmp.lt.s32.totalorder %v10207_v44, 31  ;;  %v7840_v44 = vld [vmem:[%s9699_s5 + $0x42] sm:$0xff] }
  0xc6   : >> { %vm731_vm11 = vcmp.lt.s32.totalorder %v10307_v34, 31  ;;  %v989_v26 = vsel %vm739_vm8, %v10259_v9, 0.0 }
  0xc7   : >> { %999 = vrot.lane.b32.xlu0 %v979_v8, %s9338_s7  ;;  %v1359_v8 = vsel %vm14973_vm3, %v1343_v21, 0.0  ;;  %v981_v20 = vsel %vm731_vm11, %v10240_v53, 0.0  ;;  %v1354_v53 = vsel %vm14974_vm15, %v10086_v5, 0.0  ;;  %vm14976_vm3 = vcmp.gt.s32.totalorder %v9847_v7, 0 }
  0xc8   : >> { %vm14977_vm15 = vcmp.gt.s32.totalorder %v9863_v23, 0 }
  0xc9   : >> { %1017 = vrot.lane.b32.xlu1 %v988_v24, %s9338_s7  ;;  %v982_v24 = vsel %vm732_vm10, %v10201_v25, 0.0  ;;  %v990_v25 = vsel %vm740_vm7, %v10244_v54, 0.0 }
  0xcb   : >> { %1015 = vrot.lane.b32.xlu0 %v987_v3, %s9338_s7 }
  0xcd   : >> { %1369 = vrot.lane.b32.xlu1 %v1352_v63, %s9342_s11  ;;  %v7817_v63 = vld [vmem:[%s9699_s5 + $0x98] sm:$0xff] }
  0xce   : >> { %v1346_v54 = vsel %vm743_vm1, %v7817_v63, 0.0 }
  0xcf   : >> { %1367 = vrot.lane.b32.xlu0 %v1351_v12, %s9342_s11  ;;  %v7816_v12 = vld [vmem:[%s9699_s5 + $0x90] sm:$0xff]  ;;  %v1362_v9 = vsel %vm14976_vm3, %v1346_v54, 0.0  ;;  %vm715_vm3 = vcmp.gt.s32.totalorder %v10307_v34, 0 }
  0xd0   : >> { %v1079_v42 = vsel %vm715_vm3, %v10090_v55, 0.0 }
  0xd1   : >> { %1385 = vrot.lane.b32.xlu1 %v1360_v38, %s9342_s11 }
  0xd3   : >> { %v10309_v51 = vpop.permute.xlu1 %877  ;;  %1383 = vrot.lane.b32.xlu0 %v1359_v8, %s9342_s11  ;;  %v1353_v8 = vsel %vm14975_vm6, %v10090_v55, 0.0  ;;  %vm716_vm6 = vcmp.gt.s32.totalorder %v10295_v10, 0 }
  0xd4   : >> { %v10311_v62 = vpop.permute.xlu0 %861 }
  0xd5   : >> { %1005 = vrot.lane.b32.xlu1 %v982_v24, %s9338_s7  ;;  %v1345_v24 = vsel %vm743_vm1, %v7816_v12, 0.0  ;;  %v1077_v12 = vsel %vm713_vm14, %v9937_v56, 0.0  ;;  %v7823_v56 = vld [vmem:[%s9699_s5 + $0x41] sm:$0xff] }
  0xd6   : >> { %v1361_v63 = vsel %vm14977_vm15, %v1345_v24, 0.0  ;;  %v1087_v55 = vsel %vm14840_vm13, %v1345_v24, 0.0  ;;  %vm14981_vm15 = vcmp.lt.s32.totalorder %v9787_v15, 31  ;;  %vm14995_vm13 = vcmp.gt.s32.totalorder %v9837_v57, 0 }
  0xd7   : >> { %v10322_v49 = vpop.permute.xlu1 %879  ;;  %1003 = vrot.lane.b32.xlu0 %v981_v20, %s9338_s7 }
  0xd8   : >> { %v10324_v18 = vpop.permute.xlu0 %863 }
  0xd9   : >> { %1021 = vrot.lane.b32.xlu1 %v990_v25, %s9338_s7 }
  0xdb   : >> { %v10335_v3 = vpop.permute.xlu1 %867  ;;  %1019 = vrot.lane.b32.xlu0 %v989_v26, %s9338_s7  ;;  %v1078_v26 = vsel %vm714_vm0, %v10007_v36, 0.0  ;;  %v1085_v36 = vsel %vm721_vm5, %v1343_v21, 0.0  ;;  %v7831_v21 = vld [vmem:[%s9699_s5 + $0x81] sm:$0xff]  ;;  %s9351_s7 = smov (%p478_p4), 96  }
  0xdc   : >> { %v10340_v27 = vpop.permute.xlu0 %865 }
  0xdd   : >> { %1373 = vrot.lane.b32.xlu1 %v1354_v53, %s9342_s11 }
  0xdf   : >> { %v10351_v38 = vpop.permute.xlu1 %883  ;;  %1371 = vrot.lane.b32.xlu0 %v1353_v8, %s9342_s11  ;;  %v1086_v8 = vsel %vm722_vm4, %v1344_v13, 0.0 }
  0xe0   : >> { %v10362_v20 = vpop.permute.xlu0 %881 }
  0xe1   : >> { %1389 = vrot.lane.b32.xlu1 %v1362_v9, %s9342_s11 }
  0xe3   : >> { %v10366_v25 = vpop.permute.xlu1 %993  ;;  %1387 = vrot.lane.b32.xlu0 %v1361_v63, %s9342_s11  ;;  %v10391_v63 = vsel %vm743_vm1, %v7824_v29, 0.0  ;;  %v10408_v29 = vsel %vm743_vm1, %v7832_v35, 0.0  ;;  %v1080_v35 = vsel %vm716_vm6, %v10086_v5, 0.0  ;;  %v9120_v5 = vld [vmem:[%s14778_s1] sm:$0xff]  }
  0xe4   : >> { %v10375_v53 = vpop.permute.xlu0 %991  ;;  %8557 = vmatprep.subr.bf16.mxu0 %v9120_v5  ;;  %8989 = vmatprep.subr.bf16.mxu1 %v9120_v5 }
  0xe5   : >> { %1099 = vrot.lane.b32.xlu1 %v1078_v26, %s9339_s8  ;;  %8558 = vmatpush3.bf16.msra.mxu0 %v9120_v5 }
  0xe6   : >> { %8997 = vmatpush3.bf16.msra.mxu1 %v9120_v5  ;;  %v9122_v5 = vld [vmem:[%s14778_s1 + $0x10] sm:$0xff]  }
  0xe7   : >> { %v10382_v9 = vpop.permute.xlu1 %1009  ;;  %1097 = vrot.lane.b32.xlu0 %v1077_v12, %s9339_s8  ;;  %v10404_v12 = vsel %vm743_vm1, %v7823_v56, 0.0 }
  0xe8   : >> { %v10393_v26 = vpop.permute.xlu0 %1007 }
  0xe9   : >> { %1115 = vrot.lane.b32.xlu1 %v1086_v8, %s9339_s8 }
  0xeb   : >> { %1113 = vrot.lane.b32.xlu0 %v1085_v36, %s9339_s8  ;;  %v10400_v13 = vpop.permute.xlu1 %997  ;;  %v10420_v36 = vsel %vm743_vm1, %v7831_v21, 0.0  ;;  %v1088_v21 = vsel %vm724_vm9, %v1346_v54, 0.0  ;;  %v10450_v54 = vsel %vm743_vm1, %v7826_v48, 0.0 }
  0xed   : >> { %1451 = vrot.lane.b32.xlu1 %v10391_v63, %s9343_s12  ;;  %v10414_v8 = vpop.permute.xlu0 %995 }
  0xee   : >> { %14978 = vst [vmem:[#allocation28_spill] sm:$0xff] %v10414_v8  ;;  %v746_v8 = vld [vmem:[%s9699_s5 + $0x8] sm:$0xff] }
  0xef   : >> { %1449 = vrot.lane.b32.xlu0 %v10404_v12, %s9343_s12 }
  0xf1   : >> { %1467 = vrot.lane.b32.xlu1 %v10408_v29, %s9343_s12 }
  0xf3   : >> { %v10425_v56 = vpop.permute.xlu1 %1013  ;;  %1465 = vrot.lane.b32.xlu0 %v10420_v36, %s9343_s12 }
  0xf5   : >> { %1103 = vrot.lane.b32.xlu1 %v1080_v35, %s9339_s8  ;;  %v10439_v52 = vpop.permute.xlu0 %1011  ;;  %v9121_v35 = vld [vmem:[%s14778_s1 + $0x8] sm:$0xff]  }
  0xf6   : >> { %8559 = vmatprep.subr.bf16.mxu0 %v9121_v35  ;;  %8990 = vmatprep.subr.bf16.mxu1 %v9121_v35 }
  0xf7   : >> { %v10441_v19 = vpop.permute.xlu1 %1091  ;;  %1101 = vrot.lane.b32.xlu0 %v1079_v42, %s9339_s8  ;;  %v7825_v42 = vld [vmem:[%s9699_s5 + $0x51] sm:$0xff]  ;;  %8560 = vmatpush3.bf16.msra.mxu0 %v9121_v35 }
  0xf8   : >> { %v10466_v48 = vsel %vm743_vm1, %v7825_v42, 0.0  ;;  %8998 = vmatpush3.bf16.msra.mxu1 %v9121_v35  ;;  %8561 = vmatprep.subr.bf16.mxu0 %v9122_v5  ;;  %v10486_v42 = vsel %vm743_vm1, %v7833_v17, 0.0  ;;  %v9123_v35 = vld [vmem:[%s14778_s1 + $0x18] sm:$0xff]   ;;  %v9124_v17 = vld [vmem:[%s14778_s1 + $0x20] sm:$0xff]  }
  0xf9   : >> { %1119 = vrot.lane.b32.xlu1 %v1088_v21, %s9339_s8  ;;  %v10455_v50 = vpop.permute.xlu0 %1089  ;;  %v7834_v21 = vld [vmem:[%s9699_s5 + $0x99] sm:$0xff]  ;;  %8991 = vmatprep.subr.bf16.mxu1 %v9122_v5 }
  0xfa   : >> { %v10470_v24 = vsel %vm743_vm1, %v7834_v21, 0.0 }
  0xfb   : >> { %v10457_v58 = vpop.permute.xlu1 %1107  ;;  %1117 = vrot.lane.b32.xlu0 %v1087_v55, %s9339_s8  ;;  %8562 = vmatpush3.bf16.msra.mxu0 %v9122_v5 }
  0xfc   : >> { %8999 = vmatpush3.bf16.msra.mxu1 %v9122_v5  ;;  %8563 = vmatprep.subr.bf16.mxu0 %v9123_v35 }
  0xfd   : >> { %1455 = vrot.lane.b32.xlu1 %v10450_v54, %s9343_s12  ;;  %v10475_v22 = vpop.permute.xlu0 %1105  ;;  %8992 = vmatprep.subr.bf16.mxu1 %v9123_v35 }
  0xff   : >> { %v10477_v55 = vpop.permute.xlu1 %1095  ;;  %1453 = vrot.lane.b32.xlu0 %v10466_v48, %s9343_s12  ;;  %8564 = vmatpush3.bf16.msra.mxu0 %v9123_v35 }
 0x100   : >> { %14979 = vst [vmem:[#allocation29_spill] sm:$0xff] %v10477_v55  ;;  %9000 = vmatpush3.bf16.msra.mxu1 %v9123_v35  ;;  %8565 = vmatprep.subr.bf16.mxu0 %v9124_v17 }
 0x101   : >> { %1471 = vrot.lane.b32.xlu1 %v10470_v24, %s9343_s12  ;;  %v10491_v21 = vpop.permute.xlu0 %1093  ;;  %8993 = vmatprep.subr.bf16.mxu1 %v9124_v17 }
 0x102   : >> { %14980 = vst [vmem:[#allocation30_spill] sm:$0xff] %v10491_v21 }
 0x103   : >> { %v1112_v1 = vpop.permute.xlu1 %1111  ;;  %1469 = vrot.lane.b32.xlu0 %v10486_v42, %s9343_s12  ;;  %8566 = vmatpush3.bf16.msra.mxu0 %v9124_v17 }
 0x104   : >> { %9001 = vmatpush3.bf16.msra.mxu1 %v9124_v17  ;;  %8567 = vmatprep.subr.bf16.mxu0 %v9125_v0  ;;  %v904_v17 = vadd.f32 %v10351_v38, %v10099_v45  ;;  %v10553_v45 = vsel %vm743_vm1, %v7848_v39, 0.0 }
 0x105   : >> { %1181 = vrot.lane.b32.xlu1 %v10391_v63, %s9340_s9  ;;  %v1110_v59 = vpop.permute.xlu0 %1109  ;;  %v1532_v63 = vsel %vm14981_vm15, %v10505_v31, 0.0  ;;  %8994 = vmatprep.subr.bf16.mxu1 %v9125_v0  ;;  %vm14982_vm15 = vcmp.lt.s32.totalorder %v9806_v32, 31  ;;  %v745_v32 = vld [vmem:[%s9699_s5] sm:$0xff] }
 0x106   : >> { %v1034_v38 = vadd.f32 %v10425_v56, %v904_v17  ;;  %v9127_v56 = vld [vmem:[%s14778_s1 + $0x38] sm:$0xff]  }
 0x107   : >> { %v10501_v5 = vpop.permute.xlu1 %1173  ;;  %1179 = vrot.lane.b32.xlu0 %v10404_v12, %s9340_s9  ;;  %v10525_v12 = vsel %vm743_vm1, %v7840_v44, 0.0  ;;  %8568 = vmatpush3.bf16.msra.mxu0 %v9125_v0 }
 0x108   : >> { %v1531_v44 = vsel %vm725_vm12, %v10525_v12, 0.0  ;;  %9002 = vmatpush3.bf16.msra.mxu1 %v9125_v0  ;;  %v764_v0 = vsel %vm743_vm1, %v746_v8, 0.0  ;;  %v1132_v55 = vadd.f32 %v1112_v1, %v1034_v38  ;;  %vm14984_vm12 = vcmp.lt.s32.totalorder %v9817_v40, 31  ;;  %v7843_v1 = vld [vmem:[%s9699_s5 + $0x5a] sm:$0xff] }
 0x109   : >> { %1197 = vrot.lane.b32.xlu1 %v10408_v29, %s9340_s9  ;;  %v10519_v35 = vpop.permute.xlu0 %1171  ;;  %v10529_v29 = vsel %vm743_vm1, %v7849_v30, 0.0  ;;  %v1539_v39 = vsel %vm14984_vm12, %v10553_v45, 0.0  ;;  %v763_v40 = vsel %vm743_vm1, %v745_v32, 0.0  ;;  %v7851_v38 = vld [vmem:[%s9699_s5 + $0x9a] sm:$0xff]  ;;  %vm14986_vm12 = vcmp.gt.s32.totalorder %v9781_v11, 0 }
 0x10a   : >> { %v1540_v30 = vsel %vm14982_vm15, %v10529_v29, 0.0  ;;  %vm14985_vm15 = vcmp.gt.s32.totalorder %v9787_v15, 0  ;;  %v811_v15 = vsel %vm14986_vm12, %v763_v40, 0.0  ;;  %vm14988_vm12 = vcmp.lt.s32.totalorder %v9837_v57, 31 }
 0x10b   : >> { %v10521_v21 = vpop.permute.xlu1 %1189  ;;  %1195 = vrot.lane.b32.xlu0 %v10420_v36, %s9340_s9  ;;  %v9126_v36 = vld [vmem:[%s14778_s1 + $0x30] sm:$0xff]   ;;  %v901_v40 = vadd.f32 %v10309_v51, %v9945_v60 }
 0x10c   : >> { %8569 = vmatprep.subr.bf16.mxu0 %v9126_v36  ;;  %8995 = vmatprep.subr.bf16.mxu1 %v9126_v36 }
 0x10d   : >> { %1549 = vrot.lane.b32.xlu1 %v1532_v63, %s9344_s27  ;;  %v10547_v63 = vpop.permute.xlu0 %1187  ;;  %8570 = vmatpush3.bf16.msra.mxu0 %v9126_v36 }
 0x10e   : >> { %9003 = vmatpush3.bf16.msra.mxu1 %v9126_v36  ;;  %8571 = vmatprep.subr.bf16.mxu0 %v9127_v56  ;;  %v7842_v36 = vld [vmem:[%s9699_s5 + $0x52] sm:$0xff] }
 0x10f   : >> { %v10549_v61 = vpop.permute.xlu1 %1177  ;;  %1547 = vrot.lane.b32.xlu0 %v1531_v44, %s9344_s27  ;;  %8996 = vmatprep.subr.bf16.mxu1 %v9127_v56 }
 0x110   : >> { %14983 = vst [vmem:[#allocation31_spill] sm:$0xff] %v10549_v61  ;;  %v903_v61 = vadd.f32 %v10362_v20, %v10104_v4  ;;  %v812_v4 = vsel %vm14985_vm15, %v764_v0, 0.0  ;;  %vm14987_vm15 = vcmp.lt.s32.totalorder %v9825_v47, 31 }
 0x111   : >> { %1565 = vrot.lane.b32.xlu1 %v1540_v30, %s9344_s27  ;;  %v10569_v17 = vpop.permute.xlu0 %1175  ;;  %8572 = vmatpush3.bf16.msra.mxu0 %v9127_v56  ;;  %v894_v32 = vadd.f32 %v10324_v18, %v812_v4  ;;  %v10606_v18 = vsel %vm743_vm1, %v7842_v36, 0.0 }
 0x112   : >> { %v1033_v8 = vadd.f32 %v10439_v52, %v903_v61  ;;  %9004 = vmatpush3.bf16.msra.mxu1 %v9127_v56 }
 0x113   : >> { %v1194_v44 = vpop.permute.xlu1 %1193  ;;  %1563 = vrot.lane.b32.xlu0 %v1539_v39, %s9344_s27 }
 0x114   : >> { %v10572_v30 = vadd.f32 %v1194_v44, %v1132_v55  ;;  %v1131_v20 = vadd.f32 %v1110_v59, %v1033_v8  ;;  %v10584_v55 = vsel %vm743_vm1, %v7843_v1, 0.0 }
 0x115   : >> { %1185 = vrot.lane.b32.xlu1 %v10450_v54, %s9340_s9  ;;  %v1192_v52 = vpop.permute.xlu0 %1191  ;;  %v1024_v54 = vadd.f32 %v10366_v25, %v894_v32  ;;  %v1534_v11 = vsel %vm14987_vm15, %v10584_v55, 0.0  ;;  %v902_v25 = vadd.f32 %v10322_v49, %v10021_v43  ;;  %vm14989_vm15 = vcmp.lt.s32.totalorder %v9847_v7, 31 }
 0x116   : >> { %v10591_v0 = vadd.f32 %v1192_v52, %v1131_v20  ;;  %v752_v52 = vld [vmem:[%s9699_s5 + $0x38] sm:$0xff] }
 0x117   : >> { %v872_v61 = vpop.permute.xlu1 %871  ;;  %1183 = vrot.lane.b32.xlu0 %v10466_v48, %s9340_s9  ;;  %v893_v48 = vadd.f32 %v10311_v62, %v811_v15  ;;  %v1122_v44 = vadd.f32 %v10441_v19, %v1024_v54  ;;  %v1533_v62 = vsel %vm14988_vm12, %v10606_v18, 0.0  ;;  %v748_v19 = vld [vmem:[%s9699_s5 + $0x18] sm:$0xff]  ;;  %v1032_v49 = vadd.f32 %v10382_v9, %v902_v25  ;;  %v751_v54 = vld [vmem:[%s9699_s5 + $0x30] sm:$0xff] }
 0x118   : >> { %v10594_v59 = vadd.f32 %v872_v61, %v10177_v46  ;;  %v10610_v46 = vsel %vm743_vm1, %v7851_v38, 0.0  ;;  %vm14990_vm12 = vcmp.lt.s32.totalorder %v9863_v23, 31  ;;  %v770_v38 = vsel %vm743_vm1, %v752_v52, 0.0  ;;  %v14999_v52 = vld [vmem:[#allocation31_spill] sm:$0xff] }
 0x119   : >> { %1201 = vrot.lane.b32.xlu1 %v10470_v24, %s9340_s9  ;;  %v870_v39 = vpop.permute.xlu0 %869  ;;  %v7850_v24 = vld [vmem:[%s9699_s5 + $0x92] sm:$0xff]  ;;  %v1542_v43 = vsel %vm14989_vm15, %v10610_v46, 0.0  ;;  %vm14991_vm15 = vcmp.lt.s32.totalorder %v10152_v14, 31 }
 0x11a   : >> { %v10618_v8 = vadd.f32 %v870_v39, %v10182_v6  ;;  %v1023_v6 = vadd.f32 %v10375_v53, %v893_v48  ;;  %v1130_v53 = vadd.f32 %v10457_v58, %v1032_v49  ;;  %v747_v58 = vld [vmem:[%s9699_s5 + $0x10] sm:$0xff]  ;;  %v14996_v49 = vld [vmem:[#allocation29_spill] sm:$0xff] }
 0x11b   : >> { %v888_v56 = vpop.permute.xlu1 %887  ;;  %1199 = vrot.lane.b32.xlu0 %v10486_v42, %s9340_s9  ;;  %v10638_v42 = vsel %vm743_vm1, %v7850_v24, 0.0  ;;  %s9348_s9 = smov (%p478_p4), 48  }
 0x11c   : >> { %v10621_v1 = vadd.f32 %v888_v56, %v10187_v28  ;;  %v1204_v28 = vadd.f32 %v10501_v5, %v1122_v44  ;;  %v1121_v7 = vadd.f32 %v10455_v50, %v1023_v6  ;;  %v766_v5 = vsel %vm743_vm1, %v748_v19, 0.0 }
 0x11d   : >> { %1553 = vrot.lane.b32.xlu1 %v1534_v11, %s9344_s27  ;;  %v886_v4 = vpop.permute.xlu0 %885  ;;  %v1541_v60 = vsel %vm14990_vm12, %v10638_v42, 0.0  ;;  %v1258_v50 = vsel %vm14991_vm15, %v10505_v31, 0.0  ;;  %v1212_v36 = vadd.f32 %v10521_v21, %v1130_v53  ;;  %vm14992_vm12 = vcmp.gt.s32.totalorder %v9825_v47, 0 }
 0x11e   : >> { %v10646_v9 = vadd.f32 %v886_v4, %v10192_v37  ;;  %v1031_v37 = vadd.f32 %v10393_v26, %v901_v40  ;;  %v1203_v51 = vadd.f32 %v10519_v35, %v1121_v7  ;;  %v814_v31 = vsel %vm14992_vm12, %v766_v5, 0.0  ;;  %v14997_v4 = vld [vmem:[#allocation26_spill] sm:$0xff] }
 0x11f   : >> { %v1272_v20 = vpop.permute.xlu1 %1271  ;;  %1551 = vrot.lane.b32.xlu0 %v1533_v62, %s9344_s27  ;;  %v765_v26 = vsel %vm743_vm1, %v747_v58, 0.0  ;;  %v818_v21 = vsel %vm716_vm6, %v770_v38, 0.0  ;;  %vm14993_vm15 = vcmp.lt.s32.totalorder %v10161_v33, 31  ;;  %v769_v47 = vsel %vm743_vm1, %v751_v54, 0.0  ;;  %v7819_v54 = vld [vmem:[%s9699_s5 + $0xa8] sm:$0xff] }
 0x120   : >> { %v10648_v61 = vadd.f32 %v1272_v20, %v1204_v28  ;;  %v1129_v23 = vadd.f32 %v10475_v22, %v1031_v37  ;;  %v1257_v22 = vsel %vm14993_vm15, %v10525_v12, 0.0  ;;  %vm14994_vm12 = vcmp.lt.s32.totalorder %v10163_v41, 31  ;;  %v7811_v20 = vld [vmem:[%s9699_s5 + $0x68] sm:$0xff]  ;;  %v15001_v37 = vld [vmem:[#allocation30_spill] sm:$0xff] }
 0x121   : >> { %1569 = vrot.lane.b32.xlu1 %v1542_v43, %s9344_s27  ;;  %v1270_v15 = vpop.permute.xlu0 %1269  ;;  %v1266_v39 = vsel %vm14994_vm12, %v10529_v29, 0.0  ;;  %v896_v25 = vadd.f32 %v10335_v3, %v814_v31  ;;  %v817_v12 = vsel %vm715_vm3, %v769_v47, 0.0  ;;  %v1265_v3 = vsel %vm737_vm2, %v10553_v45, 0.0  ;;  %v14998_v45 = vld [vmem:[#allocation28_spill] sm:$0xff] }
 0x122   : >> { %v10668_v11 = vadd.f32 %v1270_v15, %v1203_v51  ;;  %v1211_v35 = vadd.f32 %v10547_v63, %v1129_v23  ;;  %v813_v63 = vsel %vm14995_vm13, %v765_v26, 0.0  ;;  %v1260_v43 = vsel %vm732_vm10, %v10584_v55, 0.0 }
 0x123   : >> { %v1288_v32 = vpop.permute.xlu1 %1287  ;;  %1567 = vrot.lane.b32.xlu0 %v1541_v60, %s9344_s27  ;;  %v1026_v29 = vadd.f32 %v10400_v13, %v896_v25  ;;  %v895_v6 = vadd.f32 %v10340_v27, %v813_v63  ;;  %v1259_v27 = vsel %vm731_vm11, %v10606_v18, 0.0  ;;  %v1268_v5 = vsel %vm740_vm7, %v10610_v46, 0.0  ;;  %v15003_v46 = vld [vmem:[#allocation23_spill] sm:$0xff] }
 0x124   : >> { %v10670_v48 = vadd.f32 %v1288_v32, %v1212_v36  ;;  %v1340_v58 = vsel %vm743_vm1, %v7811_v20, 0.0  ;;  %v15002_v36 = vld [vmem:[#allocation27_spill] sm:$0xff]  ;;  %v7810_v32 = vld [vmem:[%s9699_s5 + $0x60] sm:$0xff]  ;;  %v1267_v23 = vsel %vm739_vm8, %v10638_v42, 0.0 }
 0x125   : >> { %1279 = vrot.lane.b32.xlu1 %v1258_v50, %s9341_s10  ;;  %v1286_v56 = vpop.permute.xlu0 %1285  ;;  %v1124_v28 = vadd.f32 %v14996_v49, %v1026_v29  ;;  %v1025_v55 = vadd.f32 %v14998_v45, %v895_v6  ;;  %v1356_v31 = vsel %vm714_vm0, %v1340_v58, 0.0  ;;  %v7821_v29 = vld [vmem:[%s9699_s5 + $0xb8] sm:$0xff]  ;;  %vm15006_vm0 = vcmp.gt.s32.totalorder %v15003_v46, 0  ;;  %v7827_v58 = vld [vmem:[%s9699_s5 + $0x61] sm:$0xff] }
 0x126   : >> { %v10690_v44 = vadd.f32 %v1286_v56, %v1211_v35  ;;  %v1339_v35 = vsel %vm743_vm1, %v7810_v32, 0.0 }
 0x127   : >> { %v876_v24 = vpop.permute.xlu1 %875  ;;  %1277 = vrot.lane.b32.xlu0 %v1257_v22, %s9341_s10  ;;  %v1206_v7 = vadd.f32 %v14999_v52, %v1124_v28  ;;  %v1123_v51 = vadd.f32 %v15001_v37, %v1025_v55  ;;  %v1348_v22 = vsel %vm743_vm1, %v7819_v54, 0.0  ;;  %v1355_v42 = vsel %vm713_vm14, %v1339_v35, 0.0  ;;  %v7820_v28 = vld [vmem:[%s9699_s5 + $0xb0] sm:$0xff]  ;;  %v7835_v54 = vld [vmem:[%s9699_s5 + $0xa1] sm:$0xff] }
 0x128   : >> { %v10692_v62 = vadd.f32 %v876_v24, %v818_v21  ;;  %v1364_v56 = vsel %vm722_vm4, %v1348_v22, 0.0  ;;  %v7828_v52 = vld [vmem:[%s9699_s5 + $0x69] sm:$0xff]  ;;  %v7829_v22 = vld [vmem:[%s9699_s5 + $0x71] sm:$0xff]  ;;  %vm15007_vm14 = vcmp.lt.s32.totalorder %v10152_v14, 31  ;;  %vm15008_vm4 = vmmov %vm14993_vm15 }
 0x129   : >> { %1295 = vrot.lane.b32.xlu1 %v1266_v39, %s9341_s10  ;;  %v874_v19 = vpop.permute.xlu0 %873  ;;  %v1205_v18 = vadd.f32 %v10569_v17, %v1123_v51  ;;  %v7818_v39 = vld [vmem:[%s9699_s5 + $0xa0] sm:$0xff]  ;;  %v7836_v37 = vld [vmem:[%s9699_s5 + $0xa9] sm:$0xff] }
 0x12a   : >> { %v10709_v40 = vadd.f32 %v874_v19, %v817_v12  ;;  %v1347_v63 = vsel %vm743_vm1, %v7818_v39, 0.0  ;;  %v1446_v51 = vsel %vm743_vm1, %v7836_v37, 0.0  ;;  %v7838_v39 = vld [vmem:[%s9699_s5 + $0xb9] sm:$0xff] }
 0x12b   : >> { %v892_v57 = vpop.permute.xlu1 %891  ;;  %1293 = vrot.lane.b32.xlu0 %v1265_v3, %s9341_s10  ;;  %v1363_v3 = vsel %vm721_vm5, %v1347_v63, 0.0  ;;  %vm15009_vm5 = vmmov %vm14994_vm12  ;;  %v7846_v37 = vld [vmem:[%s9699_s5 + $0x72] sm:$0xff] }
 0x12c   : >> { %v10712_v13 = vadd.f32 %v892_v57, %v14997_v4  ;;  %v15005_v4 = vld [vmem:[#allocation25_spill] sm:$0xff] }
 0x12d   : >> { %1283 = vrot.lane.b32.xlu1 %v1260_v43, %s9341_s10  ;;  %v890_v60 = vpop.permute.xlu0 %889  ;;  %v15004_v43 = vld [vmem:[#allocation24_spill] sm:$0xff]  ;;  %v1357_v20 = vsel %vm715_vm3, %v15005_v4, 0.0 }
 0x12e   : >> { %v10729_v38 = vadd.f32 %v890_v60, %v15002_v36  ;;  %v1358_v19 = vsel %vm716_vm6, %v15004_v43, 0.0  ;;  %v7844_v43 = vld [vmem:[%s9699_s5 + $0x62] sm:$0xff] }
 0x12f   : >> { %v1276_v50 = vpop.permute.xlu1 %1275  ;;  %1281 = vrot.lane.b32.xlu0 %v1259_v27, %s9341_s10 }
 0x130   : >> { %v10731_v15 = vadd.f32 %v1276_v50, %v1206_v7 }
 0x131   : >> { %1299 = vrot.lane.b32.xlu1 %v1268_v5, %s9341_s10  ;;  %v1274_v26 = vpop.permute.xlu0 %1273  ;;  %v1438_v5 = vsel %vm743_vm1, %v7828_v52, 0.0 }
 0x132   : >> { %v10747_v47 = vadd.f32 %v1274_v26, %v1205_v18  ;;  %v7830_v18 = vld [vmem:[%s9699_s5 + $0x79] sm:$0xff] }
 0x133   : >> { %v1292_v21 = vpop.permute.xlu1 %1291  ;;  %1297 = vrot.lane.b32.xlu0 %v1267_v23, %s9341_s10  ;;  %v1440_v26 = vsel %vm743_vm1, %v7830_v18, 0.0  ;;  %s9349_s10 = smov (%p478_p4), 64  }
 0x134   : >> { %v10750_v17 = vadd.f32 %v1292_v21, %v10572_v30 }
 0x135   : >> { %1377 = vrot.lane.b32.xlu1 %v1356_v31, %s9342_s11  ;;  %v1290_v24 = vpop.permute.xlu0 %1289  ;;  %v1445_v31 = vsel %vm743_vm1, %v7835_v54, 0.0  ;;  %v1521_v54 = vsel %vm743_vm1, %v7846_v37, 0.0 }
 0x136   : >> { %v10762_v30 = vadd.f32 %v1290_v24, %v10591_v0  ;;  %v1350_v0 = vsel %vm743_vm1, %v7821_v29, 0.0  ;;  %v1439_v24 = vsel %vm743_vm1, %v7829_v22, 0.0  ;;  %v1537_v2 = vsel %vm731_vm11, %v1521_v54, 0.0 }
 0x137   : >> { %v1002_v25 = vpop.permute.xlu1 %1001  ;;  %1375 = vrot.lane.b32.xlu0 %v1355_v42, %s9342_s11  ;;  %v1366_v45 = vsel %vm724_vm9, %v1350_v0, 0.0 }
 0x138   : >> { %v10765_v12 = vadd.f32 %v1002_v25, %v10594_v59  ;;  %v1448_v25 = vsel %vm743_vm1, %v7838_v39, 0.0 }
 0x139   : >> { %1393 = vrot.lane.b32.xlu1 %v1364_v56, %s9342_s11  ;;  %v1000_v57 = vpop.permute.xlu0 %999  ;;  %v7845_v56 = vld [vmem:[%s9699_s5 + $0x6a] sm:$0xff] }
 0x13a   : >> { %v10778_v59 = vadd.f32 %v1000_v57, %v10618_v8 }
 0x13b   : >> { %v1018_v6 = vpop.permute.xlu1 %1017  ;;  %1391 = vrot.lane.b32.xlu0 %v1363_v3, %s9342_s11 }
 0x13c   : >> { %v10781_v49 = vadd.f32 %v1018_v6, %v10621_v1  ;;  %v1349_v1 = vsel %vm743_vm1, %v7820_v28, 0.0 }
 0x13d   : >> { %1381 = vrot.lane.b32.xlu1 %v1358_v19, %s9342_s11  ;;  %v1016_v55 = vpop.permute.xlu0 %1015  ;;  %v1365_v27 = vsel %vm15006_vm0, %v1349_v1, 0.0  ;;  %v7853_v19 = vld [vmem:[%s9699_s5 + $0xaa] sm:$0xff] }
 0x13e   : >> { %v10797_v7 = vadd.f32 %v1016_v55, %v10646_v9  ;;  %v1437_v9 = vsel %vm743_vm1, %v7827_v58, 0.0  ;;  %v1528_v4 = vsel %vm743_vm1, %v7853_v19, 0.0 }
 0x13f   : >> { %v10791_v8 = vpop.permute.xlu1 %1369  ;;  %1379 = vrot.lane.b32.xlu0 %v1357_v20, %s9342_s11  ;;  %v7852_v20 = vld [vmem:[%s9699_s5 + $0xa2] sm:$0xff]  ;;  %v1544_v55 = vsel %vm15009_vm5, %v1528_v4, 0.0 }
 0x141   : >> { %1397 = vrot.lane.b32.xlu1 %v1366_v45, %s9342_s11  ;;  %v10805_v60 = vpop.permute.xlu0 %1367  ;;  %v7847_v45 = vld [vmem:[%s9699_s5 + $0x7a] sm:$0xff] }
 0x143   : >> { %v10807_v50 = vpop.permute.xlu1 %1385  ;;  %1395 = vrot.lane.b32.xlu0 %v1365_v27, %s9342_s11  ;;  %v1527_v27 = vsel %vm743_vm1, %v7852_v20, 0.0  ;;  %s9350_s11 = smov (%p478_p4), 80  }
 0x144   : >> { %v1543_v33 = vsel %vm737_vm2, %v1527_v27, 0.0  ;;  %v1408_v27 = vadd.f32 %v10807_v50, %v10670_v48 }
 0x145   : >> { %1459 = vrot.lane.b32.xlu1 %v1438_v5, %s9343_s12  ;;  %v10817_v36 = vpop.permute.xlu0 %1383  ;;  %v1522_v5 = vsel %vm743_vm1, %v7847_v45, 0.0 }
 0x146   : >> { %v1538_v41 = vsel %vm732_vm10, %v1522_v5, 0.0 }
 0x147   : >> { %v1006_v32 = vpop.permute.xlu1 %1005  ;;  %1457 = vrot.lane.b32.xlu0 %v1437_v9, %s9343_s12  ;;  %v7855_v9 = vld [vmem:[%s9699_s5 + $0xba] sm:$0xff] }
 0x148   : >> { %v10822_v23 = vadd.f32 %v1006_v32, %v10692_v62 }
 0x149   : >> { %1475 = vrot.lane.b32.xlu1 %v1446_v51, %s9343_s12  ;;  %v1004_v21 = vpop.permute.xlu0 %1003 }
 0x14a   : >> { %v10833_v62 = vadd.f32 %v1004_v21, %v10709_v40  ;;  %v7837_v40 = vld [vmem:[%s9699_s5 + $0xb1] sm:$0xff] }
 0x14b   : >> { %v1022_v35 = vpop.permute.xlu1 %1021  ;;  %1473 = vrot.lane.b32.xlu0 %v1445_v31, %s9343_s12  ;;  %v1447_v57 = vsel %vm743_vm1, %v7837_v40, 0.0 }
 0x14c   : >> { %v10836_v42 = vadd.f32 %v1022_v35, %v10712_v13  ;;  %v1520_v13 = vsel %vm743_vm1, %v7845_v56, 0.0 }
 0x14d   : >> { %1463 = vrot.lane.b32.xlu1 %v1440_v26, %s9343_s12  ;;  %v1020_v63 = vpop.permute.xlu0 %1019  ;;  %v1536_v6 = vsel %vm15007_vm14, %v1520_v13, 0.0  ;;  %v7854_v26 = vld [vmem:[%s9699_s5 + $0xb2] sm:$0xff]  ;;  %s10966_s5 = scalar_lea.vmem [#allocation3], %s9688_s30  ;;  %s9347_s30 = smov (%p478_p4), 16  }
 0x14e   : >> { %v1037_v3 = vadd.f32 %v1020_v63, %v10729_v38  ;;  %v1519_v38 = vsel %vm743_vm1, %v7844_v43, 0.0  ;;  %v1529_v22 = vsel %vm743_vm1, %v7854_v26, 0.0 }
 0x14f   : >> { %v10845_v29 = vpop.permute.xlu1 %1373  ;;  %1461 = vrot.lane.b32.xlu0 %v1439_v24, %s9343_s12  ;;  %v1535_v14 = vsel %vm15008_vm4, %v1519_v38, 0.0 }
 0x151   : >> { %1479 = vrot.lane.b32.xlu1 %v1448_v25, %s9343_s12  ;;  %v10859_v0 = vpop.permute.xlu0 %1371 }
 0x153   : >> { %v10861_v28 = vpop.permute.xlu1 %1389  ;;  %1477 = vrot.lane.b32.xlu0 %v1447_v57, %s9343_s12 }
 0x155   : >> { %1557 = vrot.lane.b32.xlu1 %v1536_v6, %s9344_s27  ;;  %v10875_v1 = vpop.permute.xlu0 %1387 }
 0x157   : >> { %v1100_v52 = vpop.permute.xlu1 %1099  ;;  %1555 = vrot.lane.b32.xlu0 %v1535_v14, %s9344_s27 }
 0x158   : >> { %v1126_v58 = vadd.f32 %v1100_v52, %v10765_v12  ;;  %v1530_v12 = vsel %vm743_vm1, %v7855_v9, 0.0 }
 0x159   : >> { %1573 = vrot.lane.b32.xlu1 %v1544_v55, %s9344_s27  ;;  %v1098_v51 = vpop.permute.xlu0 %1097  ;;  %v1546_v10 = vsel %vm740_vm7, %v1530_v12, 0.0 }
 0x15a   : >> { %v1125_v18 = vadd.f32 %v1098_v51, %v10778_v59 }
 0x15b   : >> { %v1116_v32 = vpop.permute.xlu1 %1115  ;;  %1571 = vrot.lane.b32.xlu0 %v1543_v33, %s9344_s27  ;;  %v1407_v33 = vadd.f32 %v10817_v36, %v10690_v44  ;;  %v1402_v44 = vadd.f32 %v10845_v29, %v10731_v15 }
 0x15c   : >> { %v1134_v31 = vadd.f32 %v1116_v32, %v10781_v49  ;;  %v1545_v49 = vsel %vm739_vm8, %v1529_v22, 0.0  ;;  %v1410_v22 = vadd.f32 %v10861_v28, %v10750_v17 }
 0x15d   : >> { %1561 = vrot.lane.b32.xlu1 %v1538_v41, %s9344_s27  ;;  %v1114_v21 = vpop.permute.xlu0 %1113 }
 0x15e   : >> { %v1133_v59 = vadd.f32 %v1114_v21, %v10797_v7 }
 0x15f   : >> { %v1452_v35 = vpop.permute.xlu1 %1451  ;;  %1559 = vrot.lane.b32.xlu0 %v1537_v2, %s9344_s27 }
 0x161   : >> { %1577 = vrot.lane.b32.xlu1 %v1546_v10, %s9344_s27  ;;  %v1450_v39 = vpop.permute.xlu0 %1449  ;;  %v1401_v10 = vadd.f32 %v10859_v0, %v10747_v47 }
 0x163   : >> { %v1468_v34 = vpop.permute.xlu1 %1467  ;;  %1575 = vrot.lane.b32.xlu0 %v1545_v49, %s9344_s27 }
 0x164   : >> { %v1490_v41 = vadd.f32 %v1468_v34, %v1408_v27 }
 0x165   : >> { %v1466_v53 = vpop.permute.xlu0 %1465 }
 0x167   : >> { %v1104_v56 = vpop.permute.xlu1 %1103 }
 0x168   : >> { %v1128_v24 = vadd.f32 %v1104_v56, %v10822_v23 }
 0x169   : >> { %v1102_v25 = vpop.permute.xlu0 %1101 }
 0x16a   : >> { %v1127_v63 = vadd.f32 %v1102_v25, %v10833_v62  ;;  %v1400_v62 = vadd.f32 %v10791_v8, %v10648_v61  ;;  %v1489_v8 = vadd.f32 %v1466_v53, %v1407_v33  ;;  %v1409_v53 = vadd.f32 %v10875_v1, %v10762_v30 }
 0x16b   : >> { %v1120_v16 = vpop.permute.xlu1 %1119 }
 0x16c   : >> { %v1136_v7 = vadd.f32 %v1120_v16, %v10836_v42  ;;  %v1482_v55 = vadd.f32 %v1452_v35, %v1400_v62 }
 0x16d   : >> { %v1118_v40 = vpop.permute.xlu0 %1117 }
 0x16e   : >> { %v1135_v43 = vadd.f32 %v1118_v40, %v1037_v3  ;;  %v1399_v3 = vadd.f32 %v10805_v60, %v10668_v11 }
 0x16f   : >> { %v1456_v13 = vpop.permute.xlu1 %1455 }
 0x170   : >> { %v1481_v5 = vadd.f32 %v1450_v39, %v1399_v3  ;;  %v1484_v21 = vadd.f32 %v1456_v13, %v1402_v44 }
 0x171   : >> { %v1454_v19 = vpop.permute.xlu0 %1453 }
 0x173   : >> { %v1472_v46 = vpop.permute.xlu1 %1471 }
 0x174   : >> { %v1492_v56 = vadd.f32 %v1472_v46, %v1410_v22 }
 0x175   : >> { %v1470_v57 = vpop.permute.xlu0 %1469 }
 0x176   : >> { %v1491_v29 = vadd.f32 %v1470_v57, %v1409_v53 }
 0x177   : >> { %v1182_v6 = vpop.permute.xlu1 %1181 }
 0x178   : >> { %v10914_v38 = vadd.f32 %v1182_v6, %v1126_v58 }
 0x179   : >> { %v1180_v4 = vpop.permute.xlu0 %1179 }
 0x17a   : >> { %v10916_v45 = vadd.f32 %v1180_v4, %v1125_v18 }
 0x17b   : >> { %v1198_v20 = vpop.permute.xlu1 %1197 }
 0x17c   : >> { %v10918_v23 = vadd.f32 %v1198_v20, %v1134_v31 }
 0x17d   : >> { %v1196_v14 = vpop.permute.xlu0 %1195 }
 0x17e   : >> { %v10924_v52 = vadd.f32 %v1196_v14, %v1133_v59  ;;  %v1483_v59 = vadd.f32 %v1454_v19, %v1401_v10 }
 0x17f   : >> { %v1550_v42 = vpop.permute.xlu1 %1549 }
 0x180   : >> { %v1580_v58 = vadd.f32 %v1550_v42, %v1482_v55 }
 0x181   : >> { %v1548_v37 = vpop.permute.xlu0 %1547 }
 0x182   : >> { %v1579_v61 = vadd.f32 %v1548_v37, %v1481_v5 }
 0x183   : >> { %v1566_v9 = vpop.permute.xlu1 %1565 }
 0x184   : >> { %v1588_v51 = vadd.f32 %v1566_v9, %v1490_v41  ;;  %v1595_v32 = vpack.c.bf16 %v1580_v58, %v1579_v61 }
 0x185   : >> { %v1564_v54 = vpop.permute.xlu0 %1563 }
 0x186   : >> { %v1587_v60 = vadd.f32 %v1564_v54, %v1489_v8  ;;  %8573 = vmatprep.mubr.bf16.mxu0 %v1595_v32 }
 0x187   : >> { %v1186_v11 = vpop.permute.xlu1 %1185 }
 0x188   : >> { %v10930_v12 = vadd.f32 %v1186_v11, %v1128_v24  ;;  %v1599_v18 = vpack.c.bf16 %v1588_v51, %v1587_v60 }
 0x189   : >> { %v1184_v48 = vpop.permute.xlu0 %1183 }
 0x18a   : >> { %v10932_v31 = vadd.f32 %v1184_v48, %v1127_v63  ;;  %8581 = vmatprep.mubr.bf16.mxu1 %v1599_v18 }
 0x18b   : >> { %v1202_v50 = vpop.permute.xlu1 %1201 }
 0x18c   : >> { %v10934_v26 = vadd.f32 %v1202_v50, %v1136_v7 }
 0x18d   : >> { %v1200_v36 = vpop.permute.xlu0 %1199 }
 0x18e   : >> { %v10940_v35 = vadd.f32 %v1200_v36, %v1135_v43 }
 0x18f   : >> { %v1554_v2 = vpop.permute.xlu1 %1553 }
 0x190   : >> { %v1582_v49 = vadd.f32 %v1554_v2, %v1484_v21 }
 0x191   : >> { %v1552_v39 = vpop.permute.xlu0 %1551 }
 0x192   : >> { %v1581_v15 = vadd.f32 %v1552_v39, %v1483_v59 }
 0x193   : >> { %v1570_v34 = vpop.permute.xlu1 %1569 }
 0x194   : >> { %v1596_v24 = vpack.c.bf16 %v1582_v49, %v1581_v15  ;;  %v1590_v25 = vadd.f32 %v1570_v34, %v1492_v56 }
 0x195   : >> { %v1568_v16 = vpop.permute.xlu0 %1567 }
 0x196   : >> { %v1589_v0 = vadd.f32 %v1568_v16, %v1491_v29  ;;  %8574 = vmatmul.mubr.bf16.vlgmr.msra.gmra.mrb[0].mxu0 %v1596_v24 }
 0x197   : >> { %v1280_v47 = vpop.permute.xlu1 %1279 }
 0x198   : >> { %v1600_v63 = vpack.c.bf16 %v1590_v25, %v1589_v0  ;;  %v1306_v37 = vadd.f32 %v1280_v47, %v10914_v38 }
 0x199   : >> { %v1278_v7 = vpop.permute.xlu0 %1277 }
 0x19a   : >> { %8582 = vmatmul.mubr.bf16.vlgmr.msra.gmra.mrb[0].mxu1 %v1600_v63  ;;  %v1305_v9 = vadd.f32 %v1278_v7, %v10916_v45 }
 0x19b   : >> { %v1296_v40 = vpop.permute.xlu1 %1295 }
 0x19c   : >> { %v1314_v8 = vadd.f32 %v1296_v40, %v10918_v23 }
 0x19d   : >> { %v1294_v17 = vpop.permute.xlu0 %1293 }
 0x19e   : >> { %v1313_v54 = vadd.f32 %v1294_v17, %v10924_v52 }
 0x19f   : >> { %v1284_v28 = vpop.permute.xlu1 %1283 }
 0x1a0   : >> { %v1308_v44 = vadd.f32 %v1284_v28, %v10930_v12 }
 0x1a1   : >> { %v1282_v13 = vpop.permute.xlu0 %1281 }
 0x1a2   : >> { %v1307_v45 = vadd.f32 %v1282_v13, %v10932_v31 }
 0x1a3   : >> { %v1300_v43 = vpop.permute.xlu1 %1299 }
 0x1a4   : >> { %v1316_v52 = vadd.f32 %v1300_v43, %v10934_v26 }
 0x1a5   : >> { %v1298_v19 = vpop.permute.xlu0 %1297 }
 0x1a6   : >> { %v1315_v56 = vadd.f32 %v1298_v19, %v10940_v35  ;;  %v15010_v35 = vld [vmem:[#allocation4_spill] sm:$0xff] }
 0x1a7   : >> { %v1378_v6 = vpop.permute.xlu1 %1377 }
 0x1a8   : >> { %v1404_v33 = vadd.f32 %v1378_v6, %v1306_v37 }
 0x1a9   : >> { %v1376_v30 = vpop.permute.xlu0 %1375 }
 0x1aa   : >> { %v1403_v51 = vadd.f32 %v1376_v30, %v1305_v9 }
 0x1ab   : >> { %v1394_v1 = vpop.permute.xlu1 %1393 }
 0x1ac   : >> { %v1412_v11 = vadd.f32 %v1394_v1, %v1314_v8  ;;  %v15011_v1 = vld [vmem:[#allocation5_spill] sm:$0xff] }
 0x1ad   : >> { %v1392_v46 = vpop.permute.xlu0 %1391 }
 0x1ae   : >> { %v1411_v36 = vadd.f32 %v1392_v46, %v1313_v54 }
 0x1af   : >> { %v1382_v57 = vpop.permute.xlu1 %1381 }
 0x1b0   : >> { %v1406_v10 = vadd.f32 %v1382_v57, %v1308_v44 }
 0x1b1   : >> { %v1380_v4 = vpop.permute.xlu0 %1379 }
 0x1b2   : >> { %v1405_v39 = vadd.f32 %v1380_v4, %v1307_v45 }
 0x1b3   : >> { %v1398_v20 = vpop.permute.xlu1 %1397 }
 0x1b4   : >> { %v1414_v12 = vadd.f32 %v1398_v20, %v1316_v52 }
 0x1b5   : >> { %v1396_v62 = vpop.permute.xlu0 %1395 }
 0x1b6   : >> { %v1413_v16 = vadd.f32 %v1396_v62, %v1315_v56 }
 0x1b7   : >> { %v1460_v14 = vpop.permute.xlu1 %1459 }
 0x1b8   : >> { %v1486_v32 = vadd.f32 %v1460_v14, %v1404_v33 }
 0x1b9   : >> { %v1458_v42 = vpop.permute.xlu0 %1457 }
 0x1ba   : >> { %v1485_v60 = vadd.f32 %v1458_v42, %v1403_v51 }
 0x1bb   : >> { %v1476_v3 = vpop.permute.xlu1 %1475 }
 0x1bc   : >> { %v1494_v38 = vadd.f32 %v1476_v3, %v1412_v11 }
 0x1bd   : >> { %v1474_v55 = vpop.permute.xlu0 %1473 }
 0x1be   : >> { %v1493_v21 = vadd.f32 %v1474_v55, %v1411_v36 }
 0x1bf   : >> { %v1464_v27 = vpop.permute.xlu1 %1463 }
 0x1c0   : >> { %v1488_v34 = vadd.f32 %v1464_v27, %v1406_v10 }
 0x1c1   : >> { %v1462_v5 = vpop.permute.xlu0 %1461 }
 0x1c2   : >> { %v1487_v15 = vadd.f32 %v1462_v5, %v1405_v39 }
 0x1c3   : >> { %v1480_v58 = vpop.permute.xlu1 %1479 }
 0x1c4   : >> { %v1496_v47 = vadd.f32 %v1480_v58, %v1414_v12 }
 0x1c5   : >> { %v1478_v41 = vpop.permute.xlu0 %1477 }
 0x1c6   : >> { %v1495_v63 = vadd.f32 %v1478_v41, %v1413_v16 }
 0x1c7   : >> { %v1558_v61 = vpop.permute.xlu1 %1557 }
 0x1c8   : >> { %v1584_v18 = vadd.f32 %v1558_v61, %v1486_v32 }
 0x1c9   : >> { %v1556_v48 = vpop.permute.xlu0 %1555 }
 0x1ca   : >> { %v1583_v2 = vadd.f32 %v1556_v48, %v1485_v60 }
 0x1cb   : >> { %v1574_v50 = vpop.permute.xlu1 %1573 }
 0x1cc   : >> { %v1597_v22 = vpack.c.bf16 %v1584_v18, %v1583_v2  ;;  %v1592_v23 = vadd.f32 %v1574_v50, %v1494_v38 }
 0x1cd   : >> { %v1572_v59 = vpop.permute.xlu0 %1571 }
 0x1ce   : >> { %v1591_v53 = vadd.f32 %v1572_v59, %v1493_v21  ;;  %8577 = vmatprep.mubr.bf16.mxu0 %v1597_v22 }
 0x1cf   : >> { %v1562_v49 = vpop.permute.xlu1 %1561 }
 0x1d0   : >> { %v1601_v29 = vpack.c.bf16 %v1592_v23, %v1591_v53  ;;  %v1586_v24 = vadd.f32 %v1562_v49, %v1488_v34 }
 0x1d1   : >> { %v1560_v25 = vpop.permute.xlu0 %1559 }
 0x1d2   : >> { %v1585_v0 = vadd.f32 %v1560_v25, %v1487_v15  ;;  %8585 = vmatprep.mubr.bf16.mxu1 %v1601_v29 }
 0x1d3   : >> { %v1578_v31 = vpop.permute.xlu1 %1577 }
 0x1d4   : >> { %v1598_v7 = vpack.c.bf16 %v1586_v24, %v1585_v0  ;;  %v1594_v40 = vadd.f32 %v1578_v31, %v1496_v47 }
 0x1d5   : >> { %v1576_v26 = vpop.permute.xlu0 %1575 }
 0x1d6   : >> { %v1593_v17 = vadd.f32 %v1576_v26, %v1495_v63  ;;  %8578 = vmatmul.mubr.bf16.gmra.mrb[4].mxu0 %v1598_v7 }
 0x1d8   : >> { %v1602_v28 = vpack.c.bf16 %v1594_v40, %v1593_v17 }
 0x1da   : >> { %8586 = vmatmul.mubr.bf16.gmra.mrb[4].mxu1 %v1602_v28 }
 0x269   : >> { %v8575_v13 = vpop.f32.mrb[0].mxu0 }
 0x26a   : >> { %v1770_v43 = vmul.f32 %v8575_v13, %v15010_v35  ;;  %v1701_v19 = vpop.f32.mrb[1].mxu0 }
 0x26b   : >> { %v1768_v6 = vmul.f32 %v15010_v35, %v1701_v19  ;;  %v8576_v30 = vpop.f32.mrb[2].mxu0 }
 0x26c   : >> { %v1790_v46 = vadd.f32 %v15011_v1, %v1770_v43  ;;  %v1771_v57 = vmul.f32 %v8576_v30, %v15010_v35  ;;  %v1704_v4 = vpop.f32.mrb[3].mxu0 }
 0x26d   : >> { %v1788_v20 = vadd.f32 %v15011_v1, %v1768_v6  ;;  %v1769_v62 = vmul.f32 %v15010_v35, %v1704_v4  ;;  %v8583_v14 = vpop.f32.mrb[0].mxu1 }
 0x26e   : >> { %vm1806_vm1 = vcmp.ge.f32.partialorder %v1790_v46, 0.0  ;;  %v1822_v42 = vmul.f32 0.001, %v1790_v46  ;;  %v1791_v3 = vadd.f32 %v15011_v1, %v1771_v57  ;;  %v1778_v55 = vmul.f32 %v8583_v14, %v15010_v35  ;;  %v1733_v27 = vpop.f32.mrb[1].mxu1 }
 0x26f   : >> { %vm1804_vm9 = vcmp.ge.f32.partialorder %v1788_v20, 0.0  ;;  %v1820_v5 = vmul.f32 0.001, %v1788_v20  ;;  %v1789_v58 = vadd.f32 %v15011_v1, %v1769_v62  ;;  %v1776_v37 = vmul.f32 %v15010_v35, %v1733_v27  ;;  %v8584_v9 = vpop.f32.mrb[2].mxu1 }
 0x270   : >> { %v1838_v33 = vsel %vm1806_vm1, %v1790_v46, %v1822_v42  ;;  %vm1807_vm13 = vcmp.ge.f32.partialorder %v1791_v3, 0.0  ;;  %v1823_v41 = vmul.f32 0.001, %v1791_v3  ;;  %v1798_v61 = vadd.f32 %v15011_v1, %v1778_v55  ;;  %v1736_v8 = vpop.f32.mrb[3].mxu1 }
 0x271   : >> { %1855 = vst [vmem:[%s10966_s5 + $0x10] sm:$0xff] %v1838_v33  ;;  %v1836_v51 = vsel %vm1804_vm9, %v1788_v20, %v1820_v5  ;;  %vm1805_vm2 = vcmp.ge.f32.partialorder %v1789_v58, 0.0  ;;  %v1821_v32 = vmul.f32 0.001, %v1789_v58  ;;  %v1796_v54 = vadd.f32 %v15011_v1, %v1776_v37 }
 0x272   : >> { %1853 = vst [vmem:[%s10966_s5] sm:$0xff] %v1836_v51  ;;  %v1839_v11 = vsel %vm1807_vm13, %v1791_v3, %v1823_v41  ;;  %vm1814_vm10 = vcmp.ge.f32.partialorder %v1798_v61, 0.0  ;;  %v1830_v60 = vmul.f32 0.001, %v1798_v61  ;;  %v1779_v18 = vmul.f32 %v8584_v9, %v15010_v35 }
 0x273   : >> { %1856 = vst [vmem:[%s10966_s5 + $0x18] sm:$0xff] %v1839_v11  ;;  %v1837_v48 = vsel %vm1805_vm2, %v1789_v58, %v1821_v32  ;;  %vm1812_vm11 = vcmp.ge.f32.partialorder %v1796_v54, 0.0  ;;  %v1828_v50 = vmul.f32 0.001, %v1796_v54  ;;  %v1777_v44 = vmul.f32 %v15010_v35, %v1736_v8 }
 0x274   : >> { %1854 = vst [vmem:[%s10966_s5 + $0x8] sm:$0xff] %v1837_v48  ;;  %v1846_v36 = vsel %vm1814_vm10, %v1798_v61, %v1830_v60  ;;  %v1799_v38 = vadd.f32 %v15011_v1, %v1779_v18  ;;  %v14846_v61 = vmov (%p478_p4), 0.0   ;;  %v15012_v48 = vld [vmem:[#allocation6_spill] sm:$0xff] (%p478_p4) }
 0x275   : >> { %1863 = vst [vmem:[%s10966_s5 + $0x50] sm:$0xff] %v1846_v36  ;;  %v1844_v2 = vsel %vm1812_vm11, %v1796_v54, %v1828_v50  ;;  %v1797_v45 = vadd.f32 %v15011_v1, %v1777_v44  ;;  %1869 = vst [vmem:[#allocation2] sm:$0xff] (%p478_p4), %v14846_v61  ;;  %vm14883_vm1 = vcmp.lt.s32.totalorder (%p478_p4), %v15012_v48, 7 }
 0x276   : >> { %1861 = vst [vmem:[%s10966_s5 + $0x40] sm:$0xff] %v1844_v2  ;;  %vm1815_vm7 = vcmp.ge.f32.partialorder %v1799_v38, 0.0  ;;  %v1831_v10 = vmul.f32 0.001, %v1799_v38  ;;  %1870 = vst [vmem:[#allocation2 + $0x8] sm:$0xff] (%p478_p4), %v14846_v61 }
 0x277   : >> { %vm1813_vm8 = vcmp.ge.f32.partialorder %v1797_v45, 0.0  ;;  %v1829_v21 = vmul.f32 0.001, %v1797_v45  ;;  %1871 = vst [vmem:[#allocation2 + $0x10] sm:$0x1] (%p478_p4), %v14846_v61  ;;  %1872 = vst [vmem:[#allocation2 + $0x111] sm:$0xff] (%p478_p4), %v14846_v61 }
 0x278   : >> { %v1847_v22 = vsel %vm1815_vm7, %v1799_v38, %v1831_v10  ;;  %1873 = vst [vmem:[#allocation2 + $0x119] sm:$0xff] (%p478_p4), %v14846_v61  ;;  %1874 = vst [vmem:[#allocation2 + $0x121] sm:$0x1] (%p478_p4), %v14846_v61 }
 0x279   : >> { %1864 = vst [vmem:[%s10966_s5 + $0x58] sm:$0xff] %v1847_v22  ;;  %v1845_v23 = vsel %vm1813_vm8, %v1797_v45, %v1829_v21 }
 0x27a   : >> { %1862 = vst [vmem:[%s10966_s5 + $0x48] sm:$0xff] %v1845_v23 }
 0x2a9   : >> { %v8579_v59 = vpop.f32.mrb[4].mxu0 }
 0x2aa   : >> { %v1774_v49 = vmul.f32 %v8579_v59, %v15010_v35  ;;  %v1717_v52 = vpop.f32.mrb[5].mxu0 }
 0x2ab   : >> { %v1772_v39 = vmul.f32 %v15010_v35, %v1717_v52  ;;  %v8580_v34 = vpop.f32.mrb[6].mxu0 }
 0x2ac   : >> { %v1794_v53 = vadd.f32 %v15011_v1, %v1774_v49  ;;  %v1775_v56 = vmul.f32 %v8580_v34, %v15010_v35  ;;  %v1720_v12 = vpop.f32.mrb[7].mxu0 }
 0x2ad   : >> { %v1792_v15 = vadd.f32 %v15011_v1, %v1772_v39  ;;  %v1773_v29 = vmul.f32 %v15010_v35, %v1720_v12  ;;  %v8587_v24 = vpop.f32.mrb[4].mxu1 }
 0x2ae   : >> { %vm1810_vm6 = vcmp.ge.f32.partialorder %v1794_v53, 0.0  ;;  %v1826_v25 = vmul.f32 0.001, %v1794_v53  ;;  %v1795_v31 = vadd.f32 %v15011_v1, %v1775_v56  ;;  %v1782_v16 = vmul.f32 %v8587_v24, %v15010_v35  ;;  %v1749_v47 = vpop.f32.mrb[5].mxu1 }
 0x2af   : >> { %vm1808_vm3 = vcmp.ge.f32.partialorder %v1792_v15, 0.0  ;;  %v1824_v0 = vmul.f32 0.001, %v1792_v15  ;;  %v1793_v63 = vadd.f32 %v15011_v1, %v1773_v29  ;;  %v1780_v7 = vmul.f32 %v15010_v35, %v1749_v47  ;;  %v8588_v40 = vpop.f32.mrb[6].mxu1 }
 0x2b0   : >> { %v1842_v26 = vsel %vm1810_vm6, %v1794_v53, %v1826_v25  ;;  %vm1811_vm15 = vcmp.ge.f32.partialorder %v1795_v31, 0.0  ;;  %v1827_v17 = vmul.f32 0.001, %v1795_v31  ;;  %v1802_v28 = vadd.f32 %v15011_v1, %v1782_v16  ;;  %v1752_v13 = vpop.f32.mrb[7].mxu1 }
 0x2b1   : >> { %1859 = vst [vmem:[%s10966_s5 + $0x30] sm:$0xff] %v1842_v26  ;;  %v1840_v43 = vsel %vm1808_vm3, %v1792_v15, %v1824_v0  ;;  %vm1809_vm12 = vcmp.ge.f32.partialorder %v1793_v63, 0.0  ;;  %v1825_v19 = vmul.f32 0.001, %v1793_v63  ;;  %v1800_v6 = vadd.f32 %v15011_v1, %v1780_v7 }
 0x2b2   : >> { %1857 = vst [vmem:[%s10966_s5 + $0x20] sm:$0xff] %v1840_v43  ;;  %v1843_v30 = vsel %vm1811_vm15, %v1795_v31, %v1827_v17  ;;  %vm1818_vm0 = vcmp.ge.f32.partialorder %v1802_v28, 0.0  ;;  %v1834_v46 = vmul.f32 0.001, %v1802_v28  ;;  %v1783_v57 = vmul.f32 %v8588_v40, %v15010_v35  ;;  %v3046_v17 = vld [vmem:[#allocation2 + $0x1] sm:$0xff] (%p478_p4) }
 0x2b3   : >> { %1860 = vst [vmem:[%s10966_s5 + $0x38] sm:$0xff] %v1843_v30  ;;  %v1841_v4 = vsel %vm1809_vm12, %v1793_v63, %v1825_v19  ;;  %vm1816_vm14 = vcmp.ge.f32.partialorder %v1800_v6, 0.0  ;;  %v1832_v20 = vmul.f32 0.001, %v1800_v6  ;;  %v1781_v62 = vmul.f32 %v15010_v35, %v1752_v13  ;;  %v3110_v13 = vld [vmem:[#allocation2 + $0x2] sm:$0xff] (%p478_p4) }
 0x2b4   : >> { %1858 = vst [vmem:[%s10966_s5 + $0x28] sm:$0xff] %v1841_v4  ;;  %v1850_v14 = vsel %vm1818_vm0, %v1802_v28, %v1834_v46  ;;  %v1803_v42 = vadd.f32 %v15011_v1, %v1783_v57  ;;  %480 = sbr.rel (!%p478_p4) target bundleno = 89 (0x59), region = 134  ;;  %v3047_v28 = vld [vmem:[#allocation2 + $0x9] sm:$0xff] (%p478_p4)  ;;  %3174 = vrot.lane.b32.xlu1 (%p478_p4), %v3110_v13, %s9346_s29  ;;  %5212 = vst [vmem:[#allocation2] sm:$0xff] (%p478_p4), %v14846_v61  ;;  %vm14884_vm3 = vmmov (%p478_p4), 1  }
 0x2b5   : >> { %1867 = vst [vmem:[%s10966_s5 + $0x70] sm:$0xff] %v1850_v14  ;;  %v1848_v3 = vsel %vm1816_vm14, %v1800_v6, %v1832_v20  ;;  %v1801_v55 = vadd.f32 %v15011_v1, %v1781_v62  ;;  %v9128_v46 = vpack.i.bf16 (%p478_p4), %v3047_v28, %v3046_v17  ;;  %5213 = vst [vmem:[#allocation2 + $0x8] sm:$0x1] (%p478_p4), %v14846_v61 }
 0x2b6   : >> { %1865 = vst [vmem:[%s10966_s5 + $0x60] sm:$0xff] %v1848_v3  ;;  %vm1819_vm4 = vcmp.ge.f32.partialorder %v1803_v42, 0.0  ;;  %v1835_v27 = vmul.f32 0.001, %v1803_v42 }
 0x2b7   : >> { %vm1817_vm5 = vcmp.ge.f32.partialorder %v1801_v55, 0.0  ;;  %v1833_v5 = vmul.f32 0.001, %v1801_v55  ;;  %9129 = vrot.lane.b32.xlu0 (%p478_p4), %v9128_v46, %s9347_s30 }
 0x2b8   : >> { %v1851_v58 = vsel %vm1819_vm4, %v1803_v42, %v1835_v27 }
 0x2b9   : >> { %1868 = vst [vmem:[%s10966_s5 + $0x78] sm:$0xff] %v1851_v58  ;;  %v1849_v37 = vsel %vm1817_vm5, %v1801_v55, %v1833_v5 }
 0x2ba   : >> { %1866 = vst [vmem:[%s10966_s5 + $0x68] sm:$0xff] %v1849_v37 }
 0x2c1   : > { %v1877_v9 = vld [vmem:[#allocation3 + $0x10] sm:$0xff]  ;;  %v1878_v33 = vld [vmem:[#allocation3 + $0x18] sm:$0xff]  ;;  %v11008_v41 = vld [vmem:[#allocation3 + $0x20] sm:$0xff] }
 0x2c2   : > { %v1881_v8 = vld [vmem:[#allocation3 + $0x30] sm:$0xff]  ;;  %v1882_v51 = vld [vmem:[#allocation3 + $0x38] sm:$0xff]  ;;  %v11016_v32 = vld [vmem:[#allocation3 + $0x40] sm:$0xff]  ;;  %v1893_v35 = vrot.slane %v1877_v9, 1  ;;  %v1894_v1 = vrot.slane %v1878_v33, 1  ;;  %v1895_v54 = vrot.slane %v11008_v41, 1 }
 0x2c3   : > { %v1897_v11 = vrot.slane %v1881_v8, 1  ;;  %v1898_v60 = vrot.slane %v1882_v51, 1  ;;  %v1899_v18 = vrot.slane %v11016_v32, 1  ;;  %v11021_v50 = vld [vmem:[#allocation3] sm:$0xff]  ;;  %v1876_v44 = vld [vmem:[#allocation3 + $0x8] sm:$0xff]  ;;  %v11036_v52 = vld [vmem:[#allocation3 + $0x50] sm:$0xff] }
 0x2c4   : > { %v1921_v36 = vsel %vm14883_vm1, %v1894_v1, %v1895_v54  ;;  %v1922_v38 = vsel %vm14883_vm1, %v1893_v35, %v1894_v1  ;;  %v1880_v2 = vld [vmem:[#allocation3 + $0x28] sm:$0xff]  ;;  %v1891_v45 = vrot.slane %v11021_v50, 1  ;;  %v1892_v10 = vrot.slane %v1876_v44, 1  ;;  %v11040_v12 = vld [vmem:[#allocation3 + $0x58] sm:$0xff]  ;;  %v1887_v24 = vld [vmem:[#allocation3 + $0x60] sm:$0xff] }
 0x2c5   : > { %v11028_v21 = vld [vmem:[#allocation3 + $0x48] sm:$0xff]  ;;  %v1917_v22 = vsel %vm14883_vm1, %v1898_v60, %v1899_v18  ;;  %v1918_v23 = vsel %vm14883_vm1, %v1897_v11, %v1898_v60  ;;  %v1928_v59 = vmax.f32 %v1877_v9, %v1922_v38  ;;  %v1929_v49 = vmax.f32 %v1878_v33, %v1921_v36  ;;  %v1889_v31 = vld [vmem:[#allocation3 + $0x70] sm:$0xff]  ;;  %v1890_v26 = vld [vmem:[#allocation3 + $0x78] sm:$0xff] }
 0x2c6   : > { %v1932_v39 = vmax.f32 %v1881_v8, %v1918_v23  ;;  %v1933_v34 = vmax.f32 %v1882_v51, %v1917_v22  ;;  %v1896_v53 = vrot.slane %v1880_v2, 1  ;;  %v1923_v56 = vsel %vm14883_vm1, %v1892_v10, %v1893_v35  ;;  %v1888_v25 = vld [vmem:[#allocation3 + $0x68] sm:$0xff]  ;;  %v11081_v36 = vld [vmem:[#allocation3 + $0x90] sm:$0xff] }
 0x2c7   : > { %v1924_v15 = vsel %vm14883_vm1, %v1891_v45, %v1892_v10  ;;  %v1927_v29 = vmax.f32 %v1876_v44, %v1923_v56  ;;  %v1900_v16 = vrot.slane %v11028_v21, 1  ;;  %v1901_v47 = vrot.slane %v11036_v52, 1  ;;  %v1986_v44 = vld [vmem:[#allocation3 + $0x88] sm:$0xff]  ;;  %v1988_v10 = vld [vmem:[#allocation3 + $0x98] sm:$0xff] }
 0x2c8   : > { %v1944_v0 = vmax.f32 %v1928_v59, %v1932_v39  ;;  %v1945_v63 = vmax.f32 %v1929_v49, %v1933_v34  ;;  %v1919_v7 = vsel %vm14883_vm1, %v1896_v53, %v1897_v11  ;;  %v1920_v40 = vsel %vm14883_vm1, %v1895_v54, %v1896_v53  ;;  %v11079_v54 = vld [vmem:[#allocation3 + $0x80] sm:$0xff]  ;;  %v1992_v59 = vld [vmem:[#allocation3 + $0xb8] sm:$0xff] }
 0x2c9   : > { %v1926_v43 = vmax.f32 %v11021_v50, %v1924_v15  ;;  %v1930_v19 = vmax.f32 %v11008_v41, %v1920_v40  ;;  %v1931_v6 = vmax.f32 %v1880_v2, %v1919_v7  ;;  %v1902_v30 = vrot.slane %v11040_v12, 1  ;;  %v1990_v2 = vld [vmem:[#allocation3 + $0xa8] sm:$0xff]  ;;  %v11085_v49 = vld [vmem:[#allocation3 + $0xc0] sm:$0xff] }
 0x2ca   : > { %1960 = vst [vmem:[#allocation3 + $0x10] sm:$0xff] %v1944_v0  ;;  %1961 = vst [vmem:[#allocation3 + $0x18] sm:$0xff] %v1945_v63  ;;  %v1903_v57 = vrot.slane %v1887_v24, 1  ;;  %v1904_v4 = vrot.slane %v1888_v25, 1  ;;  %v1905_v20 = vrot.slane %v1889_v31, 1  ;;  %v1906_v42 = vrot.slane %v1890_v26, 1 }
 0x2cb   : > { %v1942_v62 = vmax.f32 %v1926_v43, %v1930_v19  ;;  %v1943_v14 = vmax.f32 %v1927_v29, %v1931_v6  ;;  %v1914_v3 = vsel %vm14883_vm1, %v1901_v47, %v1902_v30  ;;  %v1915_v58 = vsel %vm14883_vm1, %v1900_v16, %v1901_v47  ;;  %v1994_v43 = vld [vmem:[#allocation3 + $0xc8] sm:$0xff]  ;;  %v11115_v19 = vld [vmem:[#allocation3 + $0xd0] sm:$0xff] }
 0x2cc   : > { %v1911_v55 = vsel %vm14883_vm1, %v1904_v4, %v1905_v20  ;;  %v1912_v27 = vsel %vm14883_vm1, %v1903_v57, %v1904_v4  ;;  %v1913_v5 = vsel %vm14883_vm1, %v1902_v30, %v1903_v57  ;;  %v1910_v37 = vsel %vm14883_vm1, %v1905_v20, %v1906_v42  ;;  %v1997_v4 = vld [vmem:[#allocation3 + $0xe0] sm:$0xff]  ;;  %v1998_v20 = vld [vmem:[#allocation3 + $0xe8] sm:$0xff] }
 0x2cd   : > { %1958 = vst [vmem:[#allocation3] sm:$0xff] %v1942_v62  ;;  %1959 = vst [vmem:[#allocation3 + $0x8] sm:$0xff] %v1943_v14  ;;  %v1916_v9 = vsel %vm14883_vm1, %v1899_v18, %v1900_v16  ;;  %v1925_v33 = vsel %vm14883_vm1, %v1906_v42, %v1891_v45  ;;  %v1935_v41 = vmax.f32 %v11028_v21, %v1915_v58  ;;  %v1989_v18 = vld [vmem:[#allocation3 + $0xa0] sm:$0xff]  ;;  %v1991_v45 = vld [vmem:[#allocation3 + $0xb0] sm:$0xff]  ;;  %v2002_v39 = vrot.slane %v1986_v44, 1 }
 0x2ce   : > { %v1934_v8 = vmax.f32 %v11016_v32, %v1916_v9  ;;  %v1936_v51 = vmax.f32 %v11036_v52, %v1914_v3  ;;  %v1937_v35 = vmax.f32 %v11040_v12, %v1913_v5  ;;  %v1938_v1 = vmax.f32 %v1887_v24, %v1912_v27 }
 0x2cf   : > { %v1939_v11 = vmax.f32 %v1888_v25, %v1911_v55  ;;  %v1940_v60 = vmax.f32 %v1889_v31, %v1910_v37  ;;  %v1941_v50 = vmax.f32 %v1890_v26, %v1925_v33  ;;  %v2001_v52 = vrot.slane %v11079_v54, 1  ;;  %v11121_v55 = vld [vmem:[#allocation3 + $0xf0] sm:$0xff] }
 0x2d0   : > { %v1950_v38 = vmax.f32 %v1934_v8, %v1938_v1  ;;  %v2003_v34 = vrot.slane %v11081_v36, 1  ;;  %v2005_v53 = vrot.slane %v1989_v18, 1  ;;  %v2006_v56 = vrot.slane %v1990_v2, 1  ;;  %v15013_v1 = vld [vmem:[#allocation7_spill] sm:$0xff] }
 0x2d1   : > { %v11083_v21 = vld [vmem:[#allocation3 + $0x10] ss:$2 sm:$0xff]  ;;  %v1951_v32 = vmax.f32 %v1935_v41, %v1939_v11  ;;  %v1952_v22 = vmax.f32 %v1936_v51, %v1940_v60  ;;  %v1953_v23 = vmax.f32 %v1937_v35, %v1941_v50  ;;  %v2007_v15 = vrot.slane %v1991_v45, 1 }
 0x2d2   : > { %1982 = vst [vmem:[#allocation2 + $0x19] sm:$0xff] %v11083_v21  ;;  %3068 = vrot.lane.b32.xlu1 %v11083_v21, %s9347_s30  ;;  %1966 = vst [vmem:[#allocation3 + $0x40] sm:$0xff] %v1950_v38  ;;  %v2004_v29 = vrot.slane %v1988_v10, 1  ;;  %v2008_v24 = vrot.slane %v1992_v59, 1  ;;  %v2009_v25 = vrot.slane %v11085_v49, 1  ;;  %v2027_v31 = vsel %vm14883_vm1, %v2005_v53, %v2006_v56 }
 0x2d3   : > { %1967 = vst [vmem:[#allocation3 + $0x48] sm:$0xff] %v1951_v32  ;;  %1968 = vst [vmem:[#allocation3 + $0x50] sm:$0xff] %v1952_v22  ;;  %v2030_v16 = vsel %vm14883_vm1, %v2002_v39, %v2003_v34  ;;  %v2031_v47 = vsel %vm14883_vm1, %v2001_v52, %v2002_v39  ;;  %v2026_v0 = vsel %vm14883_vm1, %v2006_v56, %v2007_v15  ;;  %v2762_v62 = vand.u32 15, %v15012_v48  ;;  %v2094_v39 = vld [vmem:[#allocation3 + $0x108] sm:$0xff] }
 0x2d4   : > { %1969 = vst [vmem:[#allocation3 + $0x58] sm:$0xff] %v1953_v23  ;;  %v11092_v12 = vld [vmem:[#allocation3] ss:$2 sm:$0xff]  ;;  %v2033_v63 = vmax.f32 %v11079_v54, %v2031_v47  ;;  %v2034_v7 = vmax.f32 %v1986_v44, %v2030_v16  ;;  %v2037_v40 = vmax.f32 %v1989_v18, %v2027_v31  ;;  %v2038_v26 = vmax.f32 %v1990_v2, %v2026_v0 }
 0x2d5   : > { %1981 = vst [vmem:[#allocation2 + $0x11] sm:$0xff] %v11092_v12  ;;  %3066 = vrot.lane.b32.xlu0 %v11092_v12, %s9347_s30  ;;  %v2024_v17 = vsel %vm14883_vm1, %v2008_v24, %v2009_v25  ;;  %v2025_v28 = vsel %vm14883_vm1, %v2007_v15, %v2008_v24  ;;  %v2028_v13 = vsel %vm14883_vm1, %v2004_v29, %v2005_v53  ;;  %v2010_v58 = vrot.slane %v1994_v43, 1  ;;  %v15018_v53 = vld [vmem:[#allocation10_spill] sm:$0xff]  ;;  %v2097_v0 = vld [vmem:[#allocation3 + $0x120] sm:$0xff] }
 0x2d6   : > { %v2049_v6 = vmax.f32 %v2033_v63, %v2037_v40  ;;  %v2029_v30 = vsel %vm14883_vm1, %v2003_v34, %v2004_v29  ;;  %v2036_v46 = vmax.f32 %v1988_v10, %v2028_v13  ;;  %v2039_v57 = vmax.f32 %v1991_v45, %v2025_v28  ;;  %v2000_v45 = vld [vmem:[#allocation3 + $0xf8] sm:$0xff]  ;;  %v11157_v29 = vld [vmem:[#allocation3 + $0x110] sm:$0xff]  ;;  %v2098_v63 = vld [vmem:[#allocation3 + $0x128] sm:$0xff] }
 0x2d7   : > { %v2050_v14 = vmax.f32 %v2034_v7, %v2038_v26  ;;  %v2035_v42 = vmax.f32 %v11081_v36, %v2029_v30  ;;  %v2040_v3 = vmax.f32 %v1992_v59, %v2024_v17  ;;  %v2011_v37 = vrot.slane %v11115_v19, 1  ;;  %v11138_v36 = vld [vmem:[#allocation3 + $0xd8] sm:$0xff]  ;;  %v11149_v59 = vld [vmem:[#allocation3 + $0x100] sm:$0xff]  ;;  %v2099_v30 = vld [vmem:[#allocation3 + $0x130] sm:$0xff] }
 0x2d8   : > { %2065 = vst [vmem:[#allocation3 + $0x80] sm:$0xff] %v2049_v6  ;;  %v2013_v41 = vrot.slane %v1997_v4, 1  ;;  %v2014_v8 = vrot.slane %v1998_v20, 1  ;;  %v2769_v11 = vand.u32 15, %v15013_v1  ;;  %v2015_v60 = vrot.slane %v11121_v55, 1  ;;  %v15014_v10 = vld [vmem:[#allocation11_spill] sm:$0xff] }
 0x2d9   : > { %2066 = vst [vmem:[#allocation3 + $0x88] sm:$0xff] %v2050_v14  ;;  %v2051_v9 = vmax.f32 %v2035_v42, %v2039_v57  ;;  %v2052_v33 = vmax.f32 %v2036_v46, %v2040_v3  ;;  %v2022_v50 = vsel %vm14883_vm1, %v2010_v58, %v2011_v37  ;;  %v2023_v44 = vsel %vm14883_vm1, %v2009_v25, %v2010_v58  ;;  %v2096_v46 = vld [vmem:[#allocation3 + $0x118] sm:$0xff]  ;;  %v11196_v14 = vld [vmem:[#allocation3 + $0x140] sm:$0xff] }
 0x2da   : > { %v11123_v27 = vld [vmem:[#allocation3 + $0x40] ss:$2 sm:$0xff]  ;;  %v2019_v18 = vsel %vm14883_vm1, %v2013_v41, %v2014_v8  ;;  %v2041_v38 = vmax.f32 %v11085_v49, %v2023_v44  ;;  %v2042_v2 = vmax.f32 %v1994_v43, %v2022_v50  ;;  %v2776_v32 = vand.u32 15, %v15014_v10 }
 0x2db   : > { %v11125_v5 = vld [vmem:[#allocation3 + $0x50] ss:$2 sm:$0xff]  ;;  %1983 = vst [vmem:[#allocation2 + $0x21] sm:$0xff] %v11123_v27  ;;  %2067 = vst [vmem:[#allocation3 + $0x90] sm:$0xff] %v2051_v9  ;;  %v2018_v22 = vsel %vm14883_vm1, %v2014_v8, %v2015_v60  ;;  %v2045_v23 = vmax.f32 %v1997_v4, %v2019_v18  ;;  %vm11151_vm9 = vcmp.gt.s32.totalorder %v2762_v62, 0  ;;  %v15015_v34 = vmov 0 }
 0x2dc   : > { %1984 = vst [vmem:[#allocation2 + $0x29] sm:$0xff] %v11125_v5  ;;  %v11130_v51 = vld [vmem:[#allocation2 + $0x12] sm:$0xff]  ;;  %2068 = vst [vmem:[#allocation3 + $0x98] sm:$0xff] %v2052_v33  ;;  %v15016_v34 = vsel %vm11151_vm9, 4294967295, %v15015_v34  ;;  %v2783_v56 = vand.u32 15, %v15018_v53  ;;  %v2046_v15 = vmax.f32 %v1998_v20, %v2018_v22  ;;  %v2012_v49 = vrot.slane %v11138_v36, 1 }
 0x2dd   : > { %v2985_v35 = vld [vmem:[#allocation2 + $0x18] sm:$0xff]  ;;  %3178 = vrot.lane.b32.xlu1 %v11130_v51, %s9346_s29  ;;  %15017 = vst [vmem:[#allocation4_spill] sm:$0xff] %v15016_v34  ;;  %v2984_v24 = vld [vmem:[#allocation2 + $0x10] sm:$0xff]  ;;  %vm11159_vm13 = vcmp.lt.s32.totalorder %v2769_v11, 15  ;;  %v2057_v16 = vmax.f32 %v2041_v38, %v2045_v23  ;;  %v2016_v47 = vrot.slane %v2000_v45, 1  ;;  %v14842_v26 = vrot.slane %v11149_v59, 1 }
 0x2de   : > { %3242 = vrot.lane.b32.xlu0 %v2985_v35, %s9348_s9  ;;  %v11163_v31 = vld [vmem:[#allocation2 + $0xa] sm:$0xff]  ;;  %v2058_v7 = vmax.f32 %v2042_v2, %v2046_v15  ;;  %v2020_v40 = vsel %vm14883_vm1, %v2012_v49, %v2013_v41  ;;  %v2110_v17 = vrot.slane %v2094_v39, 1  ;;  %v2021_v43 = vsel %vm14883_vm1, %v2011_v37, %v2012_v49  ;;  %v2100_v62 = vld [vmem:[#allocation3 + $0x138] sm:$0xff]  ;;  %vm7906_vm15 = vmpackc.low %vm11159_vm13, %vm14884_vm3 }
 0x2df   : > { %2073 = vst [vmem:[#allocation3 + $0xc0] sm:$0xff] %v2057_v16  ;;  %v2017_v13 = vsel %vm14883_vm1, %v2015_v60, %v2016_v47  ;;  %v2044_v6 = vmax.f32 %v11138_v36, %v2020_v40  ;;  %v3224_v57 = vsel %vm11151_vm9, %v2984_v24, 0.0  ;;  %vm11185_vm2 = vcmp.gt.s32.totalorder %v2776_v32, 0  ;;  %v11206_v33 = vld [vmem:[#allocation3 + $0x148] sm:$0xff]  ;;  %v11245_v24 = vld [vmem:[#allocation3 + $0x160] sm:$0xff] }
 0x2e0   : > { %v15021_v4 = vmov 0  ;;  %vm11189_vm10 = vcmp.lt.s32.totalorder %v2783_v56, 15  ;;  %v11193_v54 = vld [vmem:[#allocation3 + $0x80] ss:$2 sm:$0xff]  ;;  %2074 = vst [vmem:[#allocation3 + $0xc8] sm:$0xff] %v2058_v7  ;;  %v3159_v42 = vsel %vm11159_vm13, %v11163_v31, 0.0  ;;  %v2047_v58 = vmax.f32 %v11121_v55, %v2017_v13 }
 0x2e1   : > { %3290 = vrot.lane.b32.xlu1 %v11092_v12, %s9349_s10  ;;  %v2032_v12 = vsel %vm14883_vm1, %v2016_v47, %v2001_v52  ;;  %v15022_v4 = vsel %vm11185_vm2, 4294967295, %v15021_v4  ;;  %v2043_v52 = vmax.f32 %v11115_v19, %v2021_v43  ;;  %2089 = vst [vmem:[#allocation2 + $0x31] sm:$0xff] %v11193_v54  ;;  %v2111_v9 = vrot.slane %v11157_v29, 1  ;;  %vm11769_vm12 = vmpackc.low %vm11189_vm10, %vm14884_vm3 }
 0x2e2   : > { %15023 = vst [vmem:[#allocation5_spill] sm:$0xff] %v15022_v4  ;;  %v2048_v37 = vmax.f32 %v2000_v45, %v2032_v12  ;;  %v11210_v19 = vld [vmem:[#allocation2 + $0x20] sm:$0xff]  ;;  %v2113_v41 = vrot.slane %v2097_v0, 1  ;;  %v2114_v8 = vrot.slane %v2098_v63, 1  ;;  %v2115_v35 = vrot.slane %v2099_v30, 1  ;;  %v2106_v12 = vld [vmem:[#allocation3 + $0x168] sm:$0xff] }
 0x2e3   : > { %v11170_v28 = vld [vmem:[#allocation2 + $0x28] sm:$0xff]  ;;  %v11202_v3 = vld [vmem:[#allocation3 + $0x90] ss:$2 sm:$0xff]  ;;  %v2139_v55 = vsel %vm14883_vm1, %v14842_v26, %v2110_v17  ;;  %v2059_v11 = vmax.f32 %v2043_v52, %v2047_v58  ;;  %v2138_v50 = vsel %vm14883_vm1, %v2110_v17, %v2111_v9  ;;  %v2112_v45 = vrot.slane %v2096_v46, 1 }
 0x2e4   : > { %3246 = vrot.lane.b32.xlu0 %v11170_v28, %s9348_s9  ;;  %2090 = vst [vmem:[#allocation2 + $0x39] sm:$0xff] %v11202_v3  ;;  %v2060_v60 = vmax.f32 %v2044_v6, %v2048_v37  ;;  %v11220_v44 = vmax.f32 %v11149_v59, %v2139_v55  ;;  %v11224_v36 = vld [vmem:[#allocation2 + $0x1a] sm:$0xff]  ;;  %v2134_v18 = vsel %vm14883_vm1, %v2114_v8, %v2115_v35  ;;  %v2116_v23 = vrot.slane %v2100_v62, 1  ;;  %v11388_v26 = vld [vmem:[#allocation3 + $0x220] sm:$0xff] }
 0x2e5   : > { %3294 = vrot.lane.b32.xlu1 %v11123_v27, %s9349_s10  ;;  %v2135_v38 = vsel %vm14883_vm1, %v2113_v41, %v2114_v8  ;;  %v11230_v2 = vmax.f32 %v2094_v39, %v2138_v50  ;;  %2075 = vst [vmem:[#allocation3 + $0xd0] sm:$0xff] %v2059_v11  ;;  %v11232_v22 = vmax.f32 %v2098_v63, %v2134_v18  ;;  %v2117_v56 = vrot.slane %v11196_v14, 1  ;;  %v11268_v6 = vld [vmem:[#allocation3 + $0x170] sm:$0xff]  ;;  %v11291_v8 = vld [vmem:[#allocation3 + $0x1c0] sm:$0xff] }
 0x2e6   : > { %2076 = vst [vmem:[#allocation3 + $0xd8] sm:$0xff] %v2060_v60  ;;  %v2145_v32 = vmax.f32 %v2097_v0, %v2135_v38  ;;  %v3226_v15 = vsel %vm11185_vm2, %v11210_v19, 0.0  ;;  %v2136_v39 = vsel %vm14883_vm1, %v2112_v45, %v2113_v41  ;;  %v2137_v49 = vsel %vm14883_vm1, %v2111_v9, %v2112_v45  ;;  %v2210_v60 = vld [vmem:[#allocation3 + $0x1c8] sm:$0xff]  ;;  %v11306_v38 = vld [vmem:[#allocation3 + $0x1d0] sm:$0xff]  ;;  %v11633_v4 = vld [vmem:[#allocation3 + $0x1a0] sm:$0xff] }
 0x2e7   : > { %v2118_v31 = vrot.slane %v11206_v33, 1  ;;  %v11248_v16 = vld [vmem:[#allocation3 + $0xc0] ss:$2 sm:$0xff]  ;;  %v2158_v0 = vmax.f32 %v11230_v2, %v11232_v22  ;;  %v2132_v63 = vsel %vm14883_vm1, %v2116_v23, %v2117_v56  ;;  %v2133_v7 = vsel %vm14883_vm1, %v2115_v35, %v2116_v23 }
 0x2e8   : > { %3292 = vrot.lane.b32.xlu0 %v11083_v21, %s9349_s10  ;;  %v11235_v21 = vld [vmem:[#allocation3 + $0x150] sm:$0xff]  ;;  %v2157_v47 = vmax.f32 %v11220_v44, %v2145_v32  ;;  %2091 = vst [vmem:[#allocation2 + $0x41] sm:$0xff] %v11248_v16  ;;  %v11260_v40 = vmax.f32 %v11157_v29, %v2137_v49  ;;  %v11262_v17 = vmax.f32 %v2096_v46, %v2136_v39  ;;  %v14844_v52 = vrot.slane %v11245_v24, 1  ;;  %v2213_v23 = vld [vmem:[#allocation3 + $0x1e0] sm:$0xff] }
 0x2e9   : > { %3240 = vrot.lane.b32.xlu1 %v3224_v57, %s9348_s9  ;;  %v11264_v13 = vmax.f32 %v2099_v30, %v2133_v7  ;;  %v11266_v43 = vmax.f32 %v2100_v62, %v2132_v63  ;;  %v3161_v57 = vsel %vm11189_vm10, %v11224_v36, 0.0  ;;  %2174 = vst [vmem:[#allocation3 + $0x108] sm:$0xff] %v2158_v0  ;;  %v14843_v46 = vrot.slane %v11235_v21, 1 }
 0x2ea   : > { %2173 = vst [vmem:[#allocation3 + $0x100] sm:$0xff] %v2157_v47  ;;  %v2122_v62 = vrot.slane %v2106_v12, 1  ;;  %v2131_v58 = vsel %vm14883_vm1, %v2117_v56, %v2118_v31  ;;  %v2214_v56 = vld [vmem:[#allocation3 + $0x1e8] sm:$0xff]  ;;  %v11317_v47 = vld [vmem:[#allocation3 + $0x180] sm:$0xff]  ;;  %v15042_v1 = vrot.slane %v11149_v59, 1  ;;  %v15074_v20 = vmov 0 }
 0x2eb   : > { %v2159_v29 = vmax.f32 %v11260_v40, %v11264_v13  ;;  %v2160_v30 = vmax.f32 %v11262_v17, %v11266_v43  ;;  %v2130_v9 = vsel %vm14883_vm1, %v2118_v31, %v14843_v46  ;;  %v2149_v41 = vmax.f32 %v11196_v14, %v2131_v58  ;;  %v9142_v59 = vld [vmem:[%s14778_s1 + $0x90] sm:$0xff]  }
 0x2ec   : > { %3176 = vrot.lane.b32.xlu0 %v3159_v42, %s9346_s29  ;;  %v14845_v42 = vrot.slane %v11268_v6, 1  ;;  %v2127_v55 = vsel %vm14883_vm1, %v14844_v52, %v2122_v62  ;;  %v2150_v11 = vmax.f32 %v11206_v33, %v2130_v9  ;;  %v15027_v33 = vld [vmem:[#allocation14_spill] sm:$0xff]  ;;  %v14841_v31 = vrot.slane %v11291_v8, 1 }
 0x2ed   : > { %3244 = vrot.lane.b32.xlu1 %v3226_v15, %s9348_s9  ;;  %v11284_v37 = vld [vmem:[#allocation3 + $0xd0] ss:$2 sm:$0xff]  ;;  %2175 = vst [vmem:[#allocation3 + $0x110] sm:$0xff] %v2159_v29  ;;  %2176 = vst [vmem:[#allocation3 + $0x118] sm:$0xff] %v2160_v30  ;;  %v2153_v14 = vmax.f32 %v11245_v24, %v2127_v55  ;;  %v2161_v18 = vmax.f32 %v2145_v32, %v2149_v41  ;;  %v2797_v39 = vand.u32 15, %v15027_v33  ;;  %v2227_v29 = vrot.slane %v11306_v38, 1 }
 0x2ee   : > { %15026 = vst [vmem:[#allocation32_spill] sm:$0xff] %v11284_v37  ;;  %2092 = vst [vmem:[#allocation2 + $0x49] sm:$0xff] %v11284_v37  ;;  %v2126_v35 = vsel %vm14883_vm1, %v2122_v62, %v14845_v42  ;;  %v2162_v45 = vmax.f32 %v11232_v22, %v2150_v11  ;;  %v11309_v15 = vld [vmem:[#allocation3 + $0x1f0] sm:$0xff]  ;;  %v2212_v32 = vld [vmem:[#allocation3 + $0x1d8] sm:$0xff]  ;;  %v2229_v30 = vrot.slane %v2213_v23, 1  ;;  %v2230_v62 = vrot.slane %v2214_v56, 1 }
 0x2ef   : > { %v2154_v50 = vmax.f32 %v2106_v12, %v2126_v35  ;;  %2177 = vst [vmem:[#allocation3 + $0x120] sm:$0xff] %v2161_v18  ;;  %v2165_v22 = vmax.f32 %v2149_v41, %v2153_v14  ;;  %v2169_v63 = vmax.f32 %v2153_v14, %v11220_v44  ;;  %v2216_v12 = vld [vmem:[#allocation3 + $0x1f8] sm:$0xff]  ;;  %v3341_v58 = vsel %vm11159_vm13, %v11224_v36, 0.0  ;;  %v11334_v41 = vld [vmem:[#allocation2 + $0x2a] sm:$0xff] }
 0x2f0   : > { %3180 = vrot.lane.b32.xlu0 %v3161_v57, %s9346_s29  ;;  %2178 = vst [vmem:[#allocation3 + $0x128] sm:$0xff] %v2162_v45  ;;  %v2226_v57 = vrot.slane %v2210_v60, 1  ;;  %v2231_v44 = vrot.slane %v11309_v15, 1  ;;  %v2235_v36 = vsel %vm14883_vm1, %v2229_v30, %v2230_v62  ;;  %v11345_v14 = vld [vmem:[#allocation2 + $0x22] sm:$0xff]  ;;  %vm11368_vm11 = vcmp.lt.s32.totalorder %v2797_v39, 15  ;;  %v11386_v39 = vld [vmem:[#allocation3 + $0x210] sm:$0xff] }
 0x2f1   : > { %3070 = vrot.lane.b32.xlu1 %v11123_v27, %s9347_s30  ;;  %v11314_v49 = vld [vmem:[#allocation3 + $0x100] ss:$2 sm:$0xff]  ;;  %v2166_v0 = vmax.f32 %v2150_v11, %v2154_v50  ;;  %v2170_v7 = vmax.f32 %v2154_v50, %v11230_v2  ;;  %2181 = vst [vmem:[#allocation3 + $0x140] sm:$0xff] %v2165_v22  ;;  %2185 = vst [vmem:[#allocation3 + $0x160] sm:$0xff] %v2169_v63  ;;  %v14848_v2 = vrot.slane %v11317_v47, 1  ;;  %v2232_v11 = vrot.slane %v2216_v12, 1 }
 0x2f2   : > { %15028 = vst [vmem:[#allocation33_spill] sm:$0xff] %v11314_v49  ;;  %2197 = vst [vmem:[#allocation2 + $0x51] sm:$0xff] %v11314_v49  ;;  %v2238_v35 = vsel %vm14883_vm1, %v2226_v57, %v2227_v29  ;;  %v2239_v55 = vsel %vm14883_vm1, %v14841_v31, %v2226_v57  ;;  %v11354_v45 = vmax.f32 %v2213_v23, %v2235_v36  ;;  %v11356_v22 = vld [vmem:[#allocation3 + $0x158] sm:$0xff]  ;;  %v11384_v31 = vld [vmem:[#allocation3 + $0x208] sm:$0xff] }
 0x2f3   : > { %2182 = vst [vmem:[#allocation3 + $0x148] sm:$0xff] %v2166_v0  ;;  %2186 = vst [vmem:[#allocation3 + $0x168] sm:$0xff] %v2170_v7  ;;  %v11350_v50 = vmax.f32 %v11291_v8, %v2239_v55  ;;  %v11352_v18 = vmax.f32 %v2210_v60, %v2238_v35  ;;  %v11358_v0 = vld [vmem:[#allocation3 + $0x178] sm:$0xff]  ;;  %v15030_v60 = vmov 0  ;;  %v2233_v36 = vsel %vm14883_vm1, %v2231_v44, %v2232_v11  ;;  %v11382_v55 = vld [vmem:[#allocation3 + $0x200] sm:$0xff] }
 0x2f4   : > { %3296 = vrot.lane.b32.xlu0 %v11125_v5, %s9349_s10  ;;  %v11328_v9 = vld [vmem:[#allocation3 + $0x110] ss:$2 sm:$0xff]  ;;  %v15031_v60 = vsel %vm11368_vm11, 4294967295, %v15030_v60 }
 0x2f5   : > { %3356 = vrot.lane.b32.xlu1 %v11130_v51, %s9350_s11  ;;  %15029 = vst [vmem:[#allocation34_spill] sm:$0xff] %v11328_v9  ;;  %v2228_v51 = vrot.slane %v2212_v32, 1  ;;  %2198 = vst [vmem:[#allocation2 + $0x59] sm:$0xff] %v11328_v9  ;;  %v9138_v63 = vld [vmem:[%s14778_s1 + $0x80] sm:$0xff]   ;;  %v11372_v23 = vld [vmem:[#allocation2 + $0x48] sm:$0xff]  ;;  %v2273_v46 = vmax.f32 %v11350_v50, %v11354_v45 }
 0x2f6   : > { %v9139_v7 = vld [vmem:[%s14778_s1 + $0x40] sm:$0xff]   ;;  %15032 = vst [vmem:[#allocation35_spill] sm:$0xff] %v15031_v60  ;;  %15033 = vst [vmem:[#allocation36_spill] sm:$0xff] %v11372_v23  ;;  %8589 = vmatprep.subr.bf16.mxu1 %v9138_v63  ;;  %v2989_v49 = vld [vmem:[#allocation2 + $0x38] sm:$0xff] }
 0x2f7   : > { %v11374_v57 = vld [vmem:[#allocation2 + $0x42] sm:$0xff]  ;;  %v2236_v35 = vsel %vm14883_vm1, %v2228_v51, %v2229_v30  ;;  %2289 = vst [vmem:[#allocation3 + $0x1c0] sm:$0xff] %v2273_v46  ;;  %8621 = vmatprep.subr.bf16.mxu0 %v9139_v7  ;;  %8590 = vmatpush3.bf16.msra.mxu1 %v9138_v63  ;;  %v2120_v63 = vrot.slane %v11356_v22, 1 }
 0x2f8   : > { %3072 = vrot.lane.b32.xlu0 %v11125_v5, %s9347_s30  ;;  %v2234_v5 = vsel %vm14883_vm1, %v2230_v62, %v2231_v44  ;;  %15034 = vst [vmem:[#allocation37_spill] sm:$0xff] %v11374_v57  ;;  %v2248_v44 = vsel %vm14883_vm1, %v2232_v11, %v14848_v2  ;;  %v11398_v30 = vmax.f32 %v2212_v32, %v2236_v35  ;;  %v3343_v32 = vsel %vm11189_vm10, %v11334_v41, 0.0  ;;  %v15037_v35 = vld [vmem:[#allocation20_spill] sm:$0xff]  ;;  %v2314_v2 = vld [vmem:[#allocation3 + $0x228] sm:$0xff]  ;;  %v11441_v11 = vld [vmem:[#allocation3 + $0x230] sm:$0xff] }
 0x2f9   : > { %3074 = vrot.lane.b32.xlu1 %v11193_v54, %s9347_s30  ;;  %v11376_v62 = vmax.f32 %v2214_v56, %v2234_v5  ;;  %v2237_v56 = vsel %vm14883_vm1, %v2227_v29, %v2228_v51  ;;  %v11401_v5 = vld [vmem:[#allocation2 + $0x4a] sm:$0xff]  ;;  %v11411_v29 = vmax.f32 %v11309_v15, %v2233_v36  ;;  %v11413_v51 = vmax.f32 %v2216_v12, %v2248_v44  ;;  %v11469_v9 = vld [vmem:[#allocation3 + $0x218] sm:$0xff] }
 0x2fa   : > { %15035 = vst [vmem:[#allocation38_spill] sm:$0xff] %v11401_v5  ;;  %v11403_v52 = vld [vmem:[#allocation2 + $0x50] sm:$0xff]  ;;  %v11408_v61 = vmax.f32 %v11306_v38, %v2237_v56  ;;  %v15038_v56 = vmov 0.0   ;;  %v9140_v15 = vld [vmem:[%s14778_s1 + $0x88] sm:$0xff]   ;;  %8622 = vmatpush3.bf16.msra.mxu0 %v9139_v7  ;;  %v15039_v7 = vrot.slane %v11268_v6, 1  ;;  %v15040_v38 = vrot.slane %v11245_v24, 1 }
 0x2fb   : > { %15036 = vst [vmem:[#allocation39_spill] sm:$0xff] %v11403_v52  ;;  %v2274_v42 = vmax.f32 %v11352_v18, %v11376_v62  ;;  %5214 = vst [vmem:[#allocation2 + $0x49] sm:$0xff] %v15038_v56  ;;  %v9141_v12 = vld [vmem:[%s14778_s1 + $0x48] sm:$0xff]   ;;  %v2276_v46 = vmax.f32 %v11398_v30, %v11413_v51  ;;  %8591 = vmatprep.subr.bf16.mxu1 %v9140_v15  ;;  %v15045_v57 = vrot.slane %v11388_v26, 1  ;;  %v11655_v60 = vld [vmem:[#allocation2 + $0x40] sm:$0xff] }
 0x2fc   : > { %3358 = vrot.lane.b32.xlu0 %v3341_v58, %s9350_s11  ;;  %5215 = vst [vmem:[#allocation2 + $0x51] sm:$0x1] %v15038_v56  ;;  %v2194_v36 = vld [vmem:[#allocation3 + $0x140] ss:$2 sm:$0xff]  ;;  %v2275_v44 = vmax.f32 %v11408_v61, %v11411_v29  ;;  %v2124_v56 = vrot.slane %v11358_v0, 1  ;;  %v2326_v58 = vrot.slane %v11384_v31, 1  ;;  %8623 = vmatprep.subr.bf16.mxu0 %v9141_v12  ;;  %v2128_v53 = vsel %vm14883_vm1, %v2120_v63, %v15040_v38 }
 0x2fd   : > { %3360 = vrot.lane.b32.xlu1 %v11345_v14, %s9350_s11  ;;  %2290 = vst [vmem:[#allocation3 + $0x1c8] sm:$0xff] %v2274_v42  ;;  %2199 = vst [vmem:[#allocation2 + $0x61] sm:$0xff] %v2194_v36  ;;  %v15041_v42 = vrot.slane %v11235_v21, 1  ;;  %v2152_v10 = vmax.f32 %v11356_v22, %v2128_v53  ;;  %v11471_v38 = vld [vmem:[#allocation3 + $0x238] sm:$0xff]  ;;  %v11473_v5 = vld [vmem:[#allocation3 + $0x240] sm:$0xff]  ;;  %8592 = vmatpush3.bf16.msra.mxu1 %v9140_v15  ;;  %v2330_v53 = vrot.slane %v2314_v2, 1 }
 0x2fe   : > { %2291 = vst [vmem:[#allocation3 + $0x1d0] sm:$0xff] %v2275_v44  ;;  %2292 = vst [vmem:[#allocation3 + $0x1d8] sm:$0xff] %v2276_v46  ;;  %v2125_v36 = vsel %vm14883_vm1, %v15039_v7, %v2124_v56  ;;  %v2140_v44 = vsel %vm14883_vm1, %v2124_v56, %v15042_v1  ;;  %v9143_v1 = vld [vmem:[%s14778_s1 + $0x50] sm:$0xff]   ;;  %v15044_v22 = vrot.slane %v11382_v55, 1  ;;  %8624 = vmatpush3.bf16.msra.mxu0 %v9141_v12  ;;  %8593 = vmatprep.subr.bf16.mxu1 %v9142_v59  ;;  %v9145_v12 = vld [vmem:[%s14778_s1 + $0x58] sm:$0xff]  }
 0x2ff   : > { %v2129_v33 = vsel %vm14883_vm1, %v15041_v42, %v2120_v63  ;;  %v2155_v7 = vmax.f32 %v11268_v6, %v2125_v36  ;;  %v2156_v24 = vmax.f32 %v11358_v0, %v2140_v44  ;;  %v15043_v6 = vrot.slane %v11386_v39, 1  ;;  %8625 = vmatprep.subr.bf16.mxu0 %v9143_v1  ;;  %v11659_v37 = vld [vmem:[#allocation3 + $0x198] sm:$0xff] }
 0x300   : > { %3076 = vrot.lane.b32.xlu0 %v11202_v3, %s9347_s30  ;;  %v2151_v46 = vmax.f32 %v11235_v21, %v2129_v33  ;;  %v2331_v21 = vrot.slane %v11441_v11, 1  ;;  %v2355_v0 = vsel %vm14883_vm1, %v15044_v22, %v2326_v58  ;;  %v2164_v63 = vmax.f32 %v11266_v43, %v2152_v10  ;;  %v11543_v22 = vld [vmem:[#allocation3 + $0x260] sm:$0xff] }
 0x301   : > { %3182 = vrot.lane.b32.xlu1 %v11345_v14, %s9346_s29  ;;  %v2354_v33 = vsel %vm14883_vm1, %v2326_v58, %v15043_v6  ;;  %v2168_v42 = vmax.f32 %v2152_v10, %v2156_v24  ;;  %v2171_v36 = vmax.f32 %v2155_v7, %v11260_v40  ;;  %v2172_v44 = vmax.f32 %v2156_v24, %v11262_v17 }
 0x302   : > { %v2163_v15 = vmax.f32 %v11264_v13, %v2151_v46  ;;  %v2167_v56 = vmax.f32 %v2151_v46, %v2155_v7  ;;  %v2350_v6 = vsel %vm14883_vm1, %v2330_v53, %v2331_v21  ;;  %v2351_v58 = vsel %vm14883_vm1, %v15045_v57, %v2330_v53  ;;  %2180 = vst [vmem:[#allocation3 + $0x138] sm:$0xff] %v2164_v63  ;;  %v9144_v57 = vld [vmem:[%s14778_s1 + $0x98] sm:$0xff]   ;;  %v15052_v63 = vld [vmem:[#allocation15_spill] sm:$0xff] }
 0x303   : > { %2184 = vst [vmem:[#allocation3 + $0x158] sm:$0xff] %v2168_v42  ;;  %v11506_v10 = vmax.f32 %v11382_v55, %v2355_v0  ;;  %v11509_v40 = vmax.f32 %v11384_v31, %v2354_v33  ;;  %v11512_v17 = vmax.f32 %v11388_v26, %v2351_v58  ;;  %v11514_v43 = vmax.f32 %v2314_v2, %v2350_v6  ;;  %v11529_v2 = vld [vmem:[#allocation2 + $0x30] sm:$0xff] }
 0x304   : > { %3362 = vrot.lane.b32.xlu0 %v3343_v32, %s9350_s11  ;;  %v11503_v13 = vld [vmem:[#allocation3 + $0x1c0] ss:$2 sm:$0xff]  ;;  %2179 = vst [vmem:[#allocation3 + $0x130] sm:$0xff] %v2163_v15  ;;  %2183 = vst [vmem:[#allocation3 + $0x150] sm:$0xff] %v2167_v56  ;;  %v15047_v31 = vsel %vm11151_vm9, %v11210_v19, 0.0  ;;  %v15048_v46 = vand.u32 15, %v15037_v35  ;;  %8594 = vmatpush3.bf16.msra.mxu1 %v9142_v59 }
 0x305   : > { %15046 = vst [vmem:[#allocation40_spill] sm:$0xff] %v11503_v13  ;;  %v11516_v32 = vld [vmem:[#allocation3 + $0x248] sm:$0xff]  ;;  %3422 = vrot.lane.b32.xlu1 %v15047_v31, %s9351_s7  ;;  %v15049_v7 = vmov 0  ;;  %2307 = vst [vmem:[#allocation2 + $0x81] sm:$0xff] %v11503_v13  ;;  %v2328_v24 = vrot.slane %v11469_v9, 1  ;;  %v2332_v53 = vrot.slane %v11471_v38, 1  ;;  %8626 = vmatpush3.bf16.msra.mxu0 %v9143_v1  ;;  %v2374_v59 = vmax.f32 %v11509_v40, %v11514_v43 }
 0x306   : > { %vm11533_vm7 = vcmp.lt.s32.totalorder %v15048_v46, 15  ;;  %2187 = vst [vmem:[#allocation3 + $0x170] sm:$0xff] %v2171_v36  ;;  %2188 = vst [vmem:[#allocation3 + $0x178] sm:$0xff] %v2172_v44  ;;  %v2333_v33 = vrot.slane %v11473_v5, 1  ;;  %v11541_v19 = vld [vmem:[#allocation3 + $0x250] sm:$0xff]  ;;  %v11545_v0 = vld [vmem:[#allocation3 + $0x268] sm:$0xff]  ;;  %v2373_v36 = vmax.f32 %v11506_v10, %v11512_v17  ;;  %8595 = vmatprep.subr.bf16.mxu1 %v9144_v57  ;;  %8627 = vmatprep.subr.bf16.mxu0 %v9145_v12 }
 0x307   : > { %v15050_v7 = vsel %vm11533_vm7, 4294967295, %v15049_v7  ;;  %v11547_v15 = vld [vmem:[#allocation2 + $0x32] sm:$0xff]  ;;  %v2790_v56 = vand.u32 15, %v15052_v63  ;;  %v15054_v6 = vsel %vm11368_vm11, %v11334_v41, 0.0  ;;  %v2349_v31 = vsel %vm14883_vm1, %v2331_v21, %v2332_v53  ;;  %v9147_v21 = vld [vmem:[%s14778_s1 + $0x60] sm:$0xff]   ;;  %2390 = vst [vmem:[#allocation3 + $0x208] sm:$0xff] %v2374_v59 }
 0x308   : > { %15051 = vst [vmem:[#allocation41_spill] sm:$0xff] %v15050_v7  ;;  %v11550_v42 = vld [vmem:[#allocation3 + $0x1d0] ss:$2 sm:$0xff]  ;;  %3184 = vrot.lane.b32.xlu0 %v15054_v6, %s9346_s29  ;;  %v2348_v58 = vsel %vm14883_vm1, %v2332_v53, %v2333_v33  ;;  %v15055_v1 = vrot.slane %v11388_v26, 1  ;;  %2389 = vst [vmem:[#allocation3 + $0x200] sm:$0xff] %v2373_v36  ;;  %v15056_v63 = vrot.slane %v11386_v39, 1  ;;  %v11580_v34 = vmax.f32 %v11441_v11, %v2349_v31 }
 0x309   : > { %15053 = vst [vmem:[#allocation42_spill] sm:$0xff] %v11550_v42  ;;  %v11554_v44 = vld [vmem:[#allocation3 + $0x270] sm:$0xff]  ;;  %2308 = vst [vmem:[#allocation2 + $0x89] sm:$0xff] %v11550_v42  ;;  %v11583_v42 = vmax.f32 %v11471_v38, %v2348_v58  ;;  %v9146_v26 = vld [vmem:[%s14778_s1 + $0xa0] sm:$0xff]   ;;  %3186 = vrot.lane.b32.xlu1 %v11547_v15, %s9346_s29  ;;  %8596 = vmatpush3.bf16.msra.mxu1 %v9144_v57  ;;  %v14857_v58 = vrot.slane %v11541_v19, 1  ;;  %v14858_v31 = vrot.slane %v11543_v22, 1 }
 0x30a   : > { %v2352_v46 = vsel %vm14883_vm1, %v2328_v24, %v15055_v1  ;;  %v2353_v6 = vsel %vm14883_vm1, %v15056_v63, %v2328_v24  ;;  %v11596_v11 = vld [vmem:[#allocation2 + $0x3a] sm:$0xff]  ;;  %v15057_v38 = vld [vmem:[#allocation21_spill] sm:$0xff]  ;;  %v2334_v63 = vrot.slane %v11516_v32, 1  ;;  %v2338_v1 = vrot.slane %v11545_v0, 1  ;;  %8628 = vmatpush3.bf16.msra.mxu0 %v9145_v12  ;;  %8597 = vmatprep.subr.bf16.mxu1 %v9146_v26 }
 0x30b   : > { %v11577_v35 = vmax.f32 %v11469_v9, %v2352_v46  ;;  %v3408_v9 = vsel %vm11185_vm2, %v11529_v2, 0.0  ;;  %v2804_v24 = vand.u32 15, %v15057_v38  ;;  %v11600_v53 = vmax.f32 %v11386_v39, %v2353_v6  ;;  %v2196_v59 = vld [vmem:[#allocation3 + $0x150] ss:$2 sm:$0xff]  ;;  %8629 = vmatprep.subr.bf16.mxu0 %v9147_v21  ;;  %v11635_v13 = vld [vmem:[#allocation3 + $0x1a8] sm:$0xff] }
 0x30c   : > { %3424 = vrot.lane.b32.xlu0 %v11170_v28, %s9351_s7  ;;  %vm11610_vm8 = vcmp.gt.s32.totalorder %v2790_v56, 0  ;;  %v15058_v39 = vmov 0  ;;  %v2347_v6 = vsel %vm14883_vm1, %v2333_v33, %v2334_v63  ;;  %v3165_v12 = vsel %vm11533_vm7, %v11596_v11, 0.0  ;;  %2200 = vst [vmem:[#allocation2 + $0x69] sm:$0xff] %v2196_v59  ;;  %v2202_v33 = vld [vmem:[#allocation3 + $0x188] sm:$0xff]  ;;  %v11631_v38 = vld [vmem:[#allocation3 + $0x190] sm:$0xff] }
 0x30d   : > { %v2376_v36 = vmax.f32 %v11577_v35, %v11583_v42  ;;  %v15059_v39 = vsel %vm11610_vm8, 4294967295, %v15058_v39  ;;  %v2375_v57 = vmax.f32 %v11600_v53, %v11580_v34  ;;  %v2343_v28 = vsel %vm14883_vm1, %v14858_v31, %v2338_v1  ;;  %v9149_v59 = vld [vmem:[%s14778_s1 + $0x68] sm:$0xff]   ;;  %3426 = vrot.lane.b32.xlu1 %v3408_v9, %s9351_s7  ;;  %v11650_v31 = vld [vmem:[#allocation3 + $0x1b0] sm:$0xff]  ;;  %8598 = vmatpush3.bf16.msra.mxu1 %v9146_v26 }
 0x30e   : > { %15060 = vst [vmem:[#allocation43_spill] sm:$0xff] %v15059_v39  ;;  %v2346_v56 = vsel %vm14883_vm1, %v2334_v63, %v14857_v58  ;;  %v2365_v46 = vmax.f32 %v11473_v5, %v2347_v6  ;;  %v15061_v5 = vrot.slane %v11554_v44, 1  ;;  %v2369_v58 = vmax.f32 %v11543_v22, %v2343_v28  ;;  %8630 = vmatpush3.bf16.msra.mxu0 %v9147_v21  ;;  %v2208_v28 = vld [vmem:[#allocation3 + $0x1b8] sm:$0xff]  ;;  %v9150_v21 = vld [vmem:[%s14778_s1 + $0xb0] sm:$0xff]  }
 0x30f   : > { %2392 = vst [vmem:[#allocation3 + $0x218] sm:$0xff] %v2376_v36  ;;  %v9148_v36 = vld [vmem:[%s14778_s1 + $0xa8] sm:$0xff]   ;;  %2391 = vst [vmem:[#allocation3 + $0x210] sm:$0xff] %v2375_v57  ;;  %v2366_v6 = vmax.f32 %v11516_v32, %v2346_v56  ;;  %v3228_v7 = vsel %vm11610_vm8, %v11529_v2, 0.0  ;;  %vm11662_vm6 = vcmp.gt.s32.totalorder %v2804_v24, 0  ;;  %v15062_v32 = vmov 0  ;;  %8631 = vmatprep.subr.bf16.mxu0 %v9149_v59 }
 0x310   : > { %v2342_v63 = vsel %vm14883_vm1, %v2338_v1, %v15061_v5  ;;  %v2377_v57 = vmax.f32 %v11512_v17, %v2365_v46  ;;  %8599 = vmatprep.subr.bf16.mxu1 %v9148_v36  ;;  %3188 = vrot.lane.b32.xlu0 %v3165_v12, %s9346_s29  ;;  %v15063_v32 = vsel %vm11662_vm6, 4294967295, %v15062_v32  ;;  %v2381_v2 = vmax.f32 %v2365_v46, %v2369_v58  ;;  %v9151_v24 = vld [vmem:[%s14778_s1 + $0x70] sm:$0xff]  }
 0x311   : > { %v2370_v9 = vmax.f32 %v11545_v0, %v2342_v63  ;;  %15064 = vst [vmem:[#allocation44_spill] sm:$0xff] %v15063_v32  ;;  %v2378_v26 = vmax.f32 %v11514_v43, %v2366_v6  ;;  %v2385_v1 = vmax.f32 %v2369_v58, %v11506_v10  ;;  %v11668_v0 = vld [vmem:[#allocation3 + $0x200] ss:$2 sm:$0xff]  ;;  %3248 = vrot.lane.b32.xlu1 %v3228_v7, %s9348_s9  ;;  %v2218_v10 = vrot.slane %v2202_v33, 1 }
 0x312   : > { %2393 = vst [vmem:[#allocation3 + $0x220] sm:$0xff] %v2377_v57  ;;  %2413 = vst [vmem:[#allocation2 + $0x91] sm:$0xff] %v11668_v0  ;;  %v2219_v43 = vrot.slane %v11631_v38, 1  ;;  %v2222_v58 = vrot.slane %v11635_v13, 1  ;;  %8600 = vmatpush3.bf16.msra.mxu1 %v9148_v36  ;;  %v3230_v46 = vsel %vm11662_vm6, %v11655_v60, 0.0  ;;  %v2223_v7 = vrot.slane %v11650_v31, 1  ;;  %8632 = vmatpush3.bf16.msra.mxu0 %v9149_v59 }
 0x313   : > { %v2382_v17 = vmax.f32 %v2366_v6, %v2370_v9  ;;  %v2386_v56 = vmax.f32 %v2370_v9, %v11509_v40  ;;  %2394 = vst [vmem:[#allocation3 + $0x228] sm:$0xff] %v2378_v26  ;;  %2397 = vst [vmem:[#allocation3 + $0x240] sm:$0xff] %v2381_v2  ;;  %v2221_v40 = vrot.slane %v11633_v4, 1  ;;  %v2220_v12 = vrot.slane %v11659_v37, 1  ;;  %8601 = vmatprep.subr.bf16.mxu1 %v9150_v21 }
 0x314   : > { %2401 = vst [vmem:[#allocation3 + $0x260] sm:$0xff] %v2385_v1  ;;  %3428 = vrot.lane.b32.xlu0 %v2989_v49, %s9351_s7  ;;  %v2246_v36 = vsel %vm14883_vm1, %v2218_v10, %v2219_v43  ;;  %v15065_v63 = vrot.slane %v11317_v47, 1  ;;  %v2224_v9 = vrot.slane %v2208_v28, 1  ;;  %8633 = vmatprep.subr.bf16.mxu0 %v9151_v24  ;;  %v2242_v59 = vsel %vm14883_vm1, %v2222_v58, %v2223_v7 }
 0x315   : > { %2398 = vst [vmem:[#allocation3 + $0x248] sm:$0xff] %v2382_v17  ;;  %2402 = vst [vmem:[#allocation3 + $0x268] sm:$0xff] %v2386_v56  ;;  %v2243_v5 = vsel %vm14883_vm1, %v2221_v40, %v2222_v58  ;;  %v2250_v2 = vmax.f32 %v2202_v33, %v2246_v36  ;;  %v2320_v17 = vld [vmem:[#allocation3 + $0x258] sm:$0xff]  ;;  %v9152_v56 = vld [vmem:[%s14778_s1 + $0xb8] sm:$0xff]   ;;  %3472 = vrot.lane.b32.xlu1 %v11123_v27, %s9352_s28  ;;  %v15066_v33 = vrot.slane %v11291_v8, 1 }
 0x316   : > { %v2247_v6 = vsel %vm14883_vm1, %v15065_v63, %v2218_v10  ;;  %v11696_v57 = vld [vmem:[#allocation3 + $0x210] ss:$2 sm:$0xff]  ;;  %v2253_v1 = vmax.f32 %v11633_v4, %v2243_v5  ;;  %v2241_v58 = vsel %vm14883_vm1, %v2223_v7, %v2224_v9  ;;  %v2244_v5 = vsel %vm14883_vm1, %v2220_v12, %v2221_v40  ;;  %8602 = vmatpush3.bf16.msra.mxu1 %v9150_v21 }
 0x317   : > { %v2249_v26 = vmax.f32 %v11317_v47, %v2247_v6  ;;  %v9153_v10 = vld [vmem:[%s14778_s1 + $0x78] sm:$0xff]   ;;  %2414 = vst [vmem:[#allocation2 + $0x99] sm:$0xff] %v11696_v57  ;;  %v2254_v47 = vmax.f32 %v11635_v13, %v2242_v59  ;;  %v2240_v4 = vsel %vm14883_vm1, %v2224_v9, %v15066_v33  ;;  %v2278_v6 = vmax.f32 %v11376_v62, %v2250_v2  ;;  %v2324_v21 = vld [vmem:[#allocation3 + $0x278] sm:$0xff] }
 0x318   : > { %v2269_v63 = vmax.f32 %v2253_v1, %v11350_v50  ;;  %3250 = vrot.lane.b32.xlu0 %v2989_v49, %s9348_s9  ;;  %v2245_v59 = vsel %vm14883_vm1, %v2219_v43, %v2220_v12  ;;  %v2252_v7 = vmax.f32 %v11659_v37, %v2244_v5  ;;  %v2256_v62 = vmax.f32 %v2208_v28, %v2240_v4  ;;  %v9274_v28 = vld [vmem:[#allocation2 + $0x29] sm:$0xff] }
 0x319   : > { %v2265_v36 = vmax.f32 %v2249_v26, %v2253_v1  ;;  %v2277_v27 = vmax.f32 %v11354_v45, %v2249_v26  ;;  %v2266_v8 = vmax.f32 %v2250_v2, %v2254_v47  ;;  %v2270_v13 = vmax.f32 %v2254_v47, %v11352_v18  ;;  %2294 = vst [vmem:[#allocation3 + $0x1e8] sm:$0xff] %v2278_v6 }
 0x31a   : > { %2285 = vst [vmem:[#allocation3 + $0x1a0] sm:$0xff] %v2269_v63  ;;  %v2251_v50 = vmax.f32 %v11631_v38, %v2245_v59  ;;  %v2255_v45 = vmax.f32 %v11650_v31, %v2241_v58  ;;  %8634 = vmatpush3.bf16.msra.mxu0 %v9151_v24  ;;  %8603 = vmatprep.subr.bf16.mxu1 %v9152_v56  ;;  %v2336_v37 = vrot.slane %v2320_v17, 1  ;;  %v15067_v12 = vrot.slane %v11543_v22, 1  ;;  %v15077_v63 = vld [vmem:[#allocation32_spill] sm:$0xff] }
 0x31b   : > { %2281 = vst [vmem:[#allocation3 + $0x180] sm:$0xff] %v2265_v36  ;;  %2293 = vst [vmem:[#allocation3 + $0x1e0] sm:$0xff] %v2277_v27  ;;  %3252 = vrot.lane.b32.xlu1 %v3230_v46, %s9348_s9  ;;  %v2280_v18 = vmax.f32 %v11413_v51, %v2252_v7  ;;  %8635 = vmatprep.subr.bf16.mxu0 %v9153_v10  ;;  %v2268_v40 = vmax.f32 %v2252_v7, %v2256_v62  ;;  %v2340_v46 = vrot.slane %v2324_v21, 1  ;;  %v2419_v36 = vld [vmem:[#allocation3 + $0x290] sm:$0xff]  ;;  %v2421_v7 = vld [vmem:[#allocation3 + $0x2a0] sm:$0xff] }
 0x31c   : > { %v2410_v49 = vld [vmem:[#allocation3 + $0x240] ss:$2 sm:$0xff]  ;;  %2282 = vst [vmem:[#allocation3 + $0x188] sm:$0xff] %v2266_v8  ;;  %2286 = vst [vmem:[#allocation3 + $0x1a8] sm:$0xff] %v2270_v13  ;;  %v2267_v43 = vmax.f32 %v2251_v50, %v2255_v45  ;;  %v2271_v38 = vmax.f32 %v2255_v45, %v11408_v61  ;;  %v2272_v31 = vmax.f32 %v2256_v62, %v11398_v30  ;;  %8604 = vmatpush3.bf16.msra.mxu1 %v9152_v56  ;;  %v2423_v45 = vld [vmem:[#allocation3 + $0x2b0] sm:$0xff] }
 0x31d   : > { %2415 = vst [vmem:[#allocation2 + $0xa1] sm:$0xff] %v2410_v49  ;;  %3474 = vrot.lane.b32.xlu0 %v9274_v28, %s9352_s28  ;;  %v2279_v24 = vmax.f32 %v11411_v29, %v2251_v50  ;;  %2296 = vst [vmem:[#allocation3 + $0x1f8] sm:$0xff] %v2280_v18  ;;  %v2344_v51 = vsel %vm14883_vm1, %v2336_v37, %v15067_v12  ;;  %v15068_v61 = vrot.slane %v11541_v19, 1  ;;  %v15069_v29 = vrot.slane %v11554_v44, 1  ;;  %v15071_v56 = vld [vmem:[#allocation13_spill] sm:$0xff]  ;;  %v15078_v13 = vld [vmem:[#allocation8_spill] sm:$0xff] }
 0x31e   : > { %2283 = vst [vmem:[#allocation3 + $0x190] sm:$0xff] %v2267_v43  ;;  %2284 = vst [vmem:[#allocation3 + $0x198] sm:$0xff] %v2268_v40  ;;  %v2368_v9 = vmax.f32 %v2320_v17, %v2344_v51  ;;  %8636 = vmatpush3.bf16.msra.mxu0 %v9153_v10  ;;  %v15070_v26 = vrot.slane %v11382_v55, 1  ;;  %v2832_v47 = vand.u32 15, %v15071_v56  ;;  %v2435_v8 = vrot.slane %v2419_v36, 1  ;;  %v2422_v50 = vld [vmem:[#allocation3 + $0x2a8] sm:$0xff] }
 0x31f   : > { %2287 = vst [vmem:[#allocation3 + $0x1b0] sm:$0xff] %v2271_v38  ;;  %2288 = vst [vmem:[#allocation3 + $0x1b8] sm:$0xff] %v2272_v31  ;;  %v2345_v30 = vsel %vm14883_vm1, %v15068_v61, %v2336_v37  ;;  %3476 = vrot.lane.b32.xlu1 %v11193_v54, %s9352_s28  ;;  %v2341_v22 = vsel %vm14883_vm1, %v15069_v29, %v2340_v46  ;;  %v2825_v59 = vand.u32 15, %v15078_v13  ;;  %v2438_v62 = vrot.slane %v2422_v50, 1  ;;  %v2420_v28 = vld [vmem:[#allocation3 + $0x298] sm:$0xff] }
 0x320   : > { %2295 = vst [vmem:[#allocation3 + $0x1f0] sm:$0xff] %v2279_v24  ;;  %v2356_v2 = vsel %vm14883_vm1, %v2340_v46, %v15070_v26  ;;  %v2367_v1 = vmax.f32 %v11541_v19, %v2345_v30  ;;  %v2371_v17 = vmax.f32 %v11554_v44, %v2341_v22  ;;  %v2380_v33 = vmax.f32 %v11583_v42, %v2368_v9  ;;  %v2424_v24 = vld [vmem:[#allocation3 + $0x2b8] sm:$0xff]  ;;  %v11829_v46 = vld [vmem:[#allocation3 + $0x2c0] sm:$0xff] }
 0x321   : > { %v2372_v10 = vmax.f32 %v2324_v21, %v2356_v2  ;;  %3254 = vrot.lane.b32.xlu0 %v11372_v23, %s9348_s9  ;;  %v7907_v19 = vpack.c.bf16 %v11334_v41, %v11345_v14  ;;  %v7910_v42 = vpack.c.bf16 %v11596_v11, %v11547_v15  ;;  %vm11782_vm0 = vcmp.gt.s32.totalorder %v2832_v47, 0  ;;  %v9275_v14 = vld [vmem:[#allocation2 + $0x39] sm:$0xff]  ;;  %v15084_v22 = vld [vmem:[#allocation12_spill] sm:$0xff]  ;;  %v15085_v2 = vld [vmem:[#allocation9_spill] sm:$0xff] }
 0x322   : > { %v2379_v55 = vmax.f32 %v11580_v34, %v2367_v1  ;;  %v2383_v4 = vmax.f32 %v2367_v1, %v2371_v17  ;;  %v2387_v5 = vmax.f32 %v2371_v17, %v11600_v53  ;;  %2396 = vst [vmem:[#allocation3 + $0x238] sm:$0xff] %v2380_v33  ;;  %v15075_v20 = vsel %vm11782_vm0, 4294967295, %v15074_v20  ;;  %v2418_v53 = vld [vmem:[#allocation3 + $0x288] sm:$0xff]  ;;  %v2428_v43 = vld [vmem:[#allocation3 + $0x2d8] sm:$0xff] }
 0x323   : > { %v11775_v25 = vld [vmem:[#allocation3 + $0x180] ss:$2 sm:$0xff]  ;;  %v2384_v58 = vmax.f32 %v2368_v9, %v2372_v10  ;;  %v2388_v34 = vmax.f32 %v2372_v10, %v11577_v35  ;;  %3298 = vrot.lane.b32.xlu1 %v11193_v54, %s9349_s10  ;;  %8605 = vmatprep.mubr.msk.bf16.mxu1 %vm7906_vm15, %v7907_v19  ;;  %15076 = vst [vmem:[#allocation45_spill] sm:$0xff] %v15075_v20  ;;  %v2434_v6 = vrot.slane %v2418_v53, 1  ;;  %v2439_v21 = vrot.slane %v2423_v45, 1  ;;  %vm7912_vm15 = vmpackc.low %vm11368_vm11, %vm14884_vm3 }
 0x324   : > { %2305 = vst [vmem:[#allocation2 + $0x71] sm:$0xff] %v11775_v25  ;;  %2395 = vst [vmem:[#allocation3 + $0x230] sm:$0xff] %v2379_v55  ;;  %8606 = vmatmul.mubr.msk.bf16.vlgmr.msra.gmra.mrb[0].mxu1 %vm11769_vm12, %v7910_v42  ;;  %v2436_v61 = vrot.slane %v2420_v28, 1  ;;  %v2440_v30 = vrot.slane %v2424_v24, 1  ;;  %vm11837_vm14 = vcmp.lt.s32.totalorder %v2825_v59, 15  ;;  %v15081_v9 = vmov 0 }
 0x325   : > { %2399 = vst [vmem:[#allocation3 + $0x250] sm:$0xff] %v2383_v4  ;;  %2400 = vst [vmem:[#allocation3 + $0x258] sm:$0xff] %v2384_v58  ;;  %3478 = vrot.lane.b32.xlu0 %v11202_v3, %s9352_s28  ;;  %v11790_v41 = vld [vmem:[#allocation3 + $0x190] ss:$2 sm:$0xff]  ;;  %v11801_v3 = vld [vmem:[#allocation3 + $0x280] sm:$0xff]  ;;  %v2462_v49 = vsel %vm14883_vm1, %v2434_v6, %v2435_v8  ;;  %v2458_v40 = vsel %vm14883_vm1, %v2438_v62, %v2439_v21  ;;  %v15082_v9 = vsel %vm11837_vm14, 4294967295, %v15081_v9 }
 0x326   : > { %2403 = vst [vmem:[#allocation3 + $0x270] sm:$0xff] %v2387_v5  ;;  %2404 = vst [vmem:[#allocation3 + $0x278] sm:$0xff] %v2388_v34  ;;  %v2433_v27 = vrot.slane %v11801_v3, 1  ;;  %v11815_v37 = vmax.f32 %v2418_v53, %v2462_v49  ;;  %v11833_v51 = vmax.f32 %v2422_v50, %v2458_v40  ;;  %v2441_v29 = vrot.slane %v11829_v46, 1  ;;  %v15086_v5 = vld [vmem:[#allocation37_spill] sm:$0xff]  ;;  %v15087_v34 = vld [vmem:[#allocation38_spill] sm:$0xff] }
 0x327   : > { %2306 = vst [vmem:[#allocation2 + $0x79] sm:$0xff] %v11790_v41  ;;  %3302 = vrot.lane.b32.xlu1 %v11248_v16, %s9349_s10  ;;  %15083 = vst [vmem:[#allocation32_spill] sm:$0xff] %v15082_v9  ;;  %v2839_v26 = vand.u32 15, %v15084_v22  ;;  %v2818_v1 = vand.u32 15, %v15085_v2  ;;  %v2457_v33 = vsel %vm14883_vm1, %v2439_v21, %v2440_v30  ;;  %v2461_v19 = vsel %vm14883_vm1, %v2435_v8, %v2436_v61  ;;  %v15089_v8 = vld [vmem:[#allocation34_spill] sm:$0xff]  ;;  %v11892_v21 = vld [vmem:[#allocation3 + $0x2f0] sm:$0xff] }
 0x328   : > { %v2463_v18 = vsel %vm14883_vm1, %v2433_v27, %v2434_v6  ;;  %v2482_v17 = vmax.f32 %v11815_v37, %v11833_v51  ;;  %v2456_v10 = vsel %vm14883_vm1, %v2440_v30, %v2441_v29  ;;  %v11857_v44 = vmax.f32 %v2419_v36, %v2461_v19  ;;  %vm7915_vm12 = vmpackc.low %vm11533_vm7, %vm14884_vm3 }
 0x329   : > { %3300 = vrot.lane.b32.xlu0 %v9275_v14, %s9349_s10  ;;  %v11827_v31 = vmax.f32 %v11801_v3, %v2463_v18  ;;  %v11861_v4 = vmax.f32 %v2423_v45, %v2457_v33  ;;  %v11863_v58 = vmax.f32 %v2424_v24, %v2456_v10  ;;  %v3982_v53 = vadd.s32 128, %v15012_v48  ;;  %v11909_v24 = vld [vmem:[#allocation2 + $0x52] sm:$0xff]  ;;  %v11922_v10 = vld [vmem:[#allocation2 + $0x5a] sm:$0xff] }
 0x32a   : > { %2498 = vst [vmem:[#allocation3 + $0x288] sm:$0xff] %v2482_v17  ;;  %vm11879_vm4 = vcmp.lt.s32.totalorder %v2839_v26, 15  ;;  %vm11886_vm5 = vcmp.gt.s32.totalorder %v2818_v1, 0  ;;  %v15092_v50 = vmov 0  ;;  %v3167_v49 = vsel %vm11837_vm14, %v15087_v34, 0.0  ;;  %v11919_v17 = vld [vmem:[#allocation3 + $0x2d0] sm:$0xff] }
 0x32b   : > { %3078 = vrot.lane.b32.xlu1 %v11248_v16, %s9347_s30  ;;  %v2437_v16 = vrot.slane %v2421_v7, 1  ;;  %v2483_v6 = vmax.f32 %v11857_v44, %v11861_v4  ;;  %v15093_v50 = vsel %vm11886_vm5, 4294967295, %v15092_v50  ;;  %v4002_v45 = vand.u32 15, %v3982_v53  ;;  %v15106_v14 = vld [vmem:[#allocation7_spill] sm:$0xff]  ;;  %v12169_v32 = vld [vmem:[#allocation2 + $0x6a] sm:$0xff] }
 0x32c   : > { %v2412_v35 = vld [vmem:[#allocation3 + $0x250] ss:$2 sm:$0xff]  ;;  %15094 = vst [vmem:[#allocation8_spill] sm:$0xff] %v15093_v50  ;;  %v15095_v30 = vmov 0  ;;  %v2443_v19 = vrot.slane %v11919_v17, 1 }
 0x32d   : > { %2416 = vst [vmem:[#allocation2 + $0xa9] sm:$0xff] %v2412_v35  ;;  %3304 = vrot.lane.b32.xlu0 %v15077_v63, %s9349_s10  ;;  %v2459_v38 = vsel %vm14883_vm1, %v2437_v16, %v2438_v62  ;;  %v2460_v55 = vsel %vm14883_vm1, %v2436_v61, %v2437_v16  ;;  %v3347_v35 = vsel %vm11533_vm7, %v15087_v34, 0.0  ;;  %2499 = vst [vmem:[#allocation3 + $0x290] sm:$0xff] %v2483_v6  ;;  %v11890_v16 = vld [vmem:[#allocation3 + $0x2e0] sm:$0xff]  ;;  %v2430_v62 = vld [vmem:[#allocation3 + $0x2e8] sm:$0xff]  ;;  %v3412_v61 = vsel %vm11662_vm6, %v11403_v52, 0.0 }
 0x32e   : > { %v11831_v12 = vmax.f32 %v2421_v7, %v2459_v38  ;;  %v11859_v42 = vmax.f32 %v2420_v28, %v2460_v55  ;;  %v3410_v7 = vsel %vm11610_vm8, %v11655_v60, 0.0  ;;  %v2445_v18 = vrot.slane %v11890_v16, 1 }
 0x32f   : > { %3364 = vrot.lane.b32.xlu1 %v11547_v15, %s9350_s11  ;;  %v3345_v15 = vsel %vm11368_vm11, %v11596_v11, 0.0  ;;  %v15080_v11 = vld [vmem:[#allocation33_spill] sm:$0xff]  ;;  %v2447_v60 = vrot.slane %v11892_v21, 1  ;;  %vm11914_vm13 = vcmp.gt.s32.totalorder %v4002_v45, 0 }
 0x330   : > { %v2481_v47 = vmax.f32 %v11827_v31, %v11831_v12  ;;  %v2484_v36 = vmax.f32 %v11859_v42, %v11863_v58  ;;  %v15096_v30 = vsel %vm11914_vm13, 4294967295, %v15095_v30 }
 0x331   : > { %3080 = vrot.lane.b32.xlu0 %v15077_v63, %s9347_s30  ;;  %15097 = vst [vmem:[#allocation35_spill] sm:$0xff] %v15096_v30 }
 0x332   : > { %2497 = vst [vmem:[#allocation3 + $0x280] sm:$0xff] %v2481_v47  ;;  %2500 = vst [vmem:[#allocation3 + $0x298] sm:$0xff] %v2484_v36  ;;  %v2426_v47 = vld [vmem:[#allocation3 + $0x2c8] sm:$0xff] }
 0x333   : > { %3082 = vrot.lane.b32.xlu1 %v15080_v11, %s9347_s30  ;;  %v2442_v55 = vrot.slane %v2426_v47, 1 }
 0x335   : > { %3366 = vrot.lane.b32.xlu0 %v3345_v15, %s9350_s11  ;;  %v2446_v15 = vrot.slane %v2430_v62, 1  ;;  %v2454_v36 = vsel %vm14883_vm1, %v2442_v55, %v2443_v19 }
 0x336   : > { %v2474_v45 = vmax.f32 %v2426_v47, %v2454_v36 }
 0x337   : > { %3368 = vrot.lane.b32.xlu1 %v15086_v5, %s9350_s11  ;;  %v2450_v38 = vsel %vm14883_vm1, %v2446_v15, %v2447_v60  ;;  %v2451_v28 = vsel %vm14883_vm1, %v2445_v18, %v2446_v15  ;;  %v11948_v15 = vpop.permute.xlu0 %9129 }
 0x338   : > { %v2477_v26 = vmax.f32 %v11890_v16, %v2451_v28  ;;  %v2478_v1 = vmax.f32 %v2430_v62, %v2450_v38  ;;  %v3169_v62 = vsel %vm11879_vm4, %v11922_v10, 0.0  ;;  %v2993_v28 = vld [vmem:[#allocation2 + $0x58] sm:$0xff] }
 0x339   : > { %3084 = vrot.lane.b32.xlu0 %v15089_v8, %s9347_s30  ;;  %v2514_v40 = vld [vmem:[#allocation3 + $0x280] ss:$2 sm:$0xff]  ;;  %v2516_v33 = vld [vmem:[#allocation3 + $0x290] ss:$2 sm:$0xff]  ;;  %v2455_v8 = vsel %vm14883_vm1, %v2441_v29, %v2442_v55 }
 0x33a   : > { %2521 = vst [vmem:[#allocation2 + $0xb1] sm:$0xff] %v2514_v40  ;;  %v2493_v53 = vmax.f32 %v2477_v26, %v11827_v31  ;;  %v2494_v6 = vmax.f32 %v2478_v1, %v11815_v37  ;;  %2522 = vst [vmem:[#allocation2 + $0xb9] sm:$0xff] %v2516_v33  ;;  %v11940_v37 = vpop.permute.xlu1 %3174  ;;  %v2490_v29 = vmax.f32 %v2474_v45, %v2478_v1  ;;  %v15099_v40 = vld [vmem:[#allocation11_spill] sm:$0xff]  ;;  %v11963_v55 = vld [vmem:[#allocation2 + $0x90] sm:$0xff] }
 0x33b   : > { %3190 = vrot.lane.b32.xlu1 %v15086_v5, %s9346_s29  ;;  %v3984_v38 = vadd.s32 128, %v15099_v40  ;;  %15100 = vst [vmem:[#allocation12_spill] sm:$0xff] %v11963_v55 }
 0x33c   : > { %2509 = vst [vmem:[#allocation3 + $0x2e0] sm:$0xff] %v2493_v53  ;;  %2510 = vst [vmem:[#allocation3 + $0x2e8] sm:$0xff] %v2494_v6  ;;  %v15101_v53 = vmov 0 }
 0x33d   : > { %3370 = vrot.lane.b32.xlu0 %v3347_v35, %s9350_s11  ;;  %v11925_v35 = vld [vmem:[#allocation2 + $0x80] sm:$0xff]  ;;  %2506 = vst [vmem:[#allocation3 + $0x2c8] sm:$0xff] %v2490_v29  ;;  %v4016_v1 = vand.u32 15, %v3984_v38  ;;  %v7916_v29 = vpack.c.bf16 %v11922_v10, %v11909_v24 }
 0x33e   : > { %15098 = vst [vmem:[#allocation33_spill] sm:$0xff] %v11925_v35 }
 0x33f   : > { %3430 = vrot.lane.b32.xlu1 %v3410_v7, %s9351_s7  ;;  %v2473_v7 = vmax.f32 %v11829_v46, %v2455_v8  ;;  %v3232_v46 = vsel %vm11886_vm5, %v11403_v52, 0.0  ;;  %vm11965_vm10 = vcmp.gt.s32.totalorder %v4016_v1, 0  ;;  %v11974_v8 = vld [vmem:[#allocation2 + $0x60] sm:$0xff] }
 0x340   : > { %v15102_v53 = vsel %vm11965_vm10, 4294967295, %v15101_v53 }
 0x341   : > { %3192 = vrot.lane.b32.xlu0 %v3167_v49, %s9346_s29  ;;  %v2489_v49 = vmax.f32 %v2473_v7, %v2477_v26  ;;  %15103 = vst [vmem:[#allocation37_spill] sm:$0xff] %v15102_v53  ;;  %v2485_v1 = vmax.f32 %v11831_v12, %v2473_v7  ;;  %v15105_v12 = vld [vmem:[#allocation42_spill] sm:$0xff] }
 0x343   : > { %3194 = vrot.lane.b32.xlu1 %v11909_v24, %s9346_s29  ;;  %2505 = vst [vmem:[#allocation3 + $0x2c0] sm:$0xff] %v2489_v49  ;;  %v15104_v49 = vld [vmem:[#allocation40_spill] sm:$0xff]  ;;  %2501 = vst [vmem:[#allocation3 + $0x2a0] sm:$0xff] %v2485_v1 }
 0x344   : > { %v11957_v47 = vpop.permute.xlu1 %3068 }
 0x345   : > { %3432 = vrot.lane.b32.xlu0 %v11372_v23, %s9351_s7 }
 0x347   : > { %3434 = vrot.lane.b32.xlu1 %v3412_v61, %s9351_s7  ;;  %v11959_v26 = vpop.permute.xlu0 %3066  ;;  %v9276_v61 = vld [vmem:[#allocation2 + $0x41] sm:$0xff] }
 0x349   : > { %3196 = vrot.lane.b32.xlu0 %v3169_v62, %s9346_s29 }
 0x34a   : > { %v2518_v33 = vld [vmem:[#allocation3 + $0x2c0] ss:$2 sm:$0xff] }
 0x34b   : > { %3256 = vrot.lane.b32.xlu1 %v3232_v46, %s9348_s9  ;;  %2523 = vst [vmem:[#allocation2 + $0xc1] sm:$0xff] %v2518_v33  ;;  %v3234_v46 = vsel %vm11782_vm0, %v11974_v8, 0.0 }
 0x34d   : > { %3436 = vrot.lane.b32.xlu0 %v2993_v28, %s9351_s7 }
 0x34f   : > { %3480 = vrot.lane.b32.xlu1 %v9276_v61, %s9352_s28  ;;  %v11970_v6 = vpop.permute.xlu1 %3178  ;;  %v2486_v61 = vmax.f32 %v11833_v51, %v2474_v45 }
 0x350   : > { %v11972_v36 = vpop.permute.xlu0 %3242 }
 0x351   : > { %3258 = vrot.lane.b32.xlu0 %v2993_v28, %s9348_s9  ;;  %v7913_v28 = vpack.c.bf16 %v15087_v34, %v15086_v5  ;;  %2502 = vst [vmem:[#allocation3 + $0x2a8] sm:$0xff] %v2486_v61  ;;  %v2432_v5 = vld [vmem:[#allocation3 + $0x2f8] sm:$0xff]  ;;  %v2444_v34 = vrot.slane %v2428_v43, 1 }
 0x352   : > { %v2448_v7 = vrot.slane %v2432_v5, 1 }
 0x353   : > { %4302 = vrot.lane.b32.xlu1 %v15104_v49, %s9347_s30  ;;  %v11988_v38 = vpop.permute.xlu1 %3290  ;;  %8609 = vmatprep.mubr.msk.bf16.mxu1 %vm7912_vm15, %v7913_v28  ;;  %v3983_v49 = vadd.s32 128, %v15106_v14  ;;  %v2453_v28 = vsel %vm14883_vm1, %v2443_v19, %v2444_v34  ;;  %v2530_v14 = vld [vmem:[#allocation3 + $0x328] sm:$0xff] }
 0x354   : > { %8610 = vmatmul.mubr.msk.bf16.gmra.mrb[4].mxu1 %vm7915_vm12, %v7916_v29  ;;  %v2449_v29 = vsel %vm14883_vm1, %v2447_v60, %v2448_v7  ;;  %v2464_v1 = vsel %vm14883_vm1, %v2448_v7, %v2433_v27  ;;  %v2475_v16 = vmax.f32 %v11919_v17, %v2453_v28  ;;  %v9277_v7 = vld [vmem:[#allocation2 + $0x59] sm:$0xff]  ;;  %v4350_v17 = vld [vmem:[#allocation2 + $0x82] sm:$0xff]  ;;  %v2546_v23 = vrot.slane %v2530_v14, 1 }
 0x355   : > { %3482 = vrot.lane.b32.xlu0 %v15077_v63, %s9352_s28  ;;  %v12003_v63 = vld [vmem:[#allocation2 + $0x68] sm:$0xff]  ;;  %v4009_v19 = vand.u32 15, %v3983_v49 }
 0x356   : > { %v11997_v33 = vpop.permute.xlu0 %3246  ;;  %v12066_v28 = vld [vmem:[#allocation2 + $0x61] sm:$0xff] }
 0x357   : > { %3260 = vrot.lane.b32.xlu1 %v3234_v46, %s9348_s9  ;;  %v12007_v51 = vpop.permute.xlu1 %3294  ;;  %v2452_v46 = vsel %vm14883_vm1, %v2444_v34, %v2445_v18  ;;  %v2479_v18 = vmax.f32 %v11892_v21, %v2449_v29  ;;  %v15107_v34 = vld [vmem:[#allocation10_spill] sm:$0xff]  ;;  %vm12052_vm11 = vcmp.lt.s32.totalorder %v4009_v19, 15 }
 0x358   : > { %v2476_v60 = vmax.f32 %v2428_v43, %v2452_v46  ;;  %v3985_v27 = vadd.s32 128, %v15107_v34 }
 0x359   : > { %4304 = vrot.lane.b32.xlu0 %v15105_v12, %s9347_s30  ;;  %v2480_v12 = vmax.f32 %v2432_v5, %v2464_v1  ;;  %v2491_v3 = vmax.f32 %v2475_v16, %v2479_v18  ;;  %v4351_v5 = vld [vmem:[#allocation2 + $0x8a] sm:$0xff]  ;;  %v12070_v1 = vld [vmem:[#allocation2 + $0x92] sm:$0xff] }
 0x35a   : > { %v12009_v45 = vpop.permute.xlu0 %3292  ;;  %v4023_v29 = vand.u32 15, %v3985_v27  ;;  %v12079_v27 = vld [vmem:[#allocation2 + $0x9a] sm:$0xff] }
 0x35b   : > { %3484 = vrot.lane.b32.xlu1 %v15080_v11, %s9352_s28  ;;  %v12032_v61 = vpop.permute.xlu1 %3240  ;;  %v2492_v54 = vmax.f32 %v2476_v60, %v2480_v12  ;;  %2507 = vst [vmem:[#allocation3 + $0x2d0] sm:$0xff] %v2491_v3  ;;  %v15112_v3 = vmov 0  ;;  %v2496_v40 = vmax.f32 %v2480_v12, %v11859_v42  ;;  %v3349_v42 = vsel %vm11837_vm14, %v11922_v10, 0.0  ;;  %v4225_v10 = vld [vmem:[#allocation2 + $0x98] sm:$0xff] }
 0x35c   : > { %vm12072_vm7 = vcmp.lt.s32.totalorder %v4023_v29, 15  ;;  %v2495_v29 = vmax.f32 %v2479_v18, %v11857_v44  ;;  %v4464_v44 = vsel %vm11914_vm13, %v11963_v55, 0.0  ;;  %v9280_v18 = vld [vmem:[#allocation2 + $0x111] sm:$0xff] }
 0x35d   : > { %3262 = vrot.lane.b32.xlu0 %v12003_v63, %s9348_s9  ;;  %2508 = vst [vmem:[#allocation3 + $0x2d8] sm:$0xff] %v2492_v54  ;;  %v4399_v54 = vsel %vm12052_vm11, %v4351_v5, 0.0  ;;  %v15113_v3 = vsel %vm12072_vm7, 4294967295, %v15112_v3  ;;  %v2488_v5 = vmax.f32 %v11863_v58, %v2476_v60  ;;  %v4401_v34 = vsel %vm12072_vm7, %v12079_v27, 0.0  ;;  %2512 = vst [vmem:[#allocation3 + $0x2f8] sm:$0xff] %v2496_v40  ;;  %v12131_v55 = vld [vmem:[#allocation3 + $0x330] sm:$0xff] }
 0x35e   : > { %v12036_v62 = vpop.permute.xlu0 %3176  ;;  %15114 = vst [vmem:[#allocation34_spill] sm:$0xff] %v15113_v3  ;;  %2511 = vst [vmem:[#allocation3 + $0x2f0] sm:$0xff] %v2495_v29  ;;  %v3030_v12 = vsel %vm11151_vm9, %v9280_v18, 0.0  ;;  %v2529_v29 = vld [vmem:[#allocation3 + $0x320] sm:$0xff]  ;;  %v2547_v30 = vrot.slane %v12131_v55, 1  ;;  %v9318_v3 = vadd.high.f32.bf16 %v9280_v18, %v11948_v15 }
 0x35f   : > { %4306 = vrot.lane.b32.xlu1 %v11668_v0, %s9347_s30  ;;  %v12042_v31 = vpop.permute.xlu1 %3244  ;;  %2504 = vst [vmem:[#allocation3 + $0x2b8] sm:$0xff] %v2488_v5  ;;  %v12126_v5 = vld [vmem:[#allocation3 + $0x310] sm:$0xff]  ;;  %v2545_v52 = vrot.slane %v2529_v29, 1 }
 0x360   : > { %v2543_v2 = vrot.slane %v12126_v5, 1 }
 0x361   : > { %3486 = vrot.lane.b32.xlu0 %v9277_v7, %s9352_s28 }
 0x362   : > { %v12044_v43 = vpop.permute.xlu0 %3180 }
 0x363   : > { %3306 = vrot.lane.b32.xlu1 %v15080_v11, %s9349_s10  ;;  %v12050_v0 = vpop.permute.xlu1 %3070 }
 0x364   : > { %15108 = vst [vmem:[#allocation38_spill] sm:$0xff] %v12050_v0  ;;  %v12160_v0 = vld [vmem:[#allocation2 + $0xa0] sm:$0xff] }
 0x365   : > { %4308 = vrot.lane.b32.xlu0 %v11696_v57, %s9347_s30  ;;  %v2520_v57 = vld [vmem:[#allocation3 + $0x2d0] ss:$2 sm:$0xff]  ;;  %15121 = vst [vmem:[#allocation48_spill] sm:$0xff] %v12160_v0 }
 0x366   : > { %v12056_v49 = vpop.permute.xlu0 %3296  ;;  %2524 = vst [vmem:[#allocation2 + $0xc9] sm:$0xff] %v2520_v57  ;;  %v12088_v57 = vld [vmem:[#allocation2 + $0x69] sm:$0xff] }
 0x367   : > { %4414 = vrot.lane.b32.xlu1 %v4350_v17, %s9346_s29  ;;  %v12060_v46 = vpop.permute.xlu1 %3356  ;;  %v2487_v17 = vmax.f32 %v11861_v4, %v2475_v16 }
 0x369   : > { %3308 = vrot.lane.b32.xlu0 %v9277_v7, %s9349_s10  ;;  %2503 = vst [vmem:[#allocation3 + $0x2b0] sm:$0xff] %v2487_v17  ;;  %v2526_v17 = vld [vmem:[#allocation3 + $0x308] sm:$0xff] }
 0x36a   : > { %v12064_v11 = vpop.permute.xlu0 %3072 }
 0x36b   : > { %15111 = vst [vmem:[#allocation41_spill] sm:$0xff] %v12064_v11  ;;  %3310 = vrot.lane.b32.xlu1 %v12066_v28, %s9349_s10  ;;  %v12077_v19 = vpop.permute.xlu1 %3074 }
 0x36c   : > { %15115 = vst [vmem:[#allocation40_spill] sm:$0xff] %v12077_v19  ;;  %v2567_v19 = vsel %vm14883_vm1, %v2545_v52, %v2546_v23 }
 0x36d   : > { %4416 = vrot.lane.b32.xlu0 %v4399_v54, %s9346_s29 }
 0x36e   : > { %v12081_v7 = vpop.permute.xlu0 %3358 }
 0x36f   : > { %4418 = vrot.lane.b32.xlu1 %v12070_v1, %s9346_s29  ;;  %v12092_v54 = vpop.permute.xlu1 %3360 }
 0x371   : > { %3312 = vrot.lane.b32.xlu0 %v12088_v57, %s9349_s10 }
 0x372   : > { %v12098_v4 = vpop.permute.xlu0 %3076 }
 0x373   : > { %15116 = vst [vmem:[#allocation42_spill] sm:$0xff] %v12098_v4  ;;  %3086 = vrot.lane.b32.xlu1 %v12066_v28, %s9347_s30  ;;  %v12109_v58 = vpop.permute.xlu1 %3182  ;;  %v12148_v4 = vld [vmem:[#allocation2 + $0x62] sm:$0xff] }
 0x374   : > { %15117 = vst [vmem:[#allocation46_spill] sm:$0xff] %v12109_v58 }
 0x375   : > { %4420 = vrot.lane.b32.xlu0 %v4401_v34, %s9346_s29  ;;  %v12124_v34 = vld [vmem:[#allocation3 + $0x300] sm:$0xff] }
 0x376   : > { %v12111_v16 = vpop.permute.xlu0 %3362  ;;  %v14874_v56 = vrot.slane %v12124_v34, 1 }
 0x377   : > { %3372 = vrot.lane.b32.xlu1 %v11909_v24, %s9350_s11  ;;  %v12117_v40 = vpop.permute.xlu1 %3422 }
 0x379   : > { %3088 = vrot.lane.b32.xlu0 %v12088_v57, %s9347_s30 }
 0x37a   : > { %v12119_v60 = vpop.permute.xlu0 %3184 }
 0x37b   : > { %15118 = vst [vmem:[#allocation47_spill] sm:$0xff] %v12119_v60  ;;  %4480 = vrot.lane.b32.xlu1 %v4464_v44, %s9348_s9  ;;  %v12129_v24 = vpop.permute.xlu1 %3186  ;;  %v2542_v44 = vrot.slane %v2526_v17, 1  ;;  %v9317_v60 = vadd.low.f32.bf16 %v3030_v12, %v11948_v15  ;;  %v2566_v12 = vsel %vm14883_vm1, %v2546_v23, %v2547_v30  ;;  %v12164_v15 = vmax.f32 %v2529_v29, %v2567_v19  ;;  %v15122_v23 = vld [vmem:[#allocation16_spill] sm:$0xff] }
 0x37c   : > { %15120 = vst [vmem:[#allocation4_spill] sm:$0xff] %v12129_v24  ;;  %v12166_v18 = vmax.f32 %v2530_v14, %v2566_v12  ;;  %v2853_v39 = vand.u32 15, %v15122_v23  ;;  %v3351_v12 = vsel %vm11879_vm4, %v12169_v32, 0.0 }
 0x37d   : > { %3374 = vrot.lane.b32.xlu0 %v3349_v42, %s9350_s11  ;;  %v2570_v42 = vsel %vm14883_vm1, %v2542_v44, %v2543_v2  ;;  %v2571_v24 = vsel %vm14883_vm1, %v14874_v56, %v2542_v44  ;;  %v3207_v56 = vadd.f32 %v9318_v3, %v12036_v62  ;;  %v9281_v62 = vld [vmem:[#allocation2 + $0x10] sm:$0xff]  ;;  %v2532_v3 = vld [vmem:[#allocation3 + $0x338] sm:$0xff] }
 0x37e   : > { %v12137_v58 = vpop.permute.xlu0 %3424  ;;  %v12162_v44 = vmax.f32 %v2526_v17, %v2570_v42  ;;  %v3032_v29 = vsel %vm11185_vm2, %v9281_v62, 0.0  ;;  %v12195_v62 = vld [vmem:[#allocation3 + $0x340] sm:$0xff]  ;;  %vm12203_vm9 = vcmp.lt.s32.totalorder %v2853_v39, 15 }
 0x37f   : > { %3090 = vrot.lane.b32.xlu1 %v11775_v25, %s9347_s30  ;;  %v12155_v25 = vmax.f32 %v12124_v34, %v2571_v24  ;;  %v12158_v11 = vpop.permute.xlu1 %3426  ;;  %v3206_v24 = vadd.f32 %v9317_v60, %v11940_v37  ;;  %v4466_v37 = vsel %vm11965_vm10, %v12160_v0, 0.0  ;;  %v3273_v53 = vadd.f32 %v11972_v36, %v3207_v56 }
 0x380   : > { %v2590_v14 = vmax.f32 %v12162_v44, %v12166_v18  ;;  %v2548_v0 = vrot.slane %v2532_v3, 1 }
 0x381   : > { %4482 = vrot.lane.b32.xlu0 %v4225_v10, %s9348_s9  ;;  %v15124_v10 = vld [vmem:[#allocation14_spill] sm:$0xff]  ;;  %v2589_v19 = vmax.f32 %v12155_v25, %v12164_v15  ;;  %v3272_v60 = vadd.f32 %v12032_v61, %v3206_v24  ;;  %v2549_v61 = vrot.slane %v12195_v62, 1 }
 0x382   : > { %v12173_v9 = vpop.permute.xlu0 %3188  ;;  %v3987_v17 = vadd.s32 128, %v15124_v10  ;;  %2606 = vst [vmem:[#allocation3 + $0x308] sm:$0xff] %v2590_v14  ;;  %v2528_v10 = vld [vmem:[#allocation3 + $0x318] sm:$0xff]  ;;  %v9282_v14 = vld [vmem:[#allocation2 + $0x18] sm:$0xff] }
 0x383   : > { %15123 = vst [vmem:[#allocation49_spill] sm:$0xff] %v12173_v9  ;;  %3376 = vrot.lane.b32.xlu1 %v12148_v4, %s9350_s11  ;;  %v12190_v42 = vpop.permute.xlu1 %3248  ;;  %2605 = vst [vmem:[#allocation3 + $0x300] sm:$0xff] %v2589_v19  ;;  %v2544_v23 = vrot.slane %v2528_v10, 1  ;;  %v3097_v9 = vadd.f32 %v9282_v14, %v11957_v47  ;;  %v2564_v56 = vsel %vm14883_vm1, %v2548_v0, %v2549_v61 }
 0x384   : > { %15126 = vst [vmem:[#allocation5_spill] sm:$0xff] %v12190_v42  ;;  %v15127_v42 = vmov 0  ;;  %v4037_v19 = vand.u32 15, %v3987_v17 }
 0x385   : > { %3092 = vrot.lane.b32.xlu0 %v11790_v41, %s9347_s30  ;;  %v3096_v41 = vadd.f32 %v11959_v26, %v3032_v29  ;;  %v15128_v42 = vsel %vm12203_vm9, 4294967295, %v15127_v42  ;;  %v2565_v26 = vsel %vm14883_vm1, %v2547_v30, %v2548_v0  ;;  %v2568_v36 = vsel %vm14883_vm1, %v2544_v23, %v2545_v52  ;;  %v12229_v52 = vld [vmem:[#allocation2 + $0xa8] sm:$0xff] }
 0x386   : > { %v12200_v24 = vpop.permute.xlu0 %3428  ;;  %15129 = vst [vmem:[#allocation50_spill] sm:$0xff] %v15128_v42  ;;  %v2569_v17 = vsel %vm14883_vm1, %v2543_v2, %v2544_v23  ;;  %v12219_v29 = vmax.f32 %v2528_v10, %v2568_v36  ;;  %v12222_v47 = vmax.f32 %v12131_v55, %v2565_v26  ;;  %v3209_v14 = vadd.f32 %v12044_v43, %v3097_v9 }
 0x387   : > { %4484 = vrot.lane.b32.xlu1 %v4466_v37, %s9348_s9  ;;  %v3473_v39 = vpop.permute.xlu1 %3472  ;;  %v12224_v37 = vmax.f32 %v2532_v3, %v2564_v56  ;;  %v3322_v30 = vadd.f32 %v11988_v38, %v3272_v60  ;;  %v3323_v0 = vadd.f32 %v12009_v45, %v3273_v53  ;;  %v3208_v2 = vadd.f32 %v11970_v6, %v3096_v41  ;;  %v12246_v53 = vld [vmem:[#allocation2 + $0xba] sm:$0xff] }
 0x388   : > { %v3414_v9 = vsel %vm11886_vm5, %v11974_v8, 0.0  ;;  %vm12242_vm2 = vcmp.lt.s32.totalorder %v4037_v19, 15  ;;  %v3171_v60 = vsel %vm12203_vm9, %v12169_v32, 0.0 }
 0x389   : > { %3378 = vrot.lane.b32.xlu0 %v3351_v12, %s9350_s11  ;;  %v12232_v12 = vmax.f32 %v12126_v5, %v2569_v17  ;;  %v2592_v38 = vmax.f32 %v12219_v29, %v12224_v37  ;;  %v3388_v6 = vadd.f32 %v12060_v46, %v3322_v30  ;;  %v3389_v45 = vadd.f32 %v12081_v7, %v3323_v0 }
 0x38a   : > { %v12235_v23 = vpop.permute.xlu0 %3250  ;;  %v2622_v5 = vld [vmem:[#allocation3 + $0x300] ss:$2 sm:$0xff]  ;;  %v3274_v46 = vadd.f32 %v12042_v31, %v3208_v2  ;;  %v3275_v7 = vadd.f32 %v11997_v33, %v3209_v14 }
 0x38b   : > { %3198 = vrot.lane.b32.xlu1 %v12148_v4, %s9346_s29  ;;  %v2591_v8 = vmax.f32 %v12232_v12, %v12222_v47  ;;  %2629 = vst [vmem:[#allocation2 + $0xd1] sm:$0xff] %v2622_v5  ;;  %2608 = vst [vmem:[#allocation3 + $0x318] sm:$0xff] %v2592_v38  ;;  %v3454_v3 = vadd.f32 %v12117_v40, %v3388_v6  ;;  %v3455_v41 = vadd.f32 %v12137_v58, %v3389_v45  ;;  %v9283_v33 = vld [vmem:[#allocation2 + $0x91] sm:$0xff]  ;;  %v12286_v5 = vld [vmem:[#allocation2 + $0x7a] sm:$0xff] }
 0x38c   : > { %v3325_v17 = vadd.f32 %v12056_v49, %v3275_v7  ;;  %v3324_v30 = vadd.f32 %v12007_v51, %v3274_v46  ;;  %v15132_v58 = vld [vmem:[#allocation18_spill] sm:$0xff]  ;;  %v2996_v51 = vld [vmem:[#allocation2 + $0x70] sm:$0xff] }
 0x38d   : > { %4486 = vrot.lane.b32.xlu0 %v12229_v52, %s9348_s9  ;;  %v12259_v10 = vpop.permute.xlu1 %3252  ;;  %2607 = vst [vmem:[#allocation3 + $0x310] sm:$0xff] %v2591_v8  ;;  %v3504_v56 = vadd.f32 %v3473_v39, %v3454_v3  ;;  %v2867_v40 = vand.u32 15, %v15132_v58  ;;  %v12278_v2 = vld [vmem:[#allocation2 + $0x72] sm:$0xff]  ;;  %v3416_v8 = vsel %vm11782_vm0, %v2996_v51, 0.0  ;;  %vm15155_vm0 = vmmov 1  }
 0x38e   : > { %v3390_v14 = vadd.f32 %v12092_v54, %v3324_v30  ;;  %v3391_v39 = vadd.f32 %v12111_v16, %v3325_v17  ;;  %v15133_v54 = vmov 0  ;;  %v15138_v17 = vmov 0  ;;  %v2538_v30 = vld [vmem:[#allocation3 + $0x368] sm:$0xff]  ;;  %vm7918_vm5 = vmpackc.low %vm11837_vm14, %vm15155_vm0 }
 0x38f   : > { %v3475_v19 = vpop.permute.xlu0 %3474  ;;  %3438 = vrot.lane.b32.xlu1 %v3414_v9, %s9351_s7  ;;  %vm12290_vm15 = vcmp.lt.s32.totalorder %v2867_v40, 15 }
 0x390   : > { %v3505_v26 = vadd.f32 %v3475_v19, %v3455_v41  ;;  %v3456_v38 = vadd.f32 %v12158_v11, %v3390_v14  ;;  %v3457_v6 = vadd.f32 %v12200_v24, %v3391_v39  ;;  %v15134_v54 = vsel %vm12290_vm15, 4294967295, %v15133_v54  ;;  %v15136_v24 = vld [vmem:[#allocation17_spill] sm:$0xff]  ;;  %v2997_v14 = vld [vmem:[#allocation2 + $0x78] sm:$0xff] }
 0x391   : > { %3200 = vrot.lane.b32.xlu0 %v3171_v60, %s9346_s29  ;;  %v3477_v36 = vpop.permute.xlu1 %3476  ;;  %15135 = vst [vmem:[#allocation18_spill] sm:$0xff] %v15134_v54  ;;  %v9284_v60 = vld [vmem:[#allocation2 + $0x99] sm:$0xff]  ;;  %v2846_v46 = vand.u32 15, %v15136_v24  ;;  %v3173_v3 = vsel %vm12290_vm15, %v12286_v5, 0.0  ;;  %v2534_v19 = vld [vmem:[#allocation3 + $0x348] sm:$0xff] }
 0x392   : > { %v3520_v31 = vpack.c.bf16 %v3505_v26, %v3504_v56  ;;  %v2535_v56 = vld [vmem:[#allocation3 + $0x350] sm:$0xff]  ;;  %v2537_v26 = vld [vmem:[#allocation3 + $0x360] sm:$0xff]  ;;  %v12622_v54 = vld [vmem:[#allocation3 + $0x398] sm:$0xff] }
 0x393   : > { %v12272_v0 = vpop.permute.xlu0 %3254  ;;  %4530 = vrot.lane.b32.xlu1 %v9283_v33, %s9349_s10  ;;  %vm12309_vm12 = vcmp.gt.s32.totalorder %v2846_v46, 0  ;;  %v2550_v33 = vrot.slane %v2534_v19, 1  ;;  %v2551_v40 = vrot.slane %v2535_v56, 1  ;;  %v2553_v39 = vrot.slane %v2537_v26, 1 }
 0x394   : > { %8637 = vmatprep.mubr.bf16.mxu0 %v3520_v31  ;;  %v2624_v9 = vld [vmem:[#allocation3 + $0x310] ss:$2 sm:$0xff]  ;;  %v15139_v17 = vsel %vm12309_vm12, 4294967295, %v15138_v17 }
 0x395   : > { %3440 = vrot.lane.b32.xlu0 %v12003_v63, %s9351_s7  ;;  %v12282_v49 = vpop.permute.xlu1 %3298  ;;  %2630 = vst [vmem:[#allocation2 + $0xd9] sm:$0xff] %v2624_v9  ;;  %v3506_v63 = vadd.f32 %v3477_v36, %v3456_v38  ;;  %15140 = vst [vmem:[#allocation52_spill] sm:$0xff] %v15139_v17  ;;  %v2539_v31 = vld [vmem:[#allocation3 + $0x370] sm:$0xff]  ;;  %v2554_v9 = vrot.slane %v2538_v30, 1 }
 0x396   : > { %v2555_v38 = vrot.slane %v2539_v31, 1  ;;  %v12534_v17 = vld [vmem:[#allocation2 + $0xb1] sm:$0xff] }
 0x397   : > { %v3479_v45 = vpop.permute.xlu0 %3478  ;;  %3202 = vrot.lane.b32.xlu1 %v12278_v2, %s9346_s29  ;;  %v2559_v46 = vsel %vm14883_vm1, %v2553_v39, %v2554_v9 }
 0x398   : > { %v3507_v16 = vadd.f32 %v3479_v45, %v3457_v6  ;;  %v12315_v45 = vld [vmem:[#allocation2 + $0xa1] sm:$0xff]  ;;  %v12339_v24 = vmax.f32 %v2537_v26, %v2559_v46 }
 0x399   : > { %4532 = vrot.lane.b32.xlu0 %v9284_v60, %s9349_s10  ;;  %v12297_v11 = vpop.permute.xlu1 %3302  ;;  %15141 = vst [vmem:[#allocation53_spill] sm:$0xff] %v12315_v45  ;;  %v2558_v60 = vsel %vm14883_vm1, %v2554_v9, %v2555_v38  ;;  %v12350_v9 = vld [vmem:[#allocation2 + $0xa9] sm:$0xff]  ;;  %v9154_v26 = vld [vmem:[%s14778_s1 + $0x80] sm:$0xff]  }
 0x39a   : > { %v3521_v7 = vpack.c.bf16 %v3507_v16, %v3506_v63  ;;  %v2562_v63 = vsel %vm14883_vm1, %v2550_v33, %v2551_v40  ;;  %v2563_v16 = vsel %vm14883_vm1, %v2549_v61, %v2550_v33  ;;  %v12341_v61 = vmax.f32 %v2538_v30, %v2558_v60  ;;  %15143 = vst [vmem:[#allocation55_spill] sm:$0xff] %v12350_v9  ;;  %v2536_v30 = vld [vmem:[#allocation3 + $0x358] sm:$0xff] }
 0x39b   : > { %v12303_v41 = vpop.permute.xlu0 %3300  ;;  %3442 = vrot.lane.b32.xlu1 %v3416_v8, %s9351_s7  ;;  %v3236_v8 = vsel %vm12309_vm12, %v2996_v51, 0.0  ;;  %v12337_v43 = vmax.f32 %v2534_v19, %v2562_v63  ;;  %v2540_v63 = vld [vmem:[#allocation3 + $0x378] sm:$0xff]  ;;  %8653 = vmatprep.subr.bf16.mxu1 %v9154_v26 }
 0x39c   : > { %8638 = vmatmul.mubr.bf16.vlgmr.msra.gmra.mrb[0].mxu0 %v3521_v7  ;;  %v12332_v7 = vmax.f32 %v12195_v62, %v2563_v16  ;;  %v2552_v16 = vrot.slane %v2536_v30, 1  ;;  %v15145_v46 = vld [vmem:[#allocation19_spill] sm:$0xff]  ;;  %8654 = vmatpush3.bf16.msra.mxu1 %v9154_v26 }
 0x39d   : > { %3204 = vrot.lane.b32.xlu0 %v3173_v3, %s9346_s29  ;;  %v12307_v36 = vpop.permute.xlu1 %3078  ;;  %v2598_v62 = vmax.f32 %v12337_v43, %v12341_v61  ;;  %v2860_v20 = vand.u32 15, %v15145_v46  ;;  %v15146_v46 = vrot.slane %v12124_v34, 1 }
 0x39e   : > { %15137 = vst [vmem:[#allocation51_spill] sm:$0xff] %v12307_v36  ;;  %v2597_v33 = vmax.f32 %v12332_v7, %v12339_v24 }
 0x39f   : > { %v12313_v6 = vpop.permute.xlu0 %3304  ;;  %4534 = vrot.lane.b32.xlu1 %v12315_v45, %s9349_s10  ;;  %2614 = vst [vmem:[#allocation3 + $0x348] sm:$0xff] %v2598_v62  ;;  %v2561_v62 = vsel %vm14883_vm1, %v2551_v40, %v2552_v16 }
 0x3a0   : > { %2613 = vst [vmem:[#allocation3 + $0x340] sm:$0xff] %v2597_v33  ;;  %v2560_v33 = vsel %vm14883_vm1, %v2552_v16, %v2553_v39  ;;  %v3991_v16 = vadd.s32 128, %v15078_v13  ;;  %v9156_v13 = vld [vmem:[%s14778_s1 + $0x90] sm:$0xff]  }
 0x3a1   : > { %3444 = vrot.lane.b32.xlu0 %v2997_v14, %s9351_s7  ;;  %v12335_v3 = vpop.permute.xlu1 %3364  ;;  %v12382_v36 = vmax.f32 %v2536_v30, %v2560_v33  ;;  %v15150_v30 = vmov 0  ;;  %v3993_v33 = vadd.s32 128, %v15084_v22  ;;  %v9157_v22 = vld [vmem:[%s14778_s1 + $0x98] sm:$0xff]  }
 0x3a3   : > { %v12343_v51 = vpop.permute.xlu0 %3080  ;;  %3264 = vrot.lane.b32.xlu1 %v3236_v8, %s9348_s9  ;;  %v2556_v8 = vrot.slane %v2540_v63, 1 }
 0x3a4   : > { %15142 = vst [vmem:[#allocation54_spill] sm:$0xff] %v12343_v51 }
 0x3a5   : > { %4536 = vrot.lane.b32.xlu0 %v12350_v9, %s9349_s10  ;;  %v12354_v19 = vpop.permute.xlu1 %3082  ;;  %v2572_v26 = vsel %vm14883_vm1, %v2556_v8, %v15146_v46 }
 0x3a6   : > { %15144 = vst [vmem:[#allocation56_spill] sm:$0xff] %v12354_v19  ;;  %v2557_v19 = vsel %vm14883_vm1, %v2555_v38, %v2556_v8  ;;  %v12380_v38 = vmax.f32 %v2535_v56, %v2561_v62  ;;  %v12386_v40 = vmax.f32 %v2540_v63, %v2572_v26  ;;  %vm12403_vm1 = vcmp.gt.s32.totalorder %v2860_v20, 0  ;;  %v12417_v20 = vld [vmem:[#allocation2 + $0xca] sm:$0xff] }
 0x3a7   : > { %v12359_v60 = vpop.permute.xlu0 %3366  ;;  %3488 = vrot.lane.b32.xlu1 %v12066_v28, %s9352_s28  ;;  %v9155_v28 = vld [vmem:[%s14778_s1 + $0x88] sm:$0xff]   ;;  %v12384_v39 = vmax.f32 %v2539_v31, %v2557_v19  ;;  %v15151_v30 = vsel %vm12403_vm1, 4294967295, %v15150_v30  ;;  %v4065_v63 = vand.u32 15, %v3991_v16  ;;  %v7919_v8 = vpack.c.bf16 %v12169_v32, %v12148_v4 }
 0x3a8   : > { %8655 = vmatprep.subr.bf16.mxu1 %v9155_v28  ;;  %v12395_v56 = vld [vmem:[#allocation3 + $0x340] ss:$2 sm:$0xff]  ;;  %v2600_v31 = vmax.f32 %v12382_v36, %v12386_v40  ;;  %15152 = vst [vmem:[#allocation60_spill] sm:$0xff] %v15151_v30  ;;  %v7922_v62 = vpack.c.bf16 %v12286_v5, %v12278_v2  ;;  %v3238_v32 = vsel %vm12403_vm1, %v11925_v35, 0.0  ;;  %v4581_v26 = vsel %vm12052_vm11, %v12079_v27, 0.0  ;;  %vm7921_vm1 = vmpackc.low %vm11879_vm4, %vm15155_vm0 }
 0x3a9   : > { %3266 = vrot.lane.b32.xlu0 %v2997_v14, %s9348_s9  ;;  %v12371_v51 = vpop.permute.xlu1 %3368  ;;  %v2599_v34 = vmax.f32 %v12380_v38, %v12384_v39  ;;  %8656 = vmatpush3.bf16.msra.mxu1 %v9155_v28  ;;  %15148 = vst [vmem:[#allocation58_spill] sm:$0xff] %v12395_v56  ;;  %2631 = vst [vmem:[#allocation2 + $0xe1] sm:$0xff] %v12395_v56  ;;  %vm12419_vm3 = vcmp.lt.s32.totalorder %v4065_v63, 15  ;;  %v4079_v28 = vand.u32 15, %v3993_v33  ;;  %v15171_v35 = vld [vmem:[#allocation47_spill] sm:$0xff]  ;;  %v15172_v56 = vld [vmem:[#allocation4_spill] sm:$0xff] }
 0x3aa   : > { %2616 = vst [vmem:[#allocation3 + $0x358] sm:$0xff] %v2600_v31  ;;  %8657 = vmatprep.subr.bf16.mxu1 %v9156_v13  ;;  %v2593_v16 = vmax.f32 %v12164_v15, %v12332_v7  ;;  %v2601_v31 = vmax.f32 %v12339_v24, %v12155_v25  ;;  %v2602_v27 = vmax.f32 %v12341_v61, %v12162_v44  ;;  %v9287_v25 = vld [vmem:[#allocation2 + $0x20] sm:$0xff]  ;;  %v9288_v24 = vld [vmem:[#allocation2 + $0x30] sm:$0xff]  ;;  %v9291_v7 = vld [vmem:[#allocation2 + $0x38] sm:$0xff] }
 0x3ab   : > { %v12388_v14 = vpop.permute.xlu0 %3084  ;;  %4310 = vrot.lane.b32.xlu1 %v12315_v45, %s9347_s30  ;;  %2615 = vst [vmem:[#allocation3 + $0x350] sm:$0xff] %v2599_v34  ;;  %v2594_v34 = vmax.f32 %v12166_v18, %v12337_v43  ;;  %8613 = vmatprep.mubr.msk.bf16.mxu1 %vm7918_vm5, %v7919_v8  ;;  %vm12459_vm12 = vcmp.lt.s32.totalorder %v4079_v28, 15  ;;  %v3034_v43 = vsel %vm11610_vm8, %v9287_v25, 0.0  ;;  %v3036_v33 = vsel %vm11662_vm6, %v9288_v24, 0.0  ;;  %v12472_v61 = vld [vmem:[#allocation2 + $0xaa] sm:$0xff]  ;;  %v12494_v24 = vld [vmem:[#allocation2 + $0xa2] sm:$0xff]  ;;  %vm7927_vm8 = vmpackc.low %vm12290_vm15, %vm15155_vm0 }
 0x3ac   : > { %15147 = vst [vmem:[#allocation57_spill] sm:$0xff] %v12388_v14  ;;  %2609 = vst [vmem:[#allocation3 + $0x320] sm:$0xff] %v2593_v16  ;;  %8614 = vmatmul.mubr.msk.bf16.gmra.mrb[8].mxu1 %vm7921_vm1, %v7922_v62  ;;  %v12482_v16 = vld [vmem:[#allocation2 + $0x88] sm:$0xff]  ;;  %v12490_v18 = vld [vmem:[#allocation2 + $0x71] sm:$0xff]  ;;  %vm15184_vm6 = vcmp.lt.s32.totalorder %v15012_v48, 7  ;;  %v15197_v42 = vsel %vm12072_vm7, %v12472_v61, 0.0 }
 0x3ad   : > { %3490 = vrot.lane.b32.xlu0 %v12088_v57, %s9352_s28  ;;  %v12401_v19 = vpop.permute.xlu1 %3190  ;;  %8658 = vmatpush3.bf16.msra.mxu1 %v9156_v13  ;;  %2610 = vst [vmem:[#allocation3 + $0x328] sm:$0xff] %v2594_v34  ;;  %2617 = vst [vmem:[#allocation3 + $0x360] sm:$0xff] %v2601_v31  ;;  %v15165_v62 = vld [vmem:[#allocation38_spill] sm:$0xff]  ;;  %v15166_v31 = vld [vmem:[#allocation41_spill] sm:$0xff] }
 0x3ae   : > { %15149 = vst [vmem:[#allocation59_spill] sm:$0xff] %v12401_v19  ;;  %8659 = vmatprep.subr.bf16.mxu1 %v9157_v22  ;;  %2618 = vst [vmem:[#allocation3 + $0x368] sm:$0xff] %v2602_v27  ;;  %v9289_v34 = vld [vmem:[#allocation2 + $0x28] sm:$0xff]  ;;  %v15179_v19 = vld [vmem:[#allocation5_spill] sm:$0xff] }
 0x3af   : > { %v12413_v46 = vpop.permute.xlu0 %3370  ;;  %4596 = vrot.lane.b32.xlu1 %v12070_v1, %s9350_s11  ;;  %15164 = vst [vmem:[#allocation61_spill] sm:$0xff] %v12482_v16  ;;  %v3099_v13 = vadd.f32 %v9289_v34, %v15166_v31  ;;  %v15168_v8 = vld [vmem:[#allocation42_spill] sm:$0xff]  ;;  %v12502_v34 = vld [vmem:[#allocation2 + $0xb2] sm:$0xff]  ;;  %vm7924_vm1 = vmpackc.low %vm12203_vm9, %vm15155_vm0 }
 0x3b0   : > { %v12467_v44 = vld [vmem:[#allocation2 + $0xda] sm:$0xff]  ;;  %v3101_v1 = vadd.f32 %v9291_v7, %v15168_v8  ;;  %v15170_v31 = vld [vmem:[#allocation46_spill] sm:$0xff]  ;;  %15181 = vst [vmem:[#allocation42_spill] sm:$0xff] %v12534_v17  ;;  %vm15187_vm14 = vmmov %vm15184_vm6 }
 0x3b1   : > { %4312 = vrot.lane.b32.xlu0 %v12350_v9, %s9347_s30  ;;  %v12434_v4 = vpop.permute.xlu1 %3430  ;;  %8660 = vmatpush3.bf16.msra.mxu1 %v9157_v22  ;;  %v15167_v22 = vld [vmem:[#allocation40_spill] sm:$0xff]  ;;  %v15173_v8 = vld [vmem:[#allocation20_spill] sm:$0xff]  ;;  %vm15189_vm4 = vmmov %vm15184_vm6 }
 0x3b2   : > { %v12480_v28 = vld [vmem:[#allocation3 + $0x350] ss:$2 sm:$0xff]  ;;  %v3100_v27 = vadd.f32 %v15167_v22, %v3036_v33  ;;  %v12512_v7 = vadd.s32 128, %v15173_v8  ;;  %vm12642_vm5 = vmpackc.low %vm12072_vm7, %vm15155_vm0 }
 0x3b3   : > { %v12451_v63 = vpop.permute.xlu0 %3192  ;;  %3268 = vrot.lane.b32.xlu1 %v3238_v32, %s9348_s9  ;;  %v9158_v32 = vld [vmem:[%s14778_s1 + $0xa0] sm:$0xff]   ;;  %15163 = vst [vmem:[#allocation44_spill] sm:$0xff] %v12480_v28  ;;  %2632 = vst [vmem:[#allocation2 + $0xe9] sm:$0xff] %v12480_v28  ;;  %v3211_v28 = vadd.f32 %v15171_v35, %v3099_v13 }
 0x3b4   : > { %15157 = vst [vmem:[#allocation32_spill] sm:$0xff] %v12451_v63  ;;  %8661 = vmatprep.subr.bf16.mxu1 %v9158_v32  ;;  %v12516_v63 = vld [vmem:[#allocation2 + $0x8a] sm:$0xff]  ;;  %v15176_v35 = vld [vmem:[#allocation49_spill] sm:$0xff] }
 0x3b5   : > { %4598 = vrot.lane.b32.xlu0 %v4581_v26, %s9350_s11  ;;  %v12470_v59 = vpop.permute.xlu1 %3194  ;;  %v3098_v26 = vadd.f32 %v15165_v62, %v3034_v43  ;;  %v12514_v43 = vld [vmem:[#allocation2 + $0x82] sm:$0xff]  ;;  %15175 = vst [vmem:[#allocation41_spill] sm:$0xff] %v12516_v63  ;;  %8662 = vmatpush3.bf16.msra.mxu1 %v9158_v32  ;;  %v3213_v13 = vadd.f32 %v15176_v35, %v3101_v1  ;;  %v12551_v33 = vld [vmem:[#allocation2 + $0x79] sm:$0xff]  ;;  %v2652_v62 = vrot.slane %v12622_v54, 1 }
 0x3b6   : > { %15162 = vst [vmem:[#allocation43_spill] sm:$0xff] %v12470_v59  ;;  %v3212_v59 = vadd.f32 %v15172_v56, %v3100_v27  ;;  %15174 = vst [vmem:[#allocation38_spill] sm:$0xff] %v12514_v43  ;;  %v15177_v56 = vld [vmem:[#allocation48_spill] sm:$0xff]  ;;  %v7925_v8 = vpack.c.bf16 %v12516_v63, %v12514_v43  ;;  %v3277_v32 = vadd.f32 %v12235_v23, %v3211_v28  ;;  %v12658_v43 = vld [vmem:[#allocation3 + $0x3b8] sm:$0xff] }
 0x3b7   : > { %v12488_v25 = vpop.permute.xlu0 %3432  ;;  %3492 = vrot.lane.b32.xlu1 %v12490_v18, %s9352_s28  ;;  %v3210_v22 = vadd.f32 %v15170_v31, %v3098_v26  ;;  %v9159_v26 = vld [vmem:[%s14778_s1 + $0xa8] sm:$0xff]   ;;  %v3279_v35 = vadd.f32 %v12272_v0, %v3213_v13  ;;  %v2596_v23 = vmax.f32 %v12224_v37, %v12382_v36  ;;  %v3546_v28 = vld [vmem:[#allocation2 + $0x9a] sm:$0xff]  ;;  %v2604_v37 = vmax.f32 %v12386_v40, %v12219_v29  ;;  %v2634_v29 = vld [vmem:[#allocation3 + $0x388] sm:$0xff] }
 0x3b8   : > { %8663 = vmatprep.subr.bf16.mxu1 %v9159_v26  ;;  %v3327_v36 = vadd.f32 %v12303_v41, %v3277_v32  ;;  %8617 = vmatprep.mubr.msk.bf16.mxu1 %vm7924_vm1, %v7925_v8  ;;  %v12578_v40 = vld [vmem:[#allocation3 + $0x390] sm:$0xff]  ;;  %v2650_v32 = vrot.slane %v2634_v29, 1  ;;  %vm15193_vm1 = vmmov %vm15189_vm4 }
 0x3b9   : > { %3270 = vrot.lane.b32.xlu0 %v12482_v16, %s9348_s9  ;;  %v12509_v14 = vpop.permute.xlu1 %3434  ;;  %v3276_v50 = vadd.f32 %v15179_v19, %v3210_v22  ;;  %v3278_v16 = vadd.f32 %v12259_v10, %v3212_v59  ;;  %v2595_v19 = vmax.f32 %v12222_v47, %v12380_v38  ;;  %v2603_v10 = vmax.f32 %v12384_v39, %v12232_v12  ;;  %v3545_v59 = vld [vmem:[#allocation2 + $0x92] sm:$0xff]  ;;  %v12548_v22 = vld [vmem:[#allocation3 + $0x380] sm:$0xff]  ;;  %vm15200_vm7 = vmmov %vm15193_vm1 }
 0x3ba   : > { %v12558_v38 = vld [vmem:[#allocation2 + $0xc2] sm:$0xff]  ;;  %8664 = vmatpush3.bf16.msra.mxu1 %v9159_v26  ;;  %v9160_v12 = vld [vmem:[%s14778_s1 + $0xb0] sm:$0xff]   ;;  %v12571_v39 = vadd.f32 %v12313_v6, %v3279_v35  ;;  %2612 = vst [vmem:[#allocation3 + $0x338] sm:$0xff] %v2596_v23  ;;  %2620 = vst [vmem:[#allocation3 + $0x378] sm:$0xff] %v2604_v37  ;;  %v14908_v35 = vrot.slane %v12578_v40, 1  ;;  %v15195_v9 = vrot.slane %v12548_v22, 1 }
 0x3bb   : > { %v12532_v30 = vpop.permute.xlu0 %3196  ;;  %4314 = vrot.lane.b32.xlu1 %v12534_v17, %s9347_s30  ;;  %v3326_v31 = vadd.f32 %v12282_v49, %v3276_v50  ;;  %v7928_v50 = vpack.c.bf16 %v3546_v28, %v3545_v59  ;;  %v3328_v49 = vadd.f32 %v12297_v11, %v3278_v16  ;;  %2611 = vst [vmem:[#allocation3 + $0x330] sm:$0xff] %v2595_v19  ;;  %2619 = vst [vmem:[#allocation3 + $0x370] sm:$0xff] %v2603_v10  ;;  %v12585_v6 = vld [vmem:[#allocation3 + $0x3a0] sm:$0xff]  ;;  %v2638_v16 = vld [vmem:[#allocation3 + $0x3a8] sm:$0xff] }
 0x3bc   : > { %15180 = vst [vmem:[#allocation40_spill] sm:$0xff] %v12532_v30  ;;  %v12587_v8 = vld [vmem:[#allocation3 + $0x3b0] sm:$0xff]  ;;  %v3393_v19 = vadd.f32 %v12359_v60, %v3327_v36  ;;  %8665 = vmatprep.subr.bf16.mxu1 %v9160_v12  ;;  %v2654_v59 = vrot.slane %v2638_v16, 1  ;;  %v12605_v36 = vld [vmem:[#allocation3 + $0x3e0] sm:$0xff]  ;;  %v2646_v26 = vld [vmem:[#allocation3 + $0x3e8] sm:$0xff]  ;;  %v2678_v10 = vsel %vm15184_vm6, %v2650_v32, %v14908_v35  ;;  %v15188_v35 = vrot.slane %v12585_v6, 1 }
 0x3bd   : > { %3494 = vrot.lane.b32.xlu0 %v12551_v33, %s9352_s28  ;;  %v12555_v0 = vpop.permute.xlu1 %3256  ;;  %v3392_v11 = vadd.f32 %v12335_v3, %v3326_v31  ;;  %8618 = vmatmul.mubr.msk.bf16.gmra.mrb[12].mxu1 %vm7927_vm8, %v7928_v50  ;;  %v12592_v3 = vld [vmem:[#allocation3 + $0x3c0] sm:$0xff]  ;;  %v2642_v31 = vld [vmem:[#allocation3 + $0x3c8] sm:$0xff]  ;;  %v12594_v23 = vld [vmem:[#allocation3 + $0x3d0] sm:$0xff]  ;;  %v12614_v28 = vadd.f32 %v12371_v51, %v3328_v49  ;;  %v2662_v17 = vrot.slane %v2646_v26, 1  ;;  %v15186_v49 = vrot.slane %v12587_v8, 1 }
 0x3be   : > { %15182 = vst [vmem:[#allocation34_spill] sm:$0xff] %v12555_v0  ;;  %v12598_v37 = vld [vmem:[#allocation2 + $0xb9] sm:$0xff]  ;;  %8666 = vmatpush3.bf16.msra.mxu1 %v9160_v12  ;;  %v2657_v47 = vrot.slane %v12592_v3, 1  ;;  %v2658_v1 = vrot.slane %v2642_v31, 1  ;;  %v2675_v63 = vsel %vm15189_vm4, %v15188_v35, %v2654_v59  ;;  %v15192_v51 = vrot.slane %v12594_v23, 1  ;;  %vm15194_vm8 = vmmov %vm15193_vm1 }
 0x3bf   : > { %v12581_v41 = vpop.permute.xlu0 %3436  ;;  %4600 = vrot.lane.b32.xlu1 %v12494_v24, %s9350_s11  ;;  %15183 = vst [vmem:[#allocation46_spill] sm:$0xff] %v12598_v37  ;;  %v9161_v60 = vld [vmem:[%s14778_s1 + $0xb8] sm:$0xff]   ;;  %v3458_v12 = vadd.f32 %v12434_v4, %v3392_v11  ;;  %v2674_v11 = vsel %vm15187_vm14, %v2654_v59, %v15186_v49  ;;  %vm15196_vm6 = vmmov %vm15193_vm1  ;;  %v12656_v59 = vmax.f32 %v2634_v29, %v2678_v10  ;;  %v2644_v29 = vld [vmem:[#allocation3 + $0x3d8] sm:$0xff] }
 0x3c0   : > { %v12617_v30 = vld [vmem:[#allocation2 + $0xd2] sm:$0xff]  ;;  %8667 = vmatprep.subr.bf16.mxu1 %v9161_v60  ;;  %v2671_v49 = vsel %vm15194_vm8, %v2657_v47, %v2658_v1  ;;  %v2679_v35 = vsel %vm15196_vm6, %v15195_v9, %v2650_v32  ;;  %v3459_v45 = vadd.f32 %v12488_v25, %v3393_v19  ;;  %vm7980_vm14 = vmpackc.low %vm12052_vm11, %vm15155_vm0  ;;  %v12675_v25 = vld [vmem:[#allocation3 + $0x3f8] sm:$0xff]  ;;  %v2686_v10 = vmax.f32 %v2638_v16, %v2674_v11 }
 0x3c1   : > { %4316 = vrot.lane.b32.xlu0 %v12598_v37, %s9347_s30  ;;  %v3481_v50 = vpop.permute.xlu1 %3480  ;;  %v12619_v0 = vld [vmem:[#allocation3 + $0x3f0] sm:$0xff]  ;;  %v2661_v37 = vrot.slane %v12605_v36, 1  ;;  %v12672_v9 = vmax.f32 %v12548_v22, %v2679_v35  ;;  %vm15201_vm11 = vmmov %vm15193_vm1  ;;  %v2660_v16 = vrot.slane %v2644_v29, 1 }
 0x3c2   : > { %v2663_v4 = vrot.slane %v12619_v0, 1  ;;  %8668 = vmatpush3.bf16.msra.mxu1 %v9161_v60  ;;  %v3508_v32 = vadd.f32 %v3481_v50, %v3458_v12  ;;  %v2656_v12 = vrot.slane %v12658_v43, 1  ;;  %vm15204_vm4 = vmmov %vm15193_vm1 }
 0x3c3   : > { %v12624_v13 = vpop.permute.xlu0 %3258  ;;  %3314 = vrot.lane.b32.xlu1 %v12490_v18, %s9349_s10  ;;  %v2667_v21 = vsel %vm15201_vm11, %v2661_v37, %v2662_v17  ;;  %v15205_v18 = vrot.slane %v12578_v40, 1  ;;  %vm15207_vm8 = vmmov %vm15193_vm1 }
 0x3c4   : > { %15185 = vst [vmem:[#allocation47_spill] sm:$0xff] %v12624_v13  ;;  %v2670_v13 = vsel %vm15193_vm1, %v2658_v1, %v15192_v51  ;;  %v2685_v1 = vmax.f32 %v12585_v6, %v2675_v63  ;;  %v2666_v19 = vsel %vm15200_vm7, %v2662_v17, %v2663_v4  ;;  %v12688_v63 = vmax.f32 %v12592_v3, %v2671_v49  ;;  %vm15209_vm6 = vmmov %vm15193_vm1 }
 0x3c5   : > { %4602 = vrot.lane.b32.xlu0 %v15197_v42, %s9350_s11  ;;  %v12666_v51 = vpop.permute.xlu1 %4302  ;;  %v15199_v42 = vpack.c.bf16 %v12472_v61, %v12494_v24  ;;  %v12690_v35 = vmax.f32 %v2642_v31, %v2670_v13  ;;  %v2698_v17 = vmax.f32 %v12656_v59, %v2686_v10  ;;  %v12706_v3 = vmax.f32 %v12605_v36, %v2667_v21  ;;  %vm15213_vm7 = vmmov %vm15193_vm1 }
 0x3c6   : > { %15198 = vst [vmem:[#allocation4_spill] sm:$0xff] %v12666_v51  ;;  %v2697_v50 = vmax.f32 %v12672_v9, %v2685_v1  ;;  %v15202_v51 = vpack.c.bf16 %v12246_v53, %v12502_v34  ;;  %v15203_v31 = vrot.slane %v12585_v6, 1  ;;  %v2672_v6 = vsel %vm15207_vm8, %v2656_v12, %v2657_v47  ;;  %vm15215_vm11 = vmmov %vm15193_vm1 }
 0x3c7   : > { %8669 = vmatprep.mubr.msk.bf16.mxu1 %vm7980_vm14, %v15199_v42  ;;  %v3483_v60 = vpop.permute.xlu0 %3482  ;;  %4422 = vrot.lane.b32.xlu1 %v12494_v24, %s9346_s29  ;;  %v2664_v24 = vrot.slane %v12675_v25, 1  ;;  %2714 = vst [vmem:[#allocation3 + $0x388] sm:$0xff] %v2698_v17  ;;  %v15208_v36 = vrot.slane %v12587_v8, 1  ;;  %vm15211_vm14 = vmmov %vm15193_vm1 }
 0x3c8   : > { %v3509_v42 = vadd.f32 %v3483_v60, %v3459_v45  ;;  %8670 = vmatmul.mubr.msk.bf16.vlgmr.msra.gmra.mrb[16].mxu1 %vm12642_vm5, %v15202_v51  ;;  %v12708_v45 = vmax.f32 %v2646_v26, %v2666_v19  ;;  %2713 = vst [vmem:[#allocation3 + $0x380] sm:$0xff] %v2697_v50  ;;  %v2676_v11 = vsel %vm15204_vm4, %v2652_v62, %v15203_v31  ;;  %vm15206_vm5 = vmmov %vm15193_vm1  ;;  %v15214_v60 = vrot.slane %v12548_v22, 1 }
 0x3c9   : > { %3316 = vrot.lane.b32.xlu0 %v12551_v33, %s9349_s10  ;;  %v12703_v13 = vpop.permute.xlu1 %3260  ;;  %v2677_v49 = vsel %vm15206_vm5, %v15205_v18, %v2652_v62  ;;  %v9162_v33 = vld [vmem:[%s14778_s1 + $0x40] sm:$0xff]   ;;  %v2665_v26 = vsel %vm15193_vm1, %v2663_v4, %v2664_v24  ;;  %v2673_v19 = vsel %vm15209_vm6, %v15208_v36, %v2656_v12  ;;  %v15210_v62 = vsel %vm11914_vm13, %v15177_v56, 0.0  ;;  %vm7986_vm5 = vmpackc.low %vm12242_vm2, %vm15155_vm0 }
 0x3ca   : > { %v3522_v51 = vpack.c.bf16 %v3509_v42, %v3508_v32  ;;  %v2668_v32 = vsel %vm15211_vm14, %v2660_v16, %v2661_v37  ;;  %v15212_v4 = vrot.slane %v12594_v23, 1  ;;  %v2680_v50 = vsel %vm15215_vm11, %v2664_v24, %v15214_v60  ;;  %v12747_v42 = vld [vmem:[#allocation2 + $0x81] sm:$0xff]  ;;  %8685 = vmatprep.subr.bf16.mxu1 %v9162_v33  ;;  %vm7992_vm14 = vmpackc.low %vm12419_vm3, %vm15155_vm0 }
 0x3cb   : > { %v12729_v21 = vpop.permute.xlu0 %4304  ;;  %4662 = vrot.lane.b32.xlu1 %v15210_v62, %s9351_s7  ;;  %v2683_v12 = vmax.f32 %v12578_v40, %v2677_v49  ;;  %v2701_v56 = vmax.f32 %v2685_v1, %v12688_v63  ;;  %v2702_v37 = vmax.f32 %v2686_v10, %v12690_v35  ;;  %v15216_v22 = vsel %vm12242_vm2, %v12472_v61, 0.0  ;;  %8686 = vmatpush3.bf16.msra.mxu1 %v9162_v33 }
 0x3cc   : > { %v2669_v47 = vsel %vm15213_vm7, %v15212_v4, %v2660_v16  ;;  %8641 = vmatprep.mubr.bf16.mxu0 %v3522_v51  ;;  %v2684_v16 = vmax.f32 %v12622_v54, %v2676_v11  ;;  %v15217_v24 = vand.u32 15, %v12512_v7  ;;  %v2709_v1 = vmax.f32 %v12706_v3, %v12672_v9 }
 0x3cd   : > { %4424 = vrot.lane.b32.xlu0 %v15216_v22, %s9346_s29  ;;  %v3485_v40 = vpop.permute.xlu1 %3484  ;;  %v2710_v54 = vmax.f32 %v12708_v45, %v12656_v59  ;;  %v2687_v61 = vmax.f32 %v12587_v8, %v2673_v19  ;;  %v3395_v7 = vadd.f32 %v12413_v46, %v12571_v39  ;;  %2717 = vst [vmem:[#allocation3 + $0x3a0] sm:$0xff] %v2701_v56  ;;  %2718 = vst [vmem:[#allocation3 + $0x3a8] sm:$0xff] %v2702_v37  ;;  %v9163_v59 = vld [vmem:[%s14778_s1 + $0x48] sm:$0xff]  }
 0x3ce   : > { %vm12762_vm4 = vcmp.lt.s32.totalorder %v15217_v24, 15  ;;  %v15220_v10 = vpack.c.bf16 %v12417_v20, %v12558_v38  ;;  %v2688_v9 = vmax.f32 %v12658_v43, %v2672_v6  ;;  %v2691_v8 = vmax.f32 %v12594_v23, %v2669_v47  ;;  %2725 = vst [vmem:[#allocation3 + $0x3e0] sm:$0xff] %v2709_v1  ;;  %8687 = vmatprep.subr.bf16.mxu1 %v9163_v59  ;;  %v12810_v19 = vld [vmem:[#allocation2 + $0x89] sm:$0xff]  ;;  %v9165_v24 = vld [vmem:[%s14778_s1 + $0x58] sm:$0xff]  }
 0x3cf   : > { %vm7989_vm1 = vmpackc.low %vm12762_vm4, %vm15155_vm0  ;;  %v2692_v11 = vmax.f32 %v2644_v29, %v2668_v32  ;;  %v12787_v46 = vpop.permute.xlu0 %3262  ;;  %3318 = vrot.lane.b32.xlu1 %v12747_v42, %s9349_s10  ;;  %2726 = vst [vmem:[#allocation3 + $0x3e8] sm:$0xff] %v2710_v54  ;;  %v2695_v39 = vmax.f32 %v12619_v0, %v2665_v26  ;;  %v2696_v18 = vmax.f32 %v12675_v25, %v2680_v50  ;;  %v12804_v25 = vld [vmem:[#allocation2 + $0xb0] sm:$0xff]  ;;  %v15223_v26 = vld [vmem:[#allocation15_spill] sm:$0xff] }
 0x3d0   : > { %8673 = vmatprep.mubr.msk.bf16.mxu1 %vm7986_vm5, %v15220_v10  ;;  %v2699_v49 = vmax.f32 %v2683_v12, %v2687_v61  ;;  %v2705_v51 = vmax.f32 %v12688_v63, %v12706_v3  ;;  %v3460_v43 = vadd.f32 %v12509_v14, %v12614_v28  ;;  %v15221_v23 = vpack.c.bf16 %v12467_v44, %v12617_v30  ;;  %v12807_v63 = vld [vmem:[#allocation3 + $0x380] ss:$2 sm:$0xff] }
 0x3d1   : > { %v2700_v29 = vmax.f32 %v2684_v16, %v2688_v9  ;;  %v2703_v33 = vmax.f32 %v2687_v61, %v2691_v8  ;;  %4664 = vrot.lane.b32.xlu0 %v12229_v52, %s9351_s7  ;;  %v12802_v0 = vpop.permute.xlu1 %4306  ;;  %15222 = vst [vmem:[#allocation49_spill] sm:$0xff] %v12804_v25  ;;  %v3986_v6 = vadd.s32 128, %v15223_v26  ;;  %8688 = vmatpush3.bf16.msra.mxu1 %v9163_v59  ;;  %2737 = vst [vmem:[#allocation2 + $0xf1] sm:$0xff] %v12807_v63  ;;  %v9164_v52 = vld [vmem:[%s14778_s1 + $0x50] sm:$0xff]   ;;  %v12841_v61 = vld [vmem:[#allocation2 + $0xe2] sm:$0xff]  ;;  %v15228_v10 = vmov 0 }
 0x3d2   : > { %8674 = vmatmul.mubr.msk.bf16.gmra.mrb[20].mxu1 %vm7989_vm1, %v15221_v23  ;;  %v2704_v14 = vmax.f32 %v2688_v9, %v2692_v11  ;;  %v2711_v28 = vmax.f32 %v2695_v39, %v2683_v12  ;;  %v2712_v3 = vmax.f32 %v2696_v18, %v2684_v16  ;;  %2715 = vst [vmem:[#allocation3 + $0x390] sm:$0xff] %v2699_v49  ;;  %2721 = vst [vmem:[#allocation3 + $0x3c0] sm:$0xff] %v2705_v51  ;;  %v9166_v49 = vld [vmem:[%s14778_s1 + $0x60] sm:$0xff]  }
 0x3d3   : > { %v3461_v36 = vadd.f32 %v12581_v41, %v3395_v7  ;;  %2716 = vst [vmem:[#allocation3 + $0x398] sm:$0xff] %v2700_v29  ;;  %2719 = vst [vmem:[#allocation3 + $0x3b0] sm:$0xff] %v2703_v33  ;;  %v2706_v62 = vmax.f32 %v12690_v35, %v12708_v45  ;;  %v2707_v32 = vmax.f32 %v2691_v8, %v2695_v39  ;;  %v3487_v47 = vpop.permute.xlu0 %3486  ;;  %4426 = vrot.lane.b32.xlu1 %v12502_v34, %s9346_s29  ;;  %v15224_v41 = vld [vmem:[#allocation16_spill] sm:$0xff]  ;;  %v12857_v8 = vld [vmem:[#allocation2 + $0xb8] sm:$0xff] }
 0x3d4   : > { %v2708_v4 = vmax.f32 %v2692_v11, %v2696_v18  ;;  %2720 = vst [vmem:[#allocation3 + $0x3b8] sm:$0xff] %v2704_v14  ;;  %2727 = vst [vmem:[#allocation3 + $0x3f0] sm:$0xff] %v2711_v28  ;;  %v3995_v60 = vadd.s32 128, %v15224_v41  ;;  %v3510_v50 = vadd.f32 %v3485_v40, %v3460_v43  ;;  %v4648_v37 = vsel %vm11965_vm10, %v12804_v25, 0.0  ;;  %8689 = vmatprep.subr.bf16.mxu1 %v9164_v52  ;;  %v3404_v39 = vld [vmem:[#allocation2 + $0x90] sm:$0xff] }
 0x3d5   : > { %2728 = vst [vmem:[#allocation3 + $0x3f8] sm:$0xff] %v2712_v3  ;;  %v3511_v12 = vadd.f32 %v3487_v47, %v3461_v36  ;;  %2722 = vst [vmem:[#allocation3 + $0x3c8] sm:$0xff] %v2706_v62  ;;  %3320 = vrot.lane.b32.xlu0 %v12810_v19, %s9349_s10  ;;  %v12826_v35 = vpop.permute.xlu1 %3306  ;;  %v4030_v45 = vand.u32 15, %v3986_v6  ;;  %8690 = vmatpush3.bf16.msra.mxu1 %v9164_v52  ;;  %v4405_v40 = vsel %vm12762_vm4, %v12246_v53, 0.0  ;;  %v3997_v29 = vadd.s32 128, %v15132_v58  ;;  %v15234_v6 = vld [vmem:[#allocation21_spill] sm:$0xff] }
 0x3d6   : > { %2723 = vst [vmem:[#allocation3 + $0x3d0] sm:$0xff] %v2707_v32  ;;  %2724 = vst [vmem:[#allocation3 + $0x3d8] sm:$0xff] %v2708_v4  ;;  %v4093_v16 = vand.u32 15, %v3995_v60  ;;  %8691 = vmatprep.subr.bf16.mxu1 %v9165_v24  ;;  %v3988_v14 = vadd.s32 128, %v15234_v6  ;;  %v3353_v28 = vsel %vm12203_vm9, %v12286_v5, 0.0  ;;  %v9167_v3 = vld [vmem:[%s14778_s1 + $0x68] sm:$0xff]  }
 0x3d7   : > { %v3523_v22 = vpack.c.bf16 %v3511_v12, %v3510_v50  ;;  %v12834_v1 = vpop.permute.xlu0 %4308  ;;  %4666 = vrot.lane.b32.xlu1 %v4648_v37, %s9351_s7  ;;  %vm12846_vm6 = vcmp.gt.s32.totalorder %v4030_v45, 0  ;;  %15231 = vst [vmem:[#allocation35_spill] sm:$0xff] %v12857_v8  ;;  %v4107_v52 = vand.u32 15, %v3997_v29  ;;  %vm12907_vm9 = vmpackc.low %vm12459_vm12, %vm15155_vm0  ;;  %v9168_v47 = vld [vmem:[%s14778_s1 + $0x70] sm:$0xff]   ;;  %v15238_v60 = vld [vmem:[#allocation53_spill] sm:$0xff] }
 0x3d8   : > { %vm12837_vm8 = vcmp.lt.s32.totalorder %v4093_v16, 15  ;;  %v15229_v10 = vsel %vm12846_vm6, 4294967295, %v15228_v10  ;;  %v12850_v59 = vld [vmem:[#allocation2 + $0xea] sm:$0xff]  ;;  %v4468_v33 = vsel %vm12846_vm6, %v12804_v25, 0.0  ;;  %v4044_v32 = vand.u32 15, %v3988_v14  ;;  %v9169_v29 = vld [vmem:[%s14778_s1 + $0x78] sm:$0xff]  }
 0x3d9   : > { %8642 = vmatmul.mubr.bf16.gmra.mrb[4].mxu0 %v3523_v22  ;;  %4428 = vrot.lane.b32.xlu0 %v4405_v40, %s9346_s29  ;;  %v12844_v7 = vpop.permute.xlu1 %4414  ;;  %15230 = vst [vmem:[#allocation48_spill] sm:$0xff] %v15229_v10  ;;  %v7993_v11 = vpack.c.bf16 %v12850_v59, %v12841_v61  ;;  %vm12924_vm7 = vcmp.lt.s32.totalorder %v4107_v52, 15  ;;  %vm7998_vm11 = vmpackc.low %vm12837_vm8, %vm15155_vm0  ;;  %v15248_v14 = vld [vmem:[#allocation38_spill] sm:$0xff]  ;;  %v4784_v58 = vld [vmem:[#allocation2 + $0x112] sm:$0xff]  ;;  %v15316_v15 = vsel %vm12837_vm8, %v12850_v59, 0.0 }
 0x3da   : > { %v12852_v9 = vld [vmem:[#allocation3 + $0x390] ss:$2 sm:$0xff]  ;;  %8692 = vmatpush3.bf16.msra.mxu1 %v9165_v24  ;;  %vm12942_vm5 = vcmp.gt.s32.totalorder %v4044_v32, 0  ;;  %v15249_v52 = vld [vmem:[#allocation55_spill] sm:$0xff]  ;;  %vm8001_vm1 = vmpackc.low %vm12924_vm7, %vm15155_vm0 }
 0x3db   : > { %2738 = vst [vmem:[#allocation2 + $0xf9] sm:$0xff] %v12852_v9  ;;  %v12871_v51 = vpop.permute.xlu0 %3308  ;;  %3380 = vrot.lane.b32.xlu1 %v12278_v2, %s9350_s11  ;;  %8677 = vmatprep.mubr.msk.bf16.mxu1 %vm7992_vm14, %v7993_v11  ;;  %v15244_v11 = vmov 0  ;;  %v15250_v5 = vld [vmem:[#allocation41_spill] sm:$0xff]  ;;  %v15262_v6 = vld [vmem:[#allocation60_spill] sm:$0xff]  ;;  %v15277_v10 = vld [vmem:[#allocation51_spill] sm:$0xff] }
 0x3dc   : > { %v12875_v43 = vld [vmem:[#allocation3 + $0x3c0] ss:$2 sm:$0xff]  ;;  %8693 = vmatprep.subr.bf16.mxu1 %v9166_v49  ;;  %v15245_v11 = vsel %vm12942_vm5, 4294967295, %v15244_v11  ;;  %vm15263_vm0 = vnez %v15262_v6 }
 0x3dd   : > { %15232 = vst [vmem:[#allocation5_spill] sm:$0xff] %v12875_v43  ;;  %v12877_v23 = vld [vmem:[#allocation3 + $0x3d0] ss:$2 sm:$0xff]  ;;  %2739 = vst [vmem:[#allocation2 + $0x101] sm:$0xff] %v12875_v43  ;;  %4668 = vrot.lane.b32.xlu0 %v12857_v8, %s9351_s7  ;;  %v12887_v2 = vpop.permute.xlu1 %3310  ;;  %v3420_v26 = vsel %vm15263_vm0, %v3404_v39, 0.0  ;;  %v15279_v6 = vld [vmem:[#allocation54_spill] sm:$0xff] }
 0x3de   : > { %15233 = vst [vmem:[#allocation16_spill] sm:$0xff] %v12877_v23  ;;  %2740 = vst [vmem:[#allocation2 + $0x109] sm:$0xff] %v12877_v23  ;;  %8694 = vmatpush3.bf16.msra.mxu1 %v9166_v49  ;;  %v12946_v49 = vld [vmem:[#allocation2 + $0xc0] sm:$0xff]  ;;  %v3405_v39 = vld [vmem:[#allocation2 + $0x98] sm:$0xff] }
 0x3df   : > { %v12896_v36 = vpop.permute.xlu0 %4416  ;;  %4488 = vrot.lane.b32.xlu1 %v4468_v33, %s9348_s9  ;;  %8695 = vmatprep.subr.bf16.mxu1 %v9167_v3  ;;  %15246 = vst [vmem:[#allocation62_spill] sm:$0xff] %v15245_v11  ;;  %15247 = vst [vmem:[#allocation63_spill] sm:$0xff] %v12946_v49  ;;  %v13025_v43 = vld [vmem:[#allocation2 + $0xc1] sm:$0xff] }
 0x3e1   : > { %3382 = vrot.lane.b32.xlu0 %v3353_v28, %s9350_s11  ;;  %v12900_v62 = vpop.permute.xlu1 %4418  ;;  %v4785_v28 = vld [vmem:[#allocation2 + $0x11a] sm:$0xff] }
 0x3e2   : > { %v12902_v4 = vld [vmem:[#allocation2 + $0xf2] sm:$0xff]  ;;  %8696 = vmatpush3.bf16.msra.mxu1 %v9167_v3  ;;  %v4470_v3 = vsel %vm12942_vm5, %v12946_v49, 0.0 }
 0x3e3   : > { %v12914_v41 = vpop.permute.xlu0 %3312  ;;  %4712 = vrot.lane.b32.xlu1 %v15238_v60, %s9352_s28  ;;  %8697 = vmatprep.subr.bf16.mxu1 %v9168_v47  ;;  %v3355_v60 = vsel %vm12290_vm15, %v15250_v5, 0.0  ;;  %v9296_v5 = vld [vmem:[#allocation2 + $0x80] sm:$0xff] }
 0x3e4   : > { %v12918_v50 = vld [vmem:[#allocation2 + $0xfa] sm:$0xff] }
 0x3e5   : > { %v12920_v12 = vld [vmem:[#allocation2 + $0x102] sm:$0xff]  ;;  %v12922_v37 = vld [vmem:[#allocation2 + $0x10a] sm:$0xff]  ;;  %v7996_v16 = vpack.c.bf16 %v12918_v50, %v12902_v4  ;;  %4490 = vrot.lane.b32.xlu0 %v12857_v8, %s9348_s9  ;;  %v12940_v24 = vpop.permute.xlu1 %3086 }
 0x3e6   : > { %15239 = vst [vmem:[#allocation37_spill] sm:$0xff] %v12920_v12  ;;  %15240 = vst [vmem:[#allocation50_spill] sm:$0xff] %v12922_v37  ;;  %v7999_v22 = vpack.c.bf16 %v12922_v37, %v12920_v12  ;;  %8698 = vmatpush3.bf16.msra.mxu1 %v9168_v47  ;;  %v15256_v47 = vld [vmem:[#allocation52_spill] sm:$0xff] }
 0x3e7   : > { %15243 = vst [vmem:[#allocation53_spill] sm:$0xff] %v12940_v24  ;;  %8678 = vmatmul.mubr.msk.bf16.gmra.mrb[24].mxu1 %vm12907_vm9, %v7996_v16  ;;  %v12953_v33 = vpop.permute.xlu0 %4420  ;;  %3384 = vrot.lane.b32.xlu1 %v15248_v14, %s9350_s11  ;;  %v8002_v16 = vpack.c.bf16 %v4785_v28, %v4784_v58  ;;  %v12967_v14 = vld [vmem:[#allocation2 + $0x111] sm:$0xff]  ;;  %v15255_v28 = vld [vmem:[#allocation42_spill] sm:$0xff]  ;;  %vm15257_vm15 = vnez %v15256_v47 }
 0x3e8   : > { %8681 = vmatprep.mubr.msk.bf16.mxu1 %vm7998_vm11, %v7999_v22  ;;  %8699 = vmatprep.subr.bf16.mxu1 %v9169_v29  ;;  %15252 = vst [vmem:[#allocation38_spill] sm:$0xff] %v12967_v14  ;;  %v15282_v24 = vld [vmem:[#allocation32_spill] sm:$0xff] }
 0x3e9   : > { %4714 = vrot.lane.b32.xlu0 %v15249_v52, %s9352_s28  ;;  %v12962_v32 = vpop.permute.xlu1 %3372  ;;  %v12979_v52 = vld [vmem:[#allocation2 + $0xc8] sm:$0xff] }
 0x3ea   : > { %8700 = vmatpush3.bf16.msra.mxu1 %v9169_v29  ;;  %15254 = vst [vmem:[#allocation41_spill] sm:$0xff] %v12979_v52 }
 0x3eb   : > { %8789 = vmatprep.subr.bf16.mxu1 %v12967_v14  ;;  %v12970_v22 = vpop.permute.xlu0 %3088  ;;  %4492 = vrot.lane.b32.xlu1 %v4470_v3, %s9348_s9  ;;  %v3418_v3 = vsel %vm15257_vm15, %v9296_v5, 0.0 }
 0x3ec   : > { %15253 = vst [vmem:[#allocation55_spill] sm:$0xff] %v12970_v22  ;;  %v15281_v22 = vld [vmem:[#allocation59_spill] sm:$0xff] }
 0x3ed   : > { %3386 = vrot.lane.b32.xlu0 %v3355_v60, %s9350_s11  ;;  %v12977_v29 = vpop.permute.xlu1 %4480 }
 0x3ef   : > { %8682 = vmatmul.mubr.msk.bf16.gmra.mrb[28].mxu1 %vm8001_vm1, %v8002_v16  ;;  %v12981_v58 = vpop.permute.xlu0 %3374  ;;  %4716 = vrot.lane.b32.xlu1 %v15255_v28, %s9352_s28  ;;  %v15259_v16 = vld [vmem:[#allocation46_spill] sm:$0xff] }
 0x3f1   : > { %4494 = vrot.lane.b32.xlu0 %v12979_v52, %s9348_s9  ;;  %v12989_v40 = vpop.permute.xlu1 %3090 }
 0x3f2   : > { %15258 = vst [vmem:[#allocation18_spill] sm:$0xff] %v12989_v40  ;;  %v13040_v40 = vld [vmem:[#allocation2 + $0xc9] sm:$0xff] }
 0x3f3   : > { %v12991_v60 = vpop.permute.xlu0 %4482  ;;  %3446 = vrot.lane.b32.xlu1 %v3418_v3, %s9351_s7  ;;  %v15265_v3 = vld [vmem:[#allocation61_spill] sm:$0xff] }
 0x3f5   : > { %4718 = vrot.lane.b32.xlu0 %v15259_v16, %s9352_s28  ;;  %v12996_v18 = vpop.permute.xlu1 %3376 }
 0x3f7   : > { %v12998_v17 = vpop.permute.xlu0 %3092  ;;  %4538 = vrot.lane.b32.xlu1 %v15255_v28, %s9349_s10  ;;  %v13002_v5 = vpop.f32.mrb[0].mxu1 }
 0x3f8   : > { %15260 = vst [vmem:[#allocation42_spill] sm:$0xff] %v12998_v17  ;;  %15261 = vst [vmem:[#allocation46_spill] sm:$0xff] %v13002_v5  ;;  %v13006_v8 = vpop.f32.mrb[1].mxu1  ;;  %v15278_v5 = vld [vmem:[#allocation36_spill] sm:$0xff] }
 0x3f9   : > { %15264 = vst [vmem:[#allocation64_spill] sm:$0xff] %v13006_v8  ;;  %3448 = vrot.lane.b32.xlu0 %v15265_v3, %s9351_s7  ;;  %v13010_v14 = vpop.permute.xlu1 %4484  ;;  %v13012_v25 = vpop.f32.mrb[2].mxu1  ;;  %v3471_v8 = vld [vmem:[#allocation2 + $0x99] sm:$0xff] }
 0x3fa   : > { %15266 = vst [vmem:[#allocation61_spill] sm:$0xff] %v13012_v25  ;;  %v13014_v12 = vpop.f32.mrb[3].mxu1 }
 0x3fb   : > { %15267 = vst [vmem:[#allocation65_spill] sm:$0xff] %v13014_v12  ;;  %v13016_v23 = vpop.permute.xlu0 %3378  ;;  %3450 = vrot.lane.b32.xlu1 %v3420_v26, %s9351_s7 }
 0x3fd   : > { %4540 = vrot.lane.b32.xlu0 %v15259_v16, %s9349_s10  ;;  %v13021_v28 = vpop.permute.xlu1 %3198  ;;  %v15271_v16 = vsel %vm12242_vm2, %v12246_v53, 0.0  ;;  %v13074_v53 = vld [vmem:[#allocation2 + $0xd0] sm:$0xff] }
 0x3fe   : > { %15268 = vst [vmem:[#allocation66_spill] sm:$0xff] %v13021_v28  ;;  %15276 = vst [vmem:[#allocation70_spill] sm:$0xff] %v13074_v53 }
 0x3ff   : > { %v13023_v48 = vpop.permute.xlu0 %4486  ;;  %4542 = vrot.lane.b32.xlu1 %v13025_v43, %s9349_s10 }
 0x401   : > { %3452 = vrot.lane.b32.xlu0 %v3405_v39, %s9351_s7  ;;  %v3439_v26 = vpop.permute.xlu1 %3438  ;;  %v3470_v39 = vld [vmem:[#allocation2 + $0x91] sm:$0xff] }
 0x403   : > { %v13033_v12 = vpop.permute.xlu0 %3200  ;;  %3496 = vrot.lane.b32.xlu1 %v12747_v42, %s9352_s28 }
 0x404   : > { %15269 = vst [vmem:[#allocation67_spill] sm:$0xff] %v13033_v12 }
 0x405   : > { %4544 = vrot.lane.b32.xlu0 %v13040_v40, %s9349_s10  ;;  %v13044_v25 = vpop.permute.xlu1 %4530 }
 0x407   : > { %v3441_v17 = vpop.permute.xlu0 %3440  ;;  %4604 = vrot.lane.b32.xlu1 %v12502_v34, %s9350_s11 }
 0x409   : > { %3498 = vrot.lane.b32.xlu0 %v12810_v19, %s9352_s28  ;;  %v13050_v42 = vpop.permute.xlu1 %3202  ;;  %v4650_v19 = vsel %vm12846_vm6, %v12946_v49, 0.0 }
 0x40a   : > { %15270 = vst [vmem:[#allocation68_spill] sm:$0xff] %v13050_v42  ;;  %v9299_v42 = vld [vmem:[#allocation2 + $0x40] sm:$0xff] }
 0x40b   : > { %v13052_v12 = vpop.permute.xlu0 %4532  ;;  %3500 = vrot.lane.b32.xlu1 %v3470_v39, %s9352_s28  ;;  %v15273_v39 = vld [vmem:[#allocation8_spill] sm:$0xff] }
 0x40c   : > { %vm15274_vm14 = vnez %v15273_v39  ;;  %v3103_v39 = vadd.f32 %v15279_v6, %v15278_v5 }
 0x40d   : > { %4606 = vrot.lane.b32.xlu0 %v15271_v16, %s9350_s11  ;;  %v13060_v37 = vpop.permute.xlu1 %3442  ;;  %v3038_v28 = vsel %vm15274_vm14, %v9299_v42, 0.0  ;;  %v4587_v16 = vsel %vm12762_vm4, %v12417_v20, 0.0 }
 0x40e   : > { %v3102_v49 = vadd.f32 %v15277_v10, %v3038_v28  ;;  %v3215_v47 = vadd.f32 %v15282_v24, %v3103_v39  ;;  %v15283_v10 = vld [vmem:[#allocation34_spill] sm:$0xff] }
 0x40f   : > { %v13062_v34 = vpop.permute.xlu0 %3204  ;;  %4608 = vrot.lane.b32.xlu1 %v12558_v38, %s9350_s11 }
 0x410   : > { %15272 = vst [vmem:[#allocation69_spill] sm:$0xff] %v13062_v34  ;;  %v3214_v31 = vadd.f32 %v15281_v22, %v3102_v49 }
 0x411   : > { %3502 = vrot.lane.b32.xlu0 %v3471_v8, %s9352_s28  ;;  %v13072_v55 = vpop.permute.xlu1 %4534  ;;  %v4652_v8 = vsel %vm12942_vm5, %v13074_v53, 0.0 }
 0x412   : > { %15275 = vst [vmem:[#allocation8_spill] sm:$0xff] %v13072_v55  ;;  %v3280_v28 = vadd.f32 %v15283_v10, %v3214_v31 }
 0x413   : > { %v13079_v34 = vpop.permute.xlu0 %3444  ;;  %4670 = vrot.lane.b32.xlu1 %v4650_v19, %s9351_s7  ;;  %v15284_v19 = vld [vmem:[#allocation47_spill] sm:$0xff] }
 0x414   : > { %v3281_v6 = vadd.f32 %v15284_v19, %v3215_v47  ;;  %v15290_v19 = vld [vmem:[#allocation56_spill] sm:$0xff] }
 0x415   : > { %4610 = vrot.lane.b32.xlu0 %v4587_v16, %s9350_s11  ;;  %v13089_v42 = vpop.permute.xlu1 %3264  ;;  %v3330_v16 = vadd.f32 %v12826_v35, %v3280_v28 }
 0x416   : > { %15280 = vst [vmem:[#allocation51_spill] sm:$0xff] %v13089_v42  ;;  %v3331_v11 = vadd.f32 %v12871_v51, %v3281_v6  ;;  %v13102_v42 = vld [vmem:[#allocation2 + $0xd8] sm:$0xff] }
 0x417   : > { %v13093_v55 = vpop.permute.xlu0 %4536  ;;  %4674 = vrot.lane.b32.xlu1 %v4652_v8, %s9351_s7  ;;  %15285 = vst [vmem:[#allocation36_spill] sm:$0xff] %v13102_v42  ;;  %v3396_v24 = vadd.f32 %v12962_v32, %v3330_v16  ;;  %v13114_v51 = vld [vmem:[#allocation2 + $0xd1] sm:$0xff] }
 0x418   : > { %v3397_v22 = vadd.f32 %v12981_v58, %v3331_v11  ;;  %v9301_v16 = vld [vmem:[#allocation2 + $0x58] sm:$0xff] }
 0x419   : > { %4672 = vrot.lane.b32.xlu0 %v12979_v52, %s9351_s7  ;;  %v3489_v5 = vpop.permute.xlu1 %3488  ;;  %v3462_v39 = vadd.f32 %v3439_v26, %v3396_v24  ;;  %v15288_v26 = vld [vmem:[#allocation39_spill] sm:$0xff] }
 0x41a   : > { %v3463_v35 = vadd.f32 %v3441_v17, %v3397_v22  ;;  %v15286_v17 = vld [vmem:[#allocation45_spill] sm:$0xff] }
 0x41b   : > { %v13104_v49 = vpop.permute.xlu0 %3266  ;;  %4720 = vrot.lane.b32.xlu1 %v13025_v43, %s9352_s28  ;;  %v3512_v31 = vadd.f32 %v3489_v5, %v3462_v39  ;;  %vm15287_vm2 = vnez %v15286_v17  ;;  %v15291_v5 = vld [vmem:[#allocation57_spill] sm:$0xff] }
 0x41c   : > { %v15289_v28 = vsel %vm15287_vm2, %v15288_v26, 0.0  ;;  %v3105_v24 = vadd.f32 %v9301_v16, %v15291_v5  ;;  %v9302_v22 = vld [vmem:[#allocation2 + $0xd9] sm:$0xff]  ;;  %v15295_v16 = vld [vmem:[#allocation13_spill] sm:$0xff] }
 0x41d   : > { %4676 = vrot.lane.b32.xlu0 %v13102_v42, %s9351_s7  ;;  %v13112_v47 = vpop.permute.xlu1 %4310  ;;  %v3104_v6 = vadd.f32 %v15290_v19, %v15289_v28  ;;  %v3992_v5 = vadd.s32 128, %v15295_v16  ;;  %v13188_v16 = vld [vmem:[#allocation2 + $0xe0] sm:$0xff] }
 0x41e   : > { %15305 = vst [vmem:[#allocation47_spill] sm:$0xff] %v13188_v16 }
 0x41f   : > { %v3491_v8 = vpop.permute.xlu0 %3490  ;;  %4724 = vrot.lane.b32.xlu1 %v13114_v51, %s9352_s28 }
 0x420   : > { %v3513_v10 = vadd.f32 %v3491_v8, %v3463_v35  ;;  %v15292_v35 = vld [vmem:[#allocation9_spill] sm:$0xff] }
 0x421   : > { %4722 = vrot.lane.b32.xlu0 %v13040_v40, %s9352_s28  ;;  %v13120_v32 = vpop.permute.xlu1 %4596  ;;  %v3990_v8 = vadd.s32 128, %v15292_v35 }
 0x422   : > { %v3524_v11 = vpack.c.bf16 %v3513_v10, %v3512_v31  ;;  %v15293_v31 = vld [vmem:[#allocation43_spill] sm:$0xff] }
 0x423   : > { %v13122_v58 = vpop.permute.xlu0 %4312  ;;  %4318 = vrot.lane.b32.xlu1 %v13025_v43, %s9347_s30  ;;  %v3216_v10 = vadd.f32 %v15293_v31, %v3104_v6  ;;  %v15294_v43 = vld [vmem:[#allocation40_spill] sm:$0xff]  ;;  %v4058_v19 = vand.u32 15, %v3990_v8 }
 0x424   : > { %8645 = vmatprep.mubr.bf16.mxu0 %v3524_v11  ;;  %v3217_v52 = vadd.f32 %v15294_v43, %v3105_v24 }
 0x425   : > { %4726 = vrot.lane.b32.xlu0 %v9302_v22, %s9352_s28  ;;  %v13133_v39 = vpop.permute.xlu1 %3268  ;;  %v3282_v26 = vadd.f32 %v12703_v13, %v3216_v10  ;;  %vm13162_vm4 = vcmp.gt.s32.totalorder %v4058_v19, 0  ;;  %v15302_v19 = vsel %vm12419_vm3, %v12417_v20, 0.0  ;;  %v15306_v20 = vsel %vm12459_vm12, %v12467_v44, 0.0 }
 0x426   : > { %v3283_v11 = vadd.f32 %v12787_v46, %v3217_v52 }
 0x427   : > { %v13138_v17 = vpop.permute.xlu0 %4598  ;;  %4322 = vrot.lane.b32.xlu1 %v13114_v51, %s9347_s30  ;;  %v3332_v6 = vadd.f32 %v12887_v2, %v3282_v26  ;;  %v13153_v31 = vpop.f32.mrb[4].mxu1 }
 0x428   : > { %v3333_v24 = vadd.f32 %v12914_v41, %v3283_v11  ;;  %15296 = vst [vmem:[#allocation54_spill] sm:$0xff] %v13153_v31  ;;  %v4072_v41 = vand.u32 15, %v3992_v5  ;;  %v4472_v11 = vsel %vm13162_vm4, %v13074_v53, 0.0 }
 0x429   : > { %4320 = vrot.lane.b32.xlu0 %v13040_v40, %s9347_s30  ;;  %v3493_v28 = vpop.permute.xlu1 %3492  ;;  %v3398_v13 = vadd.f32 %v12996_v18, %v3332_v6  ;;  %v13157_v40 = vpop.f32.mrb[5].mxu1 }
 0x42a   : > { %v3399_v46 = vadd.f32 %v13016_v23, %v3333_v24  ;;  %15297 = vst [vmem:[#allocation59_spill] sm:$0xff] %v13157_v40  ;;  %v13166_v8 = vpop.f32.mrb[6].mxu1  ;;  %vm13184_vm9 = vcmp.gt.s32.totalorder %v4072_v41, 0  ;;  %v13210_v41 = vld [vmem:[#allocation2 + $0xe8] sm:$0xff]  ;;  %v4335_v40 = vadd.f32 %v12729_v21, %v15265_v3  ;;  %v4654_v21 = vsel %vm13162_vm4, %v13188_v16, 0.0  ;;  %v15315_v3 = vld [vmem:[#allocation17_spill] sm:$0xff] }
 0x42b   : > { %v13149_v35 = vpop.permute.xlu0 %3270  ;;  %4430 = vrot.lane.b32.xlu1 %v12558_v38, %s9346_s29  ;;  %15300 = vst [vmem:[#allocation32_spill] sm:$0xff] %v13166_v8  ;;  %v3464_v38 = vadd.f32 %v13060_v37, %v3398_v13  ;;  %v13170_v18 = vpop.f32.mrb[7].mxu1  ;;  %v4474_v6 = vsel %vm13184_vm9, %v13188_v16, 0.0  ;;  %15307 = vst [vmem:[#allocation45_spill] sm:$0xff] %v13210_v41  ;;  %v9309_v16 = vld [vmem:[#allocation2 + $0x78] sm:$0xff] }
 0x42c   : > { %v3465_v10 = vadd.f32 %v13079_v34, %v3399_v46  ;;  %15301 = vst [vmem:[#allocation34_spill] sm:$0xff] %v13170_v18  ;;  %v15313_v18 = vld [vmem:[#allocation4_spill] sm:$0xff] }
 0x42d   : > { %4324 = vrot.lane.b32.xlu0 %v9302_v22, %s9347_s30  ;;  %v13160_v52 = vpop.permute.xlu1 %4314  ;;  %v3514_v43 = vadd.f32 %v3493_v28, %v3464_v38 }
 0x42f   : > { %v3495_v23 = vpop.permute.xlu0 %3494  ;;  %4434 = vrot.lane.b32.xlu1 %v12617_v30, %s9346_s29 }
 0x430   : > { %v3515_v26 = vadd.f32 %v3495_v23, %v3465_v10 }
 0x431   : > { %4432 = vrot.lane.b32.xlu0 %v15302_v19, %s9346_s29  ;;  %v13182_v37 = vpop.permute.xlu1 %4600  ;;  %v13225_v19 = vld [vmem:[#allocation2 + $0xe1] sm:$0xff] }
 0x432   : > { %v3525_v28 = vpack.c.bf16 %v3515_v26, %v3514_v43  ;;  %v15308_v43 = vld [vmem:[#allocation58_spill] sm:$0xff] }
 0x433   : > { %v13190_v5 = vpop.permute.xlu0 %4316  ;;  %4496 = vrot.lane.b32.xlu1 %v4472_v11, %s9348_s9 }
 0x434   : > { %8646 = vmatmul.mubr.bf16.gmra.mrb[8].mxu0 %v3525_v28 }
 0x435   : > { %4436 = vrot.lane.b32.xlu0 %v15306_v20, %s9346_s29  ;;  %v13201_v24 = vpop.permute.xlu1 %3314 }
 0x437   : > { %v13203_v13 = vpop.permute.xlu0 %4602  ;;  %4500 = vrot.lane.b32.xlu1 %v4474_v6, %s9348_s9 }
 0x439   : > { %4498 = vrot.lane.b32.xlu0 %v13102_v42, %s9348_s9  ;;  %v13208_v46 = vpop.permute.xlu1 %4422 }
 0x43b   : > { %v13212_v38 = vpop.permute.xlu0 %3316  ;;  %4546 = vrot.lane.b32.xlu1 %v13114_v51, %s9349_s10  ;;  %v15309_v51 = vld [vmem:[#allocation44_spill] sm:$0xff] }
 0x43d   : > { %4502 = vrot.lane.b32.xlu0 %v13210_v41, %s9348_s9  ;;  %v4663_v10 = vpop.permute.xlu1 %4662 }
 0x43f   : > { %v13218_v23 = vpop.permute.xlu0 %4424  ;;  %4550 = vrot.lane.b32.xlu1 %v15308_v43, %s9349_s10  ;;  %v15310_v43 = vsel %vm12419_vm3, %v12467_v44, 0.0 }
 0x441   : > { %4548 = vrot.lane.b32.xlu0 %v9302_v22, %s9349_s10  ;;  %v13223_v26 = vpop.permute.xlu1 %3318 }
 0x443   : > { %v4665_v11 = vpop.permute.xlu0 %4664  ;;  %4326 = vrot.lane.b32.xlu1 %v13225_v19, %s9347_s30 }
 0x445   : > { %4552 = vrot.lane.b32.xlu0 %v15309_v51, %s9349_s10  ;;  %v13231_v28 = vpop.permute.xlu1 %4426 }
 0x447   : > { %v13233_v6 = vpop.permute.xlu0 %3320  ;;  %4612 = vrot.lane.b32.xlu1 %v12617_v30, %s9350_s11  ;;  %v15311_v30 = vld [vmem:[#allocation33_spill] sm:$0xff] }
 0x449   : > { %4328 = vrot.lane.b32.xlu0 %v15309_v51, %s9347_s30  ;;  %v13239_v22 = vpop.permute.xlu1 %4666  ;;  %v15312_v51 = vsel %vm11914_vm13, %v15311_v30, 0.0 }
 0x44a   : > { %v4334_v8 = vadd.f32 %v15313_v18, %v15312_v51 }
 0x44b   : > { %v13241_v20 = vpop.permute.xlu0 %4428  ;;  %4330 = vrot.lane.b32.xlu1 %v12807_v63, %s9347_s30 }
 0x44c   : > { %v4446_v44 = vadd.f32 %v12844_v7, %v4334_v8  ;;  %v15314_v7 = vsel %vm12459_vm12, %v12850_v59, 0.0 }
 0x44d   : > { %4614 = vrot.lane.b32.xlu0 %v15310_v43, %s9350_s11  ;;  %v13250_v42 = vpop.permute.xlu1 %3380  ;;  %v4447_v43 = vadd.f32 %v12896_v36, %v4335_v40  ;;  %v3994_v40 = vadd.s32 128, %v15315_v3 }
 0x44e   : > { %v4512_v27 = vadd.f32 %v12977_v29, %v4446_v44  ;;  %v13298_v44 = vld [vmem:[#allocation2 + $0xf0] sm:$0xff] }
 0x44f   : > { %v13252_v53 = vpop.permute.xlu0 %4668  ;;  %4616 = vrot.lane.b32.xlu1 %v12841_v61, %s9350_s11  ;;  %v4513_v18 = vadd.f32 %v12991_v60, %v4447_v43  ;;  %15317 = vst [vmem:[#allocation39_spill] sm:$0xff] %v13298_v44 }
 0x450   : > { %v4562_v8 = vadd.f32 %v13044_v25, %v4512_v27  ;;  %v4086_v25 = vand.u32 15, %v3994_v40  ;;  %v15318_v27 = vld [vmem:[#allocation12_spill] sm:$0xff] }
 0x451   : > { %4332 = vrot.lane.b32.xlu0 %v12852_v9, %s9347_s30  ;;  %v13265_v57 = vpop.permute.xlu1 %4488 }
 0x452   : > { %v4628_v60 = vadd.f32 %v13120_v32, %v4562_v8  ;;  %vm13315_vm3 = vcmp.gt.s32.totalorder %v4086_v25, 0 }
 0x453   : > { %v13269_v31 = vpop.permute.xlu0 %3382  ;;  %4438 = vrot.lane.b32.xlu1 %v12841_v61, %s9346_s29  ;;  %v4563_v61 = vadd.f32 %v13052_v12, %v4513_v18  ;;  %v15319_v18 = vsel %vm11965_vm10, %v15318_v27, 0.0 }
 0x454   : > { %v4694_v12 = vadd.f32 %v4663_v10, %v4628_v60  ;;  %v4336_v32 = vadd.f32 %v12802_v0, %v15319_v18  ;;  %v4656_v10 = vsel %vm13184_vm9, %v13298_v44, 0.0 }
 0x455   : > { %4618 = vrot.lane.b32.xlu0 %v15314_v7, %s9350_s11  ;;  %v4713_v36 = vpop.permute.xlu1 %4712  ;;  %v4629_v30 = vadd.f32 %v13138_v17, %v4563_v61 }
 0x456   : > { %v4744_v7 = vadd.f32 %v4713_v36, %v4694_v12  ;;  %v4448_v8 = vadd.f32 %v12900_v62, %v4336_v32  ;;  %v15323_v62 = vsel %vm12924_vm7, %v12918_v50, 0.0  ;;  %v15324_v12 = vld [vmem:[#allocation8_spill] sm:$0xff] }
 0x457   : > { %v13286_v29 = vpop.permute.xlu0 %4490  ;;  %4678 = vrot.lane.b32.xlu1 %v4654_v21, %s9351_s7  ;;  %v4695_v43 = vadd.f32 %v4665_v11, %v4629_v30  ;;  %v9304_v21 = vld [vmem:[#allocation2 + $0x98] sm:$0xff]  ;;  %v15322_v11 = vld [vmem:[#allocation19_spill] sm:$0xff] }
 0x458   : > { %v4337_v59 = vadd.f32 %v9304_v21, %v12834_v1  ;;  %v3996_v40 = vadd.s32 128, %v15322_v11  ;;  %v4514_v60 = vadd.f32 %v13010_v14, %v4448_v8  ;;  %v13337_v14 = vld [vmem:[#allocation2 + $0xf8] sm:$0xff] }
 0x459   : > { %4440 = vrot.lane.b32.xlu0 %v15316_v15, %s9346_s29  ;;  %v13296_v51 = vpop.permute.xlu1 %3384  ;;  %v4476_v15 = vsel %vm13315_vm3, %v13298_v44, 0.0  ;;  %15325 = vst [vmem:[#allocation56_spill] sm:$0xff] %v13337_v14 }
 0x45a   : > { %v4449_v1 = vadd.f32 %v12953_v33, %v4337_v59  ;;  %v4100_v25 = vand.u32 15, %v3996_v40 }
 0x45b   : > { %v4715_v17 = vpop.permute.xlu0 %4714  ;;  %4442 = vrot.lane.b32.xlu1 %v12902_v4, %s9346_s29 }
 0x45c   : > { %v4745_v3 = vadd.f32 %v4715_v17, %v4695_v43  ;;  %v4515_v30 = vadd.f32 %v13023_v48, %v4449_v1  ;;  %v4564_v43 = vadd.f32 %v15324_v12, %v4514_v60  ;;  %vm13348_vm13 = vcmp.gt.s32.totalorder %v4100_v25, 0  ;;  %v9306_v1 = vld [vmem:[#allocation2 + $0xe9] sm:$0xff] }
 0x45d   : > { %4680 = vrot.lane.b32.xlu0 %v13210_v41, %s9351_s7  ;;  %v13313_v56 = vpop.permute.xlu1 %4492  ;;  %v13373_v60 = vld [vmem:[#allocation2 + $0x108] sm:$0xff] }
 0x45e   : > { %v4760_v36 = vpack.c.bf16 %v4745_v3, %v4744_v7  ;;  %v4565_v27 = vadd.f32 %v13093_v55, %v4515_v30  ;;  %v4630_v18 = vadd.f32 %v13182_v37, %v4564_v43  ;;  %v13352_v55 = vld [vmem:[#allocation2 + $0x100] sm:$0xff]  ;;  %v9307_v12 = vld [vmem:[#allocation2 + $0x68] sm:$0xff]  ;;  %v15330_v43 = vld [vmem:[#allocation55_spill] sm:$0xff] }
 0x45f   : > { %v13322_v61 = vpop.permute.xlu0 %3386  ;;  %4682 = vrot.lane.b32.xlu1 %v4656_v10, %s9351_s7  ;;  %v4478_v10 = vsel %vm13348_vm13, %v13352_v55, 0.0  ;;  %v15329_v30 = vld [vmem:[#allocation53_spill] sm:$0xff] }
 0x460   : > { %8701 = vmatprep.mubr.bf16.mxu1 %v4760_v36  ;;  %v4631_v32 = vadd.f32 %v13203_v13, %v4565_v27  ;;  %v4696_v59 = vadd.f32 %v13239_v22, %v4630_v18  ;;  %v3107_v27 = vadd.f32 %v9307_v12, %v15330_v43  ;;  %v9308_v18 = vld [vmem:[#allocation2 + $0x70] sm:$0xff]  ;;  %v15336_v43 = vld [vmem:[#allocation61_spill] sm:$0xff] }
 0x461   : > { %4444 = vrot.lane.b32.xlu0 %v15323_v62, %s9346_s29  ;;  %v4717_v33 = vpop.permute.xlu1 %4716 }
 0x462   : > { %v4697_v7 = vadd.f32 %v13252_v53, %v4631_v32  ;;  %v4746_v37 = vadd.f32 %v4717_v33, %v4696_v59  ;;  %v9305_v53 = vld [vmem:[#allocation2 + $0x60] sm:$0xff]  ;;  %v3044_v59 = vsel %vm15263_vm0, %v9308_v18, 0.0  ;;  %v15337_v32 = vld [vmem:[#allocation18_spill] sm:$0xff] }
 0x463   : > { %v13339_v48 = vpop.permute.xlu0 %4494  ;;  %4504 = vrot.lane.b32.xlu1 %v4476_v15, %s9348_s9  ;;  %v13381_v33 = vld [vmem:[%s14779_s2 + $0x1] ss:$0 sm:$0xff] }
 0x465   : > { %4684 = vrot.lane.b32.xlu0 %v13337_v14, %s9351_s7  ;;  %v13346_v17 = vpop.permute.xlu1 %3446 }
 0x467   : > { %v4719_v3 = vpop.permute.xlu0 %4718  ;;  %4728 = vrot.lane.b32.xlu1 %v13225_v19, %s9352_s28  ;;  %v3042_v19 = vsel %vm15257_vm15, %v9305_v53, 0.0  ;;  %v15334_v53 = vld [vmem:[#allocation64_spill] sm:$0xff] }
 0x468   : > { %v4747_v13 = vadd.f32 %v4719_v3, %v4697_v7  ;;  %v3106_v15 = vadd.f32 %v15329_v30, %v3042_v19  ;;  %v15332_v7 = vld [vmem:[#allocation46_spill] sm:$0xff]  ;;  %v15335_v30 = vld [vmem:[#allocation67_spill] sm:$0xff] }
 0x469   : > { %4506 = vrot.lane.b32.xlu0 %v13337_v14, %s9348_s9  ;;  %v13363_v11 = vpop.permute.xlu1 %4538  ;;  %v3219_v12 = vadd.f32 %v15335_v30, %v3107_v27  ;;  %v15340_v27 = vld [vmem:[#allocation42_spill] sm:$0xff] }
 0x46a   : > { %v4761_v40 = vpack.c.bf16 %v4747_v13, %v4746_v37  ;;  %v15333_v13 = vld [vmem:[#allocation66_spill] sm:$0xff]  ;;  %v3109_v30 = vadd.f32 %v9309_v16, %v15340_v27 }
 0x46b   : > { %v13365_v8 = vpop.permute.xlu0 %3448  ;;  %4508 = vrot.lane.b32.xlu1 %v4478_v10, %s9348_s9  ;;  %v3218_v10 = vadd.f32 %v15333_v13, %v3106_v15  ;;  %v15338_v13 = vld [vmem:[#allocation51_spill] sm:$0xff] }
 0x46c   : > { %8702 = vmatmul.mubr.bf16.vlgmr.msra.gmra.mrb[16].mxu1 %v4761_v40  ;;  %v13393_v40 = vld [vmem:[%s14780_s3 + $0x1] ss:$0 sm:$0xff] }
 0x46d   : > { %4730 = vrot.lane.b32.xlu0 %v9306_v1, %s9352_s28  ;;  %v13371_v36 = vpop.permute.xlu1 %3450  ;;  %v3284_v14 = vadd.f32 %v15338_v13, %v3218_v10 }
 0x46f   : > { %v13376_v62 = vpop.permute.xlu0 %4540  ;;  %v8639_v25 = vpop.f32.mrb[0].mxu0  ;;  %4732 = vrot.lane.b32.xlu1 %v12807_v63, %s9352_s28 }
 0x470   : > { %v3824_v3 = vadd.f32 %v8639_v25, %v15332_v7  ;;  %v3815_v37 = vpop.f32.mrb[1].mxu0  ;;  %v3108_v7 = vadd.f32 %v15337_v32, %v3044_v59 }
 0x471   : > { %v3816_v22 = vadd.f32 %v3815_v37, %v15334_v53  ;;  %4510 = vrot.lane.b32.xlu0 %v13373_v60, %s9348_s9  ;;  %v8640_v19 = vpop.f32.mrb[2].mxu0  ;;  %v13398_v1 = vpop.permute.xlu1 %4542  ;;  %v15339_v37 = vld [vmem:[#allocation65_spill] sm:$0xff] }
 0x472   : > { %v3884_v25 = vmul.f32 %v13381_v33, %v3824_v3  ;;  %v3827_v18 = vadd.f32 %v8640_v19, %v15336_v43  ;;  %v3818_v15 = vpop.f32.mrb[3].mxu0  ;;  %v3285_v3 = vadd.f32 %v13104_v49, %v3219_v12  ;;  %v15341_v43 = vld [vmem:[#allocation68_spill] sm:$0xff] }
 0x473   : > { %v3882_v41 = vmul.f32 %v13381_v33, %v3816_v22  ;;  %v3819_v53 = vadd.f32 %v3818_v15, %v15339_v37  ;;  %v13407_v44 = vpop.permute.xlu0 %3452  ;;  %4554 = vrot.lane.b32.xlu1 %v12807_v63, %s9349_s10  ;;  %v3220_v10 = vadd.f32 %v15341_v43, %v3108_v7  ;;  %v3334_v22 = vadd.f32 %v13201_v24, %v3284_v14  ;;  %v15343_v37 = vld [vmem:[#allocation69_spill] sm:$0xff] }
 0x474   : > { %v3904_v19 = vadd.f32 %v13393_v40, %v3884_v25  ;;  %v3885_v59 = vmul.f32 %v13381_v33, %v3827_v18  ;;  %v3335_v16 = vadd.f32 %v13212_v38, %v3285_v3 }
 0x475   : > { %v3902_v15 = vadd.f32 %v13393_v40, %v3882_v41  ;;  %v3883_v32 = vmul.f32 %v13381_v33, %v3819_v53  ;;  %4734 = vrot.lane.b32.xlu0 %v12852_v9, %s9352_s28  ;;  %v3497_v63 = vpop.permute.xlu1 %3496  ;;  %v3400_v25 = vadd.f32 %v13250_v42, %v3334_v22  ;;  %v15342_v41 = vld [vmem:[#allocation5_spill] sm:$0xff]  ;;  %v3221_v53 = vadd.f32 %v15343_v37, %v3109_v30  ;;  %v15350_v37 = vld [vmem:[#allocation37_spill] sm:$0xff] }
 0x476   : > { %vm3920_vm10 = vcmp.ge.f32.partialorder %v3904_v19, 0.0  ;;  %v3936_v49 = vmul.f32 0.001, %v3904_v19  ;;  %v3905_v12 = vadd.f32 %v13393_v40, %v3885_v59  ;;  %v3401_v7 = vadd.f32 %v13269_v31, %v3335_v16 }
 0x477   : > { %vm3918_vm12 = vcmp.ge.f32.partialorder %v3902_v15, 0.0  ;;  %v3934_v18 = vmul.f32 0.001, %v3902_v15  ;;  %v3903_v24 = vadd.f32 %v13393_v40, %v3883_v32  ;;  %v13425_v14 = vpop.permute.xlu0 %4544  ;;  %4558 = vrot.lane.b32.xlu1 %v15342_v41, %s9349_s10  ;;  %v3286_v59 = vadd.f32 %v13133_v39, %v3220_v10 }
 0x478   : > { %v3952_v13 = vsel %vm3920_vm10, %v3904_v19, %v3936_v49  ;;  %vm3921_vm11 = vcmp.ge.f32.partialorder %v3905_v12, 0.0  ;;  %v3937_v38 = vmul.f32 0.001, %v3905_v12  ;;  %v3466_v43 = vadd.f32 %v13346_v17, %v3400_v25  ;;  %v15346_v25 = vld [vmem:[#allocation16_spill] sm:$0xff] }
 0x479   : > { %v13431_v27 = vsel %vm3918_vm12, %v3902_v15, %v3934_v18  ;;  %vm3919_vm1 = vcmp.ge.f32.partialorder %v3903_v24, 0.0  ;;  %v3935_v42 = vmul.f32 0.001, %v3903_v24  ;;  %4556 = vrot.lane.b32.xlu0 %v12852_v9, %s9349_s10  ;;  %v13435_v3 = vpop.permute.xlu1 %4604  ;;  %v3467_v31 = vadd.f32 %v13365_v8, %v3401_v7 }
 0x47a   : > { %v13440_v19 = vsel %vm3921_vm11, %v3905_v12, %v3937_v38  ;;  %v3287_v22 = vadd.f32 %v13149_v35, %v3221_v53  ;;  %v5234_v30 = vrot.slane %v3952_v13, 1  ;;  %v14934_v9 = vrot.slane %v13431_v27, 1  ;;  %v15344_v35 = vld [vmem:[#allocation6_spill] sm:$0xff] }
 0x47b   : > { %v5235_v15 = vrot.slane %v13440_v19, 1  ;;  %v3951_v32 = vsel %vm3919_vm1, %v3903_v24, %v3935_v42  ;;  %v3499_v16 = vpop.permute.xlu0 %3498  ;;  %4620 = vrot.lane.b32.xlu1 %v12902_v4, %s9350_s11  ;;  %v3516_v39 = vadd.f32 %v3497_v63, %v3466_v43  ;;  %v3336_v17 = vadd.f32 %v13223_v26, %v3286_v59 }
 0x47c   : > { %v5233_v49 = vrot.slane %v3951_v32, 1  ;;  %v3517_v10 = vadd.f32 %v3499_v16, %v3467_v31  ;;  %v3337_v8 = vadd.f32 %v13233_v6, %v3287_v22  ;;  %vm15345_vm15 = vcmp.lt.s32.totalorder %v15344_v35, 7  ;;  %v4644_v22 = vld [vmem:[#allocation2 + $0x110] sm:$0xff] }
 0x47d   : > { %v5260_v12 = vsel %vm15345_vm15, %v5234_v30, %v5235_v15  ;;  %4560 = vrot.lane.b32.xlu0 %v15346_v25, %s9349_s10  ;;  %v3501_v18 = vpop.permute.xlu1 %3500  ;;  %vm15347_vm0 = vmmov %vm15345_vm15  ;;  %v4658_v42 = vsel %vm13315_vm3, %v13352_v55, 0.0  ;;  %v15351_v43 = vsel %vm12837_vm8, %v12918_v50, 0.0  ;;  %v4660_v16 = vsel %vm13348_vm13, %v4644_v22, 0.0 }
 0x47e   : > { %v5266_v24 = vmax.f32 %v3952_v13, %v5260_v12  ;;  %v5261_v4 = vsel %vm15347_vm0, %v5233_v49, %v5234_v30  ;;  %vm15348_vm14 = vmmov %vm15347_vm0  ;;  %v3526_v63 = vpack.c.bf16 %v3517_v10, %v3516_v39  ;;  %v3402_v13 = vadd.f32 %v13296_v51, %v3336_v17  ;;  %v15353_v39 = vld [vmem:[#allocation50_spill] sm:$0xff] }
 0x47f   : > { %v5262_v26 = vsel %vm15348_vm14, %v14934_v9, %v5233_v49  ;;  %v13464_v7 = vmax.f32 %v3951_v32, %v5261_v4  ;;  %v4607_v38 = vpop.permute.xlu0 %4606  ;;  %4624 = vrot.lane.b32.xlu1 %v15350_v37, %s9350_s11  ;;  %v3403_v53 = vadd.f32 %v13322_v61, %v3337_v8  ;;  %v9310_v49 = vld [vmem:[#allocation2 + $0xa0] sm:$0xff]  ;;  %v13492_v8 = vpop.f32.mrb[8].mxu1  ;;  %vm15363_vm2 = vmmov %vm15347_vm0 }
 0x480   : > { %v13462_v6 = vmax.f32 %v13431_v27, %v5262_v26  ;;  %8649 = vmatprep.mubr.bf16.mxu0 %v3526_v63  ;;  %v3468_v30 = vadd.f32 %v13371_v36, %v3402_v13  ;;  %v4274_v50 = vsel %vm12846_vm6, %v9310_v49, 0.0  ;;  %v15354_v36 = vsel %vm12924_vm7, %v15353_v39, 0.0  ;;  %v13496_v4 = vpop.f32.mrb[9].mxu1  ;;  %v15355_v26 = vld [vmem:[#allocation49_spill] sm:$0xff]  ;;  %vm15364_vm10 = vmmov %vm15347_vm0 }
 0x481   : > { %15349 = vst [vmem:[#allocation57_spill] sm:$0xff] %v13464_v7  ;;  %4622 = vrot.lane.b32.xlu0 %v15351_v43, %s9350_s11  ;;  %v4609_v31 = vpop.permute.xlu1 %4608  ;;  %v3469_v51 = vadd.f32 %v13407_v44, %v3403_v53  ;;  %v4338_v12 = vadd.f32 %v13112_v47, %v4274_v50  ;;  %v4276_v63 = vsel %vm12942_vm5, %v15355_v26, 0.0  ;;  %v13503_v13 = vpop.f32.mrb[10].mxu1  ;;  %v15357_v43 = vld [vmem:[#allocation38_spill] sm:$0xff]  ;;  %vm15365_vm12 = vmmov %vm15347_vm0 }
 0x482   : > { %v5280_v59 = vmax.f32 %v13462_v6, %v5266_v24  ;;  %v3518_v32 = vadd.f32 %v3501_v18, %v3468_v30  ;;  %v9311_v18 = vld [vmem:[#allocation2 + $0xa8] sm:$0xff]  ;;  %v9133_v22 = vpack.i.bf16 %v15357_v43, %v15357_v43  ;;  %v4340_v30 = vadd.f32 %v13160_v52, %v4276_v63  ;;  %vm15366_vm11 = vmmov %vm15347_vm0 }
 0x483   : > { %v3503_v61 = vpop.permute.xlu0 %3502  ;;  %4686 = vrot.lane.b32.xlu1 %v4658_v42, %s9351_s7  ;;  %v4339_v24 = vadd.f32 %v9311_v18, %v13122_v58  ;;  %v4450_v53 = vadd.f32 %v13208_v46, %v4338_v12  ;;  %v4645_v42 = vld [vmem:[#allocation2 + $0x118] sm:$0xff]  ;;  %v15359_v43 = vld [vmem:[#allocation54_spill] sm:$0xff]  ;;  %vm15377_vm1 = vmmov %vm15347_vm0 }
 0x484   : > { %5296 = vst [vmem:[#allocation3] sm:$0xff] %v5280_v59  ;;  %v3519_v55 = vadd.f32 %v3503_v61, %v3469_v51  ;;  %v13507_v59 = vpop.f32.mrb[11].mxu1  ;;  %vm15378_vm15 = vmmov %vm15347_vm0 }
 0x485   : > { %4626 = vrot.lane.b32.xlu0 %v15354_v36, %s9350_s11  ;;  %v4671_v44 = vpop.permute.xlu1 %4670  ;;  %v4451_v47 = vadd.f32 %v13218_v23, %v4339_v24  ;;  %v4516_v61 = vadd.f32 %v13265_v57, %v4450_v53  ;;  %vm15379_vm14 = vmmov %vm15347_vm0 }
 0x486   : > { %v3527_v10 = vpack.c.bf16 %v3519_v55, %v3518_v32  ;;  %v4452_v32 = vadd.f32 %v13231_v28, %v4340_v30 }
 0x487   : > { %v4611_v17 = vpop.permute.xlu0 %4610  ;;  %4690 = vrot.lane.b32.xlu1 %v4660_v16, %s9351_s7  ;;  %v4517_v46 = vadd.f32 %v13286_v29, %v4451_v47 }
 0x488   : > { %8650 = vmatmul.mubr.bf16.gmra.mrb[12].mxu0 %v3527_v10  ;;  %v4518_v52 = vadd.f32 %v13313_v56, %v4452_v32 }
 0x489   : > { %4688 = vrot.lane.b32.xlu0 %v13373_v60, %s9351_s7  ;;  %v4675_v37 = vpop.permute.xlu1 %4674  ;;  %v15358_v60 = vld [vmem:[#allocation35_spill] sm:$0xff]  ;;  %v4567_v16 = vadd.f32 %v13376_v62, %v4517_v46 }
 0x48a   : > { %v4341_v51 = vadd.f32 %v13190_v5, %v15358_v60 }
 0x48b   : > { %v4673_v58 = vpop.permute.xlu0 %4672  ;;  %4736 = vrot.lane.b32.xlu1 %v15342_v41, %s9352_s28  ;;  %v4566_v41 = vadd.f32 %v13363_v11, %v4516_v61  ;;  %v4633_v29 = vadd.f32 %v4607_v38, %v4567_v16 }
 0x48c   : > { %v4453_v55 = vadd.f32 %v13241_v20, %v4341_v51  ;;  %v4568_v20 = vadd.f32 %v13398_v1, %v4518_v52  ;;  %v15360_v51 = vld [vmem:[#allocation59_spill] sm:$0xff] }
 0x48d   : > { %4692 = vrot.lane.b32.xlu0 %v4645_v42, %s9351_s7  ;;  %v4721_v23 = vpop.permute.xlu1 %4720  ;;  %v4632_v57 = vadd.f32 %v13435_v3, %v4566_v41  ;;  %v4699_v62 = vadd.f32 %v4673_v58, %v4633_v29 }
 0x48e   : > { %v4519_v5 = vadd.f32 %v13339_v48, %v4453_v55  ;;  %v4634_v39 = vadd.f32 %v4609_v31, %v4568_v20  ;;  %v15361_v55 = vld [vmem:[#allocation32_spill] sm:$0xff] }
 0x48f   : > { %v4677_v49 = vpop.permute.xlu0 %4676  ;;  %9134 = vrot.lane.b32.xlu1 %v9133_v22, %s9352_s28  ;;  %v4698_v54 = vadd.f32 %v4671_v44, %v4632_v57 }
 0x490   : > { %v4569_v11 = vadd.f32 %v13425_v14, %v4519_v5  ;;  %v4700_v48 = vadd.f32 %v4675_v37, %v4634_v39  ;;  %v13551_v47 = vpop.f32.mrb[12].mxu1  ;;  %v15362_v5 = vld [vmem:[#allocation34_spill] sm:$0xff] }
 0x491   : > { %4738 = vrot.lane.b32.xlu0 %v15346_v25, %s9352_s28  ;;  %v4725_v28 = vpop.permute.xlu1 %4724  ;;  %v4748_v10 = vadd.f32 %v4721_v23, %v4698_v54  ;;  %v13556_v60 = vpop.f32.mrb[13].mxu1 }
 0x492   : > { %v4635_v36 = vadd.f32 %v4611_v17, %v4569_v11  ;;  %v4750_v24 = vadd.f32 %v4725_v28, %v4700_v48 }
 0x493   : > { %v4723_v50 = vpop.permute.xlu0 %4722 }
 0x494   : > { %v4749_v56 = vadd.f32 %v4723_v50, %v4699_v62  ;;  %v4701_v3 = vadd.f32 %v4677_v49, %v4635_v36  ;;  %v13563_v49 = vpop.f32.mrb[14].mxu1 }
 0x495   : > { %v13531_v12 = vpop.permute.xlu1 %4318  ;;  %v13569_v28 = vpop.f32.mrb[15].mxu1 }
 0x496   : > { %v4762_v38 = vpack.c.bf16 %v4749_v56, %v4748_v10 }
 0x497   : > { %v4727_v18 = vpop.permute.xlu0 %4726 }
 0x498   : > { %v4751_v25 = vadd.f32 %v4727_v18, %v4701_v3  ;;  %8705 = vmatprep.mubr.bf16.mxu1 %v4762_v38 }
 0x499   : > { %v13533_v26 = vpop.permute.xlu1 %4322 }
 0x49a   : > { %v4763_v1 = vpack.c.bf16 %v4751_v25, %v4750_v24 }
 0x49b   : > { %v13535_v14 = vpop.permute.xlu0 %4320 }
 0x49c   : > { %8706 = vmatmul.mubr.bf16.gmra.mrb[20].mxu1 %v4763_v1 }
 0x49d   : > { %v13537_v44 = vpop.permute.xlu1 %4430 }
 0x49f   : > { %v13539_v31 = vpop.permute.xlu0 %4324 }
 0x4a1   : > { %v13541_v17 = vpop.permute.xlu1 %4434 }
 0x4a3   : > { %v13543_v45 = vpop.permute.xlu0 %4432 }
 0x4a5   : > { %v13545_v63 = vpop.permute.xlu1 %4496 }
 0x4a7   : > { %v13547_v37 = vpop.permute.xlu0 %4436 }
 0x4a9   : > { %v13549_v53 = vpop.permute.xlu1 %4500 }
 0x4ab   : > { %v13553_v42 = vpop.permute.xlu0 %4498 }
 0x4ac   : > { %v8643_v58 = vpop.f32.mrb[4].mxu0 }
 0x4ad   : > { %v3840_v22 = vadd.f32 %v8643_v58, %v15359_v43  ;;  %v3831_v30 = vpop.f32.mrb[5].mxu0  ;;  %v13559_v23 = vpop.permute.xlu1 %4546 }
 0x4ae   : > { %v3832_v61 = vadd.f32 %v3831_v30, %v15360_v51  ;;  %v8644_v46 = vpop.f32.mrb[6].mxu0 }
 0x4af   : > { %v3888_v32 = vmul.f32 %v13381_v33, %v3840_v22  ;;  %v3843_v41 = vadd.f32 %v8644_v46, %v15361_v55  ;;  %v3834_v16 = vpop.f32.mrb[7].mxu0  ;;  %v13567_v29 = vpop.permute.xlu0 %4502 }
 0x4b0   : > { %v3886_v52 = vmul.f32 %v13381_v33, %v3832_v61  ;;  %v3835_v57 = vadd.f32 %v3834_v16, %v15362_v5 }
 0x4b1   : > { %v3908_v20 = vadd.f32 %v13393_v40, %v3888_v32  ;;  %v3889_v11 = vmul.f32 %v13381_v33, %v3843_v41  ;;  %v13575_v50 = vpop.permute.xlu1 %4550 }
 0x4b2   : > { %v3906_v54 = vadd.f32 %v13393_v40, %v3886_v52  ;;  %v3887_v62 = vmul.f32 %v13381_v33, %v3835_v57 }
 0x4b3   : > { %vm3924_vm8 = vcmp.ge.f32.partialorder %v3908_v20, 0.0  ;;  %v3940_v39 = vmul.f32 0.001, %v3908_v20  ;;  %v3909_v36 = vadd.f32 %v13393_v40, %v3889_v11  ;;  %v4549_v48 = vpop.permute.xlu0 %4548 }
 0x4b4   : > { %vm3922_vm6 = vcmp.ge.f32.partialorder %v3906_v54, 0.0  ;;  %v3938_v10 = vmul.f32 0.001, %v3906_v54  ;;  %v3907_v56 = vadd.f32 %v13393_v40, %v3887_v62 }
 0x4b5   : > { %v3956_v3 = vsel %vm3924_vm8, %v3908_v20, %v3940_v39  ;;  %vm3925_vm7 = vcmp.ge.f32.partialorder %v3909_v36, 0.0  ;;  %v3941_v38 = vmul.f32 0.001, %v3909_v36  ;;  %v13579_v25 = vpop.permute.xlu1 %4326 }
 0x4b6   : > { %v3954_v18 = vsel %vm3922_vm6, %v3906_v54, %v3938_v10  ;;  %vm3923_vm5 = vcmp.ge.f32.partialorder %v3907_v56, 0.0  ;;  %v3939_v24 = vmul.f32 0.001, %v3907_v56  ;;  %v5238_v43 = vrot.slane %v3956_v3, 1 }
 0x4b7   : > { %v5236_v1 = vrot.slane %v3954_v18, 1  ;;  %v13581_v58 = vsel %vm3925_vm7, %v3909_v36, %v3941_v38  ;;  %v4553_v51 = vpop.permute.xlu0 %4552 }
 0x4b8   : > { %v14935_v22 = vrot.slane %v13581_v58, 1  ;;  %v13584_v30 = vsel %vm3923_vm5, %v3907_v56, %v3939_v24 }
 0x4b9   : > { %v5259_v61 = vsel %vm15363_vm2, %v5235_v15, %v5236_v1  ;;  %v5237_v46 = vrot.slane %v13584_v30, 1  ;;  %v4613_v41 = vpop.permute.xlu1 %4612 }
 0x4ba   : > { %v5267_v32 = vmax.f32 %v13440_v19, %v5259_v61  ;;  %v5256_v55 = vsel %vm15364_vm10, %v5238_v43, %v14935_v22  ;;  %vm15383_vm10 = vmmov %vm15347_vm0 }
 0x4bb   : > { %v5270_v16 = vmax.f32 %v3956_v3, %v5256_v55  ;;  %v13598_v52 = vsel %vm15365_vm12, %v5237_v46, %v5238_v43  ;;  %v5258_v5 = vsel %vm15366_vm11, %v5236_v1, %v5237_v46  ;;  %v13605_v20 = vpop.permute.xlu0 %4328  ;;  %v15368_v43 = vld [vmem:[#allocation63_spill] sm:$0xff]  ;;  %vm15384_vm12 = vmmov %vm15347_vm0 }
 0x4bc   : > { %v5281_v15 = vmax.f32 %v13464_v7, %v5267_v32  ;;  %v5268_v57 = vmax.f32 %v3954_v18, %v5258_v5  ;;  %v4278_v61 = vsel %vm13162_vm4, %v15368_v43, 0.0  ;;  %vm15385_vm11 = vmmov %vm15347_vm0 }
 0x4bd   : > { %v13607_v54 = vpop.permute.xlu1 %4330  ;;  %v4342_v55 = vadd.f32 %v13531_v12, %v4278_v61 }
 0x4be   : > { %5297 = vst [vmem:[#allocation3 + $0x8] sm:$0xff] %v5281_v15  ;;  %v5284_v11 = vmax.f32 %v5268_v57, %v5270_v16  ;;  %v15369_v16 = vld [vmem:[#allocation41_spill] sm:$0xff] }
 0x4bf   : > { %v4615_v62 = vpop.permute.xlu0 %4614  ;;  %v4343_v5 = vadd.f32 %v13535_v14, %v15369_v16  ;;  %v4454_v57 = vadd.f32 %v13537_v44, %v4342_v55  ;;  %v15371_v16 = vld [vmem:[#allocation36_spill] sm:$0xff] }
 0x4c0   : > { %5300 = vst [vmem:[#allocation3 + $0x20] sm:$0xff] %v5284_v11  ;;  %v4345_v44 = vadd.f32 %v13539_v31, %v15371_v16 }
 0x4c1   : > { %v4617_v39 = vpop.permute.xlu1 %4616  ;;  %v4455_v11 = vadd.f32 %v13543_v45, %v4343_v5  ;;  %v4520_v19 = vadd.f32 %v13545_v63, %v4454_v57 }
 0x4c3   : > { %v13609_v36 = vpop.permute.xlu0 %4332  ;;  %v4521_v22 = vadd.f32 %v13553_v42, %v4455_v11  ;;  %v4570_v12 = vadd.f32 %v13559_v23, %v4520_v19  ;;  %v4457_v42 = vadd.f32 %v13547_v37, %v4345_v44 }
 0x4c5   : > { %v13611_v10 = vld [vmem:[#allocation3] ss:$2 sm:$0xff]  ;;  %v13613_v56 = vpop.permute.xlu1 %4438  ;;  %v4571_v61 = vadd.f32 %v4549_v48, %v4521_v22  ;;  %v4636_v45 = vadd.f32 %v4613_v41, %v4570_v12  ;;  %v4523_v23 = vadd.f32 %v13567_v29, %v4457_v42 }
 0x4c6   : > { %15367 = vst [vmem:[#allocation9_spill] sm:$0xff] %v13611_v10  ;;  %5318 = vst [vmem:[#allocation2 + $0x9] sm:$0xff] %v13611_v10  ;;  %v15370_v10 = vld [vmem:[#allocation70_spill] sm:$0xff] }
 0x4c7   : > { %v4619_v3 = vpop.permute.xlu0 %4618  ;;  %v4280_v2 = vsel %vm13184_vm9, %v15370_v10, 0.0  ;;  %v4637_v55 = vadd.f32 %v4615_v62, %v4571_v61  ;;  %v4573_v31 = vadd.f32 %v4553_v51, %v4523_v23  ;;  %v15372_v51 = vld [vmem:[#allocation47_spill] sm:$0xff] }
 0x4c8   : > { %v4344_v14 = vadd.f32 %v13533_v26, %v4280_v2 }
 0x4c9   : > { %v4679_v38 = vpop.permute.xlu1 %4678  ;;  %v4639_v12 = vadd.f32 %v4619_v3, %v4573_v31  ;;  %v15373_v3 = vld [vmem:[#allocation39_spill] sm:$0xff] }
 0x4ca   : > { %v4456_v63 = vadd.f32 %v13541_v17, %v4344_v14  ;;  %v4702_v57 = vadd.f32 %v4679_v38, %v4636_v45 }
 0x4cb   : > { %v13616_v18 = vpop.permute.xlu0 %4440 }
 0x4cc   : > { %v4522_v11 = vadd.f32 %v13549_v53, %v4456_v63 }
 0x4cd   : > { %v13618_v24 = vpop.permute.xlu1 %4442 }
 0x4ce   : > { %v4572_v19 = vadd.f32 %v13575_v50, %v4522_v11 }
 0x4cf   : > { %v4681_v1 = vpop.permute.xlu0 %4680 }
 0x4d0   : > { %v4703_v34 = vadd.f32 %v4681_v1, %v4637_v55  ;;  %v4638_v2 = vadd.f32 %v4617_v39, %v4572_v19  ;;  %v4282_v39 = vsel %vm13315_vm3, %v15372_v51, 0.0 }
 0x4d1   : > { %v4683_v46 = vpop.permute.xlu1 %4682  ;;  %v4346_v55 = vadd.f32 %v13579_v25, %v4282_v39 }
 0x4d2   : > { %v4704_v37 = vadd.f32 %v4683_v46, %v4638_v2  ;;  %v4284_v46 = vsel %vm13348_vm13, %v15373_v3, 0.0 }
 0x4d3   : > { %v4445_v32 = vpop.permute.xlu0 %4444  ;;  %v4348_v63 = vadd.f32 %v13607_v54, %v4284_v46  ;;  %v4458_v23 = vadd.f32 %v13613_v56, %v4346_v55 }
 0x4d5   : > { %v4505_v15 = vpop.permute.xlu1 %4504  ;;  %v4460_v0 = vadd.f32 %v13618_v24, %v4348_v63 }
 0x4d7   : > { %v4685_v9 = vpop.permute.xlu0 %4684 }
 0x4d8   : > { %v4705_v38 = vadd.f32 %v4685_v9, %v4639_v12 }
 0x4d9   : > { %v4729_v43 = vpop.permute.xlu1 %4728 }
 0x4da   : > { %v4752_v48 = vadd.f32 %v4729_v43, %v4702_v57  ;;  %v15374_v57 = vld [vmem:[#allocation45_spill] sm:$0xff] }
 0x4db   : > { %v4507_v7 = vpop.permute.xlu0 %4506 }
 0x4dd   : > { %v4509_v5 = vpop.permute.xlu1 %4508 }
 0x4de   : > { %v4526_v19 = vadd.f32 %v4509_v5, %v4460_v0 }
 0x4df   : > { %v4731_v10 = vpop.permute.xlu0 %4730 }
 0x4e0   : > { %v4753_v22 = vadd.f32 %v4731_v10, %v4703_v34  ;;  %v4347_v34 = vadd.f32 %v13605_v20, %v15374_v57  ;;  %v15375_v10 = vld [vmem:[#allocation56_spill] sm:$0xff] }
 0x4e1   : > { %v4733_v26 = vpop.permute.xlu1 %4732  ;;  %v4349_v11 = vadd.f32 %v13609_v36, %v15375_v10 }
 0x4e2   : > { %v4764_v41 = vpack.c.bf16 %v4753_v22, %v4752_v48  ;;  %v4754_v61 = vadd.f32 %v4733_v26, %v4704_v37  ;;  %v4459_v21 = vadd.f32 %v13616_v18, %v4347_v34  ;;  %v4524_v26 = vadd.f32 %v4505_v15, %v4458_v23 }
 0x4e3   : > { %v4511_v62 = vpop.permute.xlu0 %4510  ;;  %v4461_v22 = vadd.f32 %v4445_v32, %v4349_v11 }
 0x4e4   : > { %8709 = vmatprep.mubr.bf16.mxu1 %v4764_v41  ;;  %v4525_v31 = vadd.f32 %v4507_v7, %v4459_v21 }
 0x4e5   : > { %v4555_v17 = vpop.permute.xlu1 %4554  ;;  %v4527_v54 = vadd.f32 %v4511_v62, %v4461_v22 }
 0x4e6   : > { %v4574_v41 = vadd.f32 %v4555_v17, %v4524_v26 }
 0x4e7   : > { %v4735_v1 = vpop.permute.xlu0 %4734 }
 0x4e8   : > { %v4755_v14 = vadd.f32 %v4735_v1, %v4705_v38 }
 0x4e9   : > { %v4559_v53 = vpop.permute.xlu1 %4558 }
 0x4ea   : > { %v4765_v16 = vpack.c.bf16 %v4755_v14, %v4754_v61  ;;  %v4576_v2 = vadd.f32 %v4559_v53, %v4526_v19 }
 0x4eb   : > { %v4557_v29 = vpop.permute.xlu0 %4556 }
 0x4ec   : > { %8710 = vmatmul.mubr.bf16.gmra.mrb[24].mxu1 %v4765_v16  ;;  %v4575_v20 = vadd.f32 %v4557_v29, %v4525_v31 }
 0x4ed   : > { %v4621_v43 = vpop.permute.xlu1 %4620 }
 0x4ee   : > { %v4640_v38 = vadd.f32 %v4621_v43, %v4574_v41 }
 0x4ef   : > { %v4561_v44 = vpop.permute.xlu0 %4560 }
 0x4f0   : > { %v4577_v37 = vadd.f32 %v4561_v44, %v4527_v54 }
 0x4f1   : > { %v4625_v45 = vpop.permute.xlu1 %4624 }
 0x4f2   : > { %v4642_v36 = vadd.f32 %v4625_v45, %v4576_v2 }
 0x4f3   : > { %v4623_v50 = vpop.permute.xlu0 %4622 }
 0x4f4   : > { %v4641_v56 = vadd.f32 %v4623_v50, %v4575_v20 }
 0x4f5   : > { %v4687_v9 = vpop.permute.xlu1 %4686 }
 0x4f6   : > { %v4706_v24 = vadd.f32 %v4687_v9, %v4640_v38  ;;  %v15380_v38 = vmax.f32 %v13584_v30, %v13598_v52 }
 0x4f7   : > { %v4627_v42 = vpop.permute.xlu0 %4626 }
 0x4f8   : > { %v4643_v61 = vadd.f32 %v4627_v42, %v4577_v37 }
 0x4f9   : > { %v4691_v48 = vpop.permute.xlu1 %4690 }
 0x4fa   : > { %v4708_v14 = vadd.f32 %v4691_v48, %v4642_v36 }
 0x4fb   : > { %v4689_v25 = vpop.permute.xlu0 %4688 }
 0x4fc   : > { %v4707_v18 = vadd.f32 %v4689_v25, %v4641_v56  ;;  %v15376_v25 = vrot.slane %v13581_v58, 1 }
 0x4fd   : > { %v4737_v12 = vpop.permute.xlu1 %4736 }
 0x4fe   : > { %v4756_v5 = vadd.f32 %v4737_v12, %v4706_v24  ;;  %v5434_v24 = vand.u32 7, %v15344_v35 }
 0x4ff   : > { %v4693_v1 = vpop.permute.xlu0 %4692 }
 0x500   : > { %v4709_v32 = vadd.f32 %v4693_v1, %v4643_v61  ;;  %vm13704_vm8 = vcmp.lt.s32.totalorder %v5434_v24, 7 }
 0x501   : > { %v9135_v16 = vpop.permute.xlu1 %9134 }
 0x502   : > { %v9319_v51 = vadd.low.f32.bf16 %v4708_v14, %v9135_v16  ;;  %v9320_v7 = vadd.high.f32.bf16 %v4709_v32, %v9135_v16 }
 0x503   : > { %v4739_v15 = vpop.permute.xlu0 %4738 }
 0x504   : > { %v4757_v62 = vadd.f32 %v4739_v15, %v4707_v18  ;;  %v4767_v53 = vpack.c.bf16 %v9320_v7, %v9319_v51 }
 0x506   : > { %v4766_v17 = vpack.c.bf16 %v4757_v62, %v4756_v5 }
 0x507   : > { %v8647_v39 = vpop.f32.mrb[8].mxu0 }
 0x508   : > { %v3856_v29 = vadd.f32 %v8647_v39, %v13492_v8  ;;  %v3847_v43 = vpop.f32.mrb[9].mxu0  ;;  %8713 = vmatprep.mubr.bf16.mxu1 %v4766_v17 }
 0x509   : > { %v3848_v44 = vadd.f32 %v3847_v43, %v13496_v4  ;;  %v8648_v45 = vpop.f32.mrb[10].mxu0  ;;  %8714 = vmatmul.mubr.bf16.gmra.mrb[28].mxu1 %v4767_v53 }
 0x50a   : > { %v3892_v50 = vmul.f32 %v13381_v33, %v3856_v29  ;;  %v3859_v3 = vadd.f32 %v8648_v45, %v13503_v13  ;;  %v3850_v46 = vpop.f32.mrb[11].mxu0 }
 0x50b   : > { %v3890_v9 = vmul.f32 %v13381_v33, %v3848_v44  ;;  %v3851_v55 = vadd.f32 %v3850_v46, %v13507_v59 }
 0x50c   : > { %v3912_v63 = vadd.f32 %v13393_v40, %v3892_v50  ;;  %v3893_v42 = vmul.f32 %v13381_v33, %v3859_v3 }
 0x50d   : > { %v3910_v8 = vadd.f32 %v13393_v40, %v3890_v9  ;;  %v3891_v57 = vmul.f32 %v13381_v33, %v3851_v55 }
 0x50e   : > { %vm3928_vm4 = vcmp.ge.f32.partialorder %v3912_v63, 0.0  ;;  %v3944_v4 = vmul.f32 0.001, %v3912_v63  ;;  %v3913_v34 = vadd.f32 %v13393_v40, %v3893_v42 }
 0x50f   : > { %vm3926_vm9 = vcmp.ge.f32.partialorder %v3910_v8, 0.0  ;;  %v3942_v10 = vmul.f32 0.001, %v3910_v8  ;;  %v3911_v13 = vadd.f32 %v13393_v40, %v3891_v57 }
 0x510   : > { %v3960_v11 = vsel %vm3928_vm4, %v3912_v63, %v3944_v4  ;;  %vm3929_vm3 = vcmp.ge.f32.partialorder %v3913_v34, 0.0  ;;  %v3945_v23 = vmul.f32 0.001, %v3913_v34 }
 0x511   : > { %v3958_v59 = vsel %vm3926_vm9, %v3910_v8, %v3942_v10  ;;  %vm3927_vm13 = vcmp.ge.f32.partialorder %v3911_v13, 0.0  ;;  %v3943_v0 = vmul.f32 0.001, %v3911_v13  ;;  %v5242_v26 = vrot.slane %v3960_v11, 1 }
 0x512   : > { %v5240_v48 = vrot.slane %v3958_v59, 1  ;;  %v13669_v21 = vsel %vm3929_vm3, %v3913_v34, %v3945_v23 }
 0x513   : > { %v13671_v22 = vsel %vm3927_vm13, %v3911_v13, %v3943_v0  ;;  %v5243_v19 = vrot.slane %v13669_v21, 1 }
 0x514   : > { %v5255_v31 = vsel %vm15377_vm1, %v15376_v25, %v5240_v48  ;;  %v5241_v54 = vrot.slane %v13671_v22, 1  ;;  %vm15386_vm1 = vmmov %vm15347_vm0 }
 0x515   : > { %v5271_v41 = vmax.f32 %v13581_v58, %v5255_v31  ;;  %v5252_v2 = vsel %vm15378_vm15, %v5242_v26, %v5243_v19  ;;  %vm15387_vm15 = vmmov %vm15347_vm0 }
 0x516   : > { %v13686_v12 = vsel %vm15347_vm0, %v5241_v54, %v5242_v26  ;;  %v5254_v20 = vsel %vm15379_vm14, %v5240_v48, %v5241_v54  ;;  %v13690_v37 = vmax.f32 %v3960_v11, %v5252_v2  ;;  %vm15389_vm14 = vmmov %vm15347_vm0 }
 0x517   : > { %v5285_v36 = vmax.f32 %v15380_v38, %v5271_v41  ;;  %v5272_v1 = vmax.f32 %v3958_v59, %v5254_v20  ;;  %v5273_v58 = vmax.f32 %v13671_v22, %v13686_v12 }
 0x519   : > { %5301 = vst [vmem:[#allocation3 + $0x28] sm:$0xff] %v5285_v36  ;;  %v5288_v56 = vmax.f32 %v5272_v1, %v13690_v37 }
 0x51b   : > { %5304 = vst [vmem:[#allocation3 + $0x40] sm:$0xff] %v5288_v56 }
 0x520   : > { %v13698_v61 = vld [vmem:[#allocation3 + $0x20] ss:$2 sm:$0xff] }
 0x521   : > { %5319 = vst [vmem:[#allocation2 + $0x11] sm:$0xff] %v13698_v61 }
 0x528   : > { %v13708_v30 = vld [vmem:[#allocation2 + $0xa] sm:$0xff] }
 0x529   : > { %v5718_v52 = vsel %vm13704_vm8, %v13708_v30, 0.0 }
 0x52a   : > { %5726 = vrot.lane.b32.xlu0 %v5718_v52, %s9346_s29 }
 0x53f   : > { %v8703_v16 = vpop.f32.mrb[16].mxu1 }
 0x540   : > { %v5118_v18 = vmul.f32 %v8703_v16, %v13381_v33  ;;  %v5053_v32 = vpop.f32.mrb[17].mxu1 }
 0x541   : > { %v5116_v15 = vmul.f32 %v13381_v33, %v5053_v32  ;;  %v8704_v5 = vpop.f32.mrb[18].mxu1 }
 0x542   : > { %v5134_v51 = vadd.f32 %v13393_v40, %v5118_v18  ;;  %v5119_v7 = vmul.f32 %v8704_v5, %v13381_v33  ;;  %v5056_v62 = vpop.f32.mrb[19].mxu1 }
 0x543   : > { %v5132_v17 = vadd.f32 %v13393_v40, %v5116_v15  ;;  %v5117_v53 = vmul.f32 %v13381_v33, %v5056_v62 }
 0x544   : > { %vm5150_vm6 = vcmp.ge.f32.partialorder %v5134_v51, 0.0  ;;  %v5166_v39 = vmul.f32 0.001, %v5134_v51  ;;  %v5135_v29 = vadd.f32 %v13393_v40, %v5119_v7 }
 0x545   : > { %vm5148_vm7 = vcmp.ge.f32.partialorder %v5132_v17, 0.0  ;;  %v5164_v43 = vmul.f32 0.001, %v5132_v17  ;;  %v5133_v44 = vadd.f32 %v13393_v40, %v5117_v53 }
 0x546   : > { %v5182_v45 = vsel %vm5150_vm6, %v5134_v51, %v5166_v39  ;;  %vm5151_vm5 = vcmp.ge.f32.partialorder %v5135_v29, 0.0  ;;  %v5167_v50 = vmul.f32 0.001, %v5135_v29  ;;  %vm15390_vm6 = vmmov %vm15347_vm0 }
 0x547   : > { %v13722_v3 = vsel %vm5148_vm7, %v5132_v17, %v5164_v43  ;;  %vm5149_vm2 = vcmp.ge.f32.partialorder %v5133_v44, 0.0  ;;  %v5165_v46 = vmul.f32 0.001, %v5133_v44  ;;  %v5340_v55 = vrot.slane %v5182_v45, 1 }
 0x548   : > { %v13724_v9 = vsel %vm5151_vm5, %v5135_v29, %v5167_v50  ;;  %v5338_v8 = vrot.slane %v13722_v3, 1  ;;  %v15388_v43 = vrot.slane %v13431_v27, 1 }
 0x549   : > { %v5341_v63 = vrot.slane %v13724_v9, 1  ;;  %v5181_v42 = vsel %vm5149_vm2, %v5133_v44, %v5165_v46 }
 0x54a   : > { %v5339_v57 = vrot.slane %v5181_v42, 1 }
 0x54b   : > { %v5366_v4 = vsel %vm15383_vm10, %v5340_v55, %v5341_v63 }
 0x54c   : > { %v13732_v34 = vmax.f32 %v5182_v45, %v5366_v4  ;;  %v5367_v10 = vsel %vm15384_vm12, %v5339_v57, %v5340_v55  ;;  %v5368_v13 = vsel %vm15385_vm11, %v5338_v8, %v5339_v57  ;;  %vm15392_vm12 = vmmov %vm15347_vm0 }
 0x54d   : > { %v13741_v11 = vmax.f32 %v13722_v3, %v5368_v13  ;;  %v13743_v23 = vmax.f32 %v5181_v42, %v5367_v10  ;;  %v15391_v10 = vld [vmem:[#allocation57_spill] sm:$0xff]  ;;  %vm15396_vm11 = vmmov %vm15347_vm0 }
 0x54f   : > { %v5386_v59 = vmax.f32 %v13741_v11, %v13732_v34 }
 0x551   : > { %5402 = vst [vmem:[#allocation3 + $0x80] sm:$0xff] %v5386_v59 }
 0x55b   : > { %v8651_v0 = vpop.f32.mrb[12].mxu0 }
 0x55c   : > { %v3872_v48 = vadd.f32 %v8651_v0, %v13551_v47  ;;  %v3863_v26 = vpop.f32.mrb[13].mxu0 }
 0x55d   : > { %v3864_v25 = vadd.f32 %v3863_v26, %v13556_v60  ;;  %v8652_v31 = vpop.f32.mrb[14].mxu0 }
 0x55e   : > { %v3896_v54 = vmul.f32 %v13381_v33, %v3872_v48  ;;  %v3875_v41 = vadd.f32 %v8652_v31, %v13563_v49  ;;  %v3866_v2 = vpop.f32.mrb[15].mxu0 }
 0x55f   : > { %v3894_v20 = vmul.f32 %v13381_v33, %v3864_v25  ;;  %v3867_v38 = vadd.f32 %v3866_v2, %v13569_v28 }
 0x560   : > { %v3916_v36 = vadd.f32 %v13393_v40, %v3896_v54  ;;  %v3897_v1 = vmul.f32 %v13381_v33, %v3875_v41 }
 0x561   : > { %v3914_v56 = vadd.f32 %v13393_v40, %v3894_v20  ;;  %v3895_v47 = vmul.f32 %v13381_v33, %v3867_v38 }
 0x562   : > { %vm3932_vm4 = vcmp.ge.f32.partialorder %v3916_v36, 0.0  ;;  %v3948_v60 = vmul.f32 0.001, %v3916_v36  ;;  %v3917_v52 = vadd.f32 %v13393_v40, %v3897_v1 }
 0x563   : > { %vm3930_vm9 = vcmp.ge.f32.partialorder %v3914_v56, 0.0  ;;  %v3946_v16 = vmul.f32 0.001, %v3914_v56  ;;  %v3915_v49 = vadd.f32 %v13393_v40, %v3895_v47 }
 0x564   : > { %v3964_v18 = vsel %vm3932_vm4, %v3916_v36, %v3948_v60  ;;  %vm3933_vm3 = vcmp.ge.f32.partialorder %v3917_v52, 0.0  ;;  %v3949_v32 = vmul.f32 0.001, %v3917_v52 }
 0x565   : > { %v3962_v28 = vsel %vm3930_vm9, %v3914_v56, %v3946_v16  ;;  %vm3931_vm13 = vcmp.ge.f32.partialorder %v3915_v49, 0.0  ;;  %v3947_v15 = vmul.f32 0.001, %v3915_v49  ;;  %v5246_v7 = vrot.slane %v3964_v18, 1  ;;  %vm15399_vm9 = vmmov %vm15347_vm0 }
 0x566   : > { %v3965_v5 = vsel %vm3933_vm3, %v3917_v52, %v3949_v32  ;;  %v5244_v51 = vrot.slane %v3962_v28, 1  ;;  %vm15400_vm3 = vmmov %vm15347_vm0 }
 0x567   : > { %v5247_v62 = vrot.slane %v3965_v5, 1  ;;  %v3963_v17 = vsel %vm3931_vm13, %v3915_v49, %v3947_v15 }
 0x568   : > { %v5245_v53 = vrot.slane %v3963_v17, 1  ;;  %v5251_v39 = vsel %vm15386_vm1, %v5243_v19, %v5244_v51 }
 0x569   : > { %v5248_v29 = vsel %vm15387_vm15, %v5246_v7, %v5247_v62  ;;  %v5263_v44 = vsel %vm15347_vm0, %v5247_v62, %v15388_v43  ;;  %v5275_v45 = vmax.f32 %v13669_v21, %v5251_v39  ;;  %vm13868_vm15 = vcmp.gt.s32.totalorder %v5434_v24, 0 }
 0x56a   : > { %v5278_v50 = vmax.f32 %v3964_v18, %v5248_v29  ;;  %v5279_v46 = vmax.f32 %v3965_v5, %v5263_v44  ;;  %v5249_v55 = vsel %vm15389_vm14, %v5245_v53, %v5246_v7  ;;  %v5250_v42 = vsel %vm15390_vm6, %v5244_v51, %v5245_v53  ;;  %v15393_v5 = vld [vmem:[#allocation7_spill] sm:$0xff]  ;;  %v15394_v7 = vld [vmem:[#allocation10_spill] sm:$0xff]  ;;  %v9171_v53 = vld [vmem:[%s14778_s1 + $0x108] sm:$0xff]  }
 0x56b   : > { %v5276_v57 = vmax.f32 %v3962_v28, %v5250_v42  ;;  %v5277_v19 = vmax.f32 %v3963_v17, %v5249_v55  ;;  %v5289_v4 = vmax.f32 %v5273_v58, %v5275_v45  ;;  %v5441_v51 = vand.u32 7, %v15393_v5  ;;  %v15395_v29 = vld [vmem:[#allocation11_spill] sm:$0xff] }
 0x56c   : > { %v5294_v27 = vmax.f32 %v5278_v50, %v13462_v6  ;;  %v5295_v13 = vmax.f32 %v5279_v46, %v15391_v10  ;;  %v5455_v62 = vand.u32 7, %v15394_v7  ;;  %v5448_v43 = vand.u32 7, %v15395_v29 }
 0x56d   : > { %v5290_v21 = vmax.f32 %v13690_v37, %v5276_v57  ;;  %v5291_v59 = vmax.f32 %v5275_v45, %v5277_v19  ;;  %v5292_v0 = vmax.f32 %v5276_v57, %v5278_v50  ;;  %v5293_v48 = vmax.f32 %v5277_v19, %v5279_v46  ;;  %5305 = vst [vmem:[#allocation3 + $0x48] sm:$0xff] %v5289_v4  ;;  %v13823_v50 = vld [vmem:[#allocation2 + $0x10] sm:$0xff] }
 0x56e   : > { %5310 = vst [vmem:[#allocation3 + $0x70] sm:$0xff] %v5294_v27  ;;  %5311 = vst [vmem:[#allocation3 + $0x78] sm:$0xff] %v5295_v13  ;;  %vm13817_vm4 = vcmp.lt.s32.totalorder %v5441_v51, 7  ;;  %v13837_v27 = vld [vmem:[#allocation2 + $0x111] sm:$0xff]  ;;  %vm13841_vm13 = vcmp.lt.s32.totalorder %v5448_v43, 7  ;;  %vm13847_vm1 = vcmp.gt.s32.totalorder %v5455_v62, 0 }
 0x56f   : > { %5306 = vst [vmem:[#allocation3 + $0x50] sm:$0xff] %v5290_v21  ;;  %5307 = vst [vmem:[#allocation3 + $0x58] sm:$0xff] %v5291_v59  ;;  %v8707_v26 = vpop.f32.mrb[20].mxu1  ;;  %vm13881_vm0 = vcmp.gt.s32.totalorder %v5448_v43, 0  ;;  %vm13900_vm14 = vcmp.lt.s32.totalorder %v5455_v62, 7  ;;  %vm13918_vm6 = vcmp.gt.s32.totalorder %v5441_v51, 0 }
 0x570   : > { %5308 = vst [vmem:[#allocation3 + $0x60] sm:$0xff] %v5292_v0  ;;  %5309 = vst [vmem:[#allocation3 + $0x68] sm:$0xff] %v5293_v48  ;;  %v5122_v22 = vmul.f32 %v8707_v26, %v13381_v33  ;;  %v5069_v12 = vpop.f32.mrb[21].mxu1  ;;  %v9172_v0 = vld [vmem:[%s14778_s1 + $0x110] sm:$0xff]   ;;  %v9313_v51 = vld [vmem:[%s14779_s2 + $0x1] ss:$0 sm:$0xff] }
 0x571   : > { %v5120_v6 = vmul.f32 %v13381_v33, %v5069_v12  ;;  %v8708_v58 = vpop.f32.mrb[22].mxu1 }
 0x572   : > { %v5138_v25 = vadd.f32 %v13393_v40, %v5122_v22  ;;  %v5123_v37 = vmul.f32 %v8708_v58, %v13381_v33  ;;  %v5072_v31 = vpop.f32.mrb[23].mxu1 }
 0x573   : > { %v5136_v54 = vadd.f32 %v13393_v40, %v5120_v6  ;;  %v5121_v41 = vmul.f32 %v13381_v33, %v5072_v31  ;;  %v9170_v33 = vld [vmem:[%s14778_s1 + $0x100] sm:$0xff]  }
 0x574   : > { %vm5154_vm7 = vcmp.ge.f32.partialorder %v5138_v25, 0.0  ;;  %v5170_v2 = vmul.f32 0.001, %v5138_v25  ;;  %v5139_v20 = vadd.f32 %v13393_v40, %v5123_v37  ;;  %v13787_v38 = vld [vmem:[#allocation3 + $0x40] ss:$2 sm:$0xff]  ;;  %8717 = vmatprep.subr.bf16.mxu0 %v9170_v33 }
 0x575   : > { %vm5152_vm5 = vcmp.ge.f32.partialorder %v5136_v54, 0.0  ;;  %v5168_v36 = vmul.f32 0.001, %v5136_v54  ;;  %v5137_v1 = vadd.f32 %v13393_v40, %v5121_v41  ;;  %5320 = vst [vmem:[#allocation2 + $0x19] sm:$0xff] %v13787_v38  ;;  %8718 = vmatpush3.bf16.msra.mxu0 %v9170_v33  ;;  %v9177_v33 = vld [vmem:[%s14778_s1 + $0x138] sm:$0xff]  }
 0x576   : > { %v5186_v47 = vsel %vm5154_vm7, %v5138_v25, %v5170_v2  ;;  %vm5155_vm2 = vcmp.ge.f32.partialorder %v5139_v20, 0.0  ;;  %v5171_v60 = vmul.f32 0.001, %v5139_v20  ;;  %8719 = vmatprep.subr.bf16.mxu0 %v9171_v53  ;;  %v5751_v25 = vsel %vm13868_vm15, %v13823_v50, 0.0  ;;  %v9175_v2 = vld [vmem:[%s14778_s1 + $0x128] sm:$0xff]  }
 0x577   : > { %v13791_v56 = vld [vmem:[#allocation3 + $0x60] ss:$2 sm:$0xff]  ;;  %v5184_v52 = vsel %vm5152_vm5, %v5136_v54, %v5168_v36  ;;  %vm5153_vm10 = vcmp.ge.f32.partialorder %v5137_v1, 0.0  ;;  %v5169_v16 = vmul.f32 0.001, %v5137_v1  ;;  %v5344_v32 = vrot.slane %v5186_v47, 1 }
 0x578   : > { %5321 = vst [vmem:[#allocation2 + $0x21] sm:$0xff] %v13791_v56  ;;  %v5342_v49 = vrot.slane %v5184_v52, 1  ;;  %v13797_v18 = vsel %vm5155_vm2, %v5139_v20, %v5171_v60  ;;  %v9174_v54 = vld [vmem:[%s14778_s1 + $0x120] sm:$0xff]   ;;  %v9195_v20 = vld [vmem:[%s14778_s1 + $0x1c8] sm:$0xff]  }
 0x579   : > { %v5185_v40 = vsel %vm5153_vm10, %v5137_v1, %v5169_v16  ;;  %v5345_v28 = vrot.slane %v13797_v18, 1  ;;  %8720 = vmatpush3.bf16.msra.mxu0 %v9171_v53  ;;  %v9176_v1 = vld [vmem:[%s14778_s1 + $0x130] sm:$0xff]  }
 0x57a   : > { %v5365_v15 = vsel %vm15392_vm12, %v5341_v63, %v5342_v49  ;;  %v5343_v17 = vrot.slane %v5185_v40, 1  ;;  %8721 = vmatprep.subr.bf16.mxu0 %v9172_v0  ;;  %vm15413_vm12 = vmmov %vm15400_vm3 }
 0x57b   : > { %v5373_v39 = vmax.f32 %v13724_v9, %v5365_v15  ;;  %v5362_v44 = vsel %vm15396_vm11, %v5344_v32, %v5345_v28  ;;  %vm15414_vm11 = vmmov %vm15400_vm3 }
 0x57c   : > { %v13821_v45 = vld [vmem:[#allocation2 + $0x12] sm:$0xff]  ;;  %v5363_v9 = vsel %vm15399_vm9, %v5343_v17, %v5344_v32  ;;  %v5364_v55 = vsel %vm15400_vm3, %v5342_v49, %v5343_v17  ;;  %v13831_v42 = vmax.f32 %v5186_v47, %v5362_v44  ;;  %v13931_v49 = vld [vmem:[#allocation2 + $0x1] sm:$0xff]  ;;  %vm15415_vm9 = vmmov %vm15400_vm3 }
 0x57d   : > { %v13825_v46 = vld [vmem:[#allocation2 + $0x18] sm:$0xff]  ;;  %v5387_v57 = vmax.f32 %v13743_v23, %v5373_v39  ;;  %v5719_v19 = vsel %vm13817_vm4, %v13821_v45, 0.0  ;;  %v5374_v4 = vmax.f32 %v5184_v52, %v5364_v55  ;;  %v13851_v59 = vmax.f32 %v5185_v40, %v5363_v9  ;;  %8722 = vmatpush3.bf16.msra.mxu0 %v9172_v0  ;;  %v13933_v40 = vld [vmem:[#allocation2 + $0x2] sm:$0xff] }
 0x57e   : > { %6270 = vst [vmem:[#allocation2 + $0x15] sm:$0x1f] %v13837_v27  ;;  %5728 = vrot.lane.b32.xlu1 %v5719_v19, %s9346_s29  ;;  %v5752_v52 = vsel %vm13918_vm6, %v13825_v46, 0.0  ;;  %6269 = vst [vmem:[#allocation2] sm:$0x1f] %v13837_v27  ;;  %v15441_v58 = vsel %vm13847_vm1, %v13825_v46, 0.0 }
 0x57f   : > { %v13845_v13 = vld [vmem:[#allocation2 + $0x1a] sm:$0xff]  ;;  %5403 = vst [vmem:[#allocation3 + $0x88] sm:$0xff] %v5387_v57  ;;  %v5388_v26 = vmax.f32 %v13732_v34, %v5374_v4  ;;  %v5390_v22 = vmax.f32 %v5374_v4, %v13831_v42  ;;  %v5389_v12 = vmax.f32 %v5373_v39, %v13851_v59 }
 0x580   : > { %v5720_v48 = vsel %vm13841_vm13, %v13845_v13, 0.0  ;;  %v9173_v34 = vld [vmem:[%s14778_s1 + $0x118] sm:$0xff]   ;;  %v13879_v37 = vld [vmem:[#allocation2 + $0x20] sm:$0xff] }
 0x581   : > { %5730 = vrot.lane.b32.xlu0 %v5720_v48, %s9346_s29  ;;  %5404 = vst [vmem:[#allocation3 + $0x90] sm:$0xff] %v5388_v26  ;;  %5406 = vst [vmem:[#allocation3 + $0xa0] sm:$0xff] %v5390_v22  ;;  %8723 = vmatprep.subr.bf16.mxu0 %v9173_v34  ;;  %v5753_v41 = vsel %vm13881_vm0, %v13879_v37, 0.0  ;;  %v9314_v39 = vld [vmem:[%s14780_s3 + $0x1] ss:$0 sm:$0xff] }
 0x582   : > { %5405 = vst [vmem:[#allocation3 + $0x98] sm:$0xff] %v5389_v12  ;;  %8724 = vmatpush3.bf16.msra.mxu0 %v9173_v34 }
 0x583   : > { %8725 = vmatprep.subr.bf16.mxu0 %v9174_v54 }
 0x585   : > { %5759 = vrot.lane.b32.xlu0 %v5751_v25, %s9349_s10 }
 0x586   : > { %v13885_v31 = vld [vmem:[#allocation3 + $0x80] ss:$2 sm:$0xff]  ;;  %8726 = vmatpush3.bf16.msra.mxu0 %v9174_v54 }
 0x587   : > { %5424 = vst [vmem:[#allocation2 + $0x29] sm:$0xff] %v13885_v31  ;;  %8727 = vmatprep.subr.bf16.mxu0 %v9175_v2 }
 0x589   : > { %5763 = vrot.lane.b32.xlu0 %v5753_v41, %s9349_s10 }
 0x58a   : > { %8728 = vmatpush3.bf16.msra.mxu0 %v9175_v2 }
 0x58b   : > { %8729 = vmatprep.subr.bf16.mxu0 %v9176_v1 }
 0x58d   : > { %5784 = vrot.lane.b32.xlu0 %v13698_v61, %s9351_s7 }
 0x58e   : > { %v13904_v36 = vld [vmem:[#allocation2 + $0x22] sm:$0xff]  ;;  %8730 = vmatpush3.bf16.msra.mxu0 %v9176_v1 }
 0x58f   : > { %v5721_v47 = vsel %vm13900_vm14, %v13904_v36, 0.0  ;;  %6337 = vst [vmem:[#allocation2 + $0x20] sm:$0x1f] %v13837_v27  ;;  %v13929_v16 = vld [vmem:[#allocation2 + $0x28] sm:$0xff]  ;;  %8731 = vmatprep.subr.bf16.mxu0 %v9177_v33 }
 0x590   : > { %5732 = vrot.lane.b32.xlu1 %v5721_v47, %s9346_s29  ;;  %v5754_v32 = vsel %vm13847_vm1, %v13929_v16, 0.0 }
 0x591   : > { %5788 = vrot.lane.b32.xlu0 %v13791_v56, %s9351_s7 }
 0x592   : > { %8732 = vmatpush3.bf16.msra.mxu0 %v9177_v33 }
 0x594   : > { %5761 = vrot.lane.b32.xlu1 %v5752_v52, %s9349_s10 }
 0x598   : > { %5765 = vrot.lane.b32.xlu1 %v5754_v32, %s9349_s10 }
 0x59c   : > { %5786 = vrot.lane.b32.xlu1 %v13787_v38, %s9351_s7 }
 0x5a0   : > { %5790 = vrot.lane.b32.xlu1 %v13885_v31, %s9351_s7 }
 0x5bf   : > { %v8711_v15 = vpop.f32.mrb[24].mxu1 }
 0x5c0   : > { %v5126_v7 = vmul.f32 %v9313_v51, %v8711_v15  ;;  %v5085_v62 = vpop.f32.mrb[25].mxu1 }
 0x5c1   : > { %v5124_v17 = vmul.f32 %v9313_v51, %v5085_v62  ;;  %v8712_v53 = vpop.f32.mrb[26].mxu1 }
 0x5c2   : > { %v5142_v29 = vadd.f32 %v9314_v39, %v5126_v7  ;;  %v5127_v43 = vmul.f32 %v9313_v51, %v8712_v53  ;;  %v5088_v44 = vpop.f32.mrb[27].mxu1 }
 0x5c3   : > { %v5140_v9 = vadd.f32 %v9314_v39, %v5124_v17  ;;  %v5125_v55 = vmul.f32 %v9313_v51, %v5088_v44 }
 0x5c4   : > { %vm5158_vm7 = vcmp.ge.f32.partialorder %v5142_v29, 0.0  ;;  %v5174_v57 = vmul.f32 0.001, %v5142_v29  ;;  %v5143_v19 = vadd.f32 %v9314_v39, %v5127_v43 }
 0x5c5   : > { %vm5156_vm5 = vcmp.ge.f32.partialorder %v5140_v9, 0.0  ;;  %v5172_v4 = vmul.f32 0.001, %v5140_v9  ;;  %v5141_v0 = vadd.f32 %v9314_v39, %v5125_v55 }
 0x5c6   : > { %v5190_v48 = vsel %vm5158_vm7, %v5142_v29, %v5174_v57  ;;  %vm5159_vm2 = vcmp.ge.f32.partialorder %v5143_v19, 0.0  ;;  %v5175_v26 = vmul.f32 0.001, %v5143_v19 }
 0x5c7   : > { %v5188_v22 = vsel %vm5156_vm5, %v5140_v9, %v5172_v4  ;;  %vm5157_vm10 = vcmp.ge.f32.partialorder %v5141_v0, 0.0  ;;  %v5173_v12 = vmul.f32 0.001, %v5141_v0  ;;  %v5348_v41 = vrot.slane %v5190_v48, 1  ;;  %v15416_v9 = vld [vmem:[#allocation15_spill] sm:$0xff] }
 0x5c8   : > { %v5191_v34 = vsel %vm5159_vm2, %v5143_v19, %v5175_v26  ;;  %v5346_v25 = vrot.slane %v5188_v22, 1  ;;  %v5462_v55 = vand.u32 7, %v15416_v9 }
 0x5c9   : > { %v5189_v54 = vsel %vm5157_vm10, %v5141_v0, %v5173_v12  ;;  %v5349_v2 = vrot.slane %v5191_v34, 1 }
 0x5ca   : > { %v5347_v1 = vrot.slane %v5189_v54, 1  ;;  %v5361_v47 = vsel %vm15413_vm12, %v5345_v28, %v5346_v25  ;;  %vm13972_vm7 = vcmp.lt.s32.totalorder %v5462_v55, 7 }
 0x5cb   : > { %v5358_v33 = vsel %vm15414_vm11, %v5348_v41, %v5349_v2  ;;  %v5377_v52 = vmax.f32 %v13797_v18, %v5361_v47  ;;  %vm15419_vm11 = vmmov %vm15400_vm3 }
 0x5cc   : > { %v5359_v32 = vsel %vm15415_vm9, %v5347_v1, %v5348_v41  ;;  %v5360_v15 = vsel %vm15400_vm3, %v5346_v25, %v5347_v1  ;;  %v13961_v7 = vmax.f32 %v5190_v48, %v5358_v33  ;;  %vm15420_vm9 = vmmov %vm15400_vm3 }
 0x5cd   : > { %v5378_v62 = vmax.f32 %v5188_v22, %v5360_v15  ;;  %v5379_v17 = vmax.f32 %v5189_v54, %v5359_v32  ;;  %v5391_v53 = vmax.f32 %v13851_v59, %v5377_v52 }
 0x5cf   : > { %v5392_v29 = vmax.f32 %v13831_v42, %v5378_v62  ;;  %v5393_v28 = vmax.f32 %v5377_v52, %v5379_v17  ;;  %v5394_v43 = vmax.f32 %v5378_v62, %v13961_v7  ;;  %5407 = vst [vmem:[#allocation3 + $0xa8] sm:$0xff] %v5391_v53  ;;  %v9197_v42 = vld [vmem:[%s14778_s1 + $0x1d8] sm:$0xff]  }
 0x5d1   : > { %5408 = vst [vmem:[#allocation3 + $0xb0] sm:$0xff] %v5392_v29  ;;  %5409 = vst [vmem:[#allocation3 + $0xb8] sm:$0xff] %v5393_v28 }
 0x5d2   : > { %5410 = vst [vmem:[#allocation3 + $0xc0] sm:$0xff] %v5394_v43 }
 0x5d6   : > { %v13966_v18 = vld [vmem:[#allocation3 + $0xa0] ss:$2 sm:$0xff] }
 0x5d7   : > { %5425 = vst [vmem:[#allocation2 + $0x31] sm:$0xff] %v13966_v18 }
 0x5dc   : > { %v8715_v44 = vpop.f32.mrb[28].mxu1 }
 0x5dd   : > { %v5130_v57 = vmul.f32 %v9313_v51, %v8715_v44  ;;  %v5101_v19 = vpop.f32.mrb[29].mxu1 }
 0x5de   : > { %v5128_v4 = vmul.f32 %v9313_v51, %v5101_v19  ;;  %v8716_v59 = vpop.f32.mrb[30].mxu1  ;;  %v13976_v0 = vld [vmem:[#allocation2 + $0x2a] sm:$0xff] }
 0x5df   : > { %v5146_v48 = vadd.f32 %v9314_v39, %v5130_v57  ;;  %v5131_v26 = vmul.f32 %v9313_v51, %v8716_v59  ;;  %v5104_v22 = vpop.f32.mrb[31].mxu1  ;;  %v5722_v12 = vsel %vm13972_vm7, %v13976_v0, 0.0  ;;  %v8088_v14 = vpack.c.bf16 %v13976_v0, %v13904_v36 }
 0x5e0   : > { %v5144_v25 = vadd.f32 %v9314_v39, %v5128_v4  ;;  %v5129_v54 = vmul.f32 %v9313_v51, %v5104_v22  ;;  %5734 = vrot.lane.b32.xlu0 %v5722_v12, %s9346_s29 }
 0x5e1   : > { %vm5162_vm5 = vcmp.ge.f32.partialorder %v5146_v48, 0.0  ;;  %v5178_v41 = vmul.f32 0.001, %v5146_v48  ;;  %v5147_v1 = vadd.f32 %v9314_v39, %v5131_v26 }
 0x5e2   : > { %vm5160_vm2 = vcmp.ge.f32.partialorder %v5144_v25, 0.0  ;;  %v5176_v47 = vmul.f32 0.001, %v5144_v25  ;;  %v5145_v33 = vadd.f32 %v9314_v39, %v5129_v54 }
 0x5e3   : > { %v5194_v52 = vsel %vm5162_vm5, %v5146_v48, %v5178_v41  ;;  %vm5163_vm10 = vcmp.ge.f32.partialorder %v5147_v1, 0.0  ;;  %v5179_v32 = vmul.f32 0.001, %v5147_v1  ;;  %vm15421_vm5 = vmmov %vm15400_vm3 }
 0x5e4   : > { %v5192_v15 = vsel %vm5160_vm2, %v5144_v25, %v5176_v47  ;;  %vm5161_vm12 = vcmp.ge.f32.partialorder %v5145_v33, 0.0  ;;  %v5177_v62 = vmul.f32 0.001, %v5145_v33  ;;  %v5352_v28 = vrot.slane %v5194_v52, 1  ;;  %vm15422_vm2 = vmmov %vm15400_vm3 }
 0x5e5   : > { %v5195_v53 = vsel %vm5163_vm10, %v5147_v1, %v5179_v32  ;;  %v5350_v29 = vrot.slane %v5192_v15, 1 }
 0x5e6   : > { %v5353_v43 = vrot.slane %v5195_v53, 1  ;;  %v5193_v44 = vsel %vm5161_vm12, %v5145_v33, %v5177_v62  ;;  %v5727_v33 = vpop.permute.xlu0 %5726  ;;  %v9199_v62 = vld [vmem:[%s14778_s1 + $0x1e8] sm:$0xff]  }
 0x5e7   : > { %v5351_v51 = vrot.slane %v5193_v44, 1  ;;  %v5357_v57 = vsel %vm15419_vm11, %v5349_v2, %v5350_v29 }
 0x5e8   : > { %v5354_v19 = vsel %vm15420_vm9, %v5352_v28, %v5353_v43  ;;  %v5369_v39 = vsel %vm15400_vm3, %v5353_v43, %v5338_v8  ;;  %v5381_v4 = vmax.f32 %v5191_v34, %v5357_v57  ;;  %v14016_v43 = vld [vmem:[#allocation2 + $0x30] sm:$0xff]  ;;  %vm14050_vm3 = vcmp.gt.s32.totalorder %v5462_v55, 0  ;;  %v8096_v57 = vld [vmem:[%s14779_s2 + $0x2] ss:$0 sm:$0xff] }
 0x5e9   : > { %v5384_v59 = vmax.f32 %v5194_v52, %v5354_v19  ;;  %v5385_v48 = vmax.f32 %v5195_v53, %v5369_v39  ;;  %v5355_v26 = vsel %vm15421_vm5, %v5351_v51, %v5352_v28  ;;  %v5356_v22 = vsel %vm15422_vm2, %v5350_v29, %v5351_v51  ;;  %v15424_v52 = vld [vmem:[#allocation14_spill] sm:$0xff]  ;;  %v15429_v29 = vld [vmem:[#allocation21_spill] sm:$0xff] }
 0x5ea   : > { %v5382_v12 = vmax.f32 %v5192_v15, %v5356_v22  ;;  %v5383_v25 = vmax.f32 %v5193_v44, %v5355_v26  ;;  %v5395_v2 = vmax.f32 %v5379_v17, %v5381_v4  ;;  %v5469_v32 = vand.u32 7, %v15424_v52 }
 0x5eb   : > { %v5400_v54 = vmax.f32 %v5384_v59, %v13741_v11  ;;  %v5401_v41 = vmax.f32 %v5385_v48, %v13743_v23  ;;  %v15423_v23 = vld [vmem:[#allocation20_spill] sm:$0xff]  ;;  %v5476_v28 = vand.u32 7, %v15429_v29 }
 0x5ec   : > { %v5396_v3 = vmax.f32 %v13961_v7, %v5382_v12  ;;  %v5397_v1 = vmax.f32 %v5381_v4, %v5383_v25  ;;  %v5398_v8 = vmax.f32 %v5382_v12, %v5384_v59  ;;  %v5399_v34 = vmax.f32 %v5383_v25, %v5385_v48  ;;  %5411 = vst [vmem:[#allocation3 + $0xc8] sm:$0xff] %v5395_v2 }
 0x5ed   : > { %5416 = vst [vmem:[#allocation3 + $0xf0] sm:$0xff] %v5400_v54  ;;  %5417 = vst [vmem:[#allocation3 + $0xf8] sm:$0xff] %v5401_v41  ;;  %v5483_v7 = vand.u32 7, %v15423_v23  ;;  %vm14009_vm12 = vcmp.lt.s32.totalorder %v5469_v32, 7  ;;  %vm14025_vm11 = vcmp.lt.s32.totalorder %v5476_v28, 7  ;;  %v5755_v54 = vsel %vm14050_vm3, %v14016_v43, 0.0 }
 0x5ee   : > { %5412 = vst [vmem:[#allocation3 + $0xd0] sm:$0xff] %v5396_v3  ;;  %5413 = vst [vmem:[#allocation3 + $0xd8] sm:$0xff] %v5397_v1  ;;  %v9178_v41 = vld [vmem:[%s14778_s1 + $0xc0] sm:$0xff]   ;;  %vm14061_vm5 = vcmp.gt.s32.totalorder %v5469_v32, 0  ;;  %vm14071_vm2 = vcmp.gt.s32.totalorder %v5476_v28, 0 }
 0x5ef   : > { %5414 = vst [vmem:[#allocation3 + $0xe0] sm:$0xff] %v5398_v8  ;;  %5415 = vst [vmem:[#allocation3 + $0xe8] sm:$0xff] %v5399_v34  ;;  %vm14005_vm10 = vcmp.gt.s32.totalorder %v5483_v7, 0  ;;  %vm14031_vm9 = vcmp.lt.s32.totalorder %v5483_v7, 7  ;;  %8741 = vmatprep.subr.bf16.mxu0 %v9178_v41  ;;  %v9192_v8 = vld [vmem:[%s14778_s1 + $0x170] sm:$0xff]  }
 0x5f0   : > { %v5729_v48 = vpop.permute.xlu1 %5728 }
 0x5f3   : > { %v13997_v47 = vld [vmem:[#allocation3 + $0xc0] ss:$2 sm:$0xff]  ;;  %v5731_v17 = vpop.permute.xlu0 %5730 }
 0x5f4   : > { %5426 = vst [vmem:[#allocation2 + $0x39] sm:$0xff] %v13997_v47 }
 0x5f6   : > { %v14000_v11 = vld [vmem:[#allocation3 + $0xe0] ss:$2 sm:$0xff] }
 0x5f7   : > { %5427 = vst [vmem:[#allocation2 + $0x41] sm:$0xff] %v14000_v11  ;;  %v5760_v26 = vpop.permute.xlu0 %5759 }
 0x5fb   : > { %v14013_v53 = vld [vmem:[#allocation2 + $0x32] sm:$0xff]  ;;  %v5764_v55 = vpop.permute.xlu0 %5763 }
 0x5fc   : > { %v14018_v44 = vld [vmem:[#allocation2 + $0x38] sm:$0xff]  ;;  %v5723_v51 = vsel %vm14009_vm12, %v14013_v53, 0.0 }
 0x5fd   : > { %6338 = vst [vmem:[#allocation2 + $0x35] sm:$0x1f] %v13837_v27  ;;  %5736 = vrot.lane.b32.xlu1 %v5723_v51, %s9346_s29  ;;  %v5756_v1 = vsel %vm14061_vm5, %v14018_v44, 0.0  ;;  %v15440_v51 = vld [vmem:[#allocation9_spill] sm:$0xff] }
 0x5fe   : > { %v14029_v19 = vld [vmem:[#allocation2 + $0x3a] sm:$0xff]  ;;  %v14035_v4 = vld [vmem:[#allocation2 + $0x42] sm:$0xff]  ;;  %v5742_v28 = vadd.f32 %v5727_v33, %v15440_v51 }
 0x5ff   : > { %v5724_v22 = vsel %vm14025_vm11, %v14029_v19, 0.0  ;;  %v5725_v12 = vsel %vm14031_vm9, %v14035_v4, 0.0  ;;  %v14065_v9 = vld [vmem:[#allocation2 + $0x40] sm:$0xff]  ;;  %v5750_v34 = vld [vmem:[#allocation2 + $0x48] sm:$0xff]  ;;  %v5785_v32 = vpop.permute.xlu0 %5784  ;;  %v8091_v63 = vpack.c.bf16 %v14029_v19, %v14013_v53 }
 0x600   : > { %5738 = vrot.lane.b32.xlu0 %v5724_v22, %s9346_s29  ;;  %v5757_v7 = vsel %vm14071_vm2, %v14065_v9, 0.0  ;;  %v5758_v52 = vsel %vm14005_vm10, %v5750_v34, 0.0  ;;  %v5743_v22 = vadd.f32 %v5729_v48, %v13698_v61 }
 0x601   : > { %5740 = vrot.lane.b32.xlu1 %v5725_v12, %s9346_s29  ;;  %v5775_v12 = vadd.f32 %v5760_v26, %v5742_v28 }
 0x602   : > { %v5733_v2 = vpop.permute.xlu1 %5732 }
 0x603   : > { %v5800_v34 = vadd.f32 %v5785_v32, %v5775_v12  ;;  %v5789_v33 = vpop.permute.xlu0 %5788  ;;  %v5665_v12 = vsel %vm13881_vm0, %v13825_v46, 0.0 }
 0x604   : > { %5767 = vrot.lane.b32.xlu0 %v5755_v54, %s9349_s10 }
 0x605   : > { %5769 = vrot.lane.b32.xlu1 %v5756_v1, %s9349_s10 }
 0x606   : > { %v5762_v23 = vpop.permute.xlu1 %5761 }
 0x607   : > { %v5776_v54 = vadd.f32 %v5762_v23, %v5743_v22  ;;  %v9183_v22 = vld [vmem:[%s14778_s1 + $0xe8] sm:$0xff]  }
 0x608   : > { %5771 = vrot.lane.b32.xlu0 %v5757_v7, %s9349_s10  ;;  %v5744_v7 = vadd.f32 %v5731_v17, %v13787_v38 }
 0x609   : > { %5773 = vrot.lane.b32.xlu1 %v5758_v52, %s9349_s10  ;;  %v5745_v52 = vadd.f32 %v5733_v2, %v13791_v56  ;;  %v9315_v2 = vld [vmem:[#allocation2 + $0x9] sm:$0xff] }
 0x60a   : > { %v5766_v29 = vpop.permute.xlu1 %5765  ;;  %v5777_v48 = vadd.f32 %v5764_v55, %v5744_v7  ;;  %v9179_v55 = vld [vmem:[%s14778_s1 + $0xc8] sm:$0xff]   ;;  %v9185_v7 = vld [vmem:[%s14778_s1 + $0xf8] sm:$0xff]  }
 0x60b   : > { %v5778_v51 = vadd.f32 %v5766_v29, %v5745_v52  ;;  %v5664_v29 = vsel %vm13918_vm6, %v13823_v50, 0.0  ;;  %v5635_v52 = vsel %vm14009_vm12, %v13976_v0, 0.0  ;;  %v9198_v0 = vld [vmem:[%s14778_s1 + $0x1e0] sm:$0xff]  }
 0x60c   : > { %5792 = vrot.lane.b32.xlu0 %v13966_v18, %s9351_s7  ;;  %v5802_v23 = vadd.f32 %v5789_v33, %v5777_v48  ;;  %v5636_v33 = vsel %vm14025_vm11, %v14013_v53, 0.0  ;;  %v5637_v48 = vsel %vm14031_vm9, %v14029_v19, 0.0  ;;  %v9200_v53 = vld [vmem:[%s14778_s1 + $0x1f0] sm:$0xff]   ;;  %v8097_v19 = vld [vmem:[%s14780_s3 + $0x2] ss:$0 sm:$0xff] }
 0x60d   : > { %5794 = vrot.lane.b32.xlu1 %v13997_v47, %s9351_s7 }
 0x60e   : > { %v5787_v1 = vpop.permute.xlu1 %5786 }
 0x60f   : > { %v5801_v59 = vadd.f32 %v5787_v1, %v5776_v54  ;;  %v5666_v54 = vsel %vm13847_vm1, %v13879_v37, 0.0  ;;  %v9184_v1 = vld [vmem:[%s14778_s1 + $0xf0] sm:$0xff]   ;;  %vm8084_vm1 = vmpackc.low %vm13817_vm4, %vm13704_vm8 }
 0x610   : > { %5796 = vrot.lane.b32.xlu0 %v14000_v11, %s9351_s7 }
 0x611   : > { %v5808_v6 = vpack.c.bf16 %v5801_v59, %v5800_v34  ;;  %5798 = vrot.lane.b32.xlu1 %v13837_v27, %s9351_s7  ;;  %v5631_v59 = vsel %vm13817_vm4, %v13708_v30, 0.0  ;;  %v5633_v30 = vsel %vm13900_vm14, %v13845_v13, 0.0  ;;  %v5634_v34 = vsel %vm13972_vm7, %v13904_v36, 0.0  ;;  %vm8093_vm4 = vmpackc.low %vm14031_vm9, %vm14025_vm11  ;;  %v9196_v36 = vld [vmem:[%s14778_s1 + $0x1d0] sm:$0xff]  }
 0x612   : > { %v5791_v26 = vpop.permute.xlu1 %5790 }
 0x613   : > { %v5803_v28 = vadd.f32 %v5791_v26, %v5778_v51  ;;  %8733 = vmatprep.mubr.bf16.mxu0 %v5808_v6  ;;  %v9180_v6 = vld [vmem:[%s14778_s1 + $0xd0] sm:$0xff]   ;;  %v5667_v51 = vsel %vm14050_vm3, %v13929_v16, 0.0  ;;  %v5668_v26 = vsel %vm14061_vm5, %v14016_v43, 0.0 }
 0x614   : > { %5582 = vrot.lane.b32.xlu0 %v13931_v49, %s9346_s29  ;;  %v5630_v49 = vsel %vm13704_vm8, %v13933_v40, 0.0  ;;  %v14122_v40 = vld [vmem:[#allocation2 + $0x8] sm:$0xff]  ;;  %vm8090_vm8 = vmpackc.low %vm14009_vm12, %vm13972_vm7  ;;  %vm15443_vm7 = vcmp.lt.s32.totalorder %v15344_v35, 7 }
 0x615   : > { %v5809_v17 = vpack.c.bf16 %v5803_v28, %v5802_v23  ;;  %5584 = vrot.lane.b32.xlu1 %v9315_v2, %s9346_s29  ;;  %v5663_v32 = vsel %vm13868_vm15, %v14122_v40, 0.0  ;;  %v5669_v23 = vsel %vm14071_vm2, %v14018_v44, 0.0  ;;  %v5670_v28 = vsel %vm14005_vm10, %v14065_v9, 0.0  ;;  %vm15445_vm9 = vmmov %vm15443_vm7 }
 0x617   : > { %8734 = vmatmul.mubr.bf16.vlgmr.msra.gmra.mrb[16].mxu0 %v5809_v17 }
 0x618   : > { %5586 = vrot.lane.b32.xlu0 %v13698_v61, %s9346_s29  ;;  %8742 = vmatpush3.bf16.msra.mxu0 %v9178_v41  ;;  %v9181_v61 = vld [vmem:[%s14778_s1 + $0xd8] sm:$0xff]   ;;  %v9182_v41 = vld [vmem:[%s14778_s1 + $0xe0] sm:$0xff]  }
 0x619   : > { %5588 = vrot.lane.b32.xlu1 %v13787_v38, %s9346_s29  ;;  %8743 = vmatprep.subr.bf16.mxu0 %v9179_v55  ;;  %v5632_v38 = vsel %vm13841_vm13, %v13821_v45, 0.0 }
 0x61c   : > { %5638 = vrot.lane.b32.xlu0 %v5630_v49, %s9349_s10  ;;  %8744 = vmatpush3.bf16.msra.mxu0 %v9179_v55 }
 0x61d   : > { %5640 = vrot.lane.b32.xlu1 %v5631_v59, %s9349_s10  ;;  %8745 = vmatprep.subr.bf16.mxu0 %v9180_v6 }
 0x620   : > { %5642 = vrot.lane.b32.xlu0 %v5632_v38, %s9349_s10  ;;  %8746 = vmatpush3.bf16.msra.mxu0 %v9180_v6 }
 0x621   : > { %5644 = vrot.lane.b32.xlu1 %v5633_v30, %s9349_s10  ;;  %8747 = vmatprep.subr.bf16.mxu0 %v9181_v61 }
 0x624   : > { %5671 = vrot.lane.b32.xlu0 %v5663_v32, %s9351_s7  ;;  %8748 = vmatpush3.bf16.msra.mxu0 %v9181_v61 }
 0x625   : > { %5673 = vrot.lane.b32.xlu1 %v5664_v29, %s9351_s7  ;;  %8749 = vmatprep.subr.bf16.mxu0 %v9182_v41 }
 0x628   : > { %5675 = vrot.lane.b32.xlu0 %v5665_v12, %s9351_s7  ;;  %8750 = vmatpush3.bf16.msra.mxu0 %v9182_v41 }
 0x629   : > { %5677 = vrot.lane.b32.xlu1 %v5666_v54, %s9351_s7  ;;  %8751 = vmatprep.subr.bf16.mxu0 %v9183_v22 }
 0x62c   : > { %5590 = vrot.lane.b32.xlu0 %v13791_v56, %s9346_s29  ;;  %8752 = vmatpush3.bf16.msra.mxu0 %v9183_v22  ;;  %v14167_v56 = vld [vmem:[%s14778_s1 + $0x140] sm:$0xff]  }
 0x62d   : > { %5592 = vrot.lane.b32.xlu1 %v13885_v31, %s9346_s29  ;;  %8753 = vmatprep.subr.bf16.mxu0 %v9184_v1 }
 0x630   : > { %5594 = vrot.lane.b32.xlu0 %v13966_v18, %s9346_s29  ;;  %8754 = vmatpush3.bf16.msra.mxu0 %v9184_v1 }
 0x631   : > { %5596 = vrot.lane.b32.xlu1 %v13997_v47, %s9346_s29  ;;  %8755 = vmatprep.subr.bf16.mxu0 %v9185_v7 }
 0x634   : > { %5646 = vrot.lane.b32.xlu0 %v5634_v34, %s9349_s10  ;;  %8756 = vmatpush3.bf16.msra.mxu0 %v9185_v7 }
 0x635   : > { %5648 = vrot.lane.b32.xlu1 %v5635_v52, %s9349_s10  ;;  %8765 = vmatprep.subr.bf16.mxu0 %v14167_v56 }
 0x638   : > { %5650 = vrot.lane.b32.xlu0 %v5636_v33, %s9349_s10 }
 0x639   : > { %5652 = vrot.lane.b32.xlu1 %v5637_v48, %s9349_s10 }
 0x63c   : > { %5679 = vrot.lane.b32.xlu0 %v5667_v51, %s9351_s7 }
 0x63d   : > { %5681 = vrot.lane.b32.xlu1 %v5668_v26, %s9351_s7 }
 0x640   : > { %5683 = vrot.lane.b32.xlu0 %v5669_v23, %s9351_s7 }
 0x641   : > { %5685 = vrot.lane.b32.xlu1 %v5670_v28, %s9351_s7 }
 0x652   : > { %v5735_v17 = vpop.permute.xlu0 %5734 }
 0x653   : > { %v5746_v30 = vadd.f32 %v5735_v17, %v13885_v31 }
 0x66f   : > { %v5737_v2 = vpop.permute.xlu1 %5736 }
 0x670   : > { %v5747_v41 = vadd.f32 %v5737_v2, %v13966_v18 }
 0x672   : > { %v5739_v55 = vpop.permute.xlu0 %5738 }
 0x673   : > { %v5741_v6 = vpop.permute.xlu1 %5740  ;;  %v5748_v9 = vadd.f32 %v5739_v55, %v13997_v47 }
 0x674   : > { %v5749_v54 = vadd.f32 %v5741_v6, %v14000_v11  ;;  %v5566_v11 = vsel %vm13868_vm15, %v13837_v27, 0.0  ;;  %v5567_v6 = vsel %vm13918_vm6, %v14122_v40, 0.0  ;;  %vm8087_vm15 = vmpackc.low %vm13900_vm14, %vm13841_vm13 }
 0x676   : > { %v5768_v49 = vpop.permute.xlu0 %5767 }
 0x677   : > { %v5770_v59 = vpop.permute.xlu1 %5769  ;;  %v5779_v29 = vadd.f32 %v5768_v49, %v5746_v30 }
 0x678   : > { %v5780_v22 = vadd.f32 %v5770_v59, %v5747_v41 }
 0x67a   : > { %v5772_v61 = vpop.permute.xlu0 %5771 }
 0x67b   : > { %v5774_v38 = vpop.permute.xlu1 %5773  ;;  %v5781_v52 = vadd.f32 %v5772_v61, %v5748_v9 }
 0x67c   : > { %v5782_v33 = vadd.f32 %v5774_v38, %v5749_v54 }
 0x67e   : > { %v5793_v32 = vpop.permute.xlu0 %5792 }
 0x67f   : > { %v5795_v12 = vpop.permute.xlu1 %5794  ;;  %v5804_v1 = vadd.f32 %v5793_v32, %v5779_v29  ;;  %v5568_v29 = vsel %vm13881_vm0, %v13823_v50, 0.0  ;;  %v9187_v50 = vld [vmem:[%s14778_s1 + $0x148] sm:$0xff]  }
 0x680   : > { %v5805_v7 = vadd.f32 %v5795_v12, %v5780_v22 }
 0x682   : > { %v5797_v34 = vpop.permute.xlu0 %5796  ;;  %v5810_v48 = vpack.c.bf16 %v5805_v7, %v5804_v1 }
 0x683   : > { %v5799_v51 = vpop.permute.xlu1 %5798  ;;  %v5806_v26 = vadd.f32 %v5797_v34, %v5781_v52 }
 0x684   : > { %v5807_v23 = vadd.f32 %v5799_v51, %v5782_v33  ;;  %8737 = vmatprep.mubr.bf16.mxu0 %v5810_v48 }
 0x686   : > { %v5583_v31 = vpop.permute.xlu0 %5582  ;;  %v5811_v18 = vpack.c.bf16 %v5807_v23, %v5806_v26  ;;  %v9188_v26 = vld [vmem:[%s14778_s1 + $0x150] sm:$0xff]  }
 0x687   : > { %v5585_v28 = vpop.permute.xlu1 %5584  ;;  %v5598_v61 = vadd.f32 %v5583_v31, %v5566_v11 }
 0x688   : > { %8738 = vmatmul.mubr.bf16.gmra.mrb[20].mxu0 %v5811_v18  ;;  %v5599_v38 = vadd.f32 %v5585_v28, %v5567_v6  ;;  %v9189_v18 = vld [vmem:[%s14778_s1 + $0x158] sm:$0xff]  }
 0x68a   : > { %v5587_v17 = vpop.permute.xlu0 %5586 }
 0x68b   : > { %v5589_v2 = vpop.permute.xlu1 %5588  ;;  %v5600_v12 = vadd.f32 %v5587_v17, %v5568_v29 }
 0x68c   : > { %v5601_v9 = vadd.f32 %v5589_v2, %v15441_v58  ;;  %v5570_v2 = vsel %vm14050_vm3, %v13879_v37, 0.0  ;;  %v5572_v37 = vsel %vm14071_vm2, %v14016_v43, 0.0  ;;  %vm15446_vm2 = vmmov %vm15443_vm7 }
 0x68e   : > { %v5639_v49 = vpop.permute.xlu0 %5638 }
 0x68f   : > { %v5641_v47 = vpop.permute.xlu1 %5640  ;;  %v5654_v41 = vadd.f32 %v5639_v49, %v5598_v61  ;;  %v5571_v49 = vsel %vm14061_vm5, %v13929_v16, 0.0  ;;  %v15442_v16 = vsel %vm14005_vm10, %v14018_v44, 0.0  ;;  %v9193_v44 = vld [vmem:[%s14778_s1 + $0x178] sm:$0xff]   ;;  %vm15444_vm10 = vmmov %vm15443_vm7 }
 0x690   : > { %v5655_v32 = vadd.f32 %v5641_v47, %v5599_v38  ;;  %v9191_v38 = vld [vmem:[%s14778_s1 + $0x168] sm:$0xff]  }
 0x692   : > { %v5643_v55 = vpop.permute.xlu0 %5642 }
 0x693   : > { %v5645_v59 = vpop.permute.xlu1 %5644  ;;  %v5656_v1 = vadd.f32 %v5643_v55, %v5600_v12 }
 0x694   : > { %v5657_v7 = vadd.f32 %v5645_v59, %v5601_v9 }
 0x696   : > { %v5672_v30 = vpop.permute.xlu0 %5671 }
 0x697   : > { %v5674_v22 = vpop.permute.xlu1 %5673  ;;  %v5687_v54 = vadd.f32 %v5672_v30, %v5654_v41 }
 0x698   : > { %v5688_v60 = vadd.f32 %v5674_v22, %v5655_v32 }
 0x69a   : > { %v5676_v40 = vpop.permute.xlu0 %5675  ;;  %v5695_v34 = vpack.c.bf16 %v5688_v60, %v5687_v54  ;;  %v8085_v60 = vpack.c.bf16 %v13845_v13, %v13821_v45  ;;  %v6062_v45 = vld [vmem:[#allocation2 + $0x4a] sm:$0xff]  ;;  %v9194_v13 = vld [vmem:[%s14778_s1 + $0x1c0] sm:$0xff]  }
 0x69b   : > { %v5678_v52 = vpop.permute.xlu1 %5677  ;;  %v5689_v33 = vadd.f32 %v5676_v40, %v5656_v1  ;;  %v8094_v10 = vpack.c.bf16 %v6062_v45, %v14035_v4  ;;  %8790 = vmatpush3.bf16.msra.mxu1 %v9194_v13 }
 0x69c   : > { %v5690_v48 = vadd.f32 %v5678_v52, %v5657_v7  ;;  %8757 = vmatprep.mubr.bf16.mxu0 %v5695_v34  ;;  %8791 = vmatprep.subr.bf16.mxu1 %v13837_v27 }
 0x69e   : > { %v5591_v51 = vpop.permute.xlu0 %5590  ;;  %v5696_v24 = vpack.c.bf16 %v5690_v48, %v5689_v33 }
 0x69f   : > { %v5593_v21 = vpop.permute.xlu1 %5592  ;;  %v5602_v11 = vadd.f32 %v5591_v51, %v5570_v2  ;;  %8792 = vmatpush3.bf16.msra.mxu1 %v9195_v20 }
 0x6a0   : > { %8758 = vmatmul.mubr.bf16.vlgmr.msra.gmra.mrb[16].mxu0 %v5696_v24  ;;  %v5603_v55 = vadd.f32 %v5593_v21, %v5571_v49  ;;  %8793 = vmatprep.subr.bf16.mxu1 %v13837_v27 }
 0x6a1   : > { %8766 = vmatpush3.bf16.msra.mxu0 %v14167_v56  ;;  %v9190_v56 = vld [vmem:[%s14778_s1 + $0x160] sm:$0xff]  }
 0x6a2   : > { %v5595_v46 = vpop.permute.xlu0 %5594  ;;  %8767 = vmatprep.subr.bf16.mxu0 %v9187_v50 }
 0x6a3   : > { %v5597_v23 = vpop.permute.xlu1 %5596  ;;  %v5604_v30 = vadd.f32 %v5595_v46, %v5572_v37  ;;  %8794 = vmatpush3.bf16.msra.mxu1 %v9196_v36 }
 0x6a4   : > { %v5605_v3 = vadd.f32 %v5597_v23, %v15442_v16  ;;  %8795 = vmatprep.subr.bf16.mxu1 %v13837_v27 }
 0x6a5   : > { %8768 = vmatpush3.bf16.msra.mxu0 %v9187_v50 }
 0x6a6   : > { %v5647_v31 = vpop.permute.xlu0 %5646  ;;  %8769 = vmatprep.subr.bf16.mxu0 %v9188_v26 }
 0x6a7   : > { %v5649_v28 = vpop.permute.xlu1 %5648  ;;  %v5658_v59 = vadd.f32 %v5647_v31, %v5602_v11  ;;  %8796 = vmatpush3.bf16.msra.mxu1 %v9197_v42 }
 0x6a8   : > { %v5659_v61 = vadd.f32 %v5649_v28, %v5603_v55  ;;  %8797 = vmatprep.subr.bf16.mxu1 %v13837_v27 }
 0x6a9   : > { %8770 = vmatpush3.bf16.msra.mxu0 %v9188_v26 }
 0x6aa   : > { %v5651_v17 = vpop.permute.xlu0 %5650  ;;  %8771 = vmatprep.subr.bf16.mxu0 %v9189_v18 }
 0x6ab   : > { %v5653_v47 = vpop.permute.xlu1 %5652  ;;  %v5660_v22 = vadd.f32 %v5651_v17, %v5604_v30  ;;  %8798 = vmatpush3.bf16.msra.mxu1 %v9198_v0 }
 0x6ac   : > { %v5661_v12 = vadd.f32 %v5653_v47, %v5605_v3  ;;  %8799 = vmatprep.subr.bf16.mxu1 %v13837_v27 }
 0x6ad   : > { %8772 = vmatpush3.bf16.msra.mxu0 %v9189_v18 }
 0x6ae   : > { %v5680_v6 = vpop.permute.xlu0 %5679  ;;  %8773 = vmatprep.subr.bf16.mxu0 %v9190_v56 }
 0x6af   : > { %v5682_v25 = vpop.permute.xlu1 %5681  ;;  %v5691_v41 = vadd.f32 %v5680_v6, %v5658_v59  ;;  %8800 = vmatpush3.bf16.msra.mxu1 %v9199_v62 }
 0x6b0   : > { %v5692_v32 = vadd.f32 %v5682_v25, %v5659_v61  ;;  %8801 = vmatprep.subr.bf16.mxu1 %v13837_v27 }
 0x6b1   : > { %8774 = vmatpush3.bf16.msra.mxu0 %v9190_v56 }
 0x6b2   : > { %v5684_v29 = vpop.permute.xlu0 %5683  ;;  %v5697_v58 = vpack.c.bf16 %v5692_v32, %v5691_v41  ;;  %8775 = vmatprep.subr.bf16.mxu0 %v9191_v38 }
 0x6b3   : > { %v5686_v43 = vpop.permute.xlu1 %5685  ;;  %v5693_v9 = vadd.f32 %v5684_v29, %v5660_v22  ;;  %8802 = vmatpush3.bf16.msra.mxu1 %v9200_v53 }
 0x6b4   : > { %v5694_v54 = vadd.f32 %v5686_v43, %v5661_v12  ;;  %8761 = vmatprep.mubr.bf16.mxu0 %v5697_v58  ;;  %8803 = vmatprep.subr.bf16.mxu1 %v13837_v27 }
 0x6b5   : > { %8776 = vmatpush3.bf16.msra.mxu0 %v9191_v38 }
 0x6b6   : > { %v5698_v15 = vpack.c.bf16 %v5694_v54, %v5693_v9  ;;  %8777 = vmatprep.subr.bf16.mxu0 %v9192_v8 }
 0x6b8   : > { %8762 = vmatmul.mubr.bf16.gmra.mrb[20].mxu0 %v5698_v15 }
 0x6b9   : > { %8778 = vmatpush3.bf16.msra.mxu0 %v9192_v8  ;;  %8781 = vmatprep.mubr.msk.bf16.mxu0 %vm8084_vm1, %v8085_v60  ;;  %vm15447_vm1 = vmmov %vm15446_vm2 }
 0x6ba   : > { %8779 = vmatprep.subr.bf16.mxu0 %v9193_v44 }
 0x6bd   : > { %8780 = vmatpush3.bf16.msra.mxu0 %v9193_v44 }
 0x6be   : > { %8889 = vmatprep.subr.bf16.mxu0 %v13837_v27 }
 0x6c0   : > { %8782 = vmatmul.mubr.msk.bf16.vlgmr.msra.gmra.mrb[16].mxu0 %vm8087_vm15, %v8088_v14  ;;  %vm15448_vm15 = vmmov %vm15447_vm1 }
 0x6c1   : > { %8785 = vmatprep.mubr.msk.bf16.mxu0 %vm8090_vm8, %v8091_v63  ;;  %vm15449_vm8 = vmmov %vm15447_vm1 }
 0x6c8   : > { %8786 = vmatmul.mubr.msk.bf16.gmra.mrb[20].mxu0 %vm8093_vm4, %v8094_v10  ;;  %vm15450_vm4 = vmmov %vm15447_vm1 }
 0x793   : > { %v8783_v39 = vpop.f32.mrb[16].mxu0 }
 0x794   : > { %v6219_v4 = vmul.f32 %v8783_v39, %v8096_v57  ;;  %v6174_v40 = vpop.f32.mrb[17].mxu0 }
 0x795   : > { %v6217_v1 = vmul.f32 %v8096_v57, %v6174_v40  ;;  %v8784_v7 = vpop.f32.mrb[18].mxu0 }
 0x796   : > { %v6231_v34 = vadd.f32 %v8097_v19, %v6219_v4  ;;  %v6220_v52 = vmul.f32 %v8784_v7, %v8096_v57  ;;  %v6177_v33 = vpop.f32.mrb[19].mxu0 }
 0x797   : > { %v6229_v48 = vadd.f32 %v8097_v19, %v6217_v1  ;;  %v6218_v51 = vmul.f32 %v8096_v57, %v6177_v33 }
 0x798   : > { %vm6239_vm13 = vcmp.ge.f32.partialorder %v6231_v34, 0.0  ;;  %v6247_v27 = vmul.f32 0.001, %v6231_v34  ;;  %v6232_v24 = vadd.f32 %v8097_v19, %v6220_v52 }
 0x799   : > { %vm6237_vm0 = vcmp.ge.f32.partialorder %v6229_v48, 0.0  ;;  %v6245_v50 = vmul.f32 0.001, %v6229_v48  ;;  %v6230_v21 = vadd.f32 %v8097_v19, %v6218_v51 }
 0x79a   : > { %v6255_v46 = vsel %vm6239_vm13, %v6231_v34, %v6247_v27  ;;  %vm6240_vm14 = vcmp.ge.f32.partialorder %v6232_v24, 0.0  ;;  %v6248_v26 = vmul.f32 0.001, %v6232_v24  ;;  %vm6330_vm13 = vcmask 1043456  }
 0x79b   : > { %vm6238_vm6 = vcmp.ge.f32.partialorder %v6230_v21, 0.0  ;;  %v6246_v23 = vmul.f32 0.001, %v6230_v21  ;;  %v8787_v31 = vpop.f32.mrb[20].mxu0  ;;  %v6253_v18 = vsel %vm6237_vm0, %v6229_v48, %v6245_v50  ;;  %v6281_v49 = vrot.slane %v6255_v46, 1 }
 0x79c   : > { %v6256_v28 = vsel %vm6240_vm14, %v6232_v24, %v6248_v26  ;;  %v6223_v17 = vmul.f32 %v8787_v31, %v8096_v57  ;;  %v6190_v56 = vpop.f32.mrb[21].mxu0  ;;  %v6279_v30 = vrot.slane %v6253_v18, 1  ;;  %v9201_v31 = vld [vmem:[%s14778_s1 + $0x1f8] sm:$0xff]   ;;  %vm9354_vm0 = vmmov 0  }
 0x79d   : > { %v6254_v2 = vsel %vm6238_vm6, %v6230_v21, %v6246_v23  ;;  %v6282_v47 = vrot.slane %v6256_v28, 1  ;;  %v6221_v11 = vmul.f32 %v8096_v57, %v6190_v56  ;;  %v8788_v55 = vpop.f32.mrb[22].mxu0  ;;  %8804 = vmatpush3.bf16.msra.mxu1 %v9201_v31  ;;  %v6350_v56 = vand.u32 3, %v15393_v5  ;;  %v9223_v31 = vld [vmem:[%s14778_s1 + $0x268] sm:$0xff]  }
 0x79e   : > { %v6280_v6 = vrot.slane %v6254_v2, 1  ;;  %v6235_v59 = vadd.f32 %v8097_v19, %v6223_v17  ;;  %v6224_v61 = vmul.f32 %v8788_v55, %v8096_v57  ;;  %v6193_v38 = vpop.f32.mrb[23].mxu0  ;;  %v14338_v17 = vld [vmem:[#allocation2 + $0x111] sm:$0xff] }
 0x79f   : > { %v6291_v37 = vsel %vm15443_vm7, %v6281_v49, %v6282_v47  ;;  %v6233_v25 = vadd.f32 %v8097_v19, %v6221_v11  ;;  %v6222_v16 = vmul.f32 %v8096_v57, %v6193_v38  ;;  %8805 = vmatprep.mubr.msk.bf16.mxu1 %vm9354_vm0, %v14338_v17  ;;  %8809 = vmatprep.subr.bf16.mxu1 %v14338_v17  ;;  %vm14350_vm6 = vcmp.gt.s32.totalorder %v6350_v56, 0 }
 0x7a0   : > { %v6292_v3 = vsel %vm15444_vm10, %v6280_v6, %v6281_v49  ;;  %v6297_v41 = vmax.f32 %v6255_v46, %v6291_v37  ;;  %vm6243_vm12 = vcmp.ge.f32.partialorder %v6235_v59, 0.0  ;;  %v6251_v32 = vmul.f32 0.001, %v6235_v59  ;;  %8905 = vmatprep.mubr.msk.bf16.mxu0 %vm9354_vm0, %v14338_v17 }
 0x7a1   : > { %v6296_v29 = vmax.f32 %v6254_v2, %v6292_v3  ;;  %vm6241_vm11 = vcmp.ge.f32.partialorder %v6233_v25, 0.0  ;;  %v6249_v22 = vmul.f32 0.001, %v6233_v25  ;;  %v6236_v12 = vadd.f32 %v8097_v19, %v6224_v61  ;;  %v9268_v2 = vld [vmem:[%s14778_s1 + $0x3d0] sm:$0xff]  }
 0x7a2   : > { %v6259_v58 = vsel %vm6243_vm12, %v6235_v59, %v6251_v32  ;;  %v6293_v8 = vsel %vm15445_vm9, %v6279_v30, %v6280_v6  ;;  %v6234_v43 = vadd.f32 %v8097_v19, %v6222_v16  ;;  %vm14366_vm10 = vcmp.lt.s32.totalorder %v6350_v56, 3 }
 0x7a3   : > { %v6304_v9 = vmax.f32 %v6296_v29, %v6297_v41  ;;  %v6257_v54 = vsel %vm6241_vm11, %v6233_v25, %v6249_v22  ;;  %vm6244_vm3 = vcmp.ge.f32.partialorder %v6236_v12, 0.0  ;;  %v6252_v15 = vmul.f32 0.001, %v6236_v12 }
 0x7a4   : > { %v6295_v44 = vmax.f32 %v6253_v18, %v6293_v8  ;;  %vm6242_vm5 = vcmp.ge.f32.partialorder %v6234_v43, 0.0  ;;  %v6250_v60 = vmul.f32 0.001, %v6234_v43  ;;  %v6283_v63 = vrot.slane %v6257_v54, 1 }
 0x7a5   : > { %6312 = vst [vmem:[#allocation3 + $0x8] sm:$0xff] %v6304_v9  ;;  %v6260_v14 = vsel %vm6244_vm3, %v6236_v12, %v6252_v15  ;;  %v6285_v45 = vrot.slane %v6259_v58, 1  ;;  %v9204_v15 = vld [vmem:[%s14778_s1 + $0x190] sm:$0xff]  }
 0x7a6   : > { %v6286_v10 = vrot.slane %v6260_v14, 1  ;;  %v6303_v13 = vmax.f32 %v6295_v44, %v6296_v29  ;;  %v6258_v20 = vsel %vm6242_vm5, %v6234_v43, %v6250_v60  ;;  %v6290_v42 = vsel %vm15446_vm2, %v6282_v47, %v6283_v63  ;;  %v9202_v43 = vld [vmem:[%s14778_s1 + $0x180] sm:$0xff]  }
 0x7a7   : > { %v6284_v36 = vrot.slane %v6258_v20, 1  ;;  %v6298_v53 = vmax.f32 %v6256_v28, %v6290_v42  ;;  %v6343_v28 = vand.u32 3, %v15344_v35  ;;  %v9206_v60 = vld [vmem:[%s14778_s1 + $0x1a0] sm:$0xff]  }
 0x7a8   : > { %v6287_v0 = vsel %vm15447_vm1, %v6285_v45, %v6286_v10  ;;  %v6294_v62 = vsel %vm15448_vm15, %v6286_v10, %v6279_v30  ;;  %6311 = vst [vmem:[#allocation3] sm:$0xff] %v6303_v13 }
 0x7a9   : > { %v6301_v57 = vmax.f32 %v6259_v58, %v6287_v0  ;;  %v6302_v19 = vmax.f32 %v6260_v14, %v6294_v62  ;;  %v6288_v39 = vsel %vm15449_vm8, %v6284_v36, %v6285_v45  ;;  %v6289_v4 = vsel %vm15450_vm4, %v6283_v63, %v6284_v36  ;;  %v9207_v14 = vld [vmem:[%s14778_s1 + $0x1a8] sm:$0xff]   ;;  %v9208_v63 = vld [vmem:[%s14778_s1 + $0x1b0] sm:$0xff]   ;;  %v9209_v0 = vld [vmem:[%s14778_s1 + $0x1b8] sm:$0xff]  }
 0x7aa   : > { %v6299_v40 = vmax.f32 %v6257_v54, %v6289_v4  ;;  %v6300_v1 = vmax.f32 %v6258_v20, %v6288_v39  ;;  %v6305_v7 = vmax.f32 %v6297_v41, %v6298_v53  ;;  %vm14346_vm14 = vcmp.gt.s32.totalorder %v6343_v28, 0  ;;  %v9203_v54 = vld [vmem:[%s14778_s1 + $0x188] sm:$0xff]   ;;  %v9212_v4 = vld [vmem:[%s14778_s1 + $0x210] sm:$0xff]  }
 0x7ab   : > { %v6309_v34 = vmax.f32 %v6301_v57, %v6302_v19  ;;  %v6310_v52 = vmax.f32 %v6302_v19, %v6295_v44  ;;  %vm14361_vm7 = vcmp.lt.s32.totalorder %v6343_v28, 3  ;;  %v9205_v44 = vld [vmem:[%s14778_s1 + $0x198] sm:$0xff]   ;;  %v9211_v39 = vld [vmem:[%s14778_s1 + $0x208] sm:$0xff]  }
 0x7ac   : > { %v6306_v33 = vmax.f32 %v6298_v53, %v6299_v40  ;;  %v6307_v48 = vmax.f32 %v6299_v40, %v6300_v1  ;;  %v6308_v51 = vmax.f32 %v6300_v1, %v6301_v57  ;;  %6313 = vst [vmem:[#allocation3 + $0x10] sm:$0xff] %v6305_v7  ;;  %v9210_v57 = vld [vmem:[%s14778_s1 + $0x200] sm:$0xff]   ;;  %v9213_v40 = vld [vmem:[%s14778_s1 + $0x218] sm:$0xff]   ;;  %v9215_v7 = vld [vmem:[%s14778_s1 + $0x228] sm:$0xff]  }
 0x7ad   : > { %6317 = vst [vmem:[#allocation3 + $0x30] sm:$0xff] %v6309_v34  ;;  %6318 = vst [vmem:[#allocation3 + $0x38] sm:$0xff] %v6310_v52  ;;  %v9214_v1 = vld [vmem:[%s14778_s1 + $0x220] sm:$0xff]   ;;  %v9216_v34 = vld [vmem:[%s14778_s1 + $0x230] sm:$0xff]  }
 0x7ae   : > { %6314 = vst [vmem:[#allocation3 + $0x18] sm:$0xff] %v6306_v33  ;;  %6315 = vst [vmem:[#allocation3 + $0x20] sm:$0xff] %v6307_v48  ;;  %v9217_v48 = vld [vmem:[%s14778_s1 + $0x238] sm:$0xff]  }
 0x7af   : > { %6316 = vst [vmem:[#allocation3 + $0x28] sm:$0xff] %v6308_v51  ;;  %v6319_v27 = vld [vmem:[#allocation3] ss:$2 sm:$0xf]  ;;  %vm8218_vm12 = vmpackc.low %vm14366_vm10, %vm14361_vm7 }
 0x7b3   : > { %v6320_v24 = vld [vmem:[#allocation3 + $0x10] ss:$2 sm:$0xf] }
 0x7b4   : > { %v6323_v50 = vld [vmem:[#allocation3 + $0x30] ss:$2 sm:$0xf]  ;;  %v6325_v21 = vrot.slane %v6320_v24, 4  ;;  %v9218_v24 = vld [vmem:[%s14778_s1 + $0x240] sm:$0xff]  }
 0x7b5   : > { %v6328_v46 = vrot.slane %v6323_v50, 4  ;;  %v6321_v26 = vld [vmem:[#allocation3 + $0x20] ss:$2 sm:$0xf] }
 0x7b6   : > { %v14328_v23 = vsel %vm6330_vm13, %v6319_v27, %v6325_v21  ;;  %v9219_v21 = vld [vmem:[%s14778_s1 + $0x248] sm:$0xff]  }
 0x7b7   : > { %v14333_v18 = vsel %vm6330_vm13, %v6321_v26, %v6328_v46  ;;  %6333 = vst [vmem:[#allocation2 + $0x5] sm:$0xff] %v14328_v23  ;;  %v9220_v46 = vld [vmem:[%s14778_s1 + $0x250] sm:$0xff]   ;;  %v9221_v26 = vld [vmem:[%s14778_s1 + $0x258] sm:$0xff]  }
 0x7b8   : > { %6334 = vst [vmem:[#allocation2 + $0xd] sm:$0xff] %v14333_v18 }
 0x7be   : > { %v6409_v49 = vld [vmem:[#allocation2 + $0x4] sm:$0xff] }
 0x7bf   : > { %v6411_v47 = vsel %vm14346_vm14, %v6409_v49, 0.0  ;;  %v6410_v11 = vld [vmem:[#allocation2 + $0xc] sm:$0xff]  ;;  %v6375_v55 = vld [vmem:[#allocation2 + $0x1] sm:$0xff] }
 0x7c0   : > { %6413 = vrot.lane.b32.xlu0 %v6411_v47, %s9348_s9  ;;  %v6412_v5 = vsel %vm14350_vm6, %v6410_v11, 0.0  ;;  %v6376_v6 = vld [vmem:[#allocation2 + $0x9] sm:$0xff]  ;;  %v6741_v16 = vld [vmem:[#allocation2 + $0x11] sm:$0xff]  ;;  %v6367_v45 = vld [vmem:[#allocation2] sm:$0xff] }
 0x7c1   : > { %6415 = vrot.lane.b32.xlu1 %v6412_v5, %s9348_s9  ;;  %v6617_v61 = vld [vmem:[#allocation2 + $0x6] sm:$0xff]  ;;  %v6618_v37 = vld [vmem:[#allocation2 + $0xe] sm:$0xff]  ;;  %v6373_v36 = vsel %vm14346_vm14, %v6367_v45, 0.0  ;;  %v9225_v5 = vld [vmem:[%s14778_s1 + $0x278] sm:$0xff]  }
 0x7c2   : > { %v6619_v25 = vsel %vm14361_vm7, %v6617_v61, 0.0  ;;  %v6620_v30 = vsel %vm14366_vm10, %v6618_v37, 0.0  ;;  %v6401_v3 = vld [vmem:[#allocation2 + $0x2] sm:$0xff]  ;;  %v14378_v41 = vld [vmem:[#allocation2 + $0xa] sm:$0xff] }
 0x7c3   : > { %v6407_v29 = vsel %vm14361_vm7, %v6401_v3, 0.0  ;;  %v6408_v58 = vsel %vm14366_vm10, %v14378_v41, 0.0  ;;  %v14413_v10 = vld [vmem:[#allocation2 + $0x8] sm:$0xff]  ;;  %v6737_v28 = vld [vmem:[#allocation2 + $0x10] sm:$0xff]  ;;  %v9226_v61 = vld [vmem:[%s14778_s1 + $0x280] sm:$0xff]  }
 0x7c4   : > { %6377 = vrot.lane.b32.xlu0 %v6375_v55, %s9348_s9  ;;  %v6374_v42 = vsel %vm14350_vm6, %v14413_v10, 0.0  ;;  %v6738_v47 = vsel %vm14346_vm14, %v14413_v10, 0.0  ;;  %v6739_v11 = vsel %vm14350_vm6, %v6737_v28, 0.0  ;;  %v9230_v3 = vld [vmem:[%s14778_s1 + $0x2a0] sm:$0xff]  }
 0x7c5   : > { %6379 = vrot.lane.b32.xlu1 %v6376_v6, %s9348_s9 }
 0x7c8   : > { %6621 = vrot.lane.b32.xlu0 %v6619_v25, %s9348_s9  ;;  %v9227_v25 = vld [vmem:[%s14778_s1 + $0x288] sm:$0xff]  }
 0x7c9   : > { %6623 = vrot.lane.b32.xlu1 %v6620_v30, %s9348_s9  ;;  %v9228_v30 = vld [vmem:[%s14778_s1 + $0x290] sm:$0xff]  }
 0x7cc   : > { %6742 = vrot.lane.b32.xlu0 %v6376_v6, %s9348_s9 }
 0x7cd   : > { %6744 = vrot.lane.b32.xlu1 %v6741_v16, %s9348_s9  ;;  %v9229_v16 = vld [vmem:[%s14778_s1 + $0x298] sm:$0xff]  }
 0x832   : > { %v6414_v32 = vpop.permute.xlu0 %6413 }
 0x833   : > { %v6417_v22 = vadd.f32 %v6414_v32, %v6407_v29  ;;  %v6416_v12 = vpop.permute.xlu1 %6415  ;;  %v9231_v32 = vld [vmem:[%s14778_s1 + $0x2a8] sm:$0xff]   ;;  %v9232_v29 = vld [vmem:[%s14778_s1 + $0x2b0] sm:$0xff]  }
 0x834   : > { %v6418_v8 = vadd.f32 %v6416_v12, %v6408_v58  ;;  %v6858_v12 = vld [vmem:[#allocation2 + $0x12] sm:$0xff] }
 0x835   : > { %v8219_v58 = vpack.c.bf16 %v6858_v12, %v14378_v41  ;;  %v9236_v41 = vld [vmem:[%s14778_s1 + $0x310] sm:$0xff]  }
 0x836   : > { %v6419_v9 = vpack.c.bf16 %v6418_v8, %v6417_v22  ;;  %v6378_v13 = vpop.permute.xlu0 %6377  ;;  %v9233_v22 = vld [vmem:[%s14778_s1 + $0x2b8] sm:$0xff]   ;;  %v9234_v8 = vld [vmem:[%s14778_s1 + $0x300] sm:$0xff]  }
 0x837   : > { %v6380_v20 = vpop.permute.xlu1 %6379  ;;  %v6381_v62 = vadd.f32 %v6378_v13, %v6373_v36  ;;  %8890 = vmatpush3.bf16.msra.mxu0 %v9234_v8 }
 0x838   : > { %8806 = vmatmul.mubr.bf16.vlgmr.msra.gmra.mrb[32].mxu1 %v6419_v9  ;;  %v6382_v53 = vadd.f32 %v6380_v20, %v6374_v42  ;;  %8891 = vmatprep.subr.bf16.mxu0 %v14338_v17  ;;  %v9237_v9 = vld [vmem:[%s14778_s1 + $0x318] sm:$0xff]  }
 0x839   : > { %8810 = vmatpush3.bf16.msra.mxu1 %v9202_v43  ;;  %8825 = vmatprep.mubr.msk.bf16.mxu1 %vm9354_vm0, %v14338_v17  ;;  %v9235_v43 = vld [vmem:[%s14778_s1 + $0x308] sm:$0xff]  }
 0x83a   : > { %8811 = vmatprep.subr.bf16.mxu1 %v14338_v17  ;;  %v6383_v19 = vpack.c.bf16 %v6382_v53, %v6381_v62  ;;  %v6622_v52 = vpop.permute.xlu0 %6621 }
 0x83b   : > { %v6624_v33 = vpop.permute.xlu1 %6623  ;;  %v6625_v51 = vadd.f32 %v6622_v52, %v14328_v23  ;;  %v9222_v23 = vld [vmem:[%s14778_s1 + $0x260] sm:$0xff]   ;;  %8892 = vmatpush3.bf16.msra.mxu0 %v9235_v43  ;;  %v9251_v43 = vld [vmem:[%s14778_s1 + $0x348] sm:$0xff]  }
 0x83c   : > { %v6626_v27 = vadd.f32 %v6624_v33, %v14333_v18  ;;  %v9224_v18 = vld [vmem:[%s14778_s1 + $0x270] sm:$0xff]   ;;  %8893 = vmatprep.subr.bf16.mxu0 %v14338_v17 }
 0x83d   : > { %8812 = vmatpush3.bf16.msra.mxu1 %v9203_v54  ;;  %v9238_v54 = vld [vmem:[%s14778_s1 + $0x320] sm:$0xff]  }
 0x83e   : > { %8813 = vmatprep.subr.bf16.mxu1 %v14338_v17  ;;  %v6627_v50 = vpack.c.bf16 %v6626_v27, %v6625_v51  ;;  %v6743_v56 = vpop.permute.xlu0 %6742 }
 0x83f   : > { %v6745_v49 = vpop.permute.xlu1 %6744  ;;  %v6746_v55 = vadd.f32 %v6743_v56, %v6738_v47  ;;  %8894 = vmatpush3.bf16.msra.mxu0 %v9236_v41  ;;  %v9242_v56 = vld [vmem:[%s14778_s1 + $0x2c0] sm:$0xff]   ;;  %v9243_v47 = vld [vmem:[%s14778_s1 + $0x2c8] sm:$0xff]   ;;  %v9252_v41 = vld [vmem:[%s14778_s1 + $0x350] sm:$0xff]  }
 0x840   : > { %v6747_v6 = vadd.f32 %v6745_v49, %v6739_v11  ;;  %8895 = vmatprep.subr.bf16.mxu0 %v14338_v17  ;;  %v9244_v11 = vld [vmem:[%s14778_s1 + $0x2d0] sm:$0xff]  }
 0x841   : > { %8814 = vmatpush3.bf16.msra.mxu1 %v9204_v15  ;;  %v9239_v15 = vld [vmem:[%s14778_s1 + $0x328] sm:$0xff]  }
 0x842   : > { %8815 = vmatprep.subr.bf16.mxu1 %v14338_v17  ;;  %v6748_v37 = vpack.c.bf16 %v6747_v6, %v6746_v55  ;;  %v9246_v55 = vld [vmem:[%s14778_s1 + $0x2e0] sm:$0xff]   ;;  %v9247_v6 = vld [vmem:[%s14778_s1 + $0x2e8] sm:$0xff]  }
 0x843   : > { %8896 = vmatpush3.bf16.msra.mxu0 %v9237_v9  ;;  %v9253_v9 = vld [vmem:[%s14778_s1 + $0x358] sm:$0xff]  }
 0x844   : > { %8897 = vmatprep.subr.bf16.mxu0 %v14338_v17 }
 0x845   : > { %8816 = vmatpush3.bf16.msra.mxu1 %v9205_v44  ;;  %v9240_v44 = vld [vmem:[%s14778_s1 + $0x330] sm:$0xff]  }
 0x846   : > { %8817 = vmatprep.subr.bf16.mxu1 %v14338_v17 }
 0x847   : > { %8898 = vmatpush3.bf16.msra.mxu0 %v9238_v54  ;;  %v9254_v54 = vld [vmem:[%s14778_s1 + $0x360] sm:$0xff]  }
 0x848   : > { %8899 = vmatprep.subr.bf16.mxu0 %v14338_v17 }
 0x849   : > { %8818 = vmatpush3.bf16.msra.mxu1 %v9206_v60  ;;  %v8221_v60 = vld [vmem:[%s14779_s2 + $0x3] ss:$0 sm:$0xff] }
 0x84a   : > { %8819 = vmatprep.subr.bf16.mxu1 %v14338_v17 }
 0x84b   : > { %8900 = vmatpush3.bf16.msra.mxu0 %v9239_v15  ;;  %v9255_v15 = vld [vmem:[%s14778_s1 + $0x368] sm:$0xff]  }
 0x84c   : > { %8901 = vmatprep.subr.bf16.mxu0 %v14338_v17 }
 0x84d   : > { %8820 = vmatpush3.bf16.msra.mxu1 %v9207_v14  ;;  %v8222_v14 = vld [vmem:[%s14780_s3 + $0x3] ss:$0 sm:$0xff] }
 0x84e   : > { %8821 = vmatprep.subr.bf16.mxu1 %v14338_v17 }
 0x84f   : > { %8902 = vmatpush3.bf16.msra.mxu0 %v9240_v44  ;;  %v9256_v44 = vld [vmem:[%s14778_s1 + $0x370] sm:$0xff]  }
 0x850   : > { %8903 = vmatprep.subr.bf16.mxu0 %v14338_v17 }
 0x851   : > { %8822 = vmatpush3.bf16.msra.mxu1 %v9208_v63 }
 0x852   : > { %8823 = vmatprep.subr.bf16.mxu1 %v14338_v17 }
 0x855   : > { %8824 = vmatpush3.bf16.msra.mxu1 %v9209_v0 }
 0x856   : > { %8829 = vmatprep.subr.bf16.mxu1 %v14338_v17 }
 0x858   : > { %8826 = vmatmul.mubr.bf16.vlgmr.msra.gmra.mrb[32].mxu1 %v6383_v19  ;;  %v9241_v19 = vld [vmem:[%s14778_s1 + $0x338] sm:$0xff]  }
 0x859   : > { %8830 = vmatpush3.bf16.msra.mxu1 %v9210_v57  ;;  %8845 = vmatprep.mubr.msk.bf16.mxu1 %vm9354_vm0, %v14338_v17 }
 0x85a   : > { %8831 = vmatprep.subr.bf16.mxu1 %v14338_v17  ;;  %8904 = vmatpush3.bf16.msra.mxu0 %v9241_v19 }
 0x85b   : > { %8909 = vmatprep.subr.bf16.mxu0 %v14338_v17 }
 0x85d   : > { %8832 = vmatpush3.bf16.msra.mxu1 %v9211_v39 }
 0x85e   : > { %8833 = vmatprep.subr.bf16.mxu1 %v14338_v17 }
 0x861   : > { %8834 = vmatpush3.bf16.msra.mxu1 %v9212_v4 }
 0x862   : > { %8835 = vmatprep.subr.bf16.mxu1 %v14338_v17 }
 0x865   : > { %8836 = vmatpush3.bf16.msra.mxu1 %v9213_v40 }
 0x866   : > { %8837 = vmatprep.subr.bf16.mxu1 %v14338_v17 }
 0x869   : > { %8838 = vmatpush3.bf16.msra.mxu1 %v9214_v1 }
 0x86a   : > { %8839 = vmatprep.subr.bf16.mxu1 %v14338_v17 }
 0x86d   : > { %8840 = vmatpush3.bf16.msra.mxu1 %v9215_v7 }
 0x86e   : > { %8841 = vmatprep.subr.bf16.mxu1 %v14338_v17 }
 0x871   : > { %8842 = vmatpush3.bf16.msra.mxu1 %v9216_v34 }
 0x872   : > { %8843 = vmatprep.subr.bf16.mxu1 %v14338_v17 }
 0x875   : > { %8844 = vmatpush3.bf16.msra.mxu1 %v9217_v48 }
 0x876   : > { %8849 = vmatprep.subr.bf16.mxu1 %v14338_v17 }
 0x878   : > { %8846 = vmatmul.mubr.bf16.vlgmr.msra.gmra.mrb[32].mxu1 %v6627_v50 }
 0x879   : > { %8850 = vmatpush3.bf16.msra.mxu1 %v9218_v24  ;;  %8865 = vmatprep.mubr.msk.bf16.mxu1 %vm9354_vm0, %v14338_v17 }
 0x87a   : > { %8851 = vmatprep.subr.bf16.mxu1 %v14338_v17 }
 0x87d   : > { %8852 = vmatpush3.bf16.msra.mxu1 %v9219_v21 }
 0x87e   : > { %8853 = vmatprep.subr.bf16.mxu1 %v14338_v17 }
 0x881   : > { %8854 = vmatpush3.bf16.msra.mxu1 %v9220_v46 }
 0x882   : > { %8855 = vmatprep.subr.bf16.mxu1 %v14338_v17 }
 0x885   : > { %8856 = vmatpush3.bf16.msra.mxu1 %v9221_v26 }
 0x886   : > { %8857 = vmatprep.subr.bf16.mxu1 %v14338_v17 }
 0x889   : > { %8858 = vmatpush3.bf16.msra.mxu1 %v9222_v23 }
 0x88a   : > { %8859 = vmatprep.subr.bf16.mxu1 %v14338_v17 }
 0x88d   : > { %8860 = vmatpush3.bf16.msra.mxu1 %v9223_v31 }
 0x88e   : > { %8861 = vmatprep.subr.bf16.mxu1 %v14338_v17 }
 0x891   : > { %8862 = vmatpush3.bf16.msra.mxu1 %v9224_v18 }
 0x892   : > { %8863 = vmatprep.subr.bf16.mxu1 %v14338_v17 }
 0x895   : > { %8864 = vmatpush3.bf16.msra.mxu1 %v9225_v5  ;;  %v9245_v5 = vld [vmem:[%s14778_s1 + $0x2d8] sm:$0xff]  }
 0x896   : > { %8869 = vmatprep.subr.bf16.mxu1 %v14338_v17 }
 0x898   : > { %8866 = vmatmul.mubr.bf16.vlgmr.msra.gmra.mrb[32].mxu1 %v6748_v37 }
 0x899   : > { %8870 = vmatpush3.bf16.msra.mxu1 %v9226_v61  ;;  %8885 = vmatprep.mubr.msk.bf16.mxu1 %vm9354_vm0, %v14338_v17  ;;  %v9248_v61 = vld [vmem:[%s14778_s1 + $0x2f0] sm:$0xff]  }
 0x89a   : > { %8871 = vmatprep.subr.bf16.mxu1 %v14338_v17 }
 0x89d   : > { %8872 = vmatpush3.bf16.msra.mxu1 %v9227_v25 }
 0x89e   : > { %8873 = vmatprep.subr.bf16.mxu1 %v14338_v17 }
 0x8a1   : > { %8874 = vmatpush3.bf16.msra.mxu1 %v9228_v30 }
 0x8a2   : > { %8875 = vmatprep.subr.bf16.mxu1 %v14338_v17 }
 0x8a5   : > { %8876 = vmatpush3.bf16.msra.mxu1 %v9229_v16 }
 0x8a6   : > { %8877 = vmatprep.subr.bf16.mxu1 %v14338_v17 }
 0x8a9   : > { %8878 = vmatpush3.bf16.msra.mxu1 %v9230_v3 }
 0x8aa   : > { %8879 = vmatprep.subr.bf16.mxu1 %v14338_v17 }
 0x8ad   : > { %8880 = vmatpush3.bf16.msra.mxu1 %v9231_v32  ;;  %v9249_v32 = vld [vmem:[%s14778_s1 + $0x2f8] sm:$0xff]  }
 0x8ae   : > { %8881 = vmatprep.subr.bf16.mxu1 %v14338_v17 }
 0x8b1   : > { %8882 = vmatpush3.bf16.msra.mxu1 %v9232_v29 }
 0x8b2   : > { %8883 = vmatprep.subr.bf16.mxu1 %v14338_v17 }
 0x8b5   : > { %8884 = vmatpush3.bf16.msra.mxu1 %v9233_v22 }
 0x8b8   : > { %8886 = vmatmul.mubr.msk.bf16.vlgmr.msra.gmra.mrb[32].mxu1 %vm8218_vm12, %v8219_v58  ;;  %v9250_v58 = vld [vmem:[%s14778_s1 + $0x340] sm:$0xff]  }
 0x98b   : > { %v6961_v63 = vpop.f32.mrb[32].mxu1 }
 0x98c   : > { %v6974_v45 = vmul.f32 %v8221_v60, %v6961_v63  ;;  %v8887_v10 = vpop.f32.mrb[33].mxu1  ;;  %v9257_v63 = vld [vmem:[%s14778_s1 + $0x378] sm:$0xff]  }
 0x98d   : > { %v6964_v13 = vpop.f32.mrb[34].mxu1 }
 0x98e   : > { %v6980_v20 = vadd.f32 %v8222_v14, %v6974_v45  ;;  %v6975_v36 = vmul.f32 %v8221_v60, %v6964_v13  ;;  %v8888_v42 = vpop.f32.mrb[35].mxu1  ;;  %v9258_v13 = vld [vmem:[%s14778_s1 + $0x380] sm:$0xff]  }
 0x98f   : > { %v9260_v42 = vld [vmem:[%s14778_s1 + $0x390] sm:$0xff]  }
 0x990   : > { %vm6982_vm11 = vcmp.ge.f32.partialorder %v6980_v20, 0.0  ;;  %v6984_v0 = vmul.f32 0.001, %v6980_v20  ;;  %v6981_v62 = vadd.f32 %v8222_v14, %v6975_v36  ;;  %v9259_v36 = vld [vmem:[%s14778_s1 + $0x388] sm:$0xff]  }
 0x992   : > { %v14578_v53 = vsel %vm6982_vm11, %v6980_v20, %v6984_v0  ;;  %vm6983_vm9 = vcmp.ge.f32.partialorder %v6981_v62, 0.0  ;;  %v6985_v57 = vmul.f32 0.001, %v6981_v62  ;;  %v9261_v0 = vld [vmem:[%s14778_s1 + $0x398] sm:$0xff]  }
 0x993   : > { %6988 = vst [vmem:[#allocation2 + $0x25] sm:$0xff] %v14578_v53 }
 0x994   : > { %v14584_v39 = vsel %vm6983_vm9, %v6981_v62, %v6985_v57  ;;  %v9262_v62 = vld [vmem:[%s14778_s1 + $0x3a0] sm:$0xff]   ;;  %v9264_v57 = vld [vmem:[%s14778_s1 + $0x3b0] sm:$0xff]  }
 0x995   : > { %6989 = vst [vmem:[#allocation2 + $0x2d] sm:$0xff] %v14584_v39 }
 0x99a   : > { %v7026_v4 = vld [vmem:[#allocation2 + $0x24] sm:$0xff] }
 0x99b   : > { %v7028_v40 = vsel %vm14346_vm14, %v7026_v4, 0.0  ;;  %v6996_v34 = vld [vmem:[#allocation2 + $0x21] sm:$0xff] }
 0x99c   : > { %7030 = vrot.lane.b32.xlu0 %v7028_v40, %s9349_s10  ;;  %v7027_v1 = vld [vmem:[#allocation2 + $0x2c] sm:$0xff]  ;;  %v7022_v50 = vld [vmem:[#allocation2 + $0x22] sm:$0xff] }
 0x99d   : > { %v7029_v7 = vsel %vm14350_vm6, %v7027_v1, 0.0  ;;  %v7234_v52 = vld [vmem:[#allocation2 + $0x26] sm:$0xff]  ;;  %v7235_v48 = vld [vmem:[#allocation2 + $0x2e] sm:$0xff]  ;;  %v7024_v26 = vsel %vm14361_vm7, %v7022_v50, 0.0  ;;  %v9265_v1 = vld [vmem:[%s14778_s1 + $0x3b8] sm:$0xff]  }
 0x99e   : > { %7032 = vrot.lane.b32.xlu1 %v7029_v7, %s9349_s10  ;;  %v6997_v33 = vld [vmem:[#allocation2 + $0x29] sm:$0xff]  ;;  %v7236_v51 = vsel %vm14361_vm7, %v7234_v52, 0.0  ;;  %v7237_v27 = vsel %vm14366_vm10, %v7235_v48, 0.0  ;;  %v7358_v24 = vld [vmem:[#allocation2 + $0x31] sm:$0xff]  ;;  %v6992_v30 = vld [vmem:[#allocation2 + $0x20] sm:$0xff] }
 0x99f   : > { %v14604_v21 = vld [vmem:[#allocation2 + $0x2a] sm:$0xff]  ;;  %v6994_v22 = vsel %vm14346_vm14, %v6992_v30, 0.0 }
 0x9a0   : > { %6998 = vrot.lane.b32.xlu0 %v6996_v34, %s9349_s10  ;;  %v7025_v31 = vsel %vm14366_vm10, %v14604_v21, 0.0  ;;  %v14639_v37 = vld [vmem:[#allocation2 + $0x28] sm:$0xff]  ;;  %v7354_v19 = vld [vmem:[#allocation2 + $0x30] sm:$0xff] }
 0x9a1   : > { %v6995_v3 = vsel %vm14350_vm6, %v14639_v37, 0.0  ;;  %v7356_v40 = vsel %vm14350_vm6, %v7354_v19, 0.0  ;;  %v7355_v34 = vsel %vm14346_vm14, %v14639_v37, 0.0  ;;  %v9267_v48 = vld [vmem:[%s14778_s1 + $0x3c8] sm:$0xff]   ;;  %v9272_v50 = vld [vmem:[%s14778_s1 + $0x3f0] sm:$0xff]  }
 0x9a2   : > { %7000 = vrot.lane.b32.xlu1 %v6997_v33, %s9349_s10 }
 0x9a4   : > { %7238 = vrot.lane.b32.xlu0 %v7236_v51, %s9349_s10  ;;  %v9269_v51 = vld [vmem:[%s14778_s1 + $0x3d8] sm:$0xff]  }
 0x9a6   : > { %7240 = vrot.lane.b32.xlu1 %v7237_v27, %s9349_s10  ;;  %v9270_v27 = vld [vmem:[%s14778_s1 + $0x3e0] sm:$0xff]  }
 0x9a8   : > { %7359 = vrot.lane.b32.xlu0 %v6997_v33, %s9349_s10  ;;  %v9266_v33 = vld [vmem:[%s14778_s1 + $0x3c0] sm:$0xff]  }
 0x9aa   : > { %7361 = vrot.lane.b32.xlu1 %v7358_v24, %s9349_s10  ;;  %v9271_v24 = vld [vmem:[%s14778_s1 + $0x3e8] sm:$0xff]  }
 0xa0e   : > { %v7031_v46 = vpop.permute.xlu0 %7030 }
 0xa0f   : > { %v7034_v18 = vadd.f32 %v7031_v46, %v7024_v26  ;;  %v9273_v46 = vld [vmem:[%s14778_s1 + $0x3f8] sm:$0xff]  }
 0xa10   : > { %v7033_v23 = vpop.permute.xlu1 %7032  ;;  %v7475_v26 = vld [vmem:[#allocation2 + $0x32] sm:$0xff] }
 0xa11   : > { %v7035_v28 = vadd.f32 %v7033_v23, %v7025_v31  ;;  %v8344_v23 = vpack.c.bf16 %v7475_v26, %v14604_v21  ;;  %v8346_v31 = vld [vmem:[%s14779_s2 + $0x4] ss:$0 sm:$0xff] }
 0xa12   : > { %v6999_v16 = vpop.permute.xlu0 %6998 }
 0xa13   : > { %v7036_v49 = vpack.c.bf16 %v7035_v28, %v7034_v18  ;;  %v7002_v12 = vadd.f32 %v6999_v16, %v6994_v22  ;;  %v8347_v18 = vld [vmem:[%s14780_s3 + $0x4] ss:$0 sm:$0xff] }
 0xa14   : > { %v7001_v25 = vpop.permute.xlu1 %7000 }
 0xa15   : > { %8906 = vmatmul.mubr.bf16.vlgmr.msra.gmra.mrb[24].mxu0 %v7036_v49  ;;  %v7003_v29 = vadd.f32 %v7001_v25, %v6995_v3 }
 0xa16   : > { %8910 = vmatpush3.bf16.msra.mxu0 %v9242_v56  ;;  %8925 = vmatprep.mubr.msk.bf16.mxu0 %vm9354_vm0, %v14338_v17  ;;  %v7239_v14 = vpop.permute.xlu0 %7238 }
 0xa17   : > { %8911 = vmatprep.subr.bf16.mxu0 %v14338_v17  ;;  %v7004_v8 = vpack.c.bf16 %v7003_v29, %v7002_v12  ;;  %v7242_v10 = vadd.f32 %v7239_v14, %v14578_v53  ;;  %v9263_v53 = vld [vmem:[%s14778_s1 + $0x3a8] sm:$0xff]  }
 0xa18   : > { %v7241_v60 = vpop.permute.xlu1 %7240 }
 0xa19   : > { %v7243_v45 = vadd.f32 %v7241_v60, %v14584_v39 }
 0xa1a   : > { %8912 = vmatpush3.bf16.msra.mxu0 %v9243_v47  ;;  %v7360_v4 = vpop.permute.xlu0 %7359 }
 0xa1b   : > { %8913 = vmatprep.subr.bf16.mxu0 %v14338_v17  ;;  %v7244_v20 = vpack.c.bf16 %v7243_v45, %v7242_v10  ;;  %v7363_v52 = vadd.f32 %v7360_v4, %v7355_v34 }
 0xa1c   : > { %v7362_v39 = vpop.permute.xlu1 %7361 }
 0xa1d   : > { %v7364_v7 = vadd.f32 %v7362_v39, %v7356_v40 }
 0xa1e   : > { %8914 = vmatpush3.bf16.msra.mxu0 %v9244_v11 }
 0xa1f   : > { %8915 = vmatprep.subr.bf16.mxu0 %v14338_v17  ;;  %v7365_v35 = vpack.c.bf16 %v7364_v7, %v7363_v52 }
 0xa22   : > { %8916 = vmatpush3.bf16.msra.mxu0 %v9245_v5 }
 0xa23   : > { %8917 = vmatprep.subr.bf16.mxu0 %v14338_v17 }
 0xa26   : > { %8918 = vmatpush3.bf16.msra.mxu0 %v9246_v55 }
 0xa27   : > { %8919 = vmatprep.subr.bf16.mxu0 %v14338_v17 }
 0xa2a   : > { %8920 = vmatpush3.bf16.msra.mxu0 %v9247_v6 }
 0xa2b   : > { %8921 = vmatprep.subr.bf16.mxu0 %v14338_v17 }
 0xa2e   : > { %8922 = vmatpush3.bf16.msra.mxu0 %v9248_v61 }
 0xa2f   : > { %8923 = vmatprep.subr.bf16.mxu0 %v14338_v17 }
 0xa32   : > { %8924 = vmatpush3.bf16.msra.mxu0 %v9249_v32 }
 0xa33   : > { %8929 = vmatprep.subr.bf16.mxu0 %v14338_v17 }
 0xa35   : > { %8926 = vmatmul.mubr.bf16.vlgmr.msra.gmra.mrb[24].mxu0 %v7004_v8 }
 0xa36   : > { %8930 = vmatpush3.bf16.msra.mxu0 %v9250_v58  ;;  %8945 = vmatprep.mubr.msk.bf16.mxu0 %vm9354_vm0, %v14338_v17 }
 0xa37   : > { %8931 = vmatprep.subr.bf16.mxu0 %v14338_v17 }
 0xa3a   : > { %8932 = vmatpush3.bf16.msra.mxu0 %v9251_v43 }
 0xa3b   : > { %8933 = vmatprep.subr.bf16.mxu0 %v14338_v17 }
 0xa3e   : > { %8934 = vmatpush3.bf16.msra.mxu0 %v9252_v41 }
 0xa3f   : > { %8935 = vmatprep.subr.bf16.mxu0 %v14338_v17 }
 0xa42   : > { %8936 = vmatpush3.bf16.msra.mxu0 %v9253_v9 }
 0xa43   : > { %8937 = vmatprep.subr.bf16.mxu0 %v14338_v17 }
 0xa46   : > { %8938 = vmatpush3.bf16.msra.mxu0 %v9254_v54 }
 0xa47   : > { %8939 = vmatprep.subr.bf16.mxu0 %v14338_v17 }
 0xa4a   : > { %8940 = vmatpush3.bf16.msra.mxu0 %v9255_v15 }
 0xa4b   : > { %8941 = vmatprep.subr.bf16.mxu0 %v14338_v17 }
 0xa4e   : > { %8942 = vmatpush3.bf16.msra.mxu0 %v9256_v44 }
 0xa4f   : > { %8943 = vmatprep.subr.bf16.mxu0 %v14338_v17 }
 0xa52   : > { %8944 = vmatpush3.bf16.msra.mxu0 %v9257_v63 }
 0xa53   : > { %8949 = vmatprep.subr.bf16.mxu0 %v14338_v17 }
 0xa55   : > { %8946 = vmatmul.mubr.bf16.vlgmr.msra.gmra.mrb[24].mxu0 %v7244_v20 }
 0xa56   : > { %8950 = vmatpush3.bf16.msra.mxu0 %v9258_v13  ;;  %8965 = vmatprep.mubr.msk.bf16.mxu0 %vm9354_vm0, %v14338_v17 }
 0xa57   : > { %8951 = vmatprep.subr.bf16.mxu0 %v14338_v17 }
 0xa5a   : > { %8952 = vmatpush3.bf16.msra.mxu0 %v9259_v36 }
 0xa5b   : > { %8953 = vmatprep.subr.bf16.mxu0 %v14338_v17 }
 0xa5e   : > { %8954 = vmatpush3.bf16.msra.mxu0 %v9260_v42 }
 0xa5f   : > { %8955 = vmatprep.subr.bf16.mxu0 %v14338_v17 }
 0xa62   : > { %8956 = vmatpush3.bf16.msra.mxu0 %v9261_v0 }
 0xa63   : > { %8957 = vmatprep.subr.bf16.mxu0 %v14338_v17 }
 0xa66   : > { %8958 = vmatpush3.bf16.msra.mxu0 %v9262_v62 }
 0xa67   : > { %8959 = vmatprep.subr.bf16.mxu0 %v14338_v17 }
 0xa6a   : > { %8960 = vmatpush3.bf16.msra.mxu0 %v9263_v53 }
 0xa6b   : > { %8961 = vmatprep.subr.bf16.mxu0 %v14338_v17 }
 0xa6e   : > { %8962 = vmatpush3.bf16.msra.mxu0 %v9264_v57 }
 0xa6f   : > { %8963 = vmatprep.subr.bf16.mxu0 %v14338_v17 }
 0xa72   : > { %8964 = vmatpush3.bf16.msra.mxu0 %v9265_v1 }
 0xa73   : > { %8969 = vmatprep.subr.bf16.mxu0 %v14338_v17 }
 0xa75   : > { %8966 = vmatmul.mubr.bf16.vlgmr.msra.gmra.mrb[24].mxu0 %v7365_v35 }
 0xa76   : > { %8970 = vmatpush3.bf16.msra.mxu0 %v9266_v33  ;;  %8985 = vmatprep.mubr.msk.bf16.mxu0 %vm9354_vm0, %v14338_v17 }
 0xa77   : > { %8971 = vmatprep.subr.bf16.mxu0 %v14338_v17 }
 0xa7a   : > { %8972 = vmatpush3.bf16.msra.mxu0 %v9267_v48 }
 0xa7b   : > { %8973 = vmatprep.subr.bf16.mxu0 %v14338_v17 }
 0xa7e   : > { %8974 = vmatpush3.bf16.msra.mxu0 %v9268_v2 }
 0xa7f   : > { %8975 = vmatprep.subr.bf16.mxu0 %v14338_v17 }
 0xa82   : > { %8976 = vmatpush3.bf16.msra.mxu0 %v9269_v51 }
 0xa83   : > { %8977 = vmatprep.subr.bf16.mxu0 %v14338_v17 }
 0xa86   : > { %8978 = vmatpush3.bf16.msra.mxu0 %v9270_v27 }
 0xa87   : > { %8979 = vmatprep.subr.bf16.mxu0 %v14338_v17 }
 0xa8a   : > { %8980 = vmatpush3.bf16.msra.mxu0 %v9271_v24 }
 0xa8b   : > { %8981 = vmatprep.subr.bf16.mxu0 %v14338_v17 }
 0xa8e   : > { %8982 = vmatpush3.bf16.msra.mxu0 %v9272_v50 }
 0xa8f   : > { %8983 = vmatprep.subr.bf16.mxu0 %v14338_v17 }
 0xa92   : > { %8984 = vmatpush3.bf16.msra.mxu0 %v9273_v46 }
 0xa95   : > { %8986 = vmatmul.mubr.msk.bf16.vlgmr.msra.gmra.mrb[24].mxu0 %vm8218_vm12, %v8344_v23 }
 0xb68   : > { %v7578_v17 = vpop.f32.mrb[24].mxu0 }
 0xb69   : > { %v7591_v28 = vmul.f32 %v8346_v31, %v7578_v17  ;;  %v8987_v56 = vpop.f32.mrb[25].mxu0 }
 0xb6a   : > { %v7581_v21 = vpop.f32.mrb[26].mxu0 }
 0xb6b   : > { %v7597_v49 = vadd.f32 %v8347_v18, %v7591_v28  ;;  %v7592_v38 = vmul.f32 %v8346_v31, %v7581_v21  ;;  %v8988_v47 = vpop.f32.mrb[27].mxu0 }
 0xb6d   : > { %vm7599_vm3 = vcmp.ge.f32.partialorder %v7597_v49, 0.0  ;;  %v7601_v59 = vmul.f32 0.001, %v7597_v49  ;;  %v7598_v11 = vadd.f32 %v8347_v18, %v7592_v38 }
 0xb6f   : > { %v7603_v5 = vsel %vm7599_vm3, %v7597_v49, %v7601_v59  ;;  %vm7600_vm5 = vcmp.ge.f32.partialorder %v7598_v11, 0.0  ;;  %v7602_v55 = vmul.f32 0.001, %v7598_v11 }
 0xb70   : > { %7605 = vst [vmem:[%s9401_s25] sm:$0xff] %v7603_v5 }
 0xb71   : > { %v7604_v6 = vsel %vm7600_vm5, %v7598_v11, %v7602_v55 }
 0xb72   : > { %7606 = vst [vmem:[%s9401_s25 + $0x8] sm:$0xff] %v7604_v6 }
 0xb73 PF: > { %s14_s15 = sadd.s32 1, %s9331_s15  }
 0xb74   : > { %p11_p5 = scmp.ge.s32.totalorder %s14_s15, 4  }
 0xb76   :  { %13 = sbr.rel (!%p11_p5) target bundleno = 1 (0x1), region = 145 }

</bundles_post_ra>
